<compile_context>
chip_gen: v6e
topology: v6e:2x2x1
jax: 0.10.0
libtpu: 0.0.40
codegen_flags: <defaults>
</compile_context>

<pallas_src>
import functools

import jax
import jax.numpy as jnp
from jax.experimental import pallas as pl
from jax.experimental.pallas import tpu as pltpu

_VMEM_LIMIT = 48 * 1024 * 1024   # fits v7x's 64 MiB physical VMEM, generous on v5e/v6e
_BN_EPS = 1e-5


# ----------------------------------------------------------------------------
# small helpers
# ----------------------------------------------------------------------------
def _round_up(v, m):
    return (v + m - 1) // m * m


def _pad2d(x, rows, cols):
    pr, pc = rows - x.shape[0], cols - x.shape[1]
    return jnp.pad(x, ((0, pr), (0, pc))) if (pr or pc) else x


def _cparams(*sem):
    return pltpu.CompilerParams(dimension_semantics=sem,
                                vmem_limit_bytes=_VMEM_LIMIT)


# ----------------------------------------------------------------------------
# Pallas kernels
# ----------------------------------------------------------------------------
def _matmul_kernel(x_ref, w_ref, b_ref, o_ref, acc_ref, *, prologue, epilogue):
    """K-tiled (tile_m, tile_k) @ (tile_k, Np) with fused activation pro/epilogue.

    prologue in {"none","lrelu","relu"} acts on the bf16 patch tile (equivalent
    to activating the conv input; f(0)=0 keeps zero padding exact).  epilogue in
    {"none","tanh"} plus bias-add run on the f32 accumulator at the last K step.
    """
    k = pl.program_id(1)

    @pl.when(k == 0)
    def _init():
        acc_ref[...] = jnp.zeros_like(acc_ref)

    x = x_ref[...]
    if prologue == "lrelu":
        x = jnp.maximum(x, x * 0.2)          # single VPU max on the bf16 tile
    elif prologue == "relu":
        x = jnp.maximum(x, 0)
    acc_ref[...] += jnp.dot(x, w_ref[...], preferred_element_type=jnp.float32)

    @pl.when(k == pl.num_programs(1) - 1)
    def _finalize():
        y = acc_ref[...] + b_ref[...]
        if epilogue == "tanh":
            y = jnp.tanh(y)
        o_ref[...] = y.astype(o_ref.dtype)


def _stats_kernel(x_ref, sum_ref, sq_ref, *, m_valid, tile_m):
    """Per-column sum / sum-of-squares over the first m_valid rows (row-masked)."""
    i = pl.program_id(0)

    @pl.when(i == 0)
    def _init():
        sum_ref[...] = jnp.zeros_like(sum_ref)
        sq_ref[...] = jnp.zeros_like(sq_ref)

    x = x_ref[...].astype(jnp.float32)
    row = i * tile_m + jax.lax.broadcasted_iota(jnp.int32, (x.shape[0], 1), 0)
    x = jnp.where(row < m_valid, x, 0.0)
    sum_ref[...] += jnp.sum(x, axis=0, keepdims=True)
    sq_ref[...] += jnp.sum(x * x, axis=0, keepdims=True)


def _affine_kernel(x_ref, s_ref, b_ref, o_ref):
    """y = x * scale + offset (per-channel), bf16 out, f32 math."""
    o_ref[...] = (x_ref[...].astype(jnp.float32) * s_ref[...] + b_ref[...]
                  ).astype(o_ref.dtype)


def _upnorm_concat_kernel(skip_ref, ph_ref, s_ref, b_ref, o_ref, *, c1, c2):
    """Fused BatchNorm-affine + sub-pixel interleave + skip concat.

    Output layout per grid step (b, m) is (1, 2, w, 2*(c1+c2)); viewing the full
    array as (nb, 2h, 2w, c1+c2) afterwards is a free reshape.  Direct sub-stores
    (no jnp.concatenate) keep vreg pressure low.
    """
    sk = skip_ref[0]                                     # (2, w, 2*c1)
    nm = ph_ref[0, 0].astype(jnp.float32) * s_ref[...] + b_ref[...]
    nm = nm.astype(o_ref.dtype)                          # (w, Np): phases ee,eo,oe,oo
    for a in (0, 1):                                     # output row parity
        o_ref[0, a, :, 0:c1] = sk[a, :, 0:c1]                              # skip, even col
        o_ref[0, a, :, c1:c1 + c2] = nm[:, (2 * a) * c2:(2 * a + 1) * c2]  # conv, even col
        o_ref[0, a, :, c1 + c2:2 * c1 + c2] = sk[a, :, c1:2 * c1]          # skip, odd col
        o_ref[0, a, :, 2 * c1 + c2:2 * (c1 + c2)] = (
            nm[:, (2 * a + 1) * c2:(2 * a + 2) * c2])                      # conv, odd col


# ----------------------------------------------------------------------------
# fused, tiled matmul wrapper (the only MXU entry point)
# ----------------------------------------------------------------------------
def _fused_matmul(x2d, w2d, bias, prologue="none", epilogue="none",
                  out_dtype=jnp.bfloat16):
    """y = epi(pro(x) @ w + b).  Returns the (Mp, Np) padded result (Mp = M
    rounded to 8, Np = N rounded to 128); callers slice the valid window."""
    M, K = x2d.shape
    N = w2d.shape[1]

    n_k = max(1, -(-K // 2048))                  # keep each K tile <= 2048
    tile_k = _round_up(-(-K // n_k), 128)
    Kp = n_k * tile_k
    Np = _round_up(N, 128)
    Mp = _round_up(M, 8)
    tile_m = min(256, Mp)                        # >=2 grid steps on big layers (megacore)
    grid_m = pl.cdiv(Mp, tile_m)

    x_p = _pad2d(x2d.astype(jnp.bfloat16), Mp, Kp)
    w_p = _pad2d(w2d.astype(jnp.bfloat16), Kp, Np)
    if bias is None:
        b_p = jnp.zeros((1, Np), jnp.float32)
    else:
        b_p = _pad2d(bias.astype(jnp.float32).reshape(1, N), 1, Np)

    kernel = functools.partial(_matmul_kernel, prologue=prologue, epilogue=epilogue)
    return pl.pallas_call(
        kernel,
        out_shape=jax.ShapeDtypeStruct((Mp, Np), out_dtype),
        grid=(grid_m, n_k),
        in_specs=[
            pl.BlockSpec((tile_m, tile_k), lambda i, k: (i, k)),   # bf16 patches
            pl.BlockSpec((tile_k, Np), lambda i, k: (k, 0)),       # bf16 weight
            pl.BlockSpec((1, Np), lambda i, k: (0, 0)),            # f32 bias (resident)
        ],
        out_specs=pl.BlockSpec((tile_m, Np), lambda i, k: (i, 0)),
        scratch_shapes=[pltpu.VMEM((tile_m, Np), jnp.float32)],
        compiler_params=_cparams("parallel", "arbitrary"),
    )(x_p, w_p, b_p)


# ----------------------------------------------------------------------------
# BatchNorm building blocks (tiled, two-pass)
# ----------------------------------------------------------------------------
def _column_stats(x2d, m_valid):
    M, C = x2d.shape
    Mp = _round_up(M, 8)
    if Mp != M:
        x2d = jnp.pad(x2d, ((0, Mp - M), (0, 0)))
    tile_m = min(512, Mp)
    kernel = functools.partial(_stats_kernel, m_valid=m_valid, tile_m=tile_m)
    return pl.pallas_call(
        kernel,
        out_shape=(jax.ShapeDtypeStruct((1, C), jnp.float32),
                   jax.ShapeDtypeStruct((1, C), jnp.float32)),
        grid=(pl.cdiv(Mp, tile_m),),
        in_specs=[pl.BlockSpec((tile_m, C), lambda i: (i, 0))],
        out_specs=[pl.BlockSpec((1, C), lambda i: (0, 0)),
                   pl.BlockSpec((1, C), lambda i: (0, 0))],
        compiler_params=_cparams("arbitrary"),
    )(x2d)


def batchnorm2d(x, gamma, beta):
    """Training-mode BatchNorm2d on an NHWC tensor (stats pass + affine pass).

    TODO(synk): the affine could be folded into the consuming conv's prologue
    (saves one HBM round trip per mid block); kept as its own pipelined pass.
    TODO(synk): single-pass E[x^2]-mean^2 variance can lose precision when the
    activation mean is large relative to its spread.
    """
    nb, h, w, c = x.shape
    M = nb * h * w
    x2 = x.reshape(M, c)
    s, sq = _column_stats(x2, M)
    mean = s / M
    var = jnp.maximum(sq / M - mean * mean, 0.0)
    scale = gamma.reshape(1, c) * jax.lax.rsqrt(var + _BN_EPS)
    offset = beta.reshape(1, c) - mean * scale

    Mp = _round_up(M, 8)
    if Mp != M:
        x2 = jnp.pad(x2, ((0, Mp - M), (0, 0)))
    tile_m = min(512, Mp)
    y = pl.pallas_call(
        _affine_kernel,
        out_shape=jax.ShapeDtypeStruct((Mp, c), jnp.bfloat16),
        grid=(pl.cdiv(Mp, tile_m),),
        in_specs=[pl.BlockSpec((tile_m, c), lambda i: (i, 0)),
                  pl.BlockSpec((1, c), lambda i: (0, 0)),
                  pl.BlockSpec((1, c), lambda i: (0, 0))],
        out_specs=pl.BlockSpec((tile_m, c), lambda i: (i, 0)),
        compiler_params=_cparams("parallel"),
    )(x2, scale, offset)
    return y[:M].reshape(nb, h, w, c)


def upnorm_concat(skip, phases, c2, gamma, beta):
    """concat([skip, BatchNorm(pixel_shuffle(phases))], channel axis), fused."""
    nb, h, w, npad = phases.shape
    c1 = skip.shape[-1]
    M = nb * h * w

    s, sq = _column_stats(phases.reshape(M, npad), M)
    # fold the 4 sub-pixel phases of each channel into one BN channel
    s4 = s[0, :4 * c2].reshape(4, c2).sum(0)
    sq4 = sq[0, :4 * c2].reshape(4, c2).sum(0)
    cnt = 4.0 * M
    mean = s4 / cnt
    var = jnp.maximum(sq4 / cnt - mean * mean, 0.0)
    scale = gamma * jax.lax.rsqrt(var + _BN_EPS)
    offset = beta - mean * scale
    s_row = jnp.zeros((1, npad), jnp.float32).at[0, :4 * c2].set(jnp.tile(scale, 4))
    b_row = jnp.zeros((1, npad), jnp.float32).at[0, :4 * c2].set(jnp.tile(offset, 4))

    skip_v = skip.reshape(nb, 2 * h, w, 2 * c1)        # free reshape (row-major)
    ctot = c1 + c2
    out = pl.pallas_call(
        functools.partial(_upnorm_concat_kernel, c1=c1, c2=c2),
        out_shape=jax.ShapeDtypeStruct((nb, 2 * h, w, 2 * ctot), jnp.bfloat16),
        grid=(nb, h),
        in_specs=[
            pl.BlockSpec((1, 2, w, 2 * c1), lambda b, m: (b, m, 0, 0)),   # skip rows 2m,2m+1
            pl.BlockSpec((1, 1, w, npad), lambda b, m: (b, m, 0, 0)),     # phase row m
            pl.BlockSpec((1, npad), lambda b, m: (0, 0)),                 # scale (resident)
            pl.BlockSpec((1, npad), lambda b, m: (0, 0)),                 # offset (resident)
        ],
        out_specs=pl.BlockSpec((1, 2, w, 2 * ctot), lambda b, m: (b, m, 0, 0)),
        compiler_params=_cparams("parallel", "parallel"),
    )(skip_v, phases, s_row, b_row)
    return out.reshape(nb, 2 * h, 2 * w, ctot)         # free reshape


# ----------------------------------------------------------------------------
# NHWC conv ops built on the fused matmul
# ----------------------------------------------------------------------------
def conv2d_s2(x, w_oihw, prologue="none"):
    """Conv2d(kernel=4, stride=2, padding=1, bias=False).  w: (C_out, C_in, 4, 4)."""
    c_out, c_in = w_oihw.shape[0], w_oihw.shape[1]
    nb, h, w, _ = x.shape
    ho, wo = h // 2, w // 2
    xp = jnp.pad(x.astype(jnp.bfloat16), ((0, 0), (1, 1), (1, 1), (0, 0)))
    # TODO(synk): im2col stays in XLA; in-kernel extraction would need manual
    # strided DMA from a pl.ANY-space input.
    cols = [xp[:, ki:ki + 2 * ho - 1:2, kj:kj + 2 * wo - 1:2, :]
            for ki in range(4) for kj in range(4)]
    patches = jnp.concatenate(cols, axis=-1).reshape(-1, 16 * c_in)
    w2d = jnp.transpose(w_oihw, (2, 3, 1, 0)).reshape(16 * c_in, c_out)
    y = _fused_matmul(patches, w2d, None, prologue=prologue)
    M = nb * ho * wo
    return y[:M, :c_out].reshape(nb, ho, wo, c_out)


# Output parity `a` uses kernel tap _TAPS[a][d] for 3x3-patch offset d
# (None -> zero weight).  Derived from kh = a + 3 - 2*dh for k=4, s=2, p=1.
_TAPS = ((3, 1, None), (None, 2, 0))


def conv_transpose2d_phases(x, w_iohw, bias=None, prologue="none",
                            epilogue="none", out_dtype=jnp.bfloat16):
    """ConvTranspose2d(k=4,s=2,p=1) as a sub-pixel phase matmul.

    Returns ((nb, h, w, Np), c_out) where lane group [p*c_out:(p+1)*c_out],
    p = 2*a + b, holds output pixel (2i+a, 2j+b).  No zero-dilated input and no
    XLA interleave chain; consumers fuse the pixel shuffle.
    """
    c_in, c_out = w_iohw.shape[0], w_iohw.shape[1]
    nb, h, w, _ = x.shape
    xp = jnp.pad(x.astype(jnp.bfloat16), ((0, 0), (1, 1), (1, 1), (0, 0)))
    cols = [xp[:, dh:dh + h, dw:dw + w, :] for dh in range(3) for dw in range(3)]
    patches = jnp.concatenate(cols, axis=-1).reshape(-1, 9 * c_in)

    zeros = jnp.zeros((c_in, c_out), w_iohw.dtype)
    phase_blocks = []
    for a in (0, 1):
        for b in (0, 1):
            taps = []
            for dh in range(3):
                for dw in range(3):
                    th, tw = _TAPS[a][dh], _TAPS[b][dw]
                    taps.append(zeros if (th is None or tw is None)
                                else w_iohw[:, :, th, tw])
            phase_blocks.append(jnp.stack(taps, 0).reshape(9 * c_in, c_out))
    w_all = jnp.concatenate(phase_blocks, axis=1)            # (9*C_in, 4*C_out)
    b_all = None if bias is None else jnp.tile(bias, 4)

    y = _fused_matmul(patches, w_all, b_all, prologue=prologue,
                      epilogue=epilogue, out_dtype=out_dtype)
    M = nb * h * w
    return y[:M, :].reshape(nb, h, w, y.shape[1]), c_out


def pixel_shuffle_phases(phases, c_out):
    """Outermost-only depth-to-space of the phase tensor (tiny, c_out=output_nc)."""
    nb, h, w, _ = phases.shape
    y = phases[:, :, :, :4 * c_out].reshape(nb, h, w, 2, 2, c_out)
    y = jnp.transpose(y, (0, 1, 3, 2, 4, 5))
    return y.reshape(nb, 2 * h, 2 * w, c_out)


# ----------------------------------------------------------------------------
# U-net construction (mirrors UnetGenerator / UnetSkipConnectionBlock)
# ----------------------------------------------------------------------------
def _init_block(key, outer_nc, inner_nc, input_nc, outermost, innermost):
    # norm_layer = BatchNorm2d -> use_bias=False, except the outermost upconv.
    ks = jax.random.split(key, 3)
    p = {"outermost": outermost, "innermost": innermost}
    p["dw"] = 0.05 * jax.random.normal(ks[0], (inner_nc, input_nc, 4, 4), jnp.float32)
    up_in = inner_nc if innermost else inner_nc * 2
    p["uw"] = 0.05 * jax.random.normal(ks[1], (up_in, outer_nc, 4, 4), jnp.float32)
    p["ub"] = (0.05 * jax.random.normal(ks[2], (outer_nc,), jnp.float32)
               if outermost else None)
    if not outermost and not innermost:
        p["dn_g"] = jnp.ones((inner_nc,), jnp.float32)
        p["dn_b"] = jnp.zeros((inner_nc,), jnp.float32)
    if not outermost:
        p["un_g"] = jnp.ones((outer_nc,), jnp.float32)
        p["un_b"] = jnp.zeros((outer_nc,), jnp.float32)
    return p


def init_unet_params(key, input_nc, output_nc, num_downs, ngf):
    specs = [dict(outer=ngf * 8, inner=ngf * 8, inp=ngf * 8, im=True, om=False)]
    for _ in range(num_downs - 5):
        specs.append(dict(outer=ngf * 8, inner=ngf * 8, inp=ngf * 8, im=False, om=False))
    specs.append(dict(outer=ngf * 4, inner=ngf * 8, inp=ngf * 4, im=False, om=False))
    specs.append(dict(outer=ngf * 2, inner=ngf * 4, inp=ngf * 2, im=False, om=False))
    specs.append(dict(outer=ngf, inner=ngf * 2, inp=ngf, im=False, om=False))
    specs.append(dict(outer=output_nc, inner=ngf, inp=input_nc, im=False, om=True))
    keys = jax.random.split(key, len(specs))
    return [_init_block(k, s["outer"], s["inner"], s["inp"], s["om"], s["im"])
            for k, s in zip(keys, specs)]      # ordered innermost -> outermost


def _block_forward(params, idx, x):
    p = params[idx]
    if p["outermost"]:
        h = conv2d_s2(x, p["dw"])                                    # downconv
        h = _block_forward(params, idx - 1, h)                       # submodule
        ph, c2 = conv_transpose2d_phases(h, p["uw"], bias=p["ub"],
                                         prologue="relu", epilogue="tanh",
                                         out_dtype=jnp.float32)      # uprelu+upconv+tanh
        return pixel_shuffle_phases(ph, c2)
    elif p["innermost"]:
        h = conv2d_s2(x, p["dw"], prologue="lrelu")                  # downrelu+downconv
        ph, c2 = conv_transpose2d_phases(h, p["uw"], prologue="relu")  # uprelu+upconv
        return upnorm_concat(x, ph, c2, p["un_g"], p["un_b"])        # upnorm+shuffle+concat
    else:
        # TODO(synk): use_dropout=False path only (matches the module default).
        h = conv2d_s2(x, p["dw"], prologue="lrelu")                  # downrelu+downconv
        h = batchnorm2d(h, p["dn_g"], p["dn_b"])                     # downnorm
        h = _block_forward(params, idx - 1, h)                       # submodule
        ph, c2 = conv_transpose2d_phases(h, p["uw"], prologue="relu")  # uprelu+upconv
        return upnorm_concat(x, ph, c2, p["un_g"], p["un_b"])        # upnorm+shuffle+concat


def unet_generator_forward(params, x_nchw):
    x = jnp.transpose(x_nchw, (0, 2, 3, 1)).astype(jnp.float32)      # NCHW -> NHWC
    y = _block_forward(params, len(params) - 1, x)
    return jnp.transpose(y, (0, 3, 1, 2))                            # NHWC -> NCHW, f32


# ----------------------------------------------------------------------------
# main
# ----------------------------------------------------------------------------
if __name__ == "__main__":
    # Small config consistent with the module: num_downs=5 requires spatial >= 32.
    input_nc, output_nc, num_downs, ngf = 3, 3, 5, 8
    batch, H, W = 2, 32, 32

    key = jax.random.PRNGKey(0)
    k_param, k_input = jax.random.split(key)
    params = init_unet_params(k_param, input_nc, output_nc, num_downs, ngf)

    x = jax.random.normal(k_input, (batch, input_nc, H, W), jnp.float32)

    fwd = jax.jit(functools.partial(unet_generator_forward, params))
    out = jax.block_until_ready(fwd(x))

    assert out.shape == (batch, output_nc, H, W), out.shape
    assert bool(jnp.all(jnp.isfinite(out)))
    print("KERNEL_OK")
</pallas_src>

<mosaic_0001>
module attributes {stable_mosaic.version = 11 : i64} {
  func.func @_matmul_kernel(%arg0: i32, %arg1: i32, %arg2: memref<256x128xbf16, #tpu.memory_space<vmem>>, %arg3: memref<128x128xbf16, #tpu.memory_space<vmem>>, %arg4: memref<1x128xf32, #tpu.memory_space<vmem>>, %arg5: memref<256x128xbf16, #tpu.memory_space<vmem>>, %arg6: memref<256x128xf32, #tpu.memory_space<vmem>>) attributes {dimension_semantics = [#tpu.dimension_semantics<parallel>, #tpu.dimension_semantics<arbitrary>], iteration_bounds = array<i64: 2, 1>, scalar_prefetch = 0 : i64, scratch_operands = 1 : i64, tpu.core_type = #tpu.core_type<tc>, window_params = [{transform_indices = @transform_0, window_bounds = array<i64: 256, 128>}, {transform_indices = @transform_1, window_bounds = array<i64: 128, 128>}, {pipeline_mode = #tpu.pipeline_mode<synchronous>, transform_indices = @transform_2, window_bounds = array<i64: 1, 128>}, {transform_indices = @transform_3, window_bounds = array<i64: 256, 128>}]} {
    %c0_i32 = arith.constant 0 : i32
    %0 = arith.cmpi eq, %arg1, %c0_i32 : i32
    %1 = arith.extui %0 : i1 to i32
    %c0_i32_0 = arith.constant 0 : i32
    %2 = arith.cmpi ne, %1, %c0_i32_0 : i32
    scf.if %2 {
      %cst_10 = arith.constant 0.000000e+00 : f32
      %12 = vector.broadcast %cst_10 : f32 to vector<256x128xf32>
      %c0_11 = arith.constant 0 : index
      %c0_12 = arith.constant 0 : index
      %13 = vector.load %arg6[%c0_11, %c0_12] : memref<256x128xf32, #tpu.memory_space<vmem>>, vector<256x128xf32>
      tpu.vector_store %arg6[%c0_11, %c0_12], %12 {strides = array<i32>} : memref<256x128xf32, #tpu.memory_space<vmem>>, vector<256x128xf32>,
    } else {
    }
    %c0 = arith.constant 0 : index
    %c0_1 = arith.constant 0 : index
    %3 = vector.load %arg2[%c0, %c0_1] : memref<256x128xbf16, #tpu.memory_space<vmem>>, vector<256x128xbf16>
    %c0_2 = arith.constant 0 : index
    %c0_3 = arith.constant 0 : index
    %4 = vector.load %arg6[%c0_2, %c0_3] : memref<256x128xf32, #tpu.memory_space<vmem>>, vector<256x128xf32>
    %c0_4 = arith.constant 0 : index
    %c0_5 = arith.constant 0 : index
    %5 = vector.load %arg3[%c0_4, %c0_5] : memref<128x128xbf16, #tpu.memory_space<vmem>>, vector<128x128xbf16>
    %cst = arith.constant dense<0.000000e+00> : vector<256x128xf32>
    %6 = tpu.matmul %3, %5, %cst {dimension_numbers = #tpu.dot_dimension_numbers<[1], [0], [0], [1], [0, 0, 1, 1], [], []>} : vector<256x128xbf16>, vector<128x128xbf16>, vector<256x128xf32> -> vector<256x128xf32>
    %7 = arith.addf %4, %6 : vector<256x128xf32>
    %c0_6 = arith.constant 0 : index
    %c0_7 = arith.constant 0 : index
    %8 = vector.load %arg6[%c0_6, %c0_7] : memref<256x128xf32, #tpu.memory_space<vmem>>, vector<256x128xf32>
    tpu.vector_store %arg6[%c0_6, %c0_7], %7 {strides = array<i32>} : memref<256x128xf32, #tpu.memory_space<vmem>>, vector<256x128xf32>,
    %c0_i32_8 = arith.constant 0 : i32
    %9 = arith.cmpi eq, %arg1, %c0_i32_8 : i32
    %10 = arith.extui %9 : i1 to i32
    %c0_i32_9 = arith.constant 0 : i32
    %11 = arith.cmpi ne, %10, %c0_i32_9 : i32
    scf.if %11 {
      %c0_10 = arith.constant 0 : index
      %c0_11 = arith.constant 0 : index
      %12 = vector.load %arg6[%c0_10, %c0_11] : memref<256x128xf32, #tpu.memory_space<vmem>>, vector<256x128xf32>
      %c0_12 = arith.constant 0 : index
      %c0_13 = arith.constant 0 : index
      %13 = vector.load %arg4[%c0_12, %c0_13] : memref<1x128xf32, #tpu.memory_space<vmem>>, vector<1x128xf32>
      %14 = vector.broadcast %13 : vector<1x128xf32> to vector<256x128xf32>
      %15 = arith.addf %12, %14 : vector<256x128xf32>
      %16 = arith.truncf %15 : vector<256x128xf32> to vector<256x128xbf16>
      %c0_14 = arith.constant 0 : index
      %c0_15 = arith.constant 0 : index
      %17 = vector.load %arg5[%c0_14, %c0_15] : memref<256x128xbf16, #tpu.memory_space<vmem>>, vector<256x128xbf16>
      tpu.vector_store %arg5[%c0_14, %c0_15], %16 {strides = array<i32>} : memref<256x128xbf16, #tpu.memory_space<vmem>>, vector<256x128xbf16>,
    } else {
    }
    return
  }
  func.func @transform_0(%arg0: i32, %arg1: i32) -> (i32, i32) {
    %c0_i32 = arith.constant 0 : i32
    return %arg0, %arg1 : i32, i32
  }
  func.func @transform_1(%arg0: i32, %arg1: i32) -> (i32, i32) {
    %c0_i32 = arith.constant 0 : i32
    %c0_i32_0 = arith.constant 0 : i32
    return %arg1, %c0_i32 : i32, i32
  }
  func.func @transform_2(%arg0: i32, %arg1: i32) -> (i32, i32) {
    %c0_i32 = arith.constant 0 : i32
    %c0_i32_0 = arith.constant 0 : i32
    %c0_i32_1 = arith.constant 0 : i32
    return %c0_i32, %c0_i32_0 : i32, i32
  }
  func.func @transform_3(%arg0: i32, %arg1: i32) -> (i32, i32) {
    %c0_i32 = arith.constant 0 : i32
    %c0_i32_0 = arith.constant 0 : i32
    return %arg0, %c0_i32 : i32, i32
  }
}

module attributes {stable_mosaic.version = 11 : i64} {
  func.func @_stats_kernel(%arg0: i32, %arg1: memref<128x16xbf16, #tpu.memory_space<vmem>>, %arg2: memref<1x16xf32, #tpu.memory_space<vmem>>, %arg3: memref<1x16xf32, #tpu.memory_space<vmem>>) attributes {dimension_semantics = [#tpu.dimension_semantics<arbitrary>], iteration_bounds = array<i64: 1>, scalar_prefetch = 0 : i64, scratch_operands = 0 : i64, tpu.core_type = #tpu.core_type<tc>, window_params = [{transform_indices = @transform_0, window_bounds = array<i64: 128, 16>}, {pipeline_mode = #tpu.pipeline_mode<synchronous>, transform_indices = @transform_1, window_bounds = array<i64: 1, 16>}, {pipeline_mode = #tpu.pipeline_mode<synchronous>, transform_indices = @transform_2, window_bounds = array<i64: 1, 16>}]} {
    %c0_i32 = arith.constant 0 : i32
    %0 = arith.cmpi eq, %arg0, %c0_i32 : i32
    %1 = arith.extui %0 : i1 to i32
    %c0_i32_0 = arith.constant 0 : i32
    %2 = arith.cmpi ne, %1, %c0_i32_0 : i32
    scf.if %2 {
      %cst_13 = arith.constant 0.000000e+00 : f32
      %26 = vector.broadcast %cst_13 : f32 to vector<1x16xf32>
      %c0_14 = arith.constant 0 : index
      %c0_15 = arith.constant 0 : index
      %27 = vector.load %arg2[%c0_14, %c0_15] : memref<1x16xf32, #tpu.memory_space<vmem>>, vector<1x16xf32>
      tpu.vector_store %arg2[%c0_14, %c0_15], %26 {strides = array<i32>} : memref<1x16xf32, #tpu.memory_space<vmem>>, vector<1x16xf32>,
      %cst_16 = arith.constant 0.000000e+00 : f32
      %28 = vector.broadcast %cst_16 : f32 to vector<1x16xf32>
      %c0_17 = arith.constant 0 : index
      %c0_18 = arith.constant 0 : index
      %29 = vector.load %arg3[%c0_17, %c0_18] : memref<1x16xf32, #tpu.memory_space<vmem>>, vector<1x16xf32>
      tpu.vector_store %arg3[%c0_17, %c0_18], %28 {strides = array<i32>} : memref<1x16xf32, #tpu.memory_space<vmem>>, vector<1x16xf32>,
    } else {
    }
    %c0 = arith.constant 0 : index
    %c0_1 = arith.constant 0 : index
    %3 = vector.load %arg1[%c0, %c0_1] : memref<128x16xbf16, #tpu.memory_space<vmem>>, vector<128x16xbf16>
    %4 = arith.extf %3 : vector<128x16xbf16> to vector<128x16xf32>
    %c128_i32 = arith.constant 128 : i32
    %5 = arith.muli %arg0, %c128_i32 : i32
    %6 = tpu.iota {dimensions = array<i32: 0>} : vector<128x1xi32>
    %7 = vector.broadcast %5 : i32 to vector<128x1xi32>
    %8 = arith.addi %7, %6 : vector<128x1xi32>
    %c128_i32_2 = arith.constant 128 : i32
    %9 = vector.broadcast %c128_i32_2 : i32 to vector<128x1xi32>
    %10 = arith.cmpi slt, %8, %9 : vector<128x1xi32>
    %cst = arith.constant 0.000000e+00 : f32
    %11 = vector.shape_cast %10 : vector<128x1xi1> to vector<128x1xi1>
    %12 = vector.broadcast %11 : vector<128x1xi1> to vector<128x16xi1>
    %13 = vector.broadcast %cst : f32 to vector<128x16xf32>
    %14 = arith.select %12, %4, %13 : vector<128x16xi1>, vector<128x16xf32>
    %c0_3 = arith.constant 0 : index
    %c0_4 = arith.constant 0 : index
    %15 = vector.load %arg2[%c0_3, %c0_4] : memref<1x16xf32, #tpu.memory_space<vmem>>, vector<1x16xf32>
    %cst_5 = arith.constant dense<0.000000e+00> : vector<16xf32>
    %16 = vector.multi_reduction <add>, %14, %cst_5 [0] : vector<128x16xf32> to vector<16xf32>
    %17 = vector.shape_cast %16 : vector<16xf32> to vector<1x16xf32>
    %18 = arith.addf %15, %17 : vector<1x16xf32>
    %c0_6 = arith.constant 0 : index
    %c0_7 = arith.constant 0 : index
    %19 = vector.load %arg2[%c0_6, %c0_7] : memref<1x16xf32, #tpu.memory_space<vmem>>, vector<1x16xf32>
    tpu.vector_store %arg2[%c0_6, %c0_7], %18 {strides = array<i32>} : memref<1x16xf32, #tpu.memory_space<vmem>>, vector<1x16xf32>,
    %c0_8 = arith.constant 0 : index
    %c0_9 = arith.constant 0 : index
    %20 = vector.load %arg3[%c0_8, %c0_9] : memref<1x16xf32, #tpu.memory_space<vmem>>, vector<1x16xf32>
    %21 = arith.mulf %14, %14 : vector<128x16xf32>
    %cst_10 = arith.constant dense<0.000000e+00> : vector<16xf32>
    %22 = vector.multi_reduction <add>, %21, %cst_10 [0] : vector<128x16xf32> to vector<16xf32>
    %23 = vector.shape_cast %22 : vector<16xf32> to vector<1x16xf32>
    %24 = arith.addf %20, %23 : vector<1x16xf32>
    %c0_11 = arith.constant 0 : index
    %c0_12 = arith.constant 0 : index
    %25 = vector.load %arg3[%c0_11, %c0_12] : memref<1x16xf32, #tpu.memory_space<vmem>>, vector<1x16xf32>
    tpu.vector_store %arg3[%c0_11, %c0_12], %24 {strides = array<i32>} : memref<1x16xf32, #tpu.memory_space<vmem>>, vector<1x16xf32>,
    return
  }
  func.func @transform_0(%arg0: i32) -> (i32, i32) {
    %c0_i32 = arith.constant 0 : i32
    %c0_i32_0 = arith.constant 0 : i32
    return %arg0, %c0_i32 : i32, i32
  }
  func.func @transform_1(%arg0: i32) -> (i32, i32) {
    %c0_i32 = arith.constant 0 : i32
    %c0_i32_0 = arith.constant 0 : i32
    %c0_i32_1 = arith.constant 0 : i32
    return %c0_i32, %c0_i32_0 : i32, i32
  }
  func.func @transform_2(%arg0: i32) -> (i32, i32) {
    %c0_i32 = arith.constant 0 : i32
    %c0_i32_0 = arith.constant 0 : i32
    %c0_i32_1 = arith.constant 0 : i32
    return %c0_i32, %c0_i32_0 : i32, i32
  }
}

module attributes {stable_mosaic.version = 11 : i64} {
  func.func @_matmul_kernel(%arg0: i32, %arg1: i32, %arg2: memref<128x128xbf16, #tpu.memory_space<vmem>>, %arg3: memref<128x128xbf16, #tpu.memory_space<vmem>>, %arg4: memref<1x128xf32, #tpu.memory_space<vmem>>, %arg5: memref<128x128xbf16, #tpu.memory_space<vmem>>, %arg6: memref<128x128xf32, #tpu.memory_space<vmem>>) attributes {dimension_semantics = [#tpu.dimension_semantics<parallel>, #tpu.dimension_semantics<arbitrary>], iteration_bounds = array<i64: 1, 1>, scalar_prefetch = 0 : i64, scratch_operands = 1 : i64, tpu.core_type = #tpu.core_type<tc>, window_params = [{transform_indices = @transform_0, window_bounds = array<i64: 128, 128>}, {transform_indices = @transform_1, window_bounds = array<i64: 128, 128>}, {pipeline_mode = #tpu.pipeline_mode<synchronous>, transform_indices = @transform_2, window_bounds = array<i64: 1, 128>}, {transform_indices = @transform_3, window_bounds = array<i64: 128, 128>}]} {
    %c0_i32 = arith.constant 0 : i32
    %0 = arith.cmpi eq, %arg1, %c0_i32 : i32
    %1 = arith.extui %0 : i1 to i32
    %c0_i32_0 = arith.constant 0 : i32
    %2 = arith.cmpi ne, %1, %c0_i32_0 : i32
    scf.if %2 {
      %cst_11 = arith.constant 0.000000e+00 : f32
      %15 = vector.broadcast %cst_11 : f32 to vector<128x128xf32>
      %c0_12 = arith.constant 0 : index
      %c0_13 = arith.constant 0 : index
      %16 = vector.load %arg6[%c0_12, %c0_13] : memref<128x128xf32, #tpu.memory_space<vmem>>, vector<128x128xf32>
      tpu.vector_store %arg6[%c0_12, %c0_13], %15 {strides = array<i32>} : memref<128x128xf32, #tpu.memory_space<vmem>>, vector<128x128xf32>,
    } else {
    }
    %c0 = arith.constant 0 : index
    %c0_1 = arith.constant 0 : index
    %3 = vector.load %arg2[%c0, %c0_1] : memref<128x128xbf16, #tpu.memory_space<vmem>>, vector<128x128xbf16>
    %cst = arith.constant 2.001950e-01 : bf16
    %4 = vector.broadcast %cst : bf16 to vector<128x128xbf16>
    %5 = arith.mulf %3, %4 : vector<128x128xbf16>
    %6 = arith.maximumf %3, %5 : vector<128x128xbf16>
    %c0_2 = arith.constant 0 : index
    %c0_3 = arith.constant 0 : index
    %7 = vector.load %arg6[%c0_2, %c0_3] : memref<128x128xf32, #tpu.memory_space<vmem>>, vector<128x128xf32>
    %c0_4 = arith.constant 0 : index
    %c0_5 = arith.constant 0 : index
    %8 = vector.load %arg3[%c0_4, %c0_5] : memref<128x128xbf16, #tpu.memory_space<vmem>>, vector<128x128xbf16>
    %cst_6 = arith.constant dense<0.000000e+00> : vector<128x128xf32>
    %9 = tpu.matmul %6, %8, %cst_6 {dimension_numbers = #tpu.dot_dimension_numbers<[1], [0], [0], [1], [0, 0, 1, 1], [], []>} : vector<128x128xbf16>, vector<128x128xbf16>, vector<128x128xf32> -> vector<128x128xf32>
    %10 = arith.addf %7, %9 : vector<128x128xf32>
    %c0_7 = arith.constant 0 : index
    %c0_8 = arith.constant 0 : index
    %11 = vector.load %arg6[%c0_7, %c0_8] : memref<128x128xf32, #tpu.memory_space<vmem>>, vector<128x128xf32>
    tpu.vector_store %arg6[%c0_7, %c0_8], %10 {strides = array<i32>} : memref<128x128xf32, #tpu.memory_space<vmem>>, vector<128x128xf32>,
    %c0_i32_9 = arith.constant 0 : i32
    %12 = arith.cmpi eq, %arg1, %c0_i32_9 : i32
    %13 = arith.extui %12 : i1 to i32
    %c0_i32_10 = arith.constant 0 : i32
    %14 = arith.cmpi ne, %13, %c0_i32_10 : i32
    scf.if %14 {
      %c0_11 = arith.constant 0 : index
      %c0_12 = arith.constant 0 : index
      %15 = vector.load %arg6[%c0_11, %c0_12] : memref<128x128xf32, #tpu.memory_space<vmem>>, vector<128x128xf32>
      %c0_13 = arith.constant 0 : index
      %c0_14 = arith.constant 0 : index
      %16 = vector.load %arg4[%c0_13, %c0_14] : memref<1x128xf32, #tpu.memory_space<vmem>>, vector<1x128xf32>
      %17 = vector.broadcast %16 : vector<1x128xf32> to vector<128x128xf32>
      %18 = arith.addf %15, %17 : vector<128x128xf32>
      %19 = arith.truncf %18 : vector<128x128xf32> to vector<128x128xbf16>
      %c0_15 = arith.constant 0 : index
      %c0_16 = arith.constant 0 : index
      %20 = vector.load %arg5[%c0_15, %c0_16] : memref<128x128xbf16, #tpu.memory_space<vmem>>, vector<128x128xbf16>
      tpu.vector_store %arg5[%c0_15, %c0_16], %19 {strides = array<i32>} : memref<128x128xbf16, #tpu.memory_space<vmem>>, vector<128x128xbf16>,
    } else {
    }
    return
  }
  func.func @transform_0(%arg0: i32, %arg1: i32) -> (i32, i32) {
    %c0_i32 = arith.constant 0 : i32
    return %arg0, %arg1 : i32, i32
  }
  func.func @transform_1(%arg0: i32, %arg1: i32) -> (i32, i32) {
    %c0_i32 = arith.constant 0 : i32
    %c0_i32_0 = arith.constant 0 : i32
    return %arg1, %c0_i32 : i32, i32
  }
  func.func @transform_2(%arg0: i32, %arg1: i32) -> (i32, i32) {
    %c0_i32 = arith.constant 0 : i32
    %c0_i32_0 = arith.constant 0 : i32
    %c0_i32_1 = arith.constant 0 : i32
    return %c0_i32, %c0_i32_0 : i32, i32
  }
  func.func @transform_3(%arg0: i32, %arg1: i32) -> (i32, i32) {
    %c0_i32 = arith.constant 0 : i32
    %c0_i32_0 = arith.constant 0 : i32
    return %arg0, %c0_i32 : i32, i32
  }
}

module attributes {stable_mosaic.version = 11 : i64} {
  func.func @_affine_kernel(%arg0: i32, %arg1: memref<128x16xbf16, #tpu.memory_space<vmem>>, %arg2: memref<1x16xf32, #tpu.memory_space<vmem>>, %arg3: memref<1x16xf32, #tpu.memory_space<vmem>>, %arg4: memref<128x16xbf16, #tpu.memory_space<vmem>>) attributes {dimension_semantics = [#tpu.dimension_semantics<parallel>], iteration_bounds = array<i64: 1>, scalar_prefetch = 0 : i64, scratch_operands = 0 : i64, tpu.core_type = #tpu.core_type<tc>, window_params = [{transform_indices = @transform_0, window_bounds = array<i64: 128, 16>}, {pipeline_mode = #tpu.pipeline_mode<synchronous>, transform_indices = @transform_1, window_bounds = array<i64: 1, 16>}, {pipeline_mode = #tpu.pipeline_mode<synchronous>, transform_indices = @transform_2, window_bounds = array<i64: 1, 16>}, {transform_indices = @transform_3, window_bounds = array<i64: 128, 16>}]} {
    %c0 = arith.constant 0 : index
    %c0_0 = arith.constant 0 : index
    %0 = vector.load %arg1[%c0, %c0_0] : memref<128x16xbf16, #tpu.memory_space<vmem>>, vector<128x16xbf16>
    %1 = arith.extf %0 : vector<128x16xbf16> to vector<128x16xf32>
    %c0_1 = arith.constant 0 : index
    %c0_2 = arith.constant 0 : index
    %2 = vector.load %arg2[%c0_1, %c0_2] : memref<1x16xf32, #tpu.memory_space<vmem>>, vector<1x16xf32>
    %3 = vector.broadcast %2 : vector<1x16xf32> to vector<128x16xf32>
    %4 = arith.mulf %1, %3 : vector<128x16xf32>
    %c0_3 = arith.constant 0 : index
    %c0_4 = arith.constant 0 : index
    %5 = vector.load %arg3[%c0_3, %c0_4] : memref<1x16xf32, #tpu.memory_space<vmem>>, vector<1x16xf32>
    %6 = vector.broadcast %5 : vector<1x16xf32> to vector<128x16xf32>
    %7 = arith.addf %4, %6 : vector<128x16xf32>
    %8 = arith.truncf %7 : vector<128x16xf32> to vector<128x16xbf16>
    %c0_5 = arith.constant 0 : index
    %c0_6 = arith.constant 0 : index
    %9 = vector.load %arg4[%c0_5, %c0_6] : memref<128x16xbf16, #tpu.memory_space<vmem>>, vector<128x16xbf16>
    tpu.vector_store %arg4[%c0_5, %c0_6], %8 {strides = array<i32>} : memref<128x16xbf16, #tpu.memory_space<vmem>>, vector<128x16xbf16>,
    return
  }
  func.func @transform_0(%arg0: i32) -> (i32, i32) {
    %c0_i32 = arith.constant 0 : i32
    %c0_i32_0 = arith.constant 0 : i32
    return %arg0, %c0_i32 : i32, i32
  }
  func.func @transform_1(%arg0: i32) -> (i32, i32) {
    %c0_i32 = arith.constant 0 : i32
    %c0_i32_0 = arith.constant 0 : i32
    %c0_i32_1 = arith.constant 0 : i32
    return %c0_i32, %c0_i32_0 : i32, i32
  }
  func.func @transform_2(%arg0: i32) -> (i32, i32) {
    %c0_i32 = arith.constant 0 : i32
    %c0_i32_0 = arith.constant 0 : i32
    %c0_i32_1 = arith.constant 0 : i32
    return %c0_i32, %c0_i32_0 : i32, i32
  }
  func.func @transform_3(%arg0: i32) -> (i32, i32) {
    %c0_i32 = arith.constant 0 : i32
    %c0_i32_0 = arith.constant 0 : i32
    return %arg0, %c0_i32 : i32, i32
  }
}

module attributes {stable_mosaic.version = 11 : i64} {
  func.func @_stats_kernel(%arg0: i32, %arg1: memref<32x32xbf16, #tpu.memory_space<vmem>>, %arg2: memref<1x32xf32, #tpu.memory_space<vmem>>, %arg3: memref<1x32xf32, #tpu.memory_space<vmem>>) attributes {dimension_semantics = [#tpu.dimension_semantics<arbitrary>], iteration_bounds = array<i64: 1>, scalar_prefetch = 0 : i64, scratch_operands = 0 : i64, tpu.core_type = #tpu.core_type<tc>, window_params = [{transform_indices = @transform_0, window_bounds = array<i64: 32, 32>}, {pipeline_mode = #tpu.pipeline_mode<synchronous>, transform_indices = @transform_1, window_bounds = array<i64: 1, 32>}, {pipeline_mode = #tpu.pipeline_mode<synchronous>, transform_indices = @transform_2, window_bounds = array<i64: 1, 32>}]} {
    %c0_i32 = arith.constant 0 : i32
    %0 = arith.cmpi eq, %arg0, %c0_i32 : i32
    %1 = arith.extui %0 : i1 to i32
    %c0_i32_0 = arith.constant 0 : i32
    %2 = arith.cmpi ne, %1, %c0_i32_0 : i32
    scf.if %2 {
      %cst_13 = arith.constant 0.000000e+00 : f32
      %26 = vector.broadcast %cst_13 : f32 to vector<1x32xf32>
      %c0_14 = arith.constant 0 : index
      %c0_15 = arith.constant 0 : index
      %27 = vector.load %arg2[%c0_14, %c0_15] : memref<1x32xf32, #tpu.memory_space<vmem>>, vector<1x32xf32>
      tpu.vector_store %arg2[%c0_14, %c0_15], %26 {strides = array<i32>} : memref<1x32xf32, #tpu.memory_space<vmem>>, vector<1x32xf32>,
      %cst_16 = arith.constant 0.000000e+00 : f32
      %28 = vector.broadcast %cst_16 : f32 to vector<1x32xf32>
      %c0_17 = arith.constant 0 : index
      %c0_18 = arith.constant 0 : index
      %29 = vector.load %arg3[%c0_17, %c0_18] : memref<1x32xf32, #tpu.memory_space<vmem>>, vector<1x32xf32>
      tpu.vector_store %arg3[%c0_17, %c0_18], %28 {strides = array<i32>} : memref<1x32xf32, #tpu.memory_space<vmem>>, vector<1x32xf32>,
    } else {
    }
    %c0 = arith.constant 0 : index
    %c0_1 = arith.constant 0 : index
    %3 = vector.load %arg1[%c0, %c0_1] : memref<32x32xbf16, #tpu.memory_space<vmem>>, vector<32x32xbf16>
    %4 = arith.extf %3 : vector<32x32xbf16> to vector<32x32xf32>
    %c32_i32 = arith.constant 32 : i32
    %5 = arith.muli %arg0, %c32_i32 : i32
    %6 = tpu.iota {dimensions = array<i32: 0>} : vector<32x1xi32>
    %7 = vector.broadcast %5 : i32 to vector<32x1xi32>
    %8 = arith.addi %7, %6 : vector<32x1xi32>
    %c32_i32_2 = arith.constant 32 : i32
    %9 = vector.broadcast %c32_i32_2 : i32 to vector<32x1xi32>
    %10 = arith.cmpi slt, %8, %9 : vector<32x1xi32>
    %cst = arith.constant 0.000000e+00 : f32
    %11 = vector.shape_cast %10 : vector<32x1xi1> to vector<32x1xi1>
    %12 = vector.broadcast %11 : vector<32x1xi1> to vector<32x32xi1>
    %13 = vector.broadcast %cst : f32 to vector<32x32xf32>
    %14 = arith.select %12, %4, %13 : vector<32x32xi1>, vector<32x32xf32>
    %c0_3 = arith.constant 0 : index
    %c0_4 = arith.constant 0 : index
    %15 = vector.load %arg2[%c0_3, %c0_4] : memref<1x32xf32, #tpu.memory_space<vmem>>, vector<1x32xf32>
    %cst_5 = arith.constant dense<0.000000e+00> : vector<32xf32>
    %16 = vector.multi_reduction <add>, %14, %cst_5 [0] : vector<32x32xf32> to vector<32xf32>
    %17 = vector.shape_cast %16 : vector<32xf32> to vector<1x32xf32>
    %18 = arith.addf %15, %17 : vector<1x32xf32>
    %c0_6 = arith.constant 0 : index
    %c0_7 = arith.constant 0 : index
    %19 = vector.load %arg2[%c0_6, %c0_7] : memref<1x32xf32, #tpu.memory_space<vmem>>, vector<1x32xf32>
    tpu.vector_store %arg2[%c0_6, %c0_7], %18 {strides = array<i32>} : memref<1x32xf32, #tpu.memory_space<vmem>>, vector<1x32xf32>,
    %c0_8 = arith.constant 0 : index
    %c0_9 = arith.constant 0 : index
    %20 = vector.load %arg3[%c0_8, %c0_9] : memref<1x32xf32, #tpu.memory_space<vmem>>, vector<1x32xf32>
    %21 = arith.mulf %14, %14 : vector<32x32xf32>
    %cst_10 = arith.constant dense<0.000000e+00> : vector<32xf32>
    %22 = vector.multi_reduction <add>, %21, %cst_10 [0] : vector<32x32xf32> to vector<32xf32>
    %23 = vector.shape_cast %22 : vector<32xf32> to vector<1x32xf32>
    %24 = arith.addf %20, %23 : vector<1x32xf32>
    %c0_11 = arith.constant 0 : index
    %c0_12 = arith.constant 0 : index
    %25 = vector.load %arg3[%c0_11, %c0_12] : memref<1x32xf32, #tpu.memory_space<vmem>>, vector<1x32xf32>
    tpu.vector_store %arg3[%c0_11, %c0_12], %24 {strides = array<i32>} : memref<1x32xf32, #tpu.memory_space<vmem>>, vector<1x32xf32>,
    return
  }
  func.func @transform_0(%arg0: i32) -> (i32, i32) {
    %c0_i32 = arith.constant 0 : i32
    %c0_i32_0 = arith.constant 0 : i32
    return %arg0, %c0_i32 : i32, i32
  }
  func.func @transform_1(%arg0: i32) -> (i32, i32) {
    %c0_i32 = arith.constant 0 : i32
    %c0_i32_0 = arith.constant 0 : i32
    %c0_i32_1 = arith.constant 0 : i32
    return %c0_i32, %c0_i32_0 : i32, i32
  }
  func.func @transform_2(%arg0: i32) -> (i32, i32) {
    %c0_i32 = arith.constant 0 : i32
    %c0_i32_0 = arith.constant 0 : i32
    %c0_i32_1 = arith.constant 0 : i32
    return %c0_i32, %c0_i32_0 : i32, i32
  }
}

module attributes {stable_mosaic.version = 11 : i64} {
  func.func @_matmul_kernel(%arg0: i32, %arg1: i32, %arg2: memref<32x256xbf16, #tpu.memory_space<vmem>>, %arg3: memref<256x128xbf16, #tpu.memory_space<vmem>>, %arg4: memref<1x128xf32, #tpu.memory_space<vmem>>, %arg5: memref<32x128xbf16, #tpu.memory_space<vmem>>, %arg6: memref<32x128xf32, #tpu.memory_space<vmem>>) attributes {dimension_semantics = [#tpu.dimension_semantics<parallel>, #tpu.dimension_semantics<arbitrary>], iteration_bounds = array<i64: 1, 1>, scalar_prefetch = 0 : i64, scratch_operands = 1 : i64, tpu.core_type = #tpu.core_type<tc>, window_params = [{transform_indices = @transform_0, window_bounds = array<i64: 32, 256>}, {transform_indices = @transform_1, window_bounds = array<i64: 256, 128>}, {pipeline_mode = #tpu.pipeline_mode<synchronous>, transform_indices = @transform_2, window_bounds = array<i64: 1, 128>}, {transform_indices = @transform_3, window_bounds = array<i64: 32, 128>}]} {
    %c0_i32 = arith.constant 0 : i32
    %0 = arith.cmpi eq, %arg1, %c0_i32 : i32
    %1 = arith.extui %0 : i1 to i32
    %c0_i32_0 = arith.constant 0 : i32
    %2 = arith.cmpi ne, %1, %c0_i32_0 : i32
    scf.if %2 {
      %cst_11 = arith.constant 0.000000e+00 : f32
      %15 = vector.broadcast %cst_11 : f32 to vector<32x128xf32>
      %c0_12 = arith.constant 0 : index
      %c0_13 = arith.constant 0 : index
      %16 = vector.load %arg6[%c0_12, %c0_13] : memref<32x128xf32, #tpu.memory_space<vmem>>, vector<32x128xf32>
      tpu.vector_store %arg6[%c0_12, %c0_13], %15 {strides = array<i32>} : memref<32x128xf32, #tpu.memory_space<vmem>>, vector<32x128xf32>,
    } else {
    }
    %c0 = arith.constant 0 : index
    %c0_1 = arith.constant 0 : index
    %3 = vector.load %arg2[%c0, %c0_1] : memref<32x256xbf16, #tpu.memory_space<vmem>>, vector<32x256xbf16>
    %cst = arith.constant 2.001950e-01 : bf16
    %4 = vector.broadcast %cst : bf16 to vector<32x256xbf16>
    %5 = arith.mulf %3, %4 : vector<32x256xbf16>
    %6 = arith.maximumf %3, %5 : vector<32x256xbf16>
    %c0_2 = arith.constant 0 : index
    %c0_3 = arith.constant 0 : index
    %7 = vector.load %arg6[%c0_2, %c0_3] : memref<32x128xf32, #tpu.memory_space<vmem>>, vector<32x128xf32>
    %c0_4 = arith.constant 0 : index
    %c0_5 = arith.constant 0 : index
    %8 = vector.load %arg3[%c0_4, %c0_5] : memref<256x128xbf16, #tpu.memory_space<vmem>>, vector<256x128xbf16>
    %cst_6 = arith.constant dense<0.000000e+00> : vector<32x128xf32>
    %9 = tpu.matmul %6, %8, %cst_6 {dimension_numbers = #tpu.dot_dimension_numbers<[1], [0], [0], [1], [0, 0, 1, 1], [], []>} : vector<32x256xbf16>, vector<256x128xbf16>, vector<32x128xf32> -> vector<32x128xf32>
    %10 = arith.addf %7, %9 : vector<32x128xf32>
    %c0_7 = arith.constant 0 : index
    %c0_8 = arith.constant 0 : index
    %11 = vector.load %arg6[%c0_7, %c0_8] : memref<32x128xf32, #tpu.memory_space<vmem>>, vector<32x128xf32>
    tpu.vector_store %arg6[%c0_7, %c0_8], %10 {strides = array<i32>} : memref<32x128xf32, #tpu.memory_space<vmem>>, vector<32x128xf32>,
    %c0_i32_9 = arith.constant 0 : i32
    %12 = arith.cmpi eq, %arg1, %c0_i32_9 : i32
    %13 = arith.extui %12 : i1 to i32
    %c0_i32_10 = arith.constant 0 : i32
    %14 = arith.cmpi ne, %13, %c0_i32_10 : i32
    scf.if %14 {
      %c0_11 = arith.constant 0 : index
      %c0_12 = arith.constant 0 : index
      %15 = vector.load %arg6[%c0_11, %c0_12] : memref<32x128xf32, #tpu.memory_space<vmem>>, vector<32x128xf32>
      %c0_13 = arith.constant 0 : index
      %c0_14 = arith.constant 0 : index
      %16 = vector.load %arg4[%c0_13, %c0_14] : memref<1x128xf32, #tpu.memory_space<vmem>>, vector<1x128xf32>
      %17 = vector.broadcast %16 : vector<1x128xf32> to vector<32x128xf32>
      %18 = arith.addf %15, %17 : vector<32x128xf32>
      %19 = arith.truncf %18 : vector<32x128xf32> to vector<32x128xbf16>
      %c0_15 = arith.constant 0 : index
      %c0_16 = arith.constant 0 : index
      %20 = vector.load %arg5[%c0_15, %c0_16] : memref<32x128xbf16, #tpu.memory_space<vmem>>, vector<32x128xbf16>
      tpu.vector_store %arg5[%c0_15, %c0_16], %19 {strides = array<i32>} : memref<32x128xbf16, #tpu.memory_space<vmem>>, vector<32x128xbf16>,
    } else {
    }
    return
  }
  func.func @transform_0(%arg0: i32, %arg1: i32) -> (i32, i32) {
    %c0_i32 = arith.constant 0 : i32
    return %arg0, %arg1 : i32, i32
  }
  func.func @transform_1(%arg0: i32, %arg1: i32) -> (i32, i32) {
    %c0_i32 = arith.constant 0 : i32
    %c0_i32_0 = arith.constant 0 : i32
    return %arg1, %c0_i32 : i32, i32
  }
  func.func @transform_2(%arg0: i32, %arg1: i32) -> (i32, i32) {
    %c0_i32 = arith.constant 0 : i32
    %c0_i32_0 = arith.constant 0 : i32
    %c0_i32_1 = arith.constant 0 : i32
    return %c0_i32, %c0_i32_0 : i32, i32
  }
  func.func @transform_3(%arg0: i32, %arg1: i32) -> (i32, i32) {
    %c0_i32 = arith.constant 0 : i32
    %c0_i32_0 = arith.constant 0 : i32
    return %arg0, %c0_i32 : i32, i32
  }
}

module attributes {stable_mosaic.version = 11 : i64} {
  func.func @_affine_kernel(%arg0: i32, %arg1: memref<32x32xbf16, #tpu.memory_space<vmem>>, %arg2: memref<1x32xf32, #tpu.memory_space<vmem>>, %arg3: memref<1x32xf32, #tpu.memory_space<vmem>>, %arg4: memref<32x32xbf16, #tpu.memory_space<vmem>>) attributes {dimension_semantics = [#tpu.dimension_semantics<parallel>], iteration_bounds = array<i64: 1>, scalar_prefetch = 0 : i64, scratch_operands = 0 : i64, tpu.core_type = #tpu.core_type<tc>, window_params = [{transform_indices = @transform_0, window_bounds = array<i64: 32, 32>}, {pipeline_mode = #tpu.pipeline_mode<synchronous>, transform_indices = @transform_1, window_bounds = array<i64: 1, 32>}, {pipeline_mode = #tpu.pipeline_mode<synchronous>, transform_indices = @transform_2, window_bounds = array<i64: 1, 32>}, {transform_indices = @transform_3, window_bounds = array<i64: 32, 32>}]} {
    %c0 = arith.constant 0 : index
    %c0_0 = arith.constant 0 : index
    %0 = vector.load %arg1[%c0, %c0_0] : memref<32x32xbf16, #tpu.memory_space<vmem>>, vector<32x32xbf16>
    %1 = arith.extf %0 : vector<32x32xbf16> to vector<32x32xf32>
    %c0_1 = arith.constant 0 : index
    %c0_2 = arith.constant 0 : index
    %2 = vector.load %arg2[%c0_1, %c0_2] : memref<1x32xf32, #tpu.memory_space<vmem>>, vector<1x32xf32>
    %3 = vector.broadcast %2 : vector<1x32xf32> to vector<32x32xf32>
    %4 = arith.mulf %1, %3 : vector<32x32xf32>
    %c0_3 = arith.constant 0 : index
    %c0_4 = arith.constant 0 : index
    %5 = vector.load %arg3[%c0_3, %c0_4] : memref<1x32xf32, #tpu.memory_space<vmem>>, vector<1x32xf32>
    %6 = vector.broadcast %5 : vector<1x32xf32> to vector<32x32xf32>
    %7 = arith.addf %4, %6 : vector<32x32xf32>
    %8 = arith.truncf %7 : vector<32x32xf32> to vector<32x32xbf16>
    %c0_5 = arith.constant 0 : index
    %c0_6 = arith.constant 0 : index
    %9 = vector.load %arg4[%c0_5, %c0_6] : memref<32x32xbf16, #tpu.memory_space<vmem>>, vector<32x32xbf16>
    tpu.vector_store %arg4[%c0_5, %c0_6], %8 {strides = array<i32>} : memref<32x32xbf16, #tpu.memory_space<vmem>>, vector<32x32xbf16>,
    return
  }
  func.func @transform_0(%arg0: i32) -> (i32, i32) {
    %c0_i32 = arith.constant 0 : i32
    %c0_i32_0 = arith.constant 0 : i32
    return %arg0, %c0_i32 : i32, i32
  }
  func.func @transform_1(%arg0: i32) -> (i32, i32) {
    %c0_i32 = arith.constant 0 : i32
    %c0_i32_0 = arith.constant 0 : i32
    %c0_i32_1 = arith.constant 0 : i32
    return %c0_i32, %c0_i32_0 : i32, i32
  }
  func.func @transform_2(%arg0: i32) -> (i32, i32) {
    %c0_i32 = arith.constant 0 : i32
    %c0_i32_0 = arith.constant 0 : i32
    %c0_i32_1 = arith.constant 0 : i32
    return %c0_i32, %c0_i32_0 : i32, i32
  }
  func.func @transform_3(%arg0: i32) -> (i32, i32) {
    %c0_i32 = arith.constant 0 : i32
    %c0_i32_0 = arith.constant 0 : i32
    return %arg0, %c0_i32 : i32, i32
  }
}

module attributes {stable_mosaic.version = 11 : i64} {
  func.func @_matmul_kernel(%arg0: i32, %arg1: i32, %arg2: memref<8x512xbf16, #tpu.memory_space<vmem>>, %arg3: memref<512x128xbf16, #tpu.memory_space<vmem>>, %arg4: memref<1x128xf32, #tpu.memory_space<vmem>>, %arg5: memref<8x128xbf16, #tpu.memory_space<vmem>>, %arg6: memref<8x128xf32, #tpu.memory_space<vmem>>) attributes {dimension_semantics = [#tpu.dimension_semantics<parallel>, #tpu.dimension_semantics<arbitrary>], iteration_bounds = array<i64: 1, 1>, scalar_prefetch = 0 : i64, scratch_operands = 1 : i64, tpu.core_type = #tpu.core_type<tc>, window_params = [{transform_indices = @transform_0, window_bounds = array<i64: 8, 512>}, {transform_indices = @transform_1, window_bounds = array<i64: 512, 128>}, {pipeline_mode = #tpu.pipeline_mode<synchronous>, transform_indices = @transform_2, window_bounds = array<i64: 1, 128>}, {transform_indices = @transform_3, window_bounds = array<i64: 8, 128>}]} {
    %c0_i32 = arith.constant 0 : i32
    %0 = arith.cmpi eq, %arg1, %c0_i32 : i32
    %1 = arith.extui %0 : i1 to i32
    %c0_i32_0 = arith.constant 0 : i32
    %2 = arith.cmpi ne, %1, %c0_i32_0 : i32
    scf.if %2 {
      %cst_11 = arith.constant 0.000000e+00 : f32
      %15 = vector.broadcast %cst_11 : f32 to vector<8x128xf32>
      %c0_12 = arith.constant 0 : index
      %c0_13 = arith.constant 0 : index
      %16 = vector.load %arg6[%c0_12, %c0_13] : memref<8x128xf32, #tpu.memory_space<vmem>>, vector<8x128xf32>
      tpu.vector_store %arg6[%c0_12, %c0_13], %15 {strides = array<i32>} : memref<8x128xf32, #tpu.memory_space<vmem>>, vector<8x128xf32>,
    } else {
    }
    %c0 = arith.constant 0 : index
    %c0_1 = arith.constant 0 : index
    %3 = vector.load %arg2[%c0, %c0_1] : memref<8x512xbf16, #tpu.memory_space<vmem>>, vector<8x512xbf16>
    %cst = arith.constant 2.001950e-01 : bf16
    %4 = vector.broadcast %cst : bf16 to vector<8x512xbf16>
    %5 = arith.mulf %3, %4 : vector<8x512xbf16>
    %6 = arith.maximumf %3, %5 : vector<8x512xbf16>
    %c0_2 = arith.constant 0 : index
    %c0_3 = arith.constant 0 : index
    %7 = vector.load %arg6[%c0_2, %c0_3] : memref<8x128xf32, #tpu.memory_space<vmem>>, vector<8x128xf32>
    %c0_4 = arith.constant 0 : index
    %c0_5 = arith.constant 0 : index
    %8 = vector.load %arg3[%c0_4, %c0_5] : memref<512x128xbf16, #tpu.memory_space<vmem>>, vector<512x128xbf16>
    %cst_6 = arith.constant dense<0.000000e+00> : vector<8x128xf32>
    %9 = tpu.matmul %6, %8, %cst_6 {dimension_numbers = #tpu.dot_dimension_numbers<[1], [0], [0], [1], [0, 0, 1, 1], [], []>} : vector<8x512xbf16>, vector<512x128xbf16>, vector<8x128xf32> -> vector<8x128xf32>
    %10 = arith.addf %7, %9 : vector<8x128xf32>
    %c0_7 = arith.constant 0 : index
    %c0_8 = arith.constant 0 : index
    %11 = vector.load %arg6[%c0_7, %c0_8] : memref<8x128xf32, #tpu.memory_space<vmem>>, vector<8x128xf32>
    tpu.vector_store %arg6[%c0_7, %c0_8], %10 {strides = array<i32>} : memref<8x128xf32, #tpu.memory_space<vmem>>, vector<8x128xf32>,
    %c0_i32_9 = arith.constant 0 : i32
    %12 = arith.cmpi eq, %arg1, %c0_i32_9 : i32
    %13 = arith.extui %12 : i1 to i32
    %c0_i32_10 = arith.constant 0 : i32
    %14 = arith.cmpi ne, %13, %c0_i32_10 : i32
    scf.if %14 {
      %c0_11 = arith.constant 0 : index
      %c0_12 = arith.constant 0 : index
      %15 = vector.load %arg6[%c0_11, %c0_12] : memref<8x128xf32, #tpu.memory_space<vmem>>, vector<8x128xf32>
      %c0_13 = arith.constant 0 : index
      %c0_14 = arith.constant 0 : index
      %16 = vector.load %arg4[%c0_13, %c0_14] : memref<1x128xf32, #tpu.memory_space<vmem>>, vector<1x128xf32>
      %17 = vector.broadcast %16 : vector<1x128xf32> to vector<8x128xf32>
      %18 = arith.addf %15, %17 : vector<8x128xf32>
      %19 = arith.truncf %18 : vector<8x128xf32> to vector<8x128xbf16>
      %c0_15 = arith.constant 0 : index
      %c0_16 = arith.constant 0 : index
      %20 = vector.load %arg5[%c0_15, %c0_16] : memref<8x128xbf16, #tpu.memory_space<vmem>>, vector<8x128xbf16>
      tpu.vector_store %arg5[%c0_15, %c0_16], %19 {strides = array<i32>} : memref<8x128xbf16, #tpu.memory_space<vmem>>, vector<8x128xbf16>,
    } else {
    }
    return
  }
  func.func @transform_0(%arg0: i32, %arg1: i32) -> (i32, i32) {
    %c0_i32 = arith.constant 0 : i32
    return %arg0, %arg1 : i32, i32
  }
  func.func @transform_1(%arg0: i32, %arg1: i32) -> (i32, i32) {
    %c0_i32 = arith.constant 0 : i32
    %c0_i32_0 = arith.constant 0 : i32
    return %arg1, %c0_i32 : i32, i32
  }
  func.func @transform_2(%arg0: i32, %arg1: i32) -> (i32, i32) {
    %c0_i32 = arith.constant 0 : i32
    %c0_i32_0 = arith.constant 0 : i32
    %c0_i32_1 = arith.constant 0 : i32
    return %c0_i32, %c0_i32_0 : i32, i32
  }
  func.func @transform_3(%arg0: i32, %arg1: i32) -> (i32, i32) {
    %c0_i32 = arith.constant 0 : i32
    %c0_i32_0 = arith.constant 0 : i32
    return %arg0, %c0_i32 : i32, i32
  }
}

module attributes {stable_mosaic.version = 11 : i64} {
  func.func @_affine_kernel(%arg0: i32, %arg1: memref<8x64xbf16, #tpu.memory_space<vmem>>, %arg2: memref<1x64xf32, #tpu.memory_space<vmem>>, %arg3: memref<1x64xf32, #tpu.memory_space<vmem>>, %arg4: memref<8x64xbf16, #tpu.memory_space<vmem>>) attributes {dimension_semantics = [#tpu.dimension_semantics<parallel>], iteration_bounds = array<i64: 1>, scalar_prefetch = 0 : i64, scratch_operands = 0 : i64, tpu.core_type = #tpu.core_type<tc>, window_params = [{transform_indices = @transform_0, window_bounds = array<i64: 8, 64>}, {pipeline_mode = #tpu.pipeline_mode<synchronous>, transform_indices = @transform_1, window_bounds = array<i64: 1, 64>}, {pipeline_mode = #tpu.pipeline_mode<synchronous>, transform_indices = @transform_2, window_bounds = array<i64: 1, 64>}, {transform_indices = @transform_3, window_bounds = array<i64: 8, 64>}]} {
    %c0 = arith.constant 0 : index
    %c0_0 = arith.constant 0 : index
    %0 = vector.load %arg1[%c0, %c0_0] : memref<8x64xbf16, #tpu.memory_space<vmem>>, vector<8x64xbf16>
    %1 = arith.extf %0 : vector<8x64xbf16> to vector<8x64xf32>
    %c0_1 = arith.constant 0 : index
    %c0_2 = arith.constant 0 : index
    %2 = vector.load %arg2[%c0_1, %c0_2] : memref<1x64xf32, #tpu.memory_space<vmem>>, vector<1x64xf32>
    %3 = vector.broadcast %2 : vector<1x64xf32> to vector<8x64xf32>
    %4 = arith.mulf %1, %3 : vector<8x64xf32>
    %c0_3 = arith.constant 0 : index
    %c0_4 = arith.constant 0 : index
    %5 = vector.load %arg3[%c0_3, %c0_4] : memref<1x64xf32, #tpu.memory_space<vmem>>, vector<1x64xf32>
    %6 = vector.broadcast %5 : vector<1x64xf32> to vector<8x64xf32>
    %7 = arith.addf %4, %6 : vector<8x64xf32>
    %8 = arith.truncf %7 : vector<8x64xf32> to vector<8x64xbf16>
    %c0_5 = arith.constant 0 : index
    %c0_6 = arith.constant 0 : index
    %9 = vector.load %arg4[%c0_5, %c0_6] : memref<8x64xbf16, #tpu.memory_space<vmem>>, vector<8x64xbf16>
    tpu.vector_store %arg4[%c0_5, %c0_6], %8 {strides = array<i32>} : memref<8x64xbf16, #tpu.memory_space<vmem>>, vector<8x64xbf16>,
    return
  }
  func.func @transform_0(%arg0: i32) -> (i32, i32) {
    %c0_i32 = arith.constant 0 : i32
    %c0_i32_0 = arith.constant 0 : i32
    return %arg0, %c0_i32 : i32, i32
  }
  func.func @transform_1(%arg0: i32) -> (i32, i32) {
    %c0_i32 = arith.constant 0 : i32
    %c0_i32_0 = arith.constant 0 : i32
    %c0_i32_1 = arith.constant 0 : i32
    return %c0_i32, %c0_i32_0 : i32, i32
  }
  func.func @transform_2(%arg0: i32) -> (i32, i32) {
    %c0_i32 = arith.constant 0 : i32
    %c0_i32_0 = arith.constant 0 : i32
    %c0_i32_1 = arith.constant 0 : i32
    return %c0_i32, %c0_i32_0 : i32, i32
  }
  func.func @transform_3(%arg0: i32) -> (i32, i32) {
    %c0_i32 = arith.constant 0 : i32
    %c0_i32_0 = arith.constant 0 : i32
    return %arg0, %c0_i32 : i32, i32
  }
}

module attributes {stable_mosaic.version = 11 : i64} {
  func.func @_stats_kernel(%arg0: i32, %arg1: memref<8x64xbf16, #tpu.memory_space<vmem>>, %arg2: memref<1x64xf32, #tpu.memory_space<vmem>>, %arg3: memref<1x64xf32, #tpu.memory_space<vmem>>) attributes {dimension_semantics = [#tpu.dimension_semantics<arbitrary>], iteration_bounds = array<i64: 1>, scalar_prefetch = 0 : i64, scratch_operands = 0 : i64, tpu.core_type = #tpu.core_type<tc>, window_params = [{transform_indices = @transform_0, window_bounds = array<i64: 8, 64>}, {pipeline_mode = #tpu.pipeline_mode<synchronous>, transform_indices = @transform_1, window_bounds = array<i64: 1, 64>}, {pipeline_mode = #tpu.pipeline_mode<synchronous>, transform_indices = @transform_2, window_bounds = array<i64: 1, 64>}]} {
    %c0_i32 = arith.constant 0 : i32
    %0 = arith.cmpi eq, %arg0, %c0_i32 : i32
    %1 = arith.extui %0 : i1 to i32
    %c0_i32_0 = arith.constant 0 : i32
    %2 = arith.cmpi ne, %1, %c0_i32_0 : i32
    scf.if %2 {
      %cst_13 = arith.constant 0.000000e+00 : f32
      %26 = vector.broadcast %cst_13 : f32 to vector<1x64xf32>
      %c0_14 = arith.constant 0 : index
      %c0_15 = arith.constant 0 : index
      %27 = vector.load %arg2[%c0_14, %c0_15] : memref<1x64xf32, #tpu.memory_space<vmem>>, vector<1x64xf32>
      tpu.vector_store %arg2[%c0_14, %c0_15], %26 {strides = array<i32>} : memref<1x64xf32, #tpu.memory_space<vmem>>, vector<1x64xf32>,
      %cst_16 = arith.constant 0.000000e+00 : f32
      %28 = vector.broadcast %cst_16 : f32 to vector<1x64xf32>
      %c0_17 = arith.constant 0 : index
      %c0_18 = arith.constant 0 : index
      %29 = vector.load %arg3[%c0_17, %c0_18] : memref<1x64xf32, #tpu.memory_space<vmem>>, vector<1x64xf32>
      tpu.vector_store %arg3[%c0_17, %c0_18], %28 {strides = array<i32>} : memref<1x64xf32, #tpu.memory_space<vmem>>, vector<1x64xf32>,
    } else {
    }
    %c0 = arith.constant 0 : index
    %c0_1 = arith.constant 0 : index
    %3 = vector.load %arg1[%c0, %c0_1] : memref<8x64xbf16, #tpu.memory_space<vmem>>, vector<8x64xbf16>
    %4 = arith.extf %3 : vector<8x64xbf16> to vector<8x64xf32>
    %c8_i32 = arith.constant 8 : i32
    %5 = arith.muli %arg0, %c8_i32 : i32
    %6 = tpu.iota {dimensions = array<i32: 0>} : vector<8x1xi32>
    %7 = vector.broadcast %5 : i32 to vector<8x1xi32>
    %8 = arith.addi %7, %6 : vector<8x1xi32>
    %c8_i32_2 = arith.constant 8 : i32
    %9 = vector.broadcast %c8_i32_2 : i32 to vector<8x1xi32>
    %10 = arith.cmpi slt, %8, %9 : vector<8x1xi32>
    %cst = arith.constant 0.000000e+00 : f32
    %11 = vector.shape_cast %10 : vector<8x1xi1> to vector<8x1xi1>
    %12 = vector.broadcast %11 : vector<8x1xi1> to vector<8x64xi1>
    %13 = vector.broadcast %cst : f32 to vector<8x64xf32>
    %14 = arith.select %12, %4, %13 : vector<8x64xi1>, vector<8x64xf32>
    %c0_3 = arith.constant 0 : index
    %c0_4 = arith.constant 0 : index
    %15 = vector.load %arg2[%c0_3, %c0_4] : memref<1x64xf32, #tpu.memory_space<vmem>>, vector<1x64xf32>
    %cst_5 = arith.constant dense<0.000000e+00> : vector<64xf32>
    %16 = vector.multi_reduction <add>, %14, %cst_5 [0] : vector<8x64xf32> to vector<64xf32>
    %17 = vector.shape_cast %16 : vector<64xf32> to vector<1x64xf32>
    %18 = arith.addf %15, %17 : vector<1x64xf32>
    %c0_6 = arith.constant 0 : index
    %c0_7 = arith.constant 0 : index
    %19 = vector.load %arg2[%c0_6, %c0_7] : memref<1x64xf32, #tpu.memory_space<vmem>>, vector<1x64xf32>
    tpu.vector_store %arg2[%c0_6, %c0_7], %18 {strides = array<i32>} : memref<1x64xf32, #tpu.memory_space<vmem>>, vector<1x64xf32>,
    %c0_8 = arith.constant 0 : index
    %c0_9 = arith.constant 0 : index
    %20 = vector.load %arg3[%c0_8, %c0_9] : memref<1x64xf32, #tpu.memory_space<vmem>>, vector<1x64xf32>
    %21 = arith.mulf %14, %14 : vector<8x64xf32>
    %cst_10 = arith.constant dense<0.000000e+00> : vector<64xf32>
    %22 = vector.multi_reduction <add>, %21, %cst_10 [0] : vector<8x64xf32> to vector<64xf32>
    %23 = vector.shape_cast %22 : vector<64xf32> to vector<1x64xf32>
    %24 = arith.addf %20, %23 : vector<1x64xf32>
    %c0_11 = arith.constant 0 : index
    %c0_12 = arith.constant 0 : index
    %25 = vector.load %arg3[%c0_11, %c0_12] : memref<1x64xf32, #tpu.memory_space<vmem>>, vector<1x64xf32>
    tpu.vector_store %arg3[%c0_11, %c0_12], %24 {strides = array<i32>} : memref<1x64xf32, #tpu.memory_space<vmem>>, vector<1x64xf32>,
    return
  }
  func.func @transform_0(%arg0: i32) -> (i32, i32) {
    %c0_i32 = arith.constant 0 : i32
    %c0_i32_0 = arith.constant 0 : i32
    return %arg0, %c0_i32 : i32, i32
  }
  func.func @transform_1(%arg0: i32) -> (i32, i32) {
    %c0_i32 = arith.constant 0 : i32
    %c0_i32_0 = arith.constant 0 : i32
    %c0_i32_1 = arith.constant 0 : i32
    return %c0_i32, %c0_i32_0 : i32, i32
  }
  func.func @transform_2(%arg0: i32) -> (i32, i32) {
    %c0_i32 = arith.constant 0 : i32
    %c0_i32_0 = arith.constant 0 : i32
    %c0_i32_1 = arith.constant 0 : i32
    return %c0_i32, %c0_i32_0 : i32, i32
  }
}

module attributes {stable_mosaic.version = 11 : i64} {
  func.func @_matmul_kernel(%arg0: i32, %arg1: i32, %arg2: memref<8x1024xbf16, #tpu.memory_space<vmem>>, %arg3: memref<1024x128xbf16, #tpu.memory_space<vmem>>, %arg4: memref<1x128xf32, #tpu.memory_space<vmem>>, %arg5: memref<8x128xbf16, #tpu.memory_space<vmem>>, %arg6: memref<8x128xf32, #tpu.memory_space<vmem>>) attributes {dimension_semantics = [#tpu.dimension_semantics<parallel>, #tpu.dimension_semantics<arbitrary>], iteration_bounds = array<i64: 1, 1>, scalar_prefetch = 0 : i64, scratch_operands = 1 : i64, tpu.core_type = #tpu.core_type<tc>, window_params = [{transform_indices = @transform_0, window_bounds = array<i64: 8, 1024>}, {transform_indices = @transform_1, window_bounds = array<i64: 1024, 128>}, {pipeline_mode = #tpu.pipeline_mode<synchronous>, transform_indices = @transform_2, window_bounds = array<i64: 1, 128>}, {transform_indices = @transform_3, window_bounds = array<i64: 8, 128>}]} {
    %c0_i32 = arith.constant 0 : i32
    %0 = arith.cmpi eq, %arg1, %c0_i32 : i32
    %1 = arith.extui %0 : i1 to i32
    %c0_i32_0 = arith.constant 0 : i32
    %2 = arith.cmpi ne, %1, %c0_i32_0 : i32
    scf.if %2 {
      %cst_11 = arith.constant 0.000000e+00 : f32
      %15 = vector.broadcast %cst_11 : f32 to vector<8x128xf32>
      %c0_12 = arith.constant 0 : index
      %c0_13 = arith.constant 0 : index
      %16 = vector.load %arg6[%c0_12, %c0_13] : memref<8x128xf32, #tpu.memory_space<vmem>>, vector<8x128xf32>
      tpu.vector_store %arg6[%c0_12, %c0_13], %15 {strides = array<i32>} : memref<8x128xf32, #tpu.memory_space<vmem>>, vector<8x128xf32>,
    } else {
    }
    %c0 = arith.constant 0 : index
    %c0_1 = arith.constant 0 : index
    %3 = vector.load %arg2[%c0, %c0_1] : memref<8x1024xbf16, #tpu.memory_space<vmem>>, vector<8x1024xbf16>
    %cst = arith.constant 2.001950e-01 : bf16
    %4 = vector.broadcast %cst : bf16 to vector<8x1024xbf16>
    %5 = arith.mulf %3, %4 : vector<8x1024xbf16>
    %6 = arith.maximumf %3, %5 : vector<8x1024xbf16>
    %c0_2 = arith.constant 0 : index
    %c0_3 = arith.constant 0 : index
    %7 = vector.load %arg6[%c0_2, %c0_3] : memref<8x128xf32, #tpu.memory_space<vmem>>, vector<8x128xf32>
    %c0_4 = arith.constant 0 : index
    %c0_5 = arith.constant 0 : index
    %8 = vector.load %arg3[%c0_4, %c0_5] : memref<1024x128xbf16, #tpu.memory_space<vmem>>, vector<1024x128xbf16>
    %cst_6 = arith.constant dense<0.000000e+00> : vector<8x128xf32>
    %9 = tpu.matmul %6, %8, %cst_6 {dimension_numbers = #tpu.dot_dimension_numbers<[1], [0], [0], [1], [0, 0, 1, 1], [], []>} : vector<8x1024xbf16>, vector<1024x128xbf16>, vector<8x128xf32> -> vector<8x128xf32>
    %10 = arith.addf %7, %9 : vector<8x128xf32>
    %c0_7 = arith.constant 0 : index
    %c0_8 = arith.constant 0 : index
    %11 = vector.load %arg6[%c0_7, %c0_8] : memref<8x128xf32, #tpu.memory_space<vmem>>, vector<8x128xf32>
    tpu.vector_store %arg6[%c0_7, %c0_8], %10 {strides = array<i32>} : memref<8x128xf32, #tpu.memory_space<vmem>>, vector<8x128xf32>,
    %c0_i32_9 = arith.constant 0 : i32
    %12 = arith.cmpi eq, %arg1, %c0_i32_9 : i32
    %13 = arith.extui %12 : i1 to i32
    %c0_i32_10 = arith.constant 0 : i32
    %14 = arith.cmpi ne, %13, %c0_i32_10 : i32
    scf.if %14 {
      %c0_11 = arith.constant 0 : index
      %c0_12 = arith.constant 0 : index
      %15 = vector.load %arg6[%c0_11, %c0_12] : memref<8x128xf32, #tpu.memory_space<vmem>>, vector<8x128xf32>
      %c0_13 = arith.constant 0 : index
      %c0_14 = arith.constant 0 : index
      %16 = vector.load %arg4[%c0_13, %c0_14] : memref<1x128xf32, #tpu.memory_space<vmem>>, vector<1x128xf32>
      %17 = vector.broadcast %16 : vector<1x128xf32> to vector<8x128xf32>
      %18 = arith.addf %15, %17 : vector<8x128xf32>
      %19 = arith.truncf %18 : vector<8x128xf32> to vector<8x128xbf16>
      %c0_15 = arith.constant 0 : index
      %c0_16 = arith.constant 0 : index
      %20 = vector.load %arg5[%c0_15, %c0_16] : memref<8x128xbf16, #tpu.memory_space<vmem>>, vector<8x128xbf16>
      tpu.vector_store %arg5[%c0_15, %c0_16], %19 {strides = array<i32>} : memref<8x128xbf16, #tpu.memory_space<vmem>>, vector<8x128xbf16>,
    } else {
    }
    return
  }
  func.func @transform_0(%arg0: i32, %arg1: i32) -> (i32, i32) {
    %c0_i32 = arith.constant 0 : i32
    return %arg0, %arg1 : i32, i32
  }
  func.func @transform_1(%arg0: i32, %arg1: i32) -> (i32, i32) {
    %c0_i32 = arith.constant 0 : i32
    %c0_i32_0 = arith.constant 0 : i32
    return %arg1, %c0_i32 : i32, i32
  }
  func.func @transform_2(%arg0: i32, %arg1: i32) -> (i32, i32) {
    %c0_i32 = arith.constant 0 : i32
    %c0_i32_0 = arith.constant 0 : i32
    %c0_i32_1 = arith.constant 0 : i32
    return %c0_i32, %c0_i32_0 : i32, i32
  }
  func.func @transform_3(%arg0: i32, %arg1: i32) -> (i32, i32) {
    %c0_i32 = arith.constant 0 : i32
    %c0_i32_0 = arith.constant 0 : i32
    return %arg0, %c0_i32 : i32, i32
  }
}

module attributes {stable_mosaic.version = 11 : i64} {
  func.func @_matmul_kernel(%arg0: i32, %arg1: i32, %arg2: memref<8x640xbf16, #tpu.memory_space<vmem>>, %arg3: memref<640x256xbf16, #tpu.memory_space<vmem>>, %arg4: memref<1x256xf32, #tpu.memory_space<vmem>>, %arg5: memref<8x256xbf16, #tpu.memory_space<vmem>>, %arg6: memref<8x256xf32, #tpu.memory_space<vmem>>) attributes {dimension_semantics = [#tpu.dimension_semantics<parallel>, #tpu.dimension_semantics<arbitrary>], iteration_bounds = array<i64: 1, 1>, scalar_prefetch = 0 : i64, scratch_operands = 1 : i64, tpu.core_type = #tpu.core_type<tc>, window_params = [{transform_indices = @transform_0, window_bounds = array<i64: 8, 640>}, {transform_indices = @transform_1, window_bounds = array<i64: 640, 256>}, {pipeline_mode = #tpu.pipeline_mode<synchronous>, transform_indices = @transform_2, window_bounds = array<i64: 1, 256>}, {transform_indices = @transform_3, window_bounds = array<i64: 8, 256>}]} {
    %c0_i32 = arith.constant 0 : i32
    %0 = arith.cmpi eq, %arg1, %c0_i32 : i32
    %1 = arith.extui %0 : i1 to i32
    %c0_i32_0 = arith.constant 0 : i32
    %2 = arith.cmpi ne, %1, %c0_i32_0 : i32
    scf.if %2 {
      %cst_11 = arith.constant 0.000000e+00 : f32
      %14 = vector.broadcast %cst_11 : f32 to vector<8x256xf32>
      %c0_12 = arith.constant 0 : index
      %c0_13 = arith.constant 0 : index
      %15 = vector.load %arg6[%c0_12, %c0_13] : memref<8x256xf32, #tpu.memory_space<vmem>>, vector<8x256xf32>
      tpu.vector_store %arg6[%c0_12, %c0_13], %14 {strides = array<i32>} : memref<8x256xf32, #tpu.memory_space<vmem>>, vector<8x256xf32>,
    } else {
    }
    %c0 = arith.constant 0 : index
    %c0_1 = arith.constant 0 : index
    %3 = vector.load %arg2[%c0, %c0_1] : memref<8x640xbf16, #tpu.memory_space<vmem>>, vector<8x640xbf16>
    %cst = arith.constant 0.000000e+00 : bf16
    %4 = vector.broadcast %cst : bf16 to vector<8x640xbf16>
    %5 = arith.maximumf %3, %4 : vector<8x640xbf16>
    %c0_2 = arith.constant 0 : index
    %c0_3 = arith.constant 0 : index
    %6 = vector.load %arg6[%c0_2, %c0_3] : memref<8x256xf32, #tpu.memory_space<vmem>>, vector<8x256xf32>
    %c0_4 = arith.constant 0 : index
    %c0_5 = arith.constant 0 : index
    %7 = vector.load %arg3[%c0_4, %c0_5] : memref<640x256xbf16, #tpu.memory_space<vmem>>, vector<640x256xbf16>
    %cst_6 = arith.constant dense<0.000000e+00> : vector<8x256xf32>
    %8 = tpu.matmul %5, %7, %cst_6 {dimension_numbers = #tpu.dot_dimension_numbers<[1], [0], [0], [1], [0, 0, 1, 1], [], []>} : vector<8x640xbf16>, vector<640x256xbf16>, vector<8x256xf32> -> vector<8x256xf32>
    %9 = arith.addf %6, %8 : vector<8x256xf32>
    %c0_7 = arith.constant 0 : index
    %c0_8 = arith.constant 0 : index
    %10 = vector.load %arg6[%c0_7, %c0_8] : memref<8x256xf32, #tpu.memory_space<vmem>>, vector<8x256xf32>
    tpu.vector_store %arg6[%c0_7, %c0_8], %9 {strides = array<i32>} : memref<8x256xf32, #tpu.memory_space<vmem>>, vector<8x256xf32>,
    %c0_i32_9 = arith.constant 0 : i32
    %11 = arith.cmpi eq, %arg1, %c0_i32_9 : i32
    %12 = arith.extui %11 : i1 to i32
    %c0_i32_10 = arith.constant 0 : i32
    %13 = arith.cmpi ne, %12, %c0_i32_10 : i32
    scf.if %13 {
      %c0_11 = arith.constant 0 : index
      %c0_12 = arith.constant 0 : index
      %14 = vector.load %arg6[%c0_11, %c0_12] : memref<8x256xf32, #tpu.memory_space<vmem>>, vector<8x256xf32>
      %c0_13 = arith.constant 0 : index
      %c0_14 = arith.constant 0 : index
      %15 = vector.load %arg4[%c0_13, %c0_14] : memref<1x256xf32, #tpu.memory_space<vmem>>, vector<1x256xf32>
      %16 = vector.broadcast %15 : vector<1x256xf32> to vector<8x256xf32>
      %17 = arith.addf %14, %16 : vector<8x256xf32>
      %18 = arith.truncf %17 : vector<8x256xf32> to vector<8x256xbf16>
      %c0_15 = arith.constant 0 : index
      %c0_16 = arith.constant 0 : index
      %19 = vector.load %arg5[%c0_15, %c0_16] : memref<8x256xbf16, #tpu.memory_space<vmem>>, vector<8x256xbf16>
      tpu.vector_store %arg5[%c0_15, %c0_16], %18 {strides = array<i32>} : memref<8x256xbf16, #tpu.memory_space<vmem>>, vector<8x256xbf16>,
    } else {
    }
    return
  }
  func.func @transform_0(%arg0: i32, %arg1: i32) -> (i32, i32) {
    %c0_i32 = arith.constant 0 : i32
    return %arg0, %arg1 : i32, i32
  }
  func.func @transform_1(%arg0: i32, %arg1: i32) -> (i32, i32) {
    %c0_i32 = arith.constant 0 : i32
    %c0_i32_0 = arith.constant 0 : i32
    return %arg1, %c0_i32 : i32, i32
  }
  func.func @transform_2(%arg0: i32, %arg1: i32) -> (i32, i32) {
    %c0_i32 = arith.constant 0 : i32
    %c0_i32_0 = arith.constant 0 : i32
    %c0_i32_1 = arith.constant 0 : i32
    return %c0_i32, %c0_i32_0 : i32, i32
  }
  func.func @transform_3(%arg0: i32, %arg1: i32) -> (i32, i32) {
    %c0_i32 = arith.constant 0 : i32
    %c0_i32_0 = arith.constant 0 : i32
    return %arg0, %c0_i32 : i32, i32
  }
}

module attributes {stable_mosaic.version = 11 : i64} {
  func.func @_stats_kernel(%arg0: i32, %arg1: memref<8x256xbf16, #tpu.memory_space<vmem>>, %arg2: memref<1x256xf32, #tpu.memory_space<vmem>>, %arg3: memref<1x256xf32, #tpu.memory_space<vmem>>) attributes {dimension_semantics = [#tpu.dimension_semantics<arbitrary>], iteration_bounds = array<i64: 1>, scalar_prefetch = 0 : i64, scratch_operands = 0 : i64, tpu.core_type = #tpu.core_type<tc>, window_params = [{transform_indices = @transform_0, window_bounds = array<i64: 8, 256>}, {pipeline_mode = #tpu.pipeline_mode<synchronous>, transform_indices = @transform_1, window_bounds = array<i64: 1, 256>}, {pipeline_mode = #tpu.pipeline_mode<synchronous>, transform_indices = @transform_2, window_bounds = array<i64: 1, 256>}]} {
    %c0_i32 = arith.constant 0 : i32
    %0 = arith.cmpi eq, %arg0, %c0_i32 : i32
    %1 = arith.extui %0 : i1 to i32
    %c0_i32_0 = arith.constant 0 : i32
    %2 = arith.cmpi ne, %1, %c0_i32_0 : i32
    scf.if %2 {
      %cst_12 = arith.constant 0.000000e+00 : f32
      %26 = vector.broadcast %cst_12 : f32 to vector<1x256xf32>
      %c0_13 = arith.constant 0 : index
      %c0_14 = arith.constant 0 : index
      %27 = vector.load %arg2[%c0_13, %c0_14] : memref<1x256xf32, #tpu.memory_space<vmem>>, vector<1x256xf32>
      tpu.vector_store %arg2[%c0_13, %c0_14], %26 {strides = array<i32>} : memref<1x256xf32, #tpu.memory_space<vmem>>, vector<1x256xf32>,
      %cst_15 = arith.constant 0.000000e+00 : f32
      %28 = vector.broadcast %cst_15 : f32 to vector<1x256xf32>
      %c0_16 = arith.constant 0 : index
      %c0_17 = arith.constant 0 : index
      %29 = vector.load %arg3[%c0_16, %c0_17] : memref<1x256xf32, #tpu.memory_space<vmem>>, vector<1x256xf32>
      tpu.vector_store %arg3[%c0_16, %c0_17], %28 {strides = array<i32>} : memref<1x256xf32, #tpu.memory_space<vmem>>, vector<1x256xf32>,
    } else {
    }
    %c0 = arith.constant 0 : index
    %c0_1 = arith.constant 0 : index
    %3 = vector.load %arg1[%c0, %c0_1] : memref<8x256xbf16, #tpu.memory_space<vmem>>, vector<8x256xbf16>
    %4 = arith.extf %3 : vector<8x256xbf16> to vector<8x256xf32>
    %c8_i32 = arith.constant 8 : i32
    %5 = arith.muli %arg0, %c8_i32 : i32
    %6 = tpu.iota {dimensions = array<i32: 0>} : vector<8x1xi32>
    %7 = vector.broadcast %5 : i32 to vector<8x1xi32>
    %8 = arith.addi %7, %6 : vector<8x1xi32>
    %c2_i32 = arith.constant 2 : i32
    %9 = vector.broadcast %c2_i32 : i32 to vector<8x1xi32>
    %10 = arith.cmpi slt, %8, %9 : vector<8x1xi32>
    %cst = arith.constant 0.000000e+00 : f32
    %11 = vector.shape_cast %10 : vector<8x1xi1> to vector<8x1xi1>
    %12 = vector.broadcast %11 : vector<8x1xi1> to vector<8x256xi1>
    %13 = vector.broadcast %cst : f32 to vector<8x256xf32>
    %14 = arith.select %12, %4, %13 : vector<8x256xi1>, vector<8x256xf32>
    %c0_2 = arith.constant 0 : index
    %c0_3 = arith.constant 0 : index
    %15 = vector.load %arg2[%c0_2, %c0_3] : memref<1x256xf32, #tpu.memory_space<vmem>>, vector<1x256xf32>
    %cst_4 = arith.constant dense<0.000000e+00> : vector<256xf32>
    %16 = vector.multi_reduction <add>, %14, %cst_4 [0] : vector<8x256xf32> to vector<256xf32>
    %17 = vector.shape_cast %16 : vector<256xf32> to vector<1x256xf32>
    %18 = arith.addf %15, %17 : vector<1x256xf32>
    %c0_5 = arith.constant 0 : index
    %c0_6 = arith.constant 0 : index
    %19 = vector.load %arg2[%c0_5, %c0_6] : memref<1x256xf32, #tpu.memory_space<vmem>>, vector<1x256xf32>
    tpu.vector_store %arg2[%c0_5, %c0_6], %18 {strides = array<i32>} : memref<1x256xf32, #tpu.memory_space<vmem>>, vector<1x256xf32>,
    %c0_7 = arith.constant 0 : index
    %c0_8 = arith.constant 0 : index
    %20 = vector.load %arg3[%c0_7, %c0_8] : memref<1x256xf32, #tpu.memory_space<vmem>>, vector<1x256xf32>
    %21 = arith.mulf %14, %14 : vector<8x256xf32>
    %cst_9 = arith.constant dense<0.000000e+00> : vector<256xf32>
    %22 = vector.multi_reduction <add>, %21, %cst_9 [0] : vector<8x256xf32> to vector<256xf32>
    %23 = vector.shape_cast %22 : vector<256xf32> to vector<1x256xf32>
    %24 = arith.addf %20, %23 : vector<1x256xf32>
    %c0_10 = arith.constant 0 : index
    %c0_11 = arith.constant 0 : index
    %25 = vector.load %arg3[%c0_10, %c0_11] : memref<1x256xf32, #tpu.memory_space<vmem>>, vector<1x256xf32>
    tpu.vector_store %arg3[%c0_10, %c0_11], %24 {strides = array<i32>} : memref<1x256xf32, #tpu.memory_space<vmem>>, vector<1x256xf32>,
    return
  }
  func.func @transform_0(%arg0: i32) -> (i32, i32) {
    %c0_i32 = arith.constant 0 : i32
    %c0_i32_0 = arith.constant 0 : i32
    return %arg0, %c0_i32 : i32, i32
  }
  func.func @transform_1(%arg0: i32) -> (i32, i32) {
    %c0_i32 = arith.constant 0 : i32
    %c0_i32_0 = arith.constant 0 : i32
    %c0_i32_1 = arith.constant 0 : i32
    return %c0_i32, %c0_i32_0 : i32, i32
  }
  func.func @transform_2(%arg0: i32) -> (i32, i32) {
    %c0_i32 = arith.constant 0 : i32
    %c0_i32_0 = arith.constant 0 : i32
    %c0_i32_1 = arith.constant 0 : i32
    return %c0_i32, %c0_i32_0 : i32, i32
  }
}

module attributes {stable_mosaic.version = 11 : i64} {
  func.func @_upnorm_concat_kernel(%arg0: i32, %arg1: i32, %arg2: memref<1x2x1x128xbf16, #tpu.memory_space<vmem>>, %arg3: memref<1x1x1x256xbf16, #tpu.memory_space<vmem>>, %arg4: memref<1x256xf32, #tpu.memory_space<vmem>>, %arg5: memref<1x256xf32, #tpu.memory_space<vmem>>, %arg6: memref<1x2x1x256xbf16, #tpu.memory_space<vmem>>) attributes {dimension_semantics = [#tpu.dimension_semantics<parallel>, #tpu.dimension_semantics<parallel>], iteration_bounds = array<i64: 2, 1>, scalar_prefetch = 0 : i64, scratch_operands = 0 : i64, tpu.core_type = #tpu.core_type<tc>, window_params = [{transform_indices = @transform_0, window_bounds = array<i64: 1, 2, 1, 128>}, {transform_indices = @transform_1, window_bounds = array<i64: 1, 1, 1, 256>}, {pipeline_mode = #tpu.pipeline_mode<synchronous>, transform_indices = @transform_2, window_bounds = array<i64: 1, 256>}, {pipeline_mode = #tpu.pipeline_mode<synchronous>, transform_indices = @transform_3, window_bounds = array<i64: 1, 256>}, {transform_indices = @transform_4, window_bounds = array<i64: 1, 2, 1, 256>}]} {
    %c0 = arith.constant 0 : index
    %c0_0 = arith.constant 0 : index
    %c0_1 = arith.constant 0 : index
    %c0_2 = arith.constant 0 : index
    %0 = vector.load %arg2[%c0, %c0_0, %c0_1, %c0_2] : memref<1x2x1x128xbf16, #tpu.memory_space<vmem>>, vector<1x2x1x128xbf16>
    %1 = vector.shape_cast %0 : vector<1x2x1x128xbf16> to vector<2x1x128xbf16>
    %c0_3 = arith.constant 0 : index
    %c0_4 = arith.constant 0 : index
    %c0_5 = arith.constant 0 : index
    %c0_6 = arith.constant 0 : index
    %2 = vector.load %arg3[%c0_3, %c0_4, %c0_5, %c0_6] : memref<1x1x1x256xbf16, #tpu.memory_space<vmem>>, vector<1x1x1x256xbf16>
    %3 = vector.shape_cast %2 : vector<1x1x1x256xbf16> to vector<1x256xbf16>
    %4 = arith.extf %3 : vector<1x256xbf16> to vector<1x256xf32>
    %c0_7 = arith.constant 0 : index
    %c0_8 = arith.constant 0 : index
    %5 = vector.load %arg4[%c0_7, %c0_8] : memref<1x256xf32, #tpu.memory_space<vmem>>, vector<1x256xf32>
    %6 = arith.mulf %4, %5 : vector<1x256xf32>
    %c0_9 = arith.constant 0 : index
    %c0_10 = arith.constant 0 : index
    %7 = vector.load %arg5[%c0_9, %c0_10] : memref<1x256xf32, #tpu.memory_space<vmem>>, vector<1x256xf32>
    %8 = arith.addf %6, %7 : vector<1x256xf32>
    %9 = arith.truncf %8 : vector<1x256xf32> to vector<1x256xbf16>
    %10 = vector.extract_strided_slice %1 {offsets = [0, 0, 0], sizes = [1, 1, 64], strides = [1, 1, 1]} : vector<2x1x128xbf16> to vector<1x1x64xbf16>
    %11 = vector.shape_cast %10 : vector<1x1x64xbf16> to vector<1x64xbf16>
    %c0_11 = arith.constant 0 : index
    %c0_12 = arith.constant 0 : index
    %c0_13 = arith.constant 0 : index
    %c0_14 = arith.constant 0 : index
    %12 = vector.load %arg6[%c0_11, %c0_12, %c0_13, %c0_14] : memref<1x2x1x256xbf16, #tpu.memory_space<vmem>>, vector<1x1x1x64xbf16>
    %13 = vector.shape_cast %12 : vector<1x1x1x64xbf16> to vector<1x64xbf16>
    %14 = vector.shape_cast %11 : vector<1x64xbf16> to vector<1x1x1x64xbf16>
    tpu.vector_store %arg6[%c0_11, %c0_12, %c0_13, %c0_14], %14 {strides = array<i32>} : memref<1x2x1x256xbf16, #tpu.memory_space<vmem>>, vector<1x1x1x64xbf16>,
    %15 = vector.extract_strided_slice %9 {offsets = [0, 0], sizes = [1, 64], strides = [1, 1]} : vector<1x256xbf16> to vector<1x64xbf16>
    %c0_15 = arith.constant 0 : index
    %c0_16 = arith.constant 0 : index
    %c0_17 = arith.constant 0 : index
    %c64 = arith.constant 64 : index
    %16 = vector.load %arg6[%c0_15, %c0_16, %c0_17, %c64] : memref<1x2x1x256xbf16, #tpu.memory_space<vmem>>, vector<1x1x1x64xbf16>
    %17 = vector.shape_cast %16 : vector<1x1x1x64xbf16> to vector<1x64xbf16>
    %18 = vector.shape_cast %15 : vector<1x64xbf16> to vector<1x1x1x64xbf16>
    tpu.vector_store %arg6[%c0_15, %c0_16, %c0_17, %c64], %18 {strides = array<i32>} : memref<1x2x1x256xbf16, #tpu.memory_space<vmem>>, vector<1x1x1x64xbf16>,
    %19 = vector.extract_strided_slice %1 {offsets = [0, 0, 64], sizes = [1, 1, 64], strides = [1, 1, 1]} : vector<2x1x128xbf16> to vector<1x1x64xbf16>
    %20 = vector.shape_cast %19 : vector<1x1x64xbf16> to vector<1x64xbf16>
    %c0_18 = arith.constant 0 : index
    %c0_19 = arith.constant 0 : index
    %c0_20 = arith.constant 0 : index
    %c128 = arith.constant 128 : index
    %21 = vector.load %arg6[%c0_18, %c0_19, %c0_20, %c128] : memref<1x2x1x256xbf16, #tpu.memory_space<vmem>>, vector<1x1x1x64xbf16>
    %22 = vector.shape_cast %21 : vector<1x1x1x64xbf16> to vector<1x64xbf16>
    %23 = vector.shape_cast %20 : vector<1x64xbf16> to vector<1x1x1x64xbf16>
    tpu.vector_store %arg6[%c0_18, %c0_19, %c0_20, %c128], %23 {strides = array<i32>} : memref<1x2x1x256xbf16, #tpu.memory_space<vmem>>, vector<1x1x1x64xbf16>,
    %24 = vector.extract_strided_slice %9 {offsets = [0, 64], sizes = [1, 64], strides = [1, 1]} : vector<1x256xbf16> to vector<1x64xbf16>
    %c0_21 = arith.constant 0 : index
    %c0_22 = arith.constant 0 : index
    %c0_23 = arith.constant 0 : index
    %c192 = arith.constant 192 : index
    %25 = vector.load %arg6[%c0_21, %c0_22, %c0_23, %c192] : memref<1x2x1x256xbf16, #tpu.memory_space<vmem>>, vector<1x1x1x64xbf16>
    %26 = vector.shape_cast %25 : vector<1x1x1x64xbf16> to vector<1x64xbf16>
    %27 = vector.shape_cast %24 : vector<1x64xbf16> to vector<1x1x1x64xbf16>
    tpu.vector_store %arg6[%c0_21, %c0_22, %c0_23, %c192], %27 {strides = array<i32>} : memref<1x2x1x256xbf16, #tpu.memory_space<vmem>>, vector<1x1x1x64xbf16>,
    %28 = vector.extract_strided_slice %1 {offsets = [1, 0, 0], sizes = [1, 1, 64], strides = [1, 1, 1]} : vector<2x1x128xbf16> to vector<1x1x64xbf16>
    %29 = vector.shape_cast %28 : vector<1x1x64xbf16> to vector<1x64xbf16>
    %c0_24 = arith.constant 0 : index
    %c1 = arith.constant 1 : index
    %c0_25 = arith.constant 0 : index
    %c0_26 = arith.constant 0 : index
    %30 = vector.load %arg6[%c0_24, %c1, %c0_25, %c0_26] : memref<1x2x1x256xbf16, #tpu.memory_space<vmem>>, vector<1x1x1x64xbf16>
    %31 = vector.shape_cast %30 : vector<1x1x1x64xbf16> to vector<1x64xbf16>
    %32 = vector.shape_cast %29 : vector<1x64xbf16> to vector<1x1x1x64xbf16>
    tpu.vector_store %arg6[%c0_24, %c1, %c0_25, %c0_26], %32 {strides = array<i32>} : memref<1x2x1x256xbf16, #tpu.memory_space<vmem>>, vector<1x1x1x64xbf16>,
    %33 = vector.extract_strided_slice %9 {offsets = [0, 128], sizes = [1, 64], strides = [1, 1]} : vector<1x256xbf16> to vector<1x64xbf16>
    %c0_27 = arith.constant 0 : index
    %c1_28 = arith.constant 1 : index
    %c0_29 = arith.constant 0 : index
    %c64_30 = arith.constant 64 : index
    %34 = vector.load %arg6[%c0_27, %c1_28, %c0_29, %c64_30] : memref<1x2x1x256xbf16, #tpu.memory_space<vmem>>, vector<1x1x1x64xbf16>
    %35 = vector.shape_cast %34 : vector<1x1x1x64xbf16> to vector<1x64xbf16>
    %36 = vector.shape_cast %33 : vector<1x64xbf16> to vector<1x1x1x64xbf16>
    tpu.vector_store %arg6[%c0_27, %c1_28, %c0_29, %c64_30], %36 {strides = array<i32>} : memref<1x2x1x256xbf16, #tpu.memory_space<vmem>>, vector<1x1x1x64xbf16>,
    %37 = vector.extract_strided_slice %1 {offsets = [1, 0, 64], sizes = [1, 1, 64], strides = [1, 1, 1]} : vector<2x1x128xbf16> to vector<1x1x64xbf16>
    %38 = vector.shape_cast %37 : vector<1x1x64xbf16> to vector<1x64xbf16>
    %c0_31 = arith.constant 0 : index
    %c1_32 = arith.constant 1 : index
    %c0_33 = arith.constant 0 : index
    %c128_34 = arith.constant 128 : index
    %39 = vector.load %arg6[%c0_31, %c1_32, %c0_33, %c128_34] : memref<1x2x1x256xbf16, #tpu.memory_space<vmem>>, vector<1x1x1x64xbf16>
    %40 = vector.shape_cast %39 : vector<1x1x1x64xbf16> to vector<1x64xbf16>
    %41 = vector.shape_cast %38 : vector<1x64xbf16> to vector<1x1x1x64xbf16>
    tpu.vector_store %arg6[%c0_31, %c1_32, %c0_33, %c128_34], %41 {strides = array<i32>} : memref<1x2x1x256xbf16, #tpu.memory_space<vmem>>, vector<1x1x1x64xbf16>,
    %42 = vector.extract_strided_slice %9 {offsets = [0, 192], sizes = [1, 64], strides = [1, 1]} : vector<1x256xbf16> to vector<1x64xbf16>
    %c0_35 = arith.constant 0 : index
    %c1_36 = arith.constant 1 : index
    %c0_37 = arith.constant 0 : index
    %c192_38 = arith.constant 192 : index
    %43 = vector.load %arg6[%c0_35, %c1_36, %c0_37, %c192_38] : memref<1x2x1x256xbf16, #tpu.memory_space<vmem>>, vector<1x1x1x64xbf16>
    %44 = vector.shape_cast %43 : vector<1x1x1x64xbf16> to vector<1x64xbf16>
    %45 = vector.shape_cast %42 : vector<1x64xbf16> to vector<1x1x1x64xbf16>
    tpu.vector_store %arg6[%c0_35, %c1_36, %c0_37, %c192_38], %45 {strides = array<i32>} : memref<1x2x1x256xbf16, #tpu.memory_space<vmem>>, vector<1x1x1x64xbf16>,
    return
  }
  func.func @transform_0(%arg0: i32, %arg1: i32) -> (i32, i32, i32, i32) {
    %c0_i32 = arith.constant 0 : i32
    %c0_i32_0 = arith.constant 0 : i32
    %c0_i32_1 = arith.constant 0 : i32
    return %arg0, %arg1, %c0_i32, %c0_i32_0 : i32, i32, i32, i32
  }
  func.func @transform_1(%arg0: i32, %arg1: i32) -> (i32, i32, i32, i32) {
    %c0_i32 = arith.constant 0 : i32
    %c0_i32_0 = arith.constant 0 : i32
    %c0_i32_1 = arith.constant 0 : i32
    return %arg0, %arg1, %c0_i32, %c0_i32_0 : i32, i32, i32, i32
  }
  func.func @transform_2(%arg0: i32, %arg1: i32) -> (i32, i32) {
    %c0_i32 = arith.constant 0 : i32
    %c0_i32_0 = arith.constant 0 : i32
    %c0_i32_1 = arith.constant 0 : i32
    return %c0_i32, %c0_i32_0 : i32, i32
  }
  func.func @transform_3(%arg0: i32, %arg1: i32) -> (i32, i32) {
    %c0_i32 = arith.constant 0 : i32
    %c0_i32_0 = arith.constant 0 : i32
    %c0_i32_1 = arith.constant 0 : i32
    return %c0_i32, %c0_i32_0 : i32, i32
  }
  func.func @transform_4(%arg0: i32, %arg1: i32) -> (i32, i32, i32, i32) {
    %c0_i32 = arith.constant 0 : i32
    %c0_i32_0 = arith.constant 0 : i32
    %c0_i32_1 = arith.constant 0 : i32
    return %arg0, %arg1, %c0_i32, %c0_i32_0 : i32, i32, i32, i32
  }
}

module attributes {stable_mosaic.version = 11 : i64} {
  func.func @_matmul_kernel(%arg0: i32, %arg1: i32, %arg2: memref<8x1152xbf16, #tpu.memory_space<vmem>>, %arg3: memref<1152x128xbf16, #tpu.memory_space<vmem>>, %arg4: memref<1x128xf32, #tpu.memory_space<vmem>>, %arg5: memref<8x128xbf16, #tpu.memory_space<vmem>>, %arg6: memref<8x128xf32, #tpu.memory_space<vmem>>) attributes {dimension_semantics = [#tpu.dimension_semantics<parallel>, #tpu.dimension_semantics<arbitrary>], iteration_bounds = array<i64: 1, 1>, scalar_prefetch = 0 : i64, scratch_operands = 1 : i64, tpu.core_type = #tpu.core_type<tc>, window_params = [{transform_indices = @transform_0, window_bounds = array<i64: 8, 1152>}, {transform_indices = @transform_1, window_bounds = array<i64: 1152, 128>}, {pipeline_mode = #tpu.pipeline_mode<synchronous>, transform_indices = @transform_2, window_bounds = array<i64: 1, 128>}, {transform_indices = @transform_3, window_bounds = array<i64: 8, 128>}]} {
    %c0_i32 = arith.constant 0 : i32
    %0 = arith.cmpi eq, %arg1, %c0_i32 : i32
    %1 = arith.extui %0 : i1 to i32
    %c0_i32_0 = arith.constant 0 : i32
    %2 = arith.cmpi ne, %1, %c0_i32_0 : i32
    scf.if %2 {
      %cst_11 = arith.constant 0.000000e+00 : f32
      %14 = vector.broadcast %cst_11 : f32 to vector<8x128xf32>
      %c0_12 = arith.constant 0 : index
      %c0_13 = arith.constant 0 : index
      %15 = vector.load %arg6[%c0_12, %c0_13] : memref<8x128xf32, #tpu.memory_space<vmem>>, vector<8x128xf32>
      tpu.vector_store %arg6[%c0_12, %c0_13], %14 {strides = array<i32>} : memref<8x128xf32, #tpu.memory_space<vmem>>, vector<8x128xf32>,
    } else {
    }
    %c0 = arith.constant 0 : index
    %c0_1 = arith.constant 0 : index
    %3 = vector.load %arg2[%c0, %c0_1] : memref<8x1152xbf16, #tpu.memory_space<vmem>>, vector<8x1152xbf16>
    %cst = arith.constant 0.000000e+00 : bf16
    %4 = vector.broadcast %cst : bf16 to vector<8x1152xbf16>
    %5 = arith.maximumf %3, %4 : vector<8x1152xbf16>
    %c0_2 = arith.constant 0 : index
    %c0_3 = arith.constant 0 : index
    %6 = vector.load %arg6[%c0_2, %c0_3] : memref<8x128xf32, #tpu.memory_space<vmem>>, vector<8x128xf32>
    %c0_4 = arith.constant 0 : index
    %c0_5 = arith.constant 0 : index
    %7 = vector.load %arg3[%c0_4, %c0_5] : memref<1152x128xbf16, #tpu.memory_space<vmem>>, vector<1152x128xbf16>
    %cst_6 = arith.constant dense<0.000000e+00> : vector<8x128xf32>
    %8 = tpu.matmul %5, %7, %cst_6 {dimension_numbers = #tpu.dot_dimension_numbers<[1], [0], [0], [1], [0, 0, 1, 1], [], []>} : vector<8x1152xbf16>, vector<1152x128xbf16>, vector<8x128xf32> -> vector<8x128xf32>
    %9 = arith.addf %6, %8 : vector<8x128xf32>
    %c0_7 = arith.constant 0 : index
    %c0_8 = arith.constant 0 : index
    %10 = vector.load %arg6[%c0_7, %c0_8] : memref<8x128xf32, #tpu.memory_space<vmem>>, vector<8x128xf32>
    tpu.vector_store %arg6[%c0_7, %c0_8], %9 {strides = array<i32>} : memref<8x128xf32, #tpu.memory_space<vmem>>, vector<8x128xf32>,
    %c0_i32_9 = arith.constant 0 : i32
    %11 = arith.cmpi eq, %arg1, %c0_i32_9 : i32
    %12 = arith.extui %11 : i1 to i32
    %c0_i32_10 = arith.constant 0 : i32
    %13 = arith.cmpi ne, %12, %c0_i32_10 : i32
    scf.if %13 {
      %c0_11 = arith.constant 0 : index
      %c0_12 = arith.constant 0 : index
      %14 = vector.load %arg6[%c0_11, %c0_12] : memref<8x128xf32, #tpu.memory_space<vmem>>, vector<8x128xf32>
      %c0_13 = arith.constant 0 : index
      %c0_14 = arith.constant 0 : index
      %15 = vector.load %arg4[%c0_13, %c0_14] : memref<1x128xf32, #tpu.memory_space<vmem>>, vector<1x128xf32>
      %16 = vector.broadcast %15 : vector<1x128xf32> to vector<8x128xf32>
      %17 = arith.addf %14, %16 : vector<8x128xf32>
      %18 = arith.truncf %17 : vector<8x128xf32> to vector<8x128xbf16>
      %c0_15 = arith.constant 0 : index
      %c0_16 = arith.constant 0 : index
      %19 = vector.load %arg5[%c0_15, %c0_16] : memref<8x128xbf16, #tpu.memory_space<vmem>>, vector<8x128xbf16>
      tpu.vector_store %arg5[%c0_15, %c0_16], %18 {strides = array<i32>} : memref<8x128xbf16, #tpu.memory_space<vmem>>, vector<8x128xbf16>,
    } else {
    }
    return
  }
  func.func @transform_0(%arg0: i32, %arg1: i32) -> (i32, i32) {
    %c0_i32 = arith.constant 0 : i32
    return %arg0, %arg1 : i32, i32
  }
  func.func @transform_1(%arg0: i32, %arg1: i32) -> (i32, i32) {
    %c0_i32 = arith.constant 0 : i32
    %c0_i32_0 = arith.constant 0 : i32
    return %arg1, %c0_i32 : i32, i32
  }
  func.func @transform_2(%arg0: i32, %arg1: i32) -> (i32, i32) {
    %c0_i32 = arith.constant 0 : i32
    %c0_i32_0 = arith.constant 0 : i32
    %c0_i32_1 = arith.constant 0 : i32
    return %c0_i32, %c0_i32_0 : i32, i32
  }
  func.func @transform_3(%arg0: i32, %arg1: i32) -> (i32, i32) {
    %c0_i32 = arith.constant 0 : i32
    %c0_i32_0 = arith.constant 0 : i32
    return %arg0, %c0_i32 : i32, i32
  }
}

module attributes {stable_mosaic.version = 11 : i64} {
  func.func @_upnorm_concat_kernel(%arg0: i32, %arg1: i32, %arg2: memref<1x2x2x64xbf16, #tpu.memory_space<vmem>>, %arg3: memref<1x1x2x128xbf16, #tpu.memory_space<vmem>>, %arg4: memref<1x128xf32, #tpu.memory_space<vmem>>, %arg5: memref<1x128xf32, #tpu.memory_space<vmem>>, %arg6: memref<1x2x2x128xbf16, #tpu.memory_space<vmem>>) attributes {dimension_semantics = [#tpu.dimension_semantics<parallel>, #tpu.dimension_semantics<parallel>], iteration_bounds = array<i64: 2, 2>, scalar_prefetch = 0 : i64, scratch_operands = 0 : i64, tpu.core_type = #tpu.core_type<tc>, window_params = [{transform_indices = @transform_0, window_bounds = array<i64: 1, 2, 2, 64>}, {transform_indices = @transform_1, window_bounds = array<i64: 1, 1, 2, 128>}, {pipeline_mode = #tpu.pipeline_mode<synchronous>, transform_indices = @transform_2, window_bounds = array<i64: 1, 128>}, {pipeline_mode = #tpu.pipeline_mode<synchronous>, transform_indices = @transform_3, window_bounds = array<i64: 1, 128>}, {transform_indices = @transform_4, window_bounds = array<i64: 1, 2, 2, 128>}]} {
    %c0 = arith.constant 0 : index
    %c0_0 = arith.constant 0 : index
    %c0_1 = arith.constant 0 : index
    %c0_2 = arith.constant 0 : index
    %0 = vector.load %arg2[%c0, %c0_0, %c0_1, %c0_2] : memref<1x2x2x64xbf16, #tpu.memory_space<vmem>>, vector<1x2x2x64xbf16>
    %1 = vector.shape_cast %0 : vector<1x2x2x64xbf16> to vector<2x2x64xbf16>
    %c0_3 = arith.constant 0 : index
    %c0_4 = arith.constant 0 : index
    %c0_5 = arith.constant 0 : index
    %c0_6 = arith.constant 0 : index
    %2 = vector.load %arg3[%c0_3, %c0_4, %c0_5, %c0_6] : memref<1x1x2x128xbf16, #tpu.memory_space<vmem>>, vector<1x1x2x128xbf16>
    %3 = vector.shape_cast %2 : vector<1x1x2x128xbf16> to vector<2x128xbf16>
    %4 = arith.extf %3 : vector<2x128xbf16> to vector<2x128xf32>
    %c0_7 = arith.constant 0 : index
    %c0_8 = arith.constant 0 : index
    %5 = vector.load %arg4[%c0_7, %c0_8] : memref<1x128xf32, #tpu.memory_space<vmem>>, vector<1x128xf32>
    %6 = vector.broadcast %5 : vector<1x128xf32> to vector<2x128xf32>
    %7 = arith.mulf %4, %6 : vector<2x128xf32>
    %c0_9 = arith.constant 0 : index
    %c0_10 = arith.constant 0 : index
    %8 = vector.load %arg5[%c0_9, %c0_10] : memref<1x128xf32, #tpu.memory_space<vmem>>, vector<1x128xf32>
    %9 = vector.broadcast %8 : vector<1x128xf32> to vector<2x128xf32>
    %10 = arith.addf %7, %9 : vector<2x128xf32>
    %11 = arith.truncf %10 : vector<2x128xf32> to vector<2x128xbf16>
    %12 = vector.extract_strided_slice %1 {offsets = [0, 0, 0], sizes = [1, 2, 32], strides = [1, 1, 1]} : vector<2x2x64xbf16> to vector<1x2x32xbf16>
    %13 = vector.shape_cast %12 : vector<1x2x32xbf16> to vector<2x32xbf16>
    %c0_11 = arith.constant 0 : index
    %c0_12 = arith.constant 0 : index
    %c0_13 = arith.constant 0 : index
    %c0_14 = arith.constant 0 : index
    %14 = vector.load %arg6[%c0_11, %c0_12, %c0_13, %c0_14] : memref<1x2x2x128xbf16, #tpu.memory_space<vmem>>, vector<1x1x2x32xbf16>
    %15 = vector.shape_cast %14 : vector<1x1x2x32xbf16> to vector<2x32xbf16>
    %16 = vector.shape_cast %13 : vector<2x32xbf16> to vector<1x1x2x32xbf16>
    tpu.vector_store %arg6[%c0_11, %c0_12, %c0_13, %c0_14], %16 {strides = array<i32>} : memref<1x2x2x128xbf16, #tpu.memory_space<vmem>>, vector<1x1x2x32xbf16>,
    %17 = vector.extract_strided_slice %11 {offsets = [0, 0], sizes = [2, 32], strides = [1, 1]} : vector<2x128xbf16> to vector<2x32xbf16>
    %c0_15 = arith.constant 0 : index
    %c0_16 = arith.constant 0 : index
    %c0_17 = arith.constant 0 : index
    %c32 = arith.constant 32 : index
    %18 = vector.load %arg6[%c0_15, %c0_16, %c0_17, %c32] : memref<1x2x2x128xbf16, #tpu.memory_space<vmem>>, vector<1x1x2x32xbf16>
    %19 = vector.shape_cast %18 : vector<1x1x2x32xbf16> to vector<2x32xbf16>
    %20 = vector.shape_cast %17 : vector<2x32xbf16> to vector<1x1x2x32xbf16>
    tpu.vector_store %arg6[%c0_15, %c0_16, %c0_17, %c32], %20 {strides = array<i32>} : memref<1x2x2x128xbf16, #tpu.memory_space<vmem>>, vector<1x1x2x32xbf16>,
    %21 = vector.extract_strided_slice %1 {offsets = [0, 0, 32], sizes = [1, 2, 32], strides = [1, 1, 1]} : vector<2x2x64xbf16> to vector<1x2x32xbf16>
    %22 = vector.shape_cast %21 : vector<1x2x32xbf16> to vector<2x32xbf16>
    %c0_18 = arith.constant 0 : index
    %c0_19 = arith.constant 0 : index
    %c0_20 = arith.constant 0 : index
    %c64 = arith.constant 64 : index
    %23 = vector.load %arg6[%c0_18, %c0_19, %c0_20, %c64] : memref<1x2x2x128xbf16, #tpu.memory_space<vmem>>, vector<1x1x2x32xbf16>
    %24 = vector.shape_cast %23 : vector<1x1x2x32xbf16> to vector<2x32xbf16>
    %25 = vector.shape_cast %22 : vector<2x32xbf16> to vector<1x1x2x32xbf16>
    tpu.vector_store %arg6[%c0_18, %c0_19, %c0_20, %c64], %25 {strides = array<i32>} : memref<1x2x2x128xbf16, #tpu.memory_space<vmem>>, vector<1x1x2x32xbf16>,
    %26 = vector.extract_strided_slice %11 {offsets = [0, 32], sizes = [2, 32], strides = [1, 1]} : vector<2x128xbf16> to vector<2x32xbf16>
    %c0_21 = arith.constant 0 : index
    %c0_22 = arith.constant 0 : index
    %c0_23 = arith.constant 0 : index
    %c96 = arith.constant 96 : index
    %27 = vector.load %arg6[%c0_21, %c0_22, %c0_23, %c96] : memref<1x2x2x128xbf16, #tpu.memory_space<vmem>>, vector<1x1x2x32xbf16>
    %28 = vector.shape_cast %27 : vector<1x1x2x32xbf16> to vector<2x32xbf16>
    %29 = vector.shape_cast %26 : vector<2x32xbf16> to vector<1x1x2x32xbf16>
    tpu.vector_store %arg6[%c0_21, %c0_22, %c0_23, %c96], %29 {strides = array<i32>} : memref<1x2x2x128xbf16, #tpu.memory_space<vmem>>, vector<1x1x2x32xbf16>,
    %30 = vector.extract_strided_slice %1 {offsets = [1, 0, 0], sizes = [1, 2, 32], strides = [1, 1, 1]} : vector<2x2x64xbf16> to vector<1x2x32xbf16>
    %31 = vector.shape_cast %30 : vector<1x2x32xbf16> to vector<2x32xbf16>
    %c0_24 = arith.constant 0 : index
    %c1 = arith.constant 1 : index
    %c0_25 = arith.constant 0 : index
    %c0_26 = arith.constant 0 : index
    %32 = vector.load %arg6[%c0_24, %c1, %c0_25, %c0_26] : memref<1x2x2x128xbf16, #tpu.memory_space<vmem>>, vector<1x1x2x32xbf16>
    %33 = vector.shape_cast %32 : vector<1x1x2x32xbf16> to vector<2x32xbf16>
    %34 = vector.shape_cast %31 : vector<2x32xbf16> to vector<1x1x2x32xbf16>
    tpu.vector_store %arg6[%c0_24, %c1, %c0_25, %c0_26], %34 {strides = array<i32>} : memref<1x2x2x128xbf16, #tpu.memory_space<vmem>>, vector<1x1x2x32xbf16>,
    %35 = vector.extract_strided_slice %11 {offsets = [0, 64], sizes = [2, 32], strides = [1, 1]} : vector<2x128xbf16> to vector<2x32xbf16>
    %c0_27 = arith.constant 0 : index
    %c1_28 = arith.constant 1 : index
    %c0_29 = arith.constant 0 : index
    %c32_30 = arith.constant 32 : index
    %36 = vector.load %arg6[%c0_27, %c1_28, %c0_29, %c32_30] : memref<1x2x2x128xbf16, #tpu.memory_space<vmem>>, vector<1x1x2x32xbf16>
    %37 = vector.shape_cast %36 : vector<1x1x2x32xbf16> to vector<2x32xbf16>
    %38 = vector.shape_cast %35 : vector<2x32xbf16> to vector<1x1x2x32xbf16>
    tpu.vector_store %arg6[%c0_27, %c1_28, %c0_29, %c32_30], %38 {strides = array<i32>} : memref<1x2x2x128xbf16, #tpu.memory_space<vmem>>, vector<1x1x2x32xbf16>,
    %39 = vector.extract_strided_slice %1 {offsets = [1, 0, 32], sizes = [1, 2, 32], strides = [1, 1, 1]} : vector<2x2x64xbf16> to vector<1x2x32xbf16>
    %40 = vector.shape_cast %39 : vector<1x2x32xbf16> to vector<2x32xbf16>
    %c0_31 = arith.constant 0 : index
    %c1_32 = arith.constant 1 : index
    %c0_33 = arith.constant 0 : index
    %c64_34 = arith.constant 64 : index
    %41 = vector.load %arg6[%c0_31, %c1_32, %c0_33, %c64_34] : memref<1x2x2x128xbf16, #tpu.memory_space<vmem>>, vector<1x1x2x32xbf16>
    %42 = vector.shape_cast %41 : vector<1x1x2x32xbf16> to vector<2x32xbf16>
    %43 = vector.shape_cast %40 : vector<2x32xbf16> to vector<1x1x2x32xbf16>
    tpu.vector_store %arg6[%c0_31, %c1_32, %c0_33, %c64_34], %43 {strides = array<i32>} : memref<1x2x2x128xbf16, #tpu.memory_space<vmem>>, vector<1x1x2x32xbf16>,
    %44 = vector.extract_strided_slice %11 {offsets = [0, 96], sizes = [2, 32], strides = [1, 1]} : vector<2x128xbf16> to vector<2x32xbf16>
    %c0_35 = arith.constant 0 : index
    %c1_36 = arith.constant 1 : index
    %c0_37 = arith.constant 0 : index
    %c96_38 = arith.constant 96 : index
    %45 = vector.load %arg6[%c0_35, %c1_36, %c0_37, %c96_38] : memref<1x2x2x128xbf16, #tpu.memory_space<vmem>>, vector<1x1x2x32xbf16>
    %46 = vector.shape_cast %45 : vector<1x1x2x32xbf16> to vector<2x32xbf16>
    %47 = vector.shape_cast %44 : vector<2x32xbf16> to vector<1x1x2x32xbf16>
    tpu.vector_store %arg6[%c0_35, %c1_36, %c0_37, %c96_38], %47 {strides = array<i32>} : memref<1x2x2x128xbf16, #tpu.memory_space<vmem>>, vector<1x1x2x32xbf16>,
    return
  }
  func.func @transform_0(%arg0: i32, %arg1: i32) -> (i32, i32, i32, i32) {
    %c0_i32 = arith.constant 0 : i32
    %c0_i32_0 = arith.constant 0 : i32
    %c0_i32_1 = arith.constant 0 : i32
    return %arg0, %arg1, %c0_i32, %c0_i32_0 : i32, i32, i32, i32
  }
  func.func @transform_1(%arg0: i32, %arg1: i32) -> (i32, i32, i32, i32) {
    %c0_i32 = arith.constant 0 : i32
    %c0_i32_0 = arith.constant 0 : i32
    %c0_i32_1 = arith.constant 0 : i32
    return %arg0, %arg1, %c0_i32, %c0_i32_0 : i32, i32, i32, i32
  }
  func.func @transform_2(%arg0: i32, %arg1: i32) -> (i32, i32) {
    %c0_i32 = arith.constant 0 : i32
    %c0_i32_0 = arith.constant 0 : i32
    %c0_i32_1 = arith.constant 0 : i32
    return %c0_i32, %c0_i32_0 : i32, i32
  }
  func.func @transform_3(%arg0: i32, %arg1: i32) -> (i32, i32) {
    %c0_i32 = arith.constant 0 : i32
    %c0_i32_0 = arith.constant 0 : i32
    %c0_i32_1 = arith.constant 0 : i32
    return %c0_i32, %c0_i32_0 : i32, i32
  }
  func.func @transform_4(%arg0: i32, %arg1: i32) -> (i32, i32, i32, i32) {
    %c0_i32 = arith.constant 0 : i32
    %c0_i32_0 = arith.constant 0 : i32
    %c0_i32_1 = arith.constant 0 : i32
    return %arg0, %arg1, %c0_i32, %c0_i32_0 : i32, i32, i32, i32
  }
}

module attributes {stable_mosaic.version = 11 : i64} {
  func.func @_stats_kernel(%arg0: i32, %arg1: memref<8x128xbf16, #tpu.memory_space<vmem>>, %arg2: memref<1x128xf32, #tpu.memory_space<vmem>>, %arg3: memref<1x128xf32, #tpu.memory_space<vmem>>) attributes {dimension_semantics = [#tpu.dimension_semantics<arbitrary>], iteration_bounds = array<i64: 1>, scalar_prefetch = 0 : i64, scratch_operands = 0 : i64, tpu.core_type = #tpu.core_type<tc>, window_params = [{transform_indices = @transform_0, window_bounds = array<i64: 8, 128>}, {pipeline_mode = #tpu.pipeline_mode<synchronous>, transform_indices = @transform_1, window_bounds = array<i64: 1, 128>}, {pipeline_mode = #tpu.pipeline_mode<synchronous>, transform_indices = @transform_2, window_bounds = array<i64: 1, 128>}]} {
    %c0_i32 = arith.constant 0 : i32
    %0 = arith.cmpi eq, %arg0, %c0_i32 : i32
    %1 = arith.extui %0 : i1 to i32
    %c0_i32_0 = arith.constant 0 : i32
    %2 = arith.cmpi ne, %1, %c0_i32_0 : i32
    scf.if %2 {
      %cst_13 = arith.constant 0.000000e+00 : f32
      %26 = vector.broadcast %cst_13 : f32 to vector<1x128xf32>
      %c0_14 = arith.constant 0 : index
      %c0_15 = arith.constant 0 : index
      %27 = vector.load %arg2[%c0_14, %c0_15] : memref<1x128xf32, #tpu.memory_space<vmem>>, vector<1x128xf32>
      tpu.vector_store %arg2[%c0_14, %c0_15], %26 {strides = array<i32>} : memref<1x128xf32, #tpu.memory_space<vmem>>, vector<1x128xf32>,
      %cst_16 = arith.constant 0.000000e+00 : f32
      %28 = vector.broadcast %cst_16 : f32 to vector<1x128xf32>
      %c0_17 = arith.constant 0 : index
      %c0_18 = arith.constant 0 : index
      %29 = vector.load %arg3[%c0_17, %c0_18] : memref<1x128xf32, #tpu.memory_space<vmem>>, vector<1x128xf32>
      tpu.vector_store %arg3[%c0_17, %c0_18], %28 {strides = array<i32>} : memref<1x128xf32, #tpu.memory_space<vmem>>, vector<1x128xf32>,
    } else {
    }
    %c0 = arith.constant 0 : index
    %c0_1 = arith.constant 0 : index
    %3 = vector.load %arg1[%c0, %c0_1] : memref<8x128xbf16, #tpu.memory_space<vmem>>, vector<8x128xbf16>
    %4 = arith.extf %3 : vector<8x128xbf16> to vector<8x128xf32>
    %c8_i32 = arith.constant 8 : i32
    %5 = arith.muli %arg0, %c8_i32 : i32
    %6 = tpu.iota {dimensions = array<i32: 0>} : vector<8x1xi32>
    %7 = vector.broadcast %5 : i32 to vector<8x1xi32>
    %8 = arith.addi %7, %6 : vector<8x1xi32>
    %c8_i32_2 = arith.constant 8 : i32
    %9 = vector.broadcast %c8_i32_2 : i32 to vector<8x1xi32>
    %10 = arith.cmpi slt, %8, %9 : vector<8x1xi32>
    %cst = arith.constant 0.000000e+00 : f32
    %11 = vector.shape_cast %10 : vector<8x1xi1> to vector<8x1xi1>
    %12 = vector.broadcast %11 : vector<8x1xi1> to vector<8x128xi1>
    %13 = vector.broadcast %cst : f32 to vector<8x128xf32>
    %14 = arith.select %12, %4, %13 : vector<8x128xi1>, vector<8x128xf32>
    %c0_3 = arith.constant 0 : index
    %c0_4 = arith.constant 0 : index
    %15 = vector.load %arg2[%c0_3, %c0_4] : memref<1x128xf32, #tpu.memory_space<vmem>>, vector<1x128xf32>
    %cst_5 = arith.constant dense<0.000000e+00> : vector<128xf32>
    %16 = vector.multi_reduction <add>, %14, %cst_5 [0] : vector<8x128xf32> to vector<128xf32>
    %17 = vector.shape_cast %16 : vector<128xf32> to vector<1x128xf32>
    %18 = arith.addf %15, %17 : vector<1x128xf32>
    %c0_6 = arith.constant 0 : index
    %c0_7 = arith.constant 0 : index
    %19 = vector.load %arg2[%c0_6, %c0_7] : memref<1x128xf32, #tpu.memory_space<vmem>>, vector<1x128xf32>
    tpu.vector_store %arg2[%c0_6, %c0_7], %18 {strides = array<i32>} : memref<1x128xf32, #tpu.memory_space<vmem>>, vector<1x128xf32>,
    %c0_8 = arith.constant 0 : index
    %c0_9 = arith.constant 0 : index
    %20 = vector.load %arg3[%c0_8, %c0_9] : memref<1x128xf32, #tpu.memory_space<vmem>>, vector<1x128xf32>
    %21 = arith.mulf %14, %14 : vector<8x128xf32>
    %cst_10 = arith.constant dense<0.000000e+00> : vector<128xf32>
    %22 = vector.multi_reduction <add>, %21, %cst_10 [0] : vector<8x128xf32> to vector<128xf32>
    %23 = vector.shape_cast %22 : vector<128xf32> to vector<1x128xf32>
    %24 = arith.addf %20, %23 : vector<1x128xf32>
    %c0_11 = arith.constant 0 : index
    %c0_12 = arith.constant 0 : index
    %25 = vector.load %arg3[%c0_11, %c0_12] : memref<1x128xf32, #tpu.memory_space<vmem>>, vector<1x128xf32>
    tpu.vector_store %arg3[%c0_11, %c0_12], %24 {strides = array<i32>} : memref<1x128xf32, #tpu.memory_space<vmem>>, vector<1x128xf32>,
    return
  }
  func.func @transform_0(%arg0: i32) -> (i32, i32) {
    %c0_i32 = arith.constant 0 : i32
    %c0_i32_0 = arith.constant 0 : i32
    return %arg0, %c0_i32 : i32, i32
  }
  func.func @transform_1(%arg0: i32) -> (i32, i32) {
    %c0_i32 = arith.constant 0 : i32
    %c0_i32_0 = arith.constant 0 : i32
    %c0_i32_1 = arith.constant 0 : i32
    return %c0_i32, %c0_i32_0 : i32, i32
  }
  func.func @transform_2(%arg0: i32) -> (i32, i32) {
    %c0_i32 = arith.constant 0 : i32
    %c0_i32_0 = arith.constant 0 : i32
    %c0_i32_1 = arith.constant 0 : i32
    return %c0_i32, %c0_i32_0 : i32, i32
  }
}

module attributes {stable_mosaic.version = 11 : i64} {
  func.func @_matmul_kernel(%arg0: i32, %arg1: i32, %arg2: memref<32x640xbf16, #tpu.memory_space<vmem>>, %arg3: memref<640x128xbf16, #tpu.memory_space<vmem>>, %arg4: memref<1x128xf32, #tpu.memory_space<vmem>>, %arg5: memref<32x128xbf16, #tpu.memory_space<vmem>>, %arg6: memref<32x128xf32, #tpu.memory_space<vmem>>) attributes {dimension_semantics = [#tpu.dimension_semantics<parallel>, #tpu.dimension_semantics<arbitrary>], iteration_bounds = array<i64: 1, 1>, scalar_prefetch = 0 : i64, scratch_operands = 1 : i64, tpu.core_type = #tpu.core_type<tc>, window_params = [{transform_indices = @transform_0, window_bounds = array<i64: 32, 640>}, {transform_indices = @transform_1, window_bounds = array<i64: 640, 128>}, {pipeline_mode = #tpu.pipeline_mode<synchronous>, transform_indices = @transform_2, window_bounds = array<i64: 1, 128>}, {transform_indices = @transform_3, window_bounds = array<i64: 32, 128>}]} {
    %c0_i32 = arith.constant 0 : i32
    %0 = arith.cmpi eq, %arg1, %c0_i32 : i32
    %1 = arith.extui %0 : i1 to i32
    %c0_i32_0 = arith.constant 0 : i32
    %2 = arith.cmpi ne, %1, %c0_i32_0 : i32
    scf.if %2 {
      %cst_11 = arith.constant 0.000000e+00 : f32
      %14 = vector.broadcast %cst_11 : f32 to vector<32x128xf32>
      %c0_12 = arith.constant 0 : index
      %c0_13 = arith.constant 0 : index
      %15 = vector.load %arg6[%c0_12, %c0_13] : memref<32x128xf32, #tpu.memory_space<vmem>>, vector<32x128xf32>
      tpu.vector_store %arg6[%c0_12, %c0_13], %14 {strides = array<i32>} : memref<32x128xf32, #tpu.memory_space<vmem>>, vector<32x128xf32>,
    } else {
    }
    %c0 = arith.constant 0 : index
    %c0_1 = arith.constant 0 : index
    %3 = vector.load %arg2[%c0, %c0_1] : memref<32x640xbf16, #tpu.memory_space<vmem>>, vector<32x640xbf16>
    %cst = arith.constant 0.000000e+00 : bf16
    %4 = vector.broadcast %cst : bf16 to vector<32x640xbf16>
    %5 = arith.maximumf %3, %4 : vector<32x640xbf16>
    %c0_2 = arith.constant 0 : index
    %c0_3 = arith.constant 0 : index
    %6 = vector.load %arg6[%c0_2, %c0_3] : memref<32x128xf32, #tpu.memory_space<vmem>>, vector<32x128xf32>
    %c0_4 = arith.constant 0 : index
    %c0_5 = arith.constant 0 : index
    %7 = vector.load %arg3[%c0_4, %c0_5] : memref<640x128xbf16, #tpu.memory_space<vmem>>, vector<640x128xbf16>
    %cst_6 = arith.constant dense<0.000000e+00> : vector<32x128xf32>
    %8 = tpu.matmul %5, %7, %cst_6 {dimension_numbers = #tpu.dot_dimension_numbers<[1], [0], [0], [1], [0, 0, 1, 1], [], []>} : vector<32x640xbf16>, vector<640x128xbf16>, vector<32x128xf32> -> vector<32x128xf32>
    %9 = arith.addf %6, %8 : vector<32x128xf32>
    %c0_7 = arith.constant 0 : index
    %c0_8 = arith.constant 0 : index
    %10 = vector.load %arg6[%c0_7, %c0_8] : memref<32x128xf32, #tpu.memory_space<vmem>>, vector<32x128xf32>
    tpu.vector_store %arg6[%c0_7, %c0_8], %9 {strides = array<i32>} : memref<32x128xf32, #tpu.memory_space<vmem>>, vector<32x128xf32>,
    %c0_i32_9 = arith.constant 0 : i32
    %11 = arith.cmpi eq, %arg1, %c0_i32_9 : i32
    %12 = arith.extui %11 : i1 to i32
    %c0_i32_10 = arith.constant 0 : i32
    %13 = arith.cmpi ne, %12, %c0_i32_10 : i32
    scf.if %13 {
      %c0_11 = arith.constant 0 : index
      %c0_12 = arith.constant 0 : index
      %14 = vector.load %arg6[%c0_11, %c0_12] : memref<32x128xf32, #tpu.memory_space<vmem>>, vector<32x128xf32>
      %c0_13 = arith.constant 0 : index
      %c0_14 = arith.constant 0 : index
      %15 = vector.load %arg4[%c0_13, %c0_14] : memref<1x128xf32, #tpu.memory_space<vmem>>, vector<1x128xf32>
      %16 = vector.broadcast %15 : vector<1x128xf32> to vector<32x128xf32>
      %17 = arith.addf %14, %16 : vector<32x128xf32>
      %18 = arith.truncf %17 : vector<32x128xf32> to vector<32x128xbf16>
      %c0_15 = arith.constant 0 : index
      %c0_16 = arith.constant 0 : index
      %19 = vector.load %arg5[%c0_15, %c0_16] : memref<32x128xbf16, #tpu.memory_space<vmem>>, vector<32x128xbf16>
      tpu.vector_store %arg5[%c0_15, %c0_16], %18 {strides = array<i32>} : memref<32x128xbf16, #tpu.memory_space<vmem>>, vector<32x128xbf16>,
    } else {
    }
    return
  }
  func.func @transform_0(%arg0: i32, %arg1: i32) -> (i32, i32) {
    %c0_i32 = arith.constant 0 : i32
    return %arg0, %arg1 : i32, i32
  }
  func.func @transform_1(%arg0: i32, %arg1: i32) -> (i32, i32) {
    %c0_i32 = arith.constant 0 : i32
    %c0_i32_0 = arith.constant 0 : i32
    return %arg1, %c0_i32 : i32, i32
  }
  func.func @transform_2(%arg0: i32, %arg1: i32) -> (i32, i32) {
    %c0_i32 = arith.constant 0 : i32
    %c0_i32_0 = arith.constant 0 : i32
    %c0_i32_1 = arith.constant 0 : i32
    return %c0_i32, %c0_i32_0 : i32, i32
  }
  func.func @transform_3(%arg0: i32, %arg1: i32) -> (i32, i32) {
    %c0_i32 = arith.constant 0 : i32
    %c0_i32_0 = arith.constant 0 : i32
    return %arg0, %c0_i32 : i32, i32
  }
}

module attributes {stable_mosaic.version = 11 : i64} {
  func.func @_stats_kernel(%arg0: i32, %arg1: memref<32x128xbf16, #tpu.memory_space<vmem>>, %arg2: memref<1x128xf32, #tpu.memory_space<vmem>>, %arg3: memref<1x128xf32, #tpu.memory_space<vmem>>) attributes {dimension_semantics = [#tpu.dimension_semantics<arbitrary>], iteration_bounds = array<i64: 1>, scalar_prefetch = 0 : i64, scratch_operands = 0 : i64, tpu.core_type = #tpu.core_type<tc>, window_params = [{transform_indices = @transform_0, window_bounds = array<i64: 32, 128>}, {pipeline_mode = #tpu.pipeline_mode<synchronous>, transform_indices = @transform_1, window_bounds = array<i64: 1, 128>}, {pipeline_mode = #tpu.pipeline_mode<synchronous>, transform_indices = @transform_2, window_bounds = array<i64: 1, 128>}]} {
    %c0_i32 = arith.constant 0 : i32
    %0 = arith.cmpi eq, %arg0, %c0_i32 : i32
    %1 = arith.extui %0 : i1 to i32
    %c0_i32_0 = arith.constant 0 : i32
    %2 = arith.cmpi ne, %1, %c0_i32_0 : i32
    scf.if %2 {
      %cst_13 = arith.constant 0.000000e+00 : f32
      %26 = vector.broadcast %cst_13 : f32 to vector<1x128xf32>
      %c0_14 = arith.constant 0 : index
      %c0_15 = arith.constant 0 : index
      %27 = vector.load %arg2[%c0_14, %c0_15] : memref<1x128xf32, #tpu.memory_space<vmem>>, vector<1x128xf32>
      tpu.vector_store %arg2[%c0_14, %c0_15], %26 {strides = array<i32>} : memref<1x128xf32, #tpu.memory_space<vmem>>, vector<1x128xf32>,
      %cst_16 = arith.constant 0.000000e+00 : f32
      %28 = vector.broadcast %cst_16 : f32 to vector<1x128xf32>
      %c0_17 = arith.constant 0 : index
      %c0_18 = arith.constant 0 : index
      %29 = vector.load %arg3[%c0_17, %c0_18] : memref<1x128xf32, #tpu.memory_space<vmem>>, vector<1x128xf32>
      tpu.vector_store %arg3[%c0_17, %c0_18], %28 {strides = array<i32>} : memref<1x128xf32, #tpu.memory_space<vmem>>, vector<1x128xf32>,
    } else {
    }
    %c0 = arith.constant 0 : index
    %c0_1 = arith.constant 0 : index
    %3 = vector.load %arg1[%c0, %c0_1] : memref<32x128xbf16, #tpu.memory_space<vmem>>, vector<32x128xbf16>
    %4 = arith.extf %3 : vector<32x128xbf16> to vector<32x128xf32>
    %c32_i32 = arith.constant 32 : i32
    %5 = arith.muli %arg0, %c32_i32 : i32
    %6 = tpu.iota {dimensions = array<i32: 0>} : vector<32x1xi32>
    %7 = vector.broadcast %5 : i32 to vector<32x1xi32>
    %8 = arith.addi %7, %6 : vector<32x1xi32>
    %c32_i32_2 = arith.constant 32 : i32
    %9 = vector.broadcast %c32_i32_2 : i32 to vector<32x1xi32>
    %10 = arith.cmpi slt, %8, %9 : vector<32x1xi32>
    %cst = arith.constant 0.000000e+00 : f32
    %11 = vector.shape_cast %10 : vector<32x1xi1> to vector<32x1xi1>
    %12 = vector.broadcast %11 : vector<32x1xi1> to vector<32x128xi1>
    %13 = vector.broadcast %cst : f32 to vector<32x128xf32>
    %14 = arith.select %12, %4, %13 : vector<32x128xi1>, vector<32x128xf32>
    %c0_3 = arith.constant 0 : index
    %c0_4 = arith.constant 0 : index
    %15 = vector.load %arg2[%c0_3, %c0_4] : memref<1x128xf32, #tpu.memory_space<vmem>>, vector<1x128xf32>
    %cst_5 = arith.constant dense<0.000000e+00> : vector<128xf32>
    %16 = vector.multi_reduction <add>, %14, %cst_5 [0] : vector<32x128xf32> to vector<128xf32>
    %17 = vector.shape_cast %16 : vector<128xf32> to vector<1x128xf32>
    %18 = arith.addf %15, %17 : vector<1x128xf32>
    %c0_6 = arith.constant 0 : index
    %c0_7 = arith.constant 0 : index
    %19 = vector.load %arg2[%c0_6, %c0_7] : memref<1x128xf32, #tpu.memory_space<vmem>>, vector<1x128xf32>
    tpu.vector_store %arg2[%c0_6, %c0_7], %18 {strides = array<i32>} : memref<1x128xf32, #tpu.memory_space<vmem>>, vector<1x128xf32>,
    %c0_8 = arith.constant 0 : index
    %c0_9 = arith.constant 0 : index
    %20 = vector.load %arg3[%c0_8, %c0_9] : memref<1x128xf32, #tpu.memory_space<vmem>>, vector<1x128xf32>
    %21 = arith.mulf %14, %14 : vector<32x128xf32>
    %cst_10 = arith.constant dense<0.000000e+00> : vector<128xf32>
    %22 = vector.multi_reduction <add>, %21, %cst_10 [0] : vector<32x128xf32> to vector<128xf32>
    %23 = vector.shape_cast %22 : vector<128xf32> to vector<1x128xf32>
    %24 = arith.addf %20, %23 : vector<1x128xf32>
    %c0_11 = arith.constant 0 : index
    %c0_12 = arith.constant 0 : index
    %25 = vector.load %arg3[%c0_11, %c0_12] : memref<1x128xf32, #tpu.memory_space<vmem>>, vector<1x128xf32>
    tpu.vector_store %arg3[%c0_11, %c0_12], %24 {strides = array<i32>} : memref<1x128xf32, #tpu.memory_space<vmem>>, vector<1x128xf32>,
    return
  }
  func.func @transform_0(%arg0: i32) -> (i32, i32) {
    %c0_i32 = arith.constant 0 : i32
    %c0_i32_0 = arith.constant 0 : i32
    return %arg0, %c0_i32 : i32, i32
  }
  func.func @transform_1(%arg0: i32) -> (i32, i32) {
    %c0_i32 = arith.constant 0 : i32
    %c0_i32_0 = arith.constant 0 : i32
    %c0_i32_1 = arith.constant 0 : i32
    return %c0_i32, %c0_i32_0 : i32, i32
  }
  func.func @transform_2(%arg0: i32) -> (i32, i32) {
    %c0_i32 = arith.constant 0 : i32
    %c0_i32_0 = arith.constant 0 : i32
    %c0_i32_1 = arith.constant 0 : i32
    return %c0_i32, %c0_i32_0 : i32, i32
  }
}

module attributes {stable_mosaic.version = 11 : i64} {
  func.func @_upnorm_concat_kernel(%arg0: i32, %arg1: i32, %arg2: memref<1x2x4x32xbf16, #tpu.memory_space<vmem>>, %arg3: memref<1x1x4x128xbf16, #tpu.memory_space<vmem>>, %arg4: memref<1x128xf32, #tpu.memory_space<vmem>>, %arg5: memref<1x128xf32, #tpu.memory_space<vmem>>, %arg6: memref<1x2x4x64xbf16, #tpu.memory_space<vmem>>) attributes {dimension_semantics = [#tpu.dimension_semantics<parallel>, #tpu.dimension_semantics<parallel>], iteration_bounds = array<i64: 2, 4>, scalar_prefetch = 0 : i64, scratch_operands = 0 : i64, tpu.core_type = #tpu.core_type<tc>, window_params = [{transform_indices = @transform_0, window_bounds = array<i64: 1, 2, 4, 32>}, {transform_indices = @transform_1, window_bounds = array<i64: 1, 1, 4, 128>}, {pipeline_mode = #tpu.pipeline_mode<synchronous>, transform_indices = @transform_2, window_bounds = array<i64: 1, 128>}, {pipeline_mode = #tpu.pipeline_mode<synchronous>, transform_indices = @transform_3, window_bounds = array<i64: 1, 128>}, {transform_indices = @transform_4, window_bounds = array<i64: 1, 2, 4, 64>}]} {
    %c0 = arith.constant 0 : index
    %c0_0 = arith.constant 0 : index
    %c0_1 = arith.constant 0 : index
    %c0_2 = arith.constant 0 : index
    %0 = vector.load %arg2[%c0, %c0_0, %c0_1, %c0_2] : memref<1x2x4x32xbf16, #tpu.memory_space<vmem>>, vector<1x2x4x32xbf16>
    %1 = vector.shape_cast %0 : vector<1x2x4x32xbf16> to vector<2x4x32xbf16>
    %c0_3 = arith.constant 0 : index
    %c0_4 = arith.constant 0 : index
    %c0_5 = arith.constant 0 : index
    %c0_6 = arith.constant 0 : index
    %2 = vector.load %arg3[%c0_3, %c0_4, %c0_5, %c0_6] : memref<1x1x4x128xbf16, #tpu.memory_space<vmem>>, vector<1x1x4x128xbf16>
    %3 = vector.shape_cast %2 : vector<1x1x4x128xbf16> to vector<4x128xbf16>
    %4 = arith.extf %3 : vector<4x128xbf16> to vector<4x128xf32>
    %c0_7 = arith.constant 0 : index
    %c0_8 = arith.constant 0 : index
    %5 = vector.load %arg4[%c0_7, %c0_8] : memref<1x128xf32, #tpu.memory_space<vmem>>, vector<1x128xf32>
    %6 = vector.broadcast %5 : vector<1x128xf32> to vector<4x128xf32>
    %7 = arith.mulf %4, %6 : vector<4x128xf32>
    %c0_9 = arith.constant 0 : index
    %c0_10 = arith.constant 0 : index
    %8 = vector.load %arg5[%c0_9, %c0_10] : memref<1x128xf32, #tpu.memory_space<vmem>>, vector<1x128xf32>
    %9 = vector.broadcast %8 : vector<1x128xf32> to vector<4x128xf32>
    %10 = arith.addf %7, %9 : vector<4x128xf32>
    %11 = arith.truncf %10 : vector<4x128xf32> to vector<4x128xbf16>
    %12 = vector.extract_strided_slice %1 {offsets = [0, 0, 0], sizes = [1, 4, 16], strides = [1, 1, 1]} : vector<2x4x32xbf16> to vector<1x4x16xbf16>
    %13 = vector.shape_cast %12 : vector<1x4x16xbf16> to vector<4x16xbf16>
    %c0_11 = arith.constant 0 : index
    %c0_12 = arith.constant 0 : index
    %c0_13 = arith.constant 0 : index
    %c0_14 = arith.constant 0 : index
    %14 = vector.load %arg6[%c0_11, %c0_12, %c0_13, %c0_14] : memref<1x2x4x64xbf16, #tpu.memory_space<vmem>>, vector<1x1x4x16xbf16>
    %15 = vector.shape_cast %14 : vector<1x1x4x16xbf16> to vector<4x16xbf16>
    %16 = vector.shape_cast %13 : vector<4x16xbf16> to vector<1x1x4x16xbf16>
    tpu.vector_store %arg6[%c0_11, %c0_12, %c0_13, %c0_14], %16 {strides = array<i32>} : memref<1x2x4x64xbf16, #tpu.memory_space<vmem>>, vector<1x1x4x16xbf16>,
    %17 = vector.extract_strided_slice %11 {offsets = [0, 0], sizes = [4, 16], strides = [1, 1]} : vector<4x128xbf16> to vector<4x16xbf16>
    %c0_15 = arith.constant 0 : index
    %c0_16 = arith.constant 0 : index
    %c0_17 = arith.constant 0 : index
    %c16 = arith.constant 16 : index
    %18 = vector.load %arg6[%c0_15, %c0_16, %c0_17, %c16] : memref<1x2x4x64xbf16, #tpu.memory_space<vmem>>, vector<1x1x4x16xbf16>
    %19 = vector.shape_cast %18 : vector<1x1x4x16xbf16> to vector<4x16xbf16>
    %20 = vector.shape_cast %17 : vector<4x16xbf16> to vector<1x1x4x16xbf16>
    tpu.vector_store %arg6[%c0_15, %c0_16, %c0_17, %c16], %20 {strides = array<i32>} : memref<1x2x4x64xbf16, #tpu.memory_space<vmem>>, vector<1x1x4x16xbf16>,
    %21 = vector.extract_strided_slice %1 {offsets = [0, 0, 16], sizes = [1, 4, 16], strides = [1, 1, 1]} : vector<2x4x32xbf16> to vector<1x4x16xbf16>
    %22 = vector.shape_cast %21 : vector<1x4x16xbf16> to vector<4x16xbf16>
    %c0_18 = arith.constant 0 : index
    %c0_19 = arith.constant 0 : index
    %c0_20 = arith.constant 0 : index
    %c32 = arith.constant 32 : index
    %23 = vector.load %arg6[%c0_18, %c0_19, %c0_20, %c32] : memref<1x2x4x64xbf16, #tpu.memory_space<vmem>>, vector<1x1x4x16xbf16>
    %24 = vector.shape_cast %23 : vector<1x1x4x16xbf16> to vector<4x16xbf16>
    %25 = vector.shape_cast %22 : vector<4x16xbf16> to vector<1x1x4x16xbf16>
    tpu.vector_store %arg6[%c0_18, %c0_19, %c0_20, %c32], %25 {strides = array<i32>} : memref<1x2x4x64xbf16, #tpu.memory_space<vmem>>, vector<1x1x4x16xbf16>,
    %26 = vector.extract_strided_slice %11 {offsets = [0, 16], sizes = [4, 16], strides = [1, 1]} : vector<4x128xbf16> to vector<4x16xbf16>
    %c0_21 = arith.constant 0 : index
    %c0_22 = arith.constant 0 : index
    %c0_23 = arith.constant 0 : index
    %c48 = arith.constant 48 : index
    %27 = vector.load %arg6[%c0_21, %c0_22, %c0_23, %c48] : memref<1x2x4x64xbf16, #tpu.memory_space<vmem>>, vector<1x1x4x16xbf16>
    %28 = vector.shape_cast %27 : vector<1x1x4x16xbf16> to vector<4x16xbf16>
    %29 = vector.shape_cast %26 : vector<4x16xbf16> to vector<1x1x4x16xbf16>
    tpu.vector_store %arg6[%c0_21, %c0_22, %c0_23, %c48], %29 {strides = array<i32>} : memref<1x2x4x64xbf16, #tpu.memory_space<vmem>>, vector<1x1x4x16xbf16>,
    %30 = vector.extract_strided_slice %1 {offsets = [1, 0, 0], sizes = [1, 4, 16], strides = [1, 1, 1]} : vector<2x4x32xbf16> to vector<1x4x16xbf16>
    %31 = vector.shape_cast %30 : vector<1x4x16xbf16> to vector<4x16xbf16>
    %c0_24 = arith.constant 0 : index
    %c1 = arith.constant 1 : index
    %c0_25 = arith.constant 0 : index
    %c0_26 = arith.constant 0 : index
    %32 = vector.load %arg6[%c0_24, %c1, %c0_25, %c0_26] : memref<1x2x4x64xbf16, #tpu.memory_space<vmem>>, vector<1x1x4x16xbf16>
    %33 = vector.shape_cast %32 : vector<1x1x4x16xbf16> to vector<4x16xbf16>
    %34 = vector.shape_cast %31 : vector<4x16xbf16> to vector<1x1x4x16xbf16>
    tpu.vector_store %arg6[%c0_24, %c1, %c0_25, %c0_26], %34 {strides = array<i32>} : memref<1x2x4x64xbf16, #tpu.memory_space<vmem>>, vector<1x1x4x16xbf16>,
    %35 = vector.extract_strided_slice %11 {offsets = [0, 32], sizes = [4, 16], strides = [1, 1]} : vector<4x128xbf16> to vector<4x16xbf16>
    %c0_27 = arith.constant 0 : index
    %c1_28 = arith.constant 1 : index
    %c0_29 = arith.constant 0 : index
    %c16_30 = arith.constant 16 : index
    %36 = vector.load %arg6[%c0_27, %c1_28, %c0_29, %c16_30] : memref<1x2x4x64xbf16, #tpu.memory_space<vmem>>, vector<1x1x4x16xbf16>
    %37 = vector.shape_cast %36 : vector<1x1x4x16xbf16> to vector<4x16xbf16>
    %38 = vector.shape_cast %35 : vector<4x16xbf16> to vector<1x1x4x16xbf16>
    tpu.vector_store %arg6[%c0_27, %c1_28, %c0_29, %c16_30], %38 {strides = array<i32>} : memref<1x2x4x64xbf16, #tpu.memory_space<vmem>>, vector<1x1x4x16xbf16>,
    %39 = vector.extract_strided_slice %1 {offsets = [1, 0, 16], sizes = [1, 4, 16], strides = [1, 1, 1]} : vector<2x4x32xbf16> to vector<1x4x16xbf16>
    %40 = vector.shape_cast %39 : vector<1x4x16xbf16> to vector<4x16xbf16>
    %c0_31 = arith.constant 0 : index
    %c1_32 = arith.constant 1 : index
    %c0_33 = arith.constant 0 : index
    %c32_34 = arith.constant 32 : index
    %41 = vector.load %arg6[%c0_31, %c1_32, %c0_33, %c32_34] : memref<1x2x4x64xbf16, #tpu.memory_space<vmem>>, vector<1x1x4x16xbf16>
    %42 = vector.shape_cast %41 : vector<1x1x4x16xbf16> to vector<4x16xbf16>
    %43 = vector.shape_cast %40 : vector<4x16xbf16> to vector<1x1x4x16xbf16>
    tpu.vector_store %arg6[%c0_31, %c1_32, %c0_33, %c32_34], %43 {strides = array<i32>} : memref<1x2x4x64xbf16, #tpu.memory_space<vmem>>, vector<1x1x4x16xbf16>,
    %44 = vector.extract_strided_slice %11 {offsets = [0, 48], sizes = [4, 16], strides = [1, 1]} : vector<4x128xbf16> to vector<4x16xbf16>
    %c0_35 = arith.constant 0 : index
    %c1_36 = arith.constant 1 : index
    %c0_37 = arith.constant 0 : index
    %c48_38 = arith.constant 48 : index
    %45 = vector.load %arg6[%c0_35, %c1_36, %c0_37, %c48_38] : memref<1x2x4x64xbf16, #tpu.memory_space<vmem>>, vector<1x1x4x16xbf16>
    %46 = vector.shape_cast %45 : vector<1x1x4x16xbf16> to vector<4x16xbf16>
    %47 = vector.shape_cast %44 : vector<4x16xbf16> to vector<1x1x4x16xbf16>
    tpu.vector_store %arg6[%c0_35, %c1_36, %c0_37, %c48_38], %47 {strides = array<i32>} : memref<1x2x4x64xbf16, #tpu.memory_space<vmem>>, vector<1x1x4x16xbf16>,
    return
  }
  func.func @transform_0(%arg0: i32, %arg1: i32) -> (i32, i32, i32, i32) {
    %c0_i32 = arith.constant 0 : i32
    %c0_i32_0 = arith.constant 0 : i32
    %c0_i32_1 = arith.constant 0 : i32
    return %arg0, %arg1, %c0_i32, %c0_i32_0 : i32, i32, i32, i32
  }
  func.func @transform_1(%arg0: i32, %arg1: i32) -> (i32, i32, i32, i32) {
    %c0_i32 = arith.constant 0 : i32
    %c0_i32_0 = arith.constant 0 : i32
    %c0_i32_1 = arith.constant 0 : i32
    return %arg0, %arg1, %c0_i32, %c0_i32_0 : i32, i32, i32, i32
  }
  func.func @transform_2(%arg0: i32, %arg1: i32) -> (i32, i32) {
    %c0_i32 = arith.constant 0 : i32
    %c0_i32_0 = arith.constant 0 : i32
    %c0_i32_1 = arith.constant 0 : i32
    return %c0_i32, %c0_i32_0 : i32, i32
  }
  func.func @transform_3(%arg0: i32, %arg1: i32) -> (i32, i32) {
    %c0_i32 = arith.constant 0 : i32
    %c0_i32_0 = arith.constant 0 : i32
    %c0_i32_1 = arith.constant 0 : i32
    return %c0_i32, %c0_i32_0 : i32, i32
  }
  func.func @transform_4(%arg0: i32, %arg1: i32) -> (i32, i32, i32, i32) {
    %c0_i32 = arith.constant 0 : i32
    %c0_i32_0 = arith.constant 0 : i32
    %c0_i32_1 = arith.constant 0 : i32
    return %arg0, %arg1, %c0_i32, %c0_i32_0 : i32, i32, i32, i32
  }
}

module attributes {stable_mosaic.version = 11 : i64} {
  func.func @_matmul_kernel(%arg0: i32, %arg1: i32, %arg2: memref<128x384xbf16, #tpu.memory_space<vmem>>, %arg3: memref<384x128xbf16, #tpu.memory_space<vmem>>, %arg4: memref<1x128xf32, #tpu.memory_space<vmem>>, %arg5: memref<128x128xbf16, #tpu.memory_space<vmem>>, %arg6: memref<128x128xf32, #tpu.memory_space<vmem>>) attributes {dimension_semantics = [#tpu.dimension_semantics<parallel>, #tpu.dimension_semantics<arbitrary>], iteration_bounds = array<i64: 1, 1>, scalar_prefetch = 0 : i64, scratch_operands = 1 : i64, tpu.core_type = #tpu.core_type<tc>, window_params = [{transform_indices = @transform_0, window_bounds = array<i64: 128, 384>}, {transform_indices = @transform_1, window_bounds = array<i64: 384, 128>}, {pipeline_mode = #tpu.pipeline_mode<synchronous>, transform_indices = @transform_2, window_bounds = array<i64: 1, 128>}, {transform_indices = @transform_3, window_bounds = array<i64: 128, 128>}]} {
    %c0_i32 = arith.constant 0 : i32
    %0 = arith.cmpi eq, %arg1, %c0_i32 : i32
    %1 = arith.extui %0 : i1 to i32
    %c0_i32_0 = arith.constant 0 : i32
    %2 = arith.cmpi ne, %1, %c0_i32_0 : i32
    scf.if %2 {
      %cst_11 = arith.constant 0.000000e+00 : f32
      %14 = vector.broadcast %cst_11 : f32 to vector<128x128xf32>
      %c0_12 = arith.constant 0 : index
      %c0_13 = arith.constant 0 : index
      %15 = vector.load %arg6[%c0_12, %c0_13] : memref<128x128xf32, #tpu.memory_space<vmem>>, vector<128x128xf32>
      tpu.vector_store %arg6[%c0_12, %c0_13], %14 {strides = array<i32>} : memref<128x128xf32, #tpu.memory_space<vmem>>, vector<128x128xf32>,
    } else {
    }
    %c0 = arith.constant 0 : index
    %c0_1 = arith.constant 0 : index
    %3 = vector.load %arg2[%c0, %c0_1] : memref<128x384xbf16, #tpu.memory_space<vmem>>, vector<128x384xbf16>
    %cst = arith.constant 0.000000e+00 : bf16
    %4 = vector.broadcast %cst : bf16 to vector<128x384xbf16>
    %5 = arith.maximumf %3, %4 : vector<128x384xbf16>
    %c0_2 = arith.constant 0 : index
    %c0_3 = arith.constant 0 : index
    %6 = vector.load %arg6[%c0_2, %c0_3] : memref<128x128xf32, #tpu.memory_space<vmem>>, vector<128x128xf32>
    %c0_4 = arith.constant 0 : index
    %c0_5 = arith.constant 0 : index
    %7 = vector.load %arg3[%c0_4, %c0_5] : memref<384x128xbf16, #tpu.memory_space<vmem>>, vector<384x128xbf16>
    %cst_6 = arith.constant dense<0.000000e+00> : vector<128x128xf32>
    %8 = tpu.matmul %5, %7, %cst_6 {dimension_numbers = #tpu.dot_dimension_numbers<[1], [0], [0], [1], [0, 0, 1, 1], [], []>} : vector<128x384xbf16>, vector<384x128xbf16>, vector<128x128xf32> -> vector<128x128xf32>
    %9 = arith.addf %6, %8 : vector<128x128xf32>
    %c0_7 = arith.constant 0 : index
    %c0_8 = arith.constant 0 : index
    %10 = vector.load %arg6[%c0_7, %c0_8] : memref<128x128xf32, #tpu.memory_space<vmem>>, vector<128x128xf32>
    tpu.vector_store %arg6[%c0_7, %c0_8], %9 {strides = array<i32>} : memref<128x128xf32, #tpu.memory_space<vmem>>, vector<128x128xf32>,
    %c0_i32_9 = arith.constant 0 : i32
    %11 = arith.cmpi eq, %arg1, %c0_i32_9 : i32
    %12 = arith.extui %11 : i1 to i32
    %c0_i32_10 = arith.constant 0 : i32
    %13 = arith.cmpi ne, %12, %c0_i32_10 : i32
    scf.if %13 {
      %c0_11 = arith.constant 0 : index
      %c0_12 = arith.constant 0 : index
      %14 = vector.load %arg6[%c0_11, %c0_12] : memref<128x128xf32, #tpu.memory_space<vmem>>, vector<128x128xf32>
      %c0_13 = arith.constant 0 : index
      %c0_14 = arith.constant 0 : index
      %15 = vector.load %arg4[%c0_13, %c0_14] : memref<1x128xf32, #tpu.memory_space<vmem>>, vector<1x128xf32>
      %16 = vector.broadcast %15 : vector<1x128xf32> to vector<128x128xf32>
      %17 = arith.addf %14, %16 : vector<128x128xf32>
      %18 = arith.truncf %17 : vector<128x128xf32> to vector<128x128xbf16>
      %c0_15 = arith.constant 0 : index
      %c0_16 = arith.constant 0 : index
      %19 = vector.load %arg5[%c0_15, %c0_16] : memref<128x128xbf16, #tpu.memory_space<vmem>>, vector<128x128xbf16>
      tpu.vector_store %arg5[%c0_15, %c0_16], %18 {strides = array<i32>} : memref<128x128xbf16, #tpu.memory_space<vmem>>, vector<128x128xbf16>,
    } else {
    }
    return
  }
  func.func @transform_0(%arg0: i32, %arg1: i32) -> (i32, i32) {
    %c0_i32 = arith.constant 0 : i32
    return %arg0, %arg1 : i32, i32
  }
  func.func @transform_1(%arg0: i32, %arg1: i32) -> (i32, i32) {
    %c0_i32 = arith.constant 0 : i32
    %c0_i32_0 = arith.constant 0 : i32
    return %arg1, %c0_i32 : i32, i32
  }
  func.func @transform_2(%arg0: i32, %arg1: i32) -> (i32, i32) {
    %c0_i32 = arith.constant 0 : i32
    %c0_i32_0 = arith.constant 0 : i32
    %c0_i32_1 = arith.constant 0 : i32
    return %c0_i32, %c0_i32_0 : i32, i32
  }
  func.func @transform_3(%arg0: i32, %arg1: i32) -> (i32, i32) {
    %c0_i32 = arith.constant 0 : i32
    %c0_i32_0 = arith.constant 0 : i32
    return %arg0, %c0_i32 : i32, i32
  }
}

module attributes {stable_mosaic.version = 11 : i64} {
  func.func @_stats_kernel(%arg0: i32, %arg1: memref<128x128xbf16, #tpu.memory_space<vmem>>, %arg2: memref<1x128xf32, #tpu.memory_space<vmem>>, %arg3: memref<1x128xf32, #tpu.memory_space<vmem>>) attributes {dimension_semantics = [#tpu.dimension_semantics<arbitrary>], iteration_bounds = array<i64: 1>, scalar_prefetch = 0 : i64, scratch_operands = 0 : i64, tpu.core_type = #tpu.core_type<tc>, window_params = [{transform_indices = @transform_0, window_bounds = array<i64: 128, 128>}, {pipeline_mode = #tpu.pipeline_mode<synchronous>, transform_indices = @transform_1, window_bounds = array<i64: 1, 128>}, {pipeline_mode = #tpu.pipeline_mode<synchronous>, transform_indices = @transform_2, window_bounds = array<i64: 1, 128>}]} {
    %c0_i32 = arith.constant 0 : i32
    %0 = arith.cmpi eq, %arg0, %c0_i32 : i32
    %1 = arith.extui %0 : i1 to i32
    %c0_i32_0 = arith.constant 0 : i32
    %2 = arith.cmpi ne, %1, %c0_i32_0 : i32
    scf.if %2 {
      %cst_13 = arith.constant 0.000000e+00 : f32
      %26 = vector.broadcast %cst_13 : f32 to vector<1x128xf32>
      %c0_14 = arith.constant 0 : index
      %c0_15 = arith.constant 0 : index
      %27 = vector.load %arg2[%c0_14, %c0_15] : memref<1x128xf32, #tpu.memory_space<vmem>>, vector<1x128xf32>
      tpu.vector_store %arg2[%c0_14, %c0_15], %26 {strides = array<i32>} : memref<1x128xf32, #tpu.memory_space<vmem>>, vector<1x128xf32>,
      %cst_16 = arith.constant 0.000000e+00 : f32
      %28 = vector.broadcast %cst_16 : f32 to vector<1x128xf32>
      %c0_17 = arith.constant 0 : index
      %c0_18 = arith.constant 0 : index
      %29 = vector.load %arg3[%c0_17, %c0_18] : memref<1x128xf32, #tpu.memory_space<vmem>>, vector<1x128xf32>
      tpu.vector_store %arg3[%c0_17, %c0_18], %28 {strides = array<i32>} : memref<1x128xf32, #tpu.memory_space<vmem>>, vector<1x128xf32>,
    } else {
    }
    %c0 = arith.constant 0 : index
    %c0_1 = arith.constant 0 : index
    %3 = vector.load %arg1[%c0, %c0_1] : memref<128x128xbf16, #tpu.memory_space<vmem>>, vector<128x128xbf16>
    %4 = arith.extf %3 : vector<128x128xbf16> to vector<128x128xf32>
    %c128_i32 = arith.constant 128 : i32
    %5 = arith.muli %arg0, %c128_i32 : i32
    %6 = tpu.iota {dimensions = array<i32: 0>} : vector<128x1xi32>
    %7 = vector.broadcast %5 : i32 to vector<128x1xi32>
    %8 = arith.addi %7, %6 : vector<128x1xi32>
    %c128_i32_2 = arith.constant 128 : i32
    %9 = vector.broadcast %c128_i32_2 : i32 to vector<128x1xi32>
    %10 = arith.cmpi slt, %8, %9 : vector<128x1xi32>
    %cst = arith.constant 0.000000e+00 : f32
    %11 = vector.shape_cast %10 : vector<128x1xi1> to vector<128x1xi1>
    %12 = vector.broadcast %11 : vector<128x1xi1> to vector<128x128xi1>
    %13 = vector.broadcast %cst : f32 to vector<128x128xf32>
    %14 = arith.select %12, %4, %13 : vector<128x128xi1>, vector<128x128xf32>
    %c0_3 = arith.constant 0 : index
    %c0_4 = arith.constant 0 : index
    %15 = vector.load %arg2[%c0_3, %c0_4] : memref<1x128xf32, #tpu.memory_space<vmem>>, vector<1x128xf32>
    %cst_5 = arith.constant dense<0.000000e+00> : vector<128xf32>
    %16 = vector.multi_reduction <add>, %14, %cst_5 [0] : vector<128x128xf32> to vector<128xf32>
    %17 = vector.shape_cast %16 : vector<128xf32> to vector<1x128xf32>
    %18 = arith.addf %15, %17 : vector<1x128xf32>
    %c0_6 = arith.constant 0 : index
    %c0_7 = arith.constant 0 : index
    %19 = vector.load %arg2[%c0_6, %c0_7] : memref<1x128xf32, #tpu.memory_space<vmem>>, vector<1x128xf32>
    tpu.vector_store %arg2[%c0_6, %c0_7], %18 {strides = array<i32>} : memref<1x128xf32, #tpu.memory_space<vmem>>, vector<1x128xf32>,
    %c0_8 = arith.constant 0 : index
    %c0_9 = arith.constant 0 : index
    %20 = vector.load %arg3[%c0_8, %c0_9] : memref<1x128xf32, #tpu.memory_space<vmem>>, vector<1x128xf32>
    %21 = arith.mulf %14, %14 : vector<128x128xf32>
    %cst_10 = arith.constant dense<0.000000e+00> : vector<128xf32>
    %22 = vector.multi_reduction <add>, %21, %cst_10 [0] : vector<128x128xf32> to vector<128xf32>
    %23 = vector.shape_cast %22 : vector<128xf32> to vector<1x128xf32>
    %24 = arith.addf %20, %23 : vector<1x128xf32>
    %c0_11 = arith.constant 0 : index
    %c0_12 = arith.constant 0 : index
    %25 = vector.load %arg3[%c0_11, %c0_12] : memref<1x128xf32, #tpu.memory_space<vmem>>, vector<1x128xf32>
    tpu.vector_store %arg3[%c0_11, %c0_12], %24 {strides = array<i32>} : memref<1x128xf32, #tpu.memory_space<vmem>>, vector<1x128xf32>,
    return
  }
  func.func @transform_0(%arg0: i32) -> (i32, i32) {
    %c0_i32 = arith.constant 0 : i32
    %c0_i32_0 = arith.constant 0 : i32
    return %arg0, %c0_i32 : i32, i32
  }
  func.func @transform_1(%arg0: i32) -> (i32, i32) {
    %c0_i32 = arith.constant 0 : i32
    %c0_i32_0 = arith.constant 0 : i32
    %c0_i32_1 = arith.constant 0 : i32
    return %c0_i32, %c0_i32_0 : i32, i32
  }
  func.func @transform_2(%arg0: i32) -> (i32, i32) {
    %c0_i32 = arith.constant 0 : i32
    %c0_i32_0 = arith.constant 0 : i32
    %c0_i32_1 = arith.constant 0 : i32
    return %c0_i32, %c0_i32_0 : i32, i32
  }
}

module attributes {stable_mosaic.version = 11 : i64} {
  func.func @_upnorm_concat_kernel(%arg0: i32, %arg1: i32, %arg2: memref<1x2x8x16xbf16, #tpu.memory_space<vmem>>, %arg3: memref<1x1x8x128xbf16, #tpu.memory_space<vmem>>, %arg4: memref<1x128xf32, #tpu.memory_space<vmem>>, %arg5: memref<1x128xf32, #tpu.memory_space<vmem>>, %arg6: memref<1x2x8x32xbf16, #tpu.memory_space<vmem>>) attributes {dimension_semantics = [#tpu.dimension_semantics<parallel>, #tpu.dimension_semantics<parallel>], iteration_bounds = array<i64: 2, 8>, scalar_prefetch = 0 : i64, scratch_operands = 0 : i64, tpu.core_type = #tpu.core_type<tc>, window_params = [{transform_indices = @transform_0, window_bounds = array<i64: 1, 2, 8, 16>}, {transform_indices = @transform_1, window_bounds = array<i64: 1, 1, 8, 128>}, {pipeline_mode = #tpu.pipeline_mode<synchronous>, transform_indices = @transform_2, window_bounds = array<i64: 1, 128>}, {pipeline_mode = #tpu.pipeline_mode<synchronous>, transform_indices = @transform_3, window_bounds = array<i64: 1, 128>}, {transform_indices = @transform_4, window_bounds = array<i64: 1, 2, 8, 32>}]} {
    %c0 = arith.constant 0 : index
    %c0_0 = arith.constant 0 : index
    %c0_1 = arith.constant 0 : index
    %c0_2 = arith.constant 0 : index
    %0 = vector.load %arg2[%c0, %c0_0, %c0_1, %c0_2] : memref<1x2x8x16xbf16, #tpu.memory_space<vmem>>, vector<1x2x8x16xbf16>
    %1 = vector.shape_cast %0 : vector<1x2x8x16xbf16> to vector<2x8x16xbf16>
    %c0_3 = arith.constant 0 : index
    %c0_4 = arith.constant 0 : index
    %c0_5 = arith.constant 0 : index
    %c0_6 = arith.constant 0 : index
    %2 = vector.load %arg3[%c0_3, %c0_4, %c0_5, %c0_6] : memref<1x1x8x128xbf16, #tpu.memory_space<vmem>>, vector<1x1x8x128xbf16>
    %3 = vector.shape_cast %2 : vector<1x1x8x128xbf16> to vector<8x128xbf16>
    %4 = arith.extf %3 : vector<8x128xbf16> to vector<8x128xf32>
    %c0_7 = arith.constant 0 : index
    %c0_8 = arith.constant 0 : index
    %5 = vector.load %arg4[%c0_7, %c0_8] : memref<1x128xf32, #tpu.memory_space<vmem>>, vector<1x128xf32>
    %6 = vector.broadcast %5 : vector<1x128xf32> to vector<8x128xf32>
    %7 = arith.mulf %4, %6 : vector<8x128xf32>
    %c0_9 = arith.constant 0 : index
    %c0_10 = arith.constant 0 : index
    %8 = vector.load %arg5[%c0_9, %c0_10] : memref<1x128xf32, #tpu.memory_space<vmem>>, vector<1x128xf32>
    %9 = vector.broadcast %8 : vector<1x128xf32> to vector<8x128xf32>
    %10 = arith.addf %7, %9 : vector<8x128xf32>
    %11 = arith.truncf %10 : vector<8x128xf32> to vector<8x128xbf16>
    %12 = vector.extract_strided_slice %1 {offsets = [0, 0, 0], sizes = [1, 8, 8], strides = [1, 1, 1]} : vector<2x8x16xbf16> to vector<1x8x8xbf16>
    %13 = vector.shape_cast %12 : vector<1x8x8xbf16> to vector<8x8xbf16>
    %c0_11 = arith.constant 0 : index
    %c0_12 = arith.constant 0 : index
    %c0_13 = arith.constant 0 : index
    %c0_14 = arith.constant 0 : index
    %14 = vector.load %arg6[%c0_11, %c0_12, %c0_13, %c0_14] : memref<1x2x8x32xbf16, #tpu.memory_space<vmem>>, vector<1x1x8x8xbf16>
    %15 = vector.shape_cast %14 : vector<1x1x8x8xbf16> to vector<8x8xbf16>
    %16 = vector.shape_cast %13 : vector<8x8xbf16> to vector<1x1x8x8xbf16>
    tpu.vector_store %arg6[%c0_11, %c0_12, %c0_13, %c0_14], %16 {strides = array<i32>} : memref<1x2x8x32xbf16, #tpu.memory_space<vmem>>, vector<1x1x8x8xbf16>,
    %17 = vector.extract_strided_slice %11 {offsets = [0, 0], sizes = [8, 8], strides = [1, 1]} : vector<8x128xbf16> to vector<8x8xbf16>
    %c0_15 = arith.constant 0 : index
    %c0_16 = arith.constant 0 : index
    %c0_17 = arith.constant 0 : index
    %c8 = arith.constant 8 : index
    %18 = vector.load %arg6[%c0_15, %c0_16, %c0_17, %c8] : memref<1x2x8x32xbf16, #tpu.memory_space<vmem>>, vector<1x1x8x8xbf16>
    %19 = vector.shape_cast %18 : vector<1x1x8x8xbf16> to vector<8x8xbf16>
    %20 = vector.shape_cast %17 : vector<8x8xbf16> to vector<1x1x8x8xbf16>
    tpu.vector_store %arg6[%c0_15, %c0_16, %c0_17, %c8], %20 {strides = array<i32>} : memref<1x2x8x32xbf16, #tpu.memory_space<vmem>>, vector<1x1x8x8xbf16>,
    %21 = vector.extract_strided_slice %1 {offsets = [0, 0, 8], sizes = [1, 8, 8], strides = [1, 1, 1]} : vector<2x8x16xbf16> to vector<1x8x8xbf16>
    %22 = vector.shape_cast %21 : vector<1x8x8xbf16> to vector<8x8xbf16>
    %c0_18 = arith.constant 0 : index
    %c0_19 = arith.constant 0 : index
    %c0_20 = arith.constant 0 : index
    %c16 = arith.constant 16 : index
    %23 = vector.load %arg6[%c0_18, %c0_19, %c0_20, %c16] : memref<1x2x8x32xbf16, #tpu.memory_space<vmem>>, vector<1x1x8x8xbf16>
    %24 = vector.shape_cast %23 : vector<1x1x8x8xbf16> to vector<8x8xbf16>
    %25 = vector.shape_cast %22 : vector<8x8xbf16> to vector<1x1x8x8xbf16>
    tpu.vector_store %arg6[%c0_18, %c0_19, %c0_20, %c16], %25 {strides = array<i32>} : memref<1x2x8x32xbf16, #tpu.memory_space<vmem>>, vector<1x1x8x8xbf16>,
    %26 = vector.extract_strided_slice %11 {offsets = [0, 8], sizes = [8, 8], strides = [1, 1]} : vector<8x128xbf16> to vector<8x8xbf16>
    %c0_21 = arith.constant 0 : index
    %c0_22 = arith.constant 0 : index
    %c0_23 = arith.constant 0 : index
    %c24 = arith.constant 24 : index
    %27 = vector.load %arg6[%c0_21, %c0_22, %c0_23, %c24] : memref<1x2x8x32xbf16, #tpu.memory_space<vmem>>, vector<1x1x8x8xbf16>
    %28 = vector.shape_cast %27 : vector<1x1x8x8xbf16> to vector<8x8xbf16>
    %29 = vector.shape_cast %26 : vector<8x8xbf16> to vector<1x1x8x8xbf16>
    tpu.vector_store %arg6[%c0_21, %c0_22, %c0_23, %c24], %29 {strides = array<i32>} : memref<1x2x8x32xbf16, #tpu.memory_space<vmem>>, vector<1x1x8x8xbf16>,
    %30 = vector.extract_strided_slice %1 {offsets = [1, 0, 0], sizes = [1, 8, 8], strides = [1, 1, 1]} : vector<2x8x16xbf16> to vector<1x8x8xbf16>
    %31 = vector.shape_cast %30 : vector<1x8x8xbf16> to vector<8x8xbf16>
    %c0_24 = arith.constant 0 : index
    %c1 = arith.constant 1 : index
    %c0_25 = arith.constant 0 : index
    %c0_26 = arith.constant 0 : index
    %32 = vector.load %arg6[%c0_24, %c1, %c0_25, %c0_26] : memref<1x2x8x32xbf16, #tpu.memory_space<vmem>>, vector<1x1x8x8xbf16>
    %33 = vector.shape_cast %32 : vector<1x1x8x8xbf16> to vector<8x8xbf16>
    %34 = vector.shape_cast %31 : vector<8x8xbf16> to vector<1x1x8x8xbf16>
    tpu.vector_store %arg6[%c0_24, %c1, %c0_25, %c0_26], %34 {strides = array<i32>} : memref<1x2x8x32xbf16, #tpu.memory_space<vmem>>, vector<1x1x8x8xbf16>,
    %35 = vector.extract_strided_slice %11 {offsets = [0, 16], sizes = [8, 8], strides = [1, 1]} : vector<8x128xbf16> to vector<8x8xbf16>
    %c0_27 = arith.constant 0 : index
    %c1_28 = arith.constant 1 : index
    %c0_29 = arith.constant 0 : index
    %c8_30 = arith.constant 8 : index
    %36 = vector.load %arg6[%c0_27, %c1_28, %c0_29, %c8_30] : memref<1x2x8x32xbf16, #tpu.memory_space<vmem>>, vector<1x1x8x8xbf16>
    %37 = vector.shape_cast %36 : vector<1x1x8x8xbf16> to vector<8x8xbf16>
    %38 = vector.shape_cast %35 : vector<8x8xbf16> to vector<1x1x8x8xbf16>
    tpu.vector_store %arg6[%c0_27, %c1_28, %c0_29, %c8_30], %38 {strides = array<i32>} : memref<1x2x8x32xbf16, #tpu.memory_space<vmem>>, vector<1x1x8x8xbf16>,
    %39 = vector.extract_strided_slice %1 {offsets = [1, 0, 8], sizes = [1, 8, 8], strides = [1, 1, 1]} : vector<2x8x16xbf16> to vector<1x8x8xbf16>
    %40 = vector.shape_cast %39 : vector<1x8x8xbf16> to vector<8x8xbf16>
    %c0_31 = arith.constant 0 : index
    %c1_32 = arith.constant 1 : index
    %c0_33 = arith.constant 0 : index
    %c16_34 = arith.constant 16 : index
    %41 = vector.load %arg6[%c0_31, %c1_32, %c0_33, %c16_34] : memref<1x2x8x32xbf16, #tpu.memory_space<vmem>>, vector<1x1x8x8xbf16>
    %42 = vector.shape_cast %41 : vector<1x1x8x8xbf16> to vector<8x8xbf16>
    %43 = vector.shape_cast %40 : vector<8x8xbf16> to vector<1x1x8x8xbf16>
    tpu.vector_store %arg6[%c0_31, %c1_32, %c0_33, %c16_34], %43 {strides = array<i32>} : memref<1x2x8x32xbf16, #tpu.memory_space<vmem>>, vector<1x1x8x8xbf16>,
    %44 = vector.extract_strided_slice %11 {offsets = [0, 24], sizes = [8, 8], strides = [1, 1]} : vector<8x128xbf16> to vector<8x8xbf16>
    %c0_35 = arith.constant 0 : index
    %c1_36 = arith.constant 1 : index
    %c0_37 = arith.constant 0 : index
    %c24_38 = arith.constant 24 : index
    %45 = vector.load %arg6[%c0_35, %c1_36, %c0_37, %c24_38] : memref<1x2x8x32xbf16, #tpu.memory_space<vmem>>, vector<1x1x8x8xbf16>
    %46 = vector.shape_cast %45 : vector<1x1x8x8xbf16> to vector<8x8xbf16>
    %47 = vector.shape_cast %44 : vector<8x8xbf16> to vector<1x1x8x8xbf16>
    tpu.vector_store %arg6[%c0_35, %c1_36, %c0_37, %c24_38], %47 {strides = array<i32>} : memref<1x2x8x32xbf16, #tpu.memory_space<vmem>>, vector<1x1x8x8xbf16>,
    return
  }
  func.func @transform_0(%arg0: i32, %arg1: i32) -> (i32, i32, i32, i32) {
    %c0_i32 = arith.constant 0 : i32
    %c0_i32_0 = arith.constant 0 : i32
    %c0_i32_1 = arith.constant 0 : i32
    return %arg0, %arg1, %c0_i32, %c0_i32_0 : i32, i32, i32, i32
  }
  func.func @transform_1(%arg0: i32, %arg1: i32) -> (i32, i32, i32, i32) {
    %c0_i32 = arith.constant 0 : i32
    %c0_i32_0 = arith.constant 0 : i32
    %c0_i32_1 = arith.constant 0 : i32
    return %arg0, %arg1, %c0_i32, %c0_i32_0 : i32, i32, i32, i32
  }
  func.func @transform_2(%arg0: i32, %arg1: i32) -> (i32, i32) {
    %c0_i32 = arith.constant 0 : i32
    %c0_i32_0 = arith.constant 0 : i32
    %c0_i32_1 = arith.constant 0 : i32
    return %c0_i32, %c0_i32_0 : i32, i32
  }
  func.func @transform_3(%arg0: i32, %arg1: i32) -> (i32, i32) {
    %c0_i32 = arith.constant 0 : i32
    %c0_i32_0 = arith.constant 0 : i32
    %c0_i32_1 = arith.constant 0 : i32
    return %c0_i32, %c0_i32_0 : i32, i32
  }
  func.func @transform_4(%arg0: i32, %arg1: i32) -> (i32, i32, i32, i32) {
    %c0_i32 = arith.constant 0 : i32
    %c0_i32_0 = arith.constant 0 : i32
    %c0_i32_1 = arith.constant 0 : i32
    return %arg0, %arg1, %c0_i32, %c0_i32_0 : i32, i32, i32, i32
  }
}

module attributes {stable_mosaic.version = 11 : i64} {
  func.func @_matmul_kernel(%arg0: i32, %arg1: i32, %arg2: memref<256x256xbf16, #tpu.memory_space<vmem>>, %arg3: memref<256x128xbf16, #tpu.memory_space<vmem>>, %arg4: memref<1x128xf32, #tpu.memory_space<vmem>>, %arg5: memref<256x128xf32, #tpu.memory_space<vmem>>, %arg6: memref<256x128xf32, #tpu.memory_space<vmem>>) attributes {dimension_semantics = [#tpu.dimension_semantics<parallel>, #tpu.dimension_semantics<arbitrary>], iteration_bounds = array<i64: 2, 1>, scalar_prefetch = 0 : i64, scratch_operands = 1 : i64, tpu.core_type = #tpu.core_type<tc>, window_params = [{transform_indices = @transform_0, window_bounds = array<i64: 256, 256>}, {transform_indices = @transform_1, window_bounds = array<i64: 256, 128>}, {pipeline_mode = #tpu.pipeline_mode<synchronous>, transform_indices = @transform_2, window_bounds = array<i64: 1, 128>}, {transform_indices = @transform_3, window_bounds = array<i64: 256, 128>}]} {
    %c0_i32 = arith.constant 0 : i32
    %0 = arith.cmpi eq, %arg1, %c0_i32 : i32
    %1 = arith.extui %0 : i1 to i32
    %c0_i32_0 = arith.constant 0 : i32
    %2 = arith.cmpi ne, %1, %c0_i32_0 : i32
    scf.if %2 {
      %cst_11 = arith.constant 0.000000e+00 : f32
      %14 = vector.broadcast %cst_11 : f32 to vector<256x128xf32>
      %c0_12 = arith.constant 0 : index
      %c0_13 = arith.constant 0 : index
      %15 = vector.load %arg6[%c0_12, %c0_13] : memref<256x128xf32, #tpu.memory_space<vmem>>, vector<256x128xf32>
      tpu.vector_store %arg6[%c0_12, %c0_13], %14 {strides = array<i32>} : memref<256x128xf32, #tpu.memory_space<vmem>>, vector<256x128xf32>,
    } else {
    }
    %c0 = arith.constant 0 : index
    %c0_1 = arith.constant 0 : index
    %3 = vector.load %arg2[%c0, %c0_1] : memref<256x256xbf16, #tpu.memory_space<vmem>>, vector<256x256xbf16>
    %cst = arith.constant 0.000000e+00 : bf16
    %4 = vector.broadcast %cst : bf16 to vector<256x256xbf16>
    %5 = arith.maximumf %3, %4 : vector<256x256xbf16>
    %c0_2 = arith.constant 0 : index
    %c0_3 = arith.constant 0 : index
    %6 = vector.load %arg6[%c0_2, %c0_3] : memref<256x128xf32, #tpu.memory_space<vmem>>, vector<256x128xf32>
    %c0_4 = arith.constant 0 : index
    %c0_5 = arith.constant 0 : index
    %7 = vector.load %arg3[%c0_4, %c0_5] : memref<256x128xbf16, #tpu.memory_space<vmem>>, vector<256x128xbf16>
    %cst_6 = arith.constant dense<0.000000e+00> : vector<256x128xf32>
    %8 = tpu.matmul %5, %7, %cst_6 {dimension_numbers = #tpu.dot_dimension_numbers<[1], [0], [0], [1], [0, 0, 1, 1], [], []>} : vector<256x256xbf16>, vector<256x128xbf16>, vector<256x128xf32> -> vector<256x128xf32>
    %9 = arith.addf %6, %8 : vector<256x128xf32>
    %c0_7 = arith.constant 0 : index
    %c0_8 = arith.constant 0 : index
    %10 = vector.load %arg6[%c0_7, %c0_8] : memref<256x128xf32, #tpu.memory_space<vmem>>, vector<256x128xf32>
    tpu.vector_store %arg6[%c0_7, %c0_8], %9 {strides = array<i32>} : memref<256x128xf32, #tpu.memory_space<vmem>>, vector<256x128xf32>,
    %c0_i32_9 = arith.constant 0 : i32
    %11 = arith.cmpi eq, %arg1, %c0_i32_9 : i32
    %12 = arith.extui %11 : i1 to i32
    %c0_i32_10 = arith.constant 0 : i32
    %13 = arith.cmpi ne, %12, %c0_i32_10 : i32
    scf.if %13 {
      %c0_11 = arith.constant 0 : index
      %c0_12 = arith.constant 0 : index
      %14 = vector.load %arg6[%c0_11, %c0_12] : memref<256x128xf32, #tpu.memory_space<vmem>>, vector<256x128xf32>
      %c0_13 = arith.constant 0 : index
      %c0_14 = arith.constant 0 : index
      %15 = vector.load %arg4[%c0_13, %c0_14] : memref<1x128xf32, #tpu.memory_space<vmem>>, vector<1x128xf32>
      %16 = vector.broadcast %15 : vector<1x128xf32> to vector<256x128xf32>
      %17 = arith.addf %14, %16 : vector<256x128xf32>
      %18 = math.tanh %17 : vector<256x128xf32>
      %c0_15 = arith.constant 0 : index
      %c0_16 = arith.constant 0 : index
      %19 = vector.load %arg5[%c0_15, %c0_16] : memref<256x128xf32, #tpu.memory_space<vmem>>, vector<256x128xf32>
      tpu.vector_store %arg5[%c0_15, %c0_16], %18 {strides = array<i32>} : memref<256x128xf32, #tpu.memory_space<vmem>>, vector<256x128xf32>,
    } else {
    }
    return
  }
  func.func @transform_0(%arg0: i32, %arg1: i32) -> (i32, i32) {
    %c0_i32 = arith.constant 0 : i32
    return %arg0, %arg1 : i32, i32
  }
  func.func @transform_1(%arg0: i32, %arg1: i32) -> (i32, i32) {
    %c0_i32 = arith.constant 0 : i32
    %c0_i32_0 = arith.constant 0 : i32
    return %arg1, %c0_i32 : i32, i32
  }
  func.func @transform_2(%arg0: i32, %arg1: i32) -> (i32, i32) {
    %c0_i32 = arith.constant 0 : i32
    %c0_i32_0 = arith.constant 0 : i32
    %c0_i32_1 = arith.constant 0 : i32
    return %c0_i32, %c0_i32_0 : i32, i32
  }
  func.func @transform_3(%arg0: i32, %arg1: i32) -> (i32, i32) {
    %c0_i32 = arith.constant 0 : i32
    %c0_i32_0 = arith.constant 0 : i32
    return %arg0, %c0_i32 : i32, i32
  }
}

</mosaic_0001>

<bundles_post_ra>
// kernel: unet_generator_forward.24
= control target key start
LH: loop header
LB: loop body
LE: loop exit
PB: predicated region body
PF: predicated region fallthrough
CT: control target
= control target key end

     0   :  { %s1398_s12 = smov 0   ;;  %s1400_s13 = smov 0   ;;  %s1535_s0 = inlined_call_operand.vmem [shape: bf16[512,128], index: 0, kind: input, shape index: {}]   ;;  %s1536_s1 = inlined_call_operand.vmem [shape: bf16[128,128], index: 1, kind: input, shape index: {}]   ;;  %s1537_s2 = inlined_call_operand.vmem [shape: f32[1,128], index: 2, kind: input, shape index: {}]   ;;  %s1538_s3 = inlined_call_operand.vmem [shape: bf16[512,128], index: 3, kind: output, shape index: {}]  }
   0x1   :  { %s1402_s14 = smov 0  }
   0x2 LB: > { %s25_s15 = sadd.s32 1, %s1372_s13  ;;  %p1027_p0 = scmp.ge.s32.totalorder %s1376_s14, 1  ;;  %s1376_s14 = sphi %s1402_s14, %s13_s14   ;;  %s1372_s13 = sphi %s1400_s13, %s1540_s13   ;;  %s1368_s12 = sphi %s1398_s12, %s1539_s12  }
   0x3   : > { %p27_p1 = scmp.ge.s32.totalorder %s25_s15, 2  ;;  %p166_p2 = scmp.lt.s32.totalorder %s1376_s14, 3 }
   0x5   : > { %s1542_s15 = smov (%p27_p1, %s25_s15), 0  ;;  %p167_p3 = pnand %p1027_p0, %p166_p2 }
   0x6   : > { %s1028_s18 = sshll.u32 (!%p167_p3), %s1368_s12, 5 }
   0x7   : > { %170 = sbr.rel (%p167_p3) target bundleno = 273 (0x111), region = 32  ;;  %p199_p4 = scmp.lt.s32.totalorder (!%p167_p3), %s1028_s18, 63 }
   0xc   : > { %v1330_v0 = vld [vmem:[%s1536_s1 + $0x38] sm:$0xff]   ;;  %v1331_v1 = vld [vmem:[%s1536_s1 + $0x30] sm:$0xff]   ;;  %s1544_s18 = smov (!%p199_p4, %s1028_s18), 63  ;;  %v1332_v2 = vld [vmem:[%s1536_s1 + $0x28] sm:$0xff]  }
   0xd   : > { %1242 = vmatprep.subr.bf16.mxu0 %v1330_v0  ;;  %1290 = vmatprep.subr.bf16.mxu1 %v1330_v0  ;;  %s1029_s23 = sshll.u32 %s1544_s18, 2  ;;  %v1333_v3 = vld [vmem:[%s1536_s1 + $0x20] sm:$0xff]   ;;  %v1334_v6 = vld [vmem:[%s1536_s1 + $0x18] sm:$0xff]   ;;  %v1335_v7 = vld [vmem:[%s1536_s1 + $0x10] sm:$0xff]  }
   0xe   : > { %1243 = vmatpush3.bf16.msra.mxu0 %v1330_v0  ;;  %1298 = vmatpush3.bf16.msra.mxu1 %v1330_v0  ;;  %s1433_s26 = scalar_lea.vmem %s1535_s0, %s1029_s23  ;;  %v1336_v8 = vld [vmem:[%s1536_s1 + $0x8] sm:$0xff]   ;;  %v1337_v9 = vld [vmem:[%s1536_s1] sm:$0xff]   ;;  %s1482_s17 = scalar_lea.vmem %s1538_s3, %s1029_s23 }
   0xf   : > { %1244 = vmatprep.subr.bf16.mxu0 %v1331_v1  ;;  %1291 = vmatprep.subr.bf16.mxu1 %v1331_v1  ;;  %v1338_v4 = vld [vmem:[%s1433_s26] sm:$0xff]   ;;  %v1340_v10 = vld [vmem:[%s1433_s26 + $0x8] sm:$0xff]   ;;  %v1342_v12 = vld [vmem:[%s1433_s26 + $0x10] sm:$0xff]  }
  0x10   : > { %v1339_v5 = vld [vmem:[%s1433_s26 + $0x40] sm:$0xff]   ;;  %1258 = vmatprep.mubr.bf16.mxu0 %v1338_v4  ;;  %v1341_v11 = vld [vmem:[%s1433_s26 + $0x48] sm:$0xff]   ;;  %v1343_v13 = vld [vmem:[%s1433_s26 + $0x50] sm:$0xff]  }
  0x11   : > { %1274 = vmatprep.mubr.bf16.mxu1 %v1339_v5  ;;  %v1344_v14 = vld [vmem:[%s1433_s26 + $0x18] sm:$0xff]   ;;  %v1346_v16 = vld [vmem:[%s1433_s26 + $0x20] sm:$0xff]   ;;  %v1348_v18 = vld [vmem:[%s1433_s26 + $0x28] sm:$0xff]  }
  0x12   : > { %1245 = vmatpush3.bf16.msra.mxu0 %v1331_v1  ;;  %1299 = vmatpush3.bf16.msra.mxu1 %v1331_v1  ;;  %v1345_v15 = vld [vmem:[%s1433_s26 + $0x58] sm:$0xff]   ;;  %v1347_v17 = vld [vmem:[%s1433_s26 + $0x60] sm:$0xff]   ;;  %v1349_v19 = vld [vmem:[%s1433_s26 + $0x68] sm:$0xff]  }
  0x13   : > { %1246 = vmatprep.subr.bf16.mxu0 %v1332_v2  ;;  %1292 = vmatprep.subr.bf16.mxu1 %v1332_v2  ;;  %v1350_v20 = vld [vmem:[%s1433_s26 + $0x30] sm:$0xff]   ;;  %v1352_v22 = vld [vmem:[%s1433_s26 + $0x38] sm:$0xff]   ;;  %v1469_v26 = vld [vmem:[%s1537_s2] ss:$0 sm:$0xff] }
  0x14   : > { %v1351_v21 = vld [vmem:[%s1433_s26 + $0x70] sm:$0xff]   ;;  %v1353_v23 = vld [vmem:[%s1433_s26 + $0x78] sm:$0xff]  }
  0x16   : > { %1247 = vmatpush3.bf16.msra.mxu0 %v1332_v2  ;;  %1300 = vmatpush3.bf16.msra.mxu1 %v1332_v2 }
  0x17   : > { %1248 = vmatprep.subr.bf16.mxu0 %v1333_v3  ;;  %1293 = vmatprep.subr.bf16.mxu1 %v1333_v3 }
  0x1a   : > { %1249 = vmatpush3.bf16.msra.mxu0 %v1333_v3  ;;  %1301 = vmatpush3.bf16.msra.mxu1 %v1333_v3 }
  0x1b   : > { %1250 = vmatprep.subr.bf16.mxu0 %v1334_v6  ;;  %1294 = vmatprep.subr.bf16.mxu1 %v1334_v6 }
  0x1e   : > { %1251 = vmatpush3.bf16.msra.mxu0 %v1334_v6  ;;  %1302 = vmatpush3.bf16.msra.mxu1 %v1334_v6 }
  0x1f   : > { %1252 = vmatprep.subr.bf16.mxu0 %v1335_v7  ;;  %1295 = vmatprep.subr.bf16.mxu1 %v1335_v7 }
  0x22   : > { %1253 = vmatpush3.bf16.msra.mxu0 %v1335_v7  ;;  %1303 = vmatpush3.bf16.msra.mxu1 %v1335_v7 }
  0x23   : > { %1254 = vmatprep.subr.bf16.mxu0 %v1336_v8  ;;  %1296 = vmatprep.subr.bf16.mxu1 %v1336_v8 }
  0x26   : > { %1255 = vmatpush3.bf16.msra.mxu0 %v1336_v8  ;;  %1304 = vmatpush3.bf16.msra.mxu1 %v1336_v8 }
  0x27   : > { %1256 = vmatprep.subr.bf16.mxu0 %v1337_v9  ;;  %1297 = vmatprep.subr.bf16.mxu1 %v1337_v9 }
  0x2a   : > { %1257 = vmatpush3.bf16.msra.mxu0 %v1337_v9  ;;  %1305 = vmatpush3.bf16.msra.mxu1 %v1337_v9 }
  0x2d   : > { %1259 = vmatmul.mubr.bf16.vlgmr.msra.gmra.mxu0 %v1340_v10  ;;  %1275 = vmatmul.mubr.bf16.vlgmr.msra.gmra.mxu1 %v1341_v11 }
  0x2e   : > { %1262 = vmatprep.mubr.bf16.mxu0 %v1342_v12  ;;  %1278 = vmatprep.mubr.bf16.mxu1 %v1343_v13 }
  0x35   : > { %1263 = vmatmul.mubr.bf16.gmra.mxu0 %v1344_v14  ;;  %1279 = vmatmul.mubr.bf16.gmra.mxu1 %v1345_v15 }
  0x36   : > { %1266 = vmatprep.mubr.bf16.mxu0 %v1346_v16  ;;  %1282 = vmatprep.mubr.bf16.mxu1 %v1347_v17 }
  0x3d   : > { %1267 = vmatmul.mubr.bf16.gmra.mxu0 %v1348_v18  ;;  %1283 = vmatmul.mubr.bf16.gmra.mxu1 %v1349_v19 }
  0x3e   : > { %1270 = vmatprep.mubr.bf16.mxu0 %v1350_v20  ;;  %1286 = vmatprep.mubr.bf16.mxu1 %v1351_v21 }
  0x45   : > { %1271 = vmatmul.mubr.bf16.gmra.mxu0 %v1352_v22  ;;  %1287 = vmatmul.mubr.bf16.gmra.mxu1 %v1353_v23 }
  0xed   : > { %v1260_v24 = vpop.f32.mrf.mxu0  ;;  %v1276_v25 = vpop.f32.mrf.mxu1 }
  0xee   : > { %v749_v31 = vadd.f32 %v1260_v24, %v1469_v26  ;;  %v765_v32 = vadd.f32 %v1276_v25, %v1469_v26 }
  0xef   : > { %v514_v27 = vpop.f32.mrf.mxu0  ;;  %v578_v28 = vpop.f32.mrf.mxu1 }
  0xf0   : > { %v747_v35 = vadd.f32 %v1469_v26, %v514_v27  ;;  %v763_v36 = vadd.f32 %v1469_v26, %v578_v28 }
  0xf1   : > { %v1261_v29 = vpop.f32.mrf.mxu0  ;;  %v1277_v30 = vpop.f32.mrf.mxu1 }
  0xf2   : > { %v750_v33 = vadd.f32 %v1261_v29, %v1469_v26  ;;  %v766_v34 = vadd.f32 %v1277_v30, %v1469_v26 }
  0xf3   : > { %v517_v37 = vpop.f32.mrf.mxu0  ;;  %v581_v38 = vpop.f32.mrf.mxu1 }
  0xf4   : > { %v1131_v39 = vpack.c.bf16 %v750_v33, %v749_v31  ;;  %v1171_v40 = vpack.c.bf16 %v766_v34, %v765_v32  ;;  %v748_v41 = vadd.f32 %v1469_v26, %v517_v37  ;;  %v764_v42 = vadd.f32 %v1469_v26, %v581_v38 }
  0xf5   : > { %v1264_v43 = vpop.f32.mrf.mxu0  ;;  %v1280_v44 = vpop.f32.mrf.mxu1 }
  0xf6   : > { %1203 = vst [vmem:[%s1482_s17 + $0x8] sm:$0xff] %v1131_v39   ;;  %1211 = vst [vmem:[%s1482_s17 + $0x48] sm:$0xff] %v1171_v40   ;;  %v1126_v45 = vpack.c.bf16 %v748_v41, %v747_v35  ;;  %v1166_v46 = vpack.c.bf16 %v764_v42, %v763_v36  ;;  %v753_v51 = vadd.f32 %v1264_v43, %v1469_v26 }
  0xf7   : > { %v530_v47 = vpop.f32.mrf.mxu0  ;;  %v594_v48 = vpop.f32.mrf.mxu1  ;;  %v769_v52 = vadd.f32 %v1280_v44, %v1469_v26 }
  0xf8   : > { %1127 = vst [vmem:[%s1482_s17] sm:$0xff] %v1126_v45   ;;  %1210 = vst [vmem:[%s1482_s17 + $0x40] sm:$0xff] %v1166_v46   ;;  %v751_v55 = vadd.f32 %v1469_v26, %v530_v47  ;;  %v767_v56 = vadd.f32 %v1469_v26, %v594_v48 }
  0xf9   : > { %v1265_v49 = vpop.f32.mrf.mxu0  ;;  %v1281_v50 = vpop.f32.mrf.mxu1 }
  0xfa   : > { %v754_v53 = vadd.f32 %v1265_v49, %v1469_v26  ;;  %v770_v54 = vadd.f32 %v1281_v50, %v1469_v26 }
  0xfb   : > { %v533_v57 = vpop.f32.mrf.mxu0  ;;  %v597_v58 = vpop.f32.mrf.mxu1 }
  0xfc   : > { %v1141_v59 = vpack.c.bf16 %v754_v53, %v753_v51  ;;  %v1181_v60 = vpack.c.bf16 %v770_v54, %v769_v52  ;;  %v752_v61 = vadd.f32 %v1469_v26, %v533_v57  ;;  %v768_v62 = vadd.f32 %v1469_v26, %v597_v58 }
  0xfd   : > { %v1268_v63 = vpop.f32.mrf.mxu0  ;;  %v1284_v0 = vpop.f32.mrf.mxu1 }
  0xfe   : > { %1205 = vst [vmem:[%s1482_s17 + $0x18] sm:$0xff] %v1141_v59   ;;  %1213 = vst [vmem:[%s1482_s17 + $0x58] sm:$0xff] %v1181_v60   ;;  %v1136_v1 = vpack.c.bf16 %v752_v61, %v751_v55  ;;  %v1176_v2 = vpack.c.bf16 %v768_v62, %v767_v56  ;;  %v757_v7 = vadd.f32 %v1268_v63, %v1469_v26 }
  0xff   : > { %v546_v3 = vpop.f32.mrf.mxu0  ;;  %v610_v4 = vpop.f32.mrf.mxu1  ;;  %v773_v8 = vadd.f32 %v1284_v0, %v1469_v26 }
 0x100   : > { %1204 = vst [vmem:[%s1482_s17 + $0x10] sm:$0xff] %v1136_v1   ;;  %1212 = vst [vmem:[%s1482_s17 + $0x50] sm:$0xff] %v1176_v2   ;;  %v755_v11 = vadd.f32 %v1469_v26, %v546_v3  ;;  %v771_v12 = vadd.f32 %v1469_v26, %v610_v4 }
 0x101   : > { %v1269_v5 = vpop.f32.mrf.mxu0  ;;  %v1285_v6 = vpop.f32.mrf.mxu1 }
 0x102   : > { %v758_v9 = vadd.f32 %v1269_v5, %v1469_v26  ;;  %v774_v10 = vadd.f32 %v1285_v6, %v1469_v26 }
 0x103   : > { %v549_v13 = vpop.f32.mrf.mxu0  ;;  %v613_v14 = vpop.f32.mrf.mxu1 }
 0x104   : > { %v1151_v15 = vpack.c.bf16 %v758_v9, %v757_v7  ;;  %v1191_v16 = vpack.c.bf16 %v774_v10, %v773_v8  ;;  %v756_v17 = vadd.f32 %v1469_v26, %v549_v13  ;;  %v772_v18 = vadd.f32 %v1469_v26, %v613_v14 }
 0x105   : > { %v1272_v19 = vpop.f32.mrf.mxu0  ;;  %v1288_v20 = vpop.f32.mrf.mxu1 }
 0x106   : > { %1207 = vst [vmem:[%s1482_s17 + $0x28] sm:$0xff] %v1151_v15   ;;  %1215 = vst [vmem:[%s1482_s17 + $0x68] sm:$0xff] %v1191_v16   ;;  %v1146_v21 = vpack.c.bf16 %v756_v17, %v755_v11  ;;  %v1186_v22 = vpack.c.bf16 %v772_v18, %v771_v12  ;;  %v761_v28 = vadd.f32 %v1272_v19, %v1469_v26 }
 0x107   : > { %v562_v23 = vpop.f32.mrf.mxu0  ;;  %v626_v24 = vpop.f32.mrf.mxu1  ;;  %v777_v29 = vadd.f32 %v1288_v20, %v1469_v26 }
 0x108   : > { %1206 = vst [vmem:[%s1482_s17 + $0x20] sm:$0xff] %v1146_v21   ;;  %1214 = vst [vmem:[%s1482_s17 + $0x60] sm:$0xff] %v1186_v22   ;;  %v759_v32 = vadd.f32 %v1469_v26, %v562_v23  ;;  %v775_v33 = vadd.f32 %v1469_v26, %v626_v24 }
 0x109   : > { %v1273_v25 = vpop.f32.mrf.mxu0  ;;  %v1289_v27 = vpop.f32.mrf.mxu1 }
 0x10a   : > { %v762_v30 = vadd.f32 %v1273_v25, %v1469_v26  ;;  %v778_v31 = vadd.f32 %v1289_v27, %v1469_v26 }
 0x10b   : > { %v565_v34 = vpop.f32.mrf.mxu0  ;;  %v629_v35 = vpop.f32.mrf.mxu1 }
 0x10c   : > { %v1161_v36 = vpack.c.bf16 %v762_v30, %v761_v28  ;;  %v1201_v37 = vpack.c.bf16 %v778_v31, %v777_v29  ;;  %v760_v38 = vadd.f32 %v1469_v26, %v565_v34  ;;  %v776_v39 = vadd.f32 %v1469_v26, %v629_v35 }
 0x10e   : > { %1209 = vst [vmem:[%s1482_s17 + $0x38] sm:$0xff] %v1161_v36   ;;  %1217 = vst [vmem:[%s1482_s17 + $0x78] sm:$0xff] %v1201_v37   ;;  %v1156_v40 = vpack.c.bf16 %v760_v38, %v759_v32  ;;  %v1196_v41 = vpack.c.bf16 %v776_v39, %v775_v33 }
 0x110   : > { %1208 = vst [vmem:[%s1482_s17 + $0x30] sm:$0xff] %v1156_v40   ;;  %1216 = vst [vmem:[%s1482_s17 + $0x70] sm:$0xff] %v1196_v41  }
 0x111 PF: > { %s13_s14 = sadd.s32 1, %s1376_s14   ;;  %s1539_s12 = smov %s1372_s13 }
 0x112   : > { %p10_p5 = scmp.ge.s32.totalorder %s13_s14, 4   ;;  %s1540_s13 = smov %s1542_s15 }
 0x114   :  { %12 = sbr.rel (!%p10_p5) target bundleno = 2 (0x2), region = 73 }

// kernel: unet_generator_forward.26
= control target key start
LH: loop header
LB: loop body
LE: loop exit
PB: predicated region body
PF: predicated region fallthrough
CT: control target
= control target key end

     0   :  { %vm14_vm0 = vcmask 122880   ;;  %v294_v0 = vmov 0.0   ;;  %vm149_vm1 = vcmask 130048   ;;  %s388_s0 = inlined_call_operand.vmem [shape: bf16[128,16], index: 0, kind: input, shape index: {}]   ;;  %s389_s1 = inlined_call_operand.vmem [shape: f32[1,16], index: 1, kind: output, shape index: {0}]   ;;  %s390_s2 = inlined_call_operand.vmem [shape: f32[1,16], index: 2, kind: output, shape index: {1}]  }
   0x1   :  { %15 = vst.msk [vmem:[%s389_s1] sm:$0x1] %vm14_vm0, %v294_v0  ;;  %v255_v1 = vld [vmem:[%s388_s0] sm:$0xff]   ;;  %v286_v2 = vld [vmem:[%s388_s0 + $0x8] sm:$0xff]   ;;  %16 = vst.msk [vmem:[%s390_s2] sm:$0x1] %vm14_vm0, %v294_v0 }
   0x2   :  { %v256_v3 = vunpack.c.l.bf16 %v255_v1  ;;  %v257_v4 = vunpack.c.h.bf16 %v255_v1  ;;  %v260_v5 = vunpack.c.l.bf16 %v286_v2  ;;  %v287_v6 = vld [vmem:[%s388_s0 + $0x10] sm:$0xff]   ;;  %v261_v7 = vunpack.c.h.bf16 %v286_v2  ;;  %v288_v14 = vld [vmem:[%s388_s0 + $0x18] sm:$0xff]   ;;  %v289_v24 = vld [vmem:[%s388_s0 + $0x20] sm:$0xff]  }
   0x3   :  { %v264_v12 = vunpack.c.l.bf16 %v287_v6  ;;  %v265_v16 = vunpack.c.h.bf16 %v287_v6  ;;  %v268_v22 = vunpack.c.l.bf16 %v288_v14  ;;  %v269_v27 = vunpack.c.h.bf16 %v288_v14  ;;  %v290_v37 = vld [vmem:[%s388_s0 + $0x28] sm:$0xff]   ;;  %v291_v50 = vld [vmem:[%s388_s0 + $0x30] sm:$0xff]   ;;  %v292_v63 = vld [vmem:[%s388_s0 + $0x38] sm:$0xff]  }
   0x4   :  { %v150_v8 = vsel %vm149_vm1, %v256_v3, 0.0  ;;  %v151_v9 = vsel %vm149_vm1, %v257_v4, 0.0  ;;  %v153_v10 = vsel %vm149_vm1, %v260_v5, 0.0  ;;  %v155_v13 = vsel %vm149_vm1, %v261_v7, 0.0 }
   0x5   :  { %v152_v11 = vadd.f32 %v151_v9, %v150_v8  ;;  %v157_v17 = vsel %vm149_vm1, %v264_v12, 0.0  ;;  %v191_v19 = vmul.f32 %v256_v3, %v256_v3  ;;  %v192_v20 = vmul.f32 %v257_v4, %v257_v4 }
   0x6   :  { %v193_v21 = vmul.f32 %v260_v5, %v260_v5  ;;  %v159_v23 = vsel %vm149_vm1, %v265_v16, 0.0  ;;  %v194_v26 = vmul.f32 %v261_v7, %v261_v7  ;;  %v161_v28 = vsel %vm149_vm1, %v268_v22, 0.0 }
   0x7   :  { %v154_v15 = vadd.f32 %v153_v10, %v152_v11  ;;  %v195_v29 = vmul.f32 %v264_v12, %v264_v12  ;;  %v207_v31 = vsel %vm149_vm1, %v191_v19, 0.0  ;;  %v208_v32 = vsel %vm149_vm1, %v192_v20, 0.0 }
   0x8   :  { %v210_v33 = vsel %vm149_vm1, %v193_v21, 0.0  ;;  %v272_v34 = vunpack.c.l.bf16 %v289_v24  ;;  %v163_v35 = vsel %vm149_vm1, %v269_v27, 0.0  ;;  %v209_v36 = vadd.f32 %v208_v32, %v207_v31 }
   0x9   :  { %v156_v18 = vadd.f32 %v155_v13, %v154_v15  ;;  %v196_v39 = vmul.f32 %v265_v16, %v265_v16  ;;  %v212_v40 = vsel %vm149_vm1, %v194_v26, 0.0  ;;  %v273_v41 = vunpack.c.h.bf16 %v289_v24 }
   0xa   :  { %v165_v42 = vsel %vm149_vm1, %v272_v34, 0.0  ;;  %v211_v43 = vadd.f32 %v210_v33, %v209_v36  ;;  %v197_v45 = vmul.f32 %v268_v22, %v268_v22  ;;  %v214_v46 = vsel %vm149_vm1, %v195_v29, 0.0 }
   0xb   :  { %v158_v25 = vadd.f32 %v157_v17, %v156_v18  ;;  %v276_v47 = vunpack.c.l.bf16 %v290_v37  ;;  %v167_v48 = vsel %vm149_vm1, %v273_v41, 0.0  ;;  %v198_v52 = vmul.f32 %v269_v27, %v269_v27 }
   0xc   :  { %v213_v49 = vadd.f32 %v212_v40, %v211_v43  ;;  %v216_v53 = vsel %vm149_vm1, %v196_v39, 0.0  ;;  %v277_v54 = vunpack.c.h.bf16 %v290_v37  ;;  %v199_v58 = vmul.f32 %v272_v34, %v272_v34 }
   0xd   :  { %v160_v30 = vadd.f32 %v159_v23, %v158_v25  ;;  %v169_v55 = vsel %vm149_vm1, %v276_v47, 0.0  ;;  %v218_v59 = vsel %vm149_vm1, %v197_v45, 0.0  ;;  %v280_v60 = vunpack.c.l.bf16 %v291_v50 }
   0xe   :  { %v215_v56 = vadd.f32 %v214_v46, %v213_v49  ;;  %v171_v61 = vsel %vm149_vm1, %v277_v54, 0.0  ;;  %v200_v1 = vmul.f32 %v273_v41, %v273_v41  ;;  %v220_v2 = vsel %vm149_vm1, %v198_v52, 0.0  ;;  %v190_v52 = vld [vmem:[%s390_s2] sm:$0x1] }
   0xf   :  { %v162_v38 = vadd.f32 %v161_v28, %v160_v30  ;;  %v281_v3 = vunpack.c.h.bf16 %v291_v50  ;;  %v173_v4 = vsel %vm149_vm1, %v280_v60, 0.0  ;;  %v201_v7 = vmul.f32 %v276_v47, %v276_v47 }
  0x10   :  { %v217_v62 = vadd.f32 %v216_v53, %v215_v56  ;;  %v222_v8 = vsel %vm149_vm1, %v199_v58, 0.0  ;;  %v284_v9 = vunpack.c.l.bf16 %v292_v63  ;;  %v202_v13 = vmul.f32 %v277_v54, %v277_v54 }
  0x11   :  { %v164_v44 = vadd.f32 %v163_v35, %v162_v38  ;;  %v175_v10 = vsel %vm149_vm1, %v281_v3, 0.0  ;;  %v224_v14 = vsel %vm149_vm1, %v200_v1, 0.0  ;;  %v285_v15 = vunpack.c.h.bf16 %v292_v63 }
  0x12   :  { %v219_v5 = vadd.f32 %v218_v59, %v217_v62  ;;  %v177_v16 = vsel %vm149_vm1, %v284_v9, 0.0  ;;  %v203_v19 = vmul.f32 %v280_v60, %v280_v60  ;;  %v226_v20 = vsel %vm149_vm1, %v201_v7, 0.0 }
  0x13   :  { %v166_v51 = vadd.f32 %v165_v42, %v164_v44  ;;  %v179_v21 = vsel %vm149_vm1, %v285_v15, 0.0  ;;  %v204_v24 = vmul.f32 %v281_v3, %v281_v3  ;;  %v228_v25 = vsel %vm149_vm1, %v202_v13, 0.0  ;;  %v148_v44 = vld [vmem:[%s389_s1] sm:$0x1] }
  0x14   :  { %v221_v11 = vadd.f32 %v220_v2, %v219_v5  ;;  %v205_v28 = vmul.f32 %v284_v9, %v284_v9  ;;  %v230_v29 = vsel %vm149_vm1, %v203_v19, 0.0  ;;  %v206_v32 = vmul.f32 %v285_v15, %v285_v15 }
  0x15   :  { %v168_v57 = vadd.f32 %v167_v48, %v166_v51  ;;  %v232_v33 = vsel %vm149_vm1, %v204_v24, 0.0 }
  0x16   :  { %v223_v17 = vadd.f32 %v222_v8, %v221_v11  ;;  %v234_v36 = vsel %vm149_vm1, %v205_v28, 0.0  ;;  %v236_v39 = vsel %vm149_vm1, %v206_v32, 0.0 }
  0x17   :  { %v170_v0 = vadd.f32 %v169_v55, %v168_v57 }
  0x18   :  { %v225_v22 = vadd.f32 %v224_v14, %v223_v17 }
  0x19   :  { %v172_v6 = vadd.f32 %v171_v61, %v170_v0 }
  0x1a   :  { %v227_v26 = vadd.f32 %v226_v20, %v225_v22 }
  0x1b   :  { %v174_v12 = vadd.f32 %v173_v4, %v172_v6 }
  0x1c   :  { %v229_v30 = vadd.f32 %v228_v25, %v227_v26 }
  0x1d   :  { %v176_v18 = vadd.f32 %v175_v10, %v174_v12 }
  0x1e   :  { %v231_v34 = vadd.f32 %v230_v29, %v229_v30 }
  0x1f   :  { %v178_v23 = vadd.f32 %v177_v16, %v176_v18 }
  0x20   :  { %v233_v37 = vadd.f32 %v232_v33, %v231_v34 }
  0x21   :  { %v180_v27 = vadd.f32 %v179_v21, %v178_v23 }
  0x22   :  { %v235_v40 = vadd.f32 %v234_v36, %v233_v37 }
  0x23   :  { %v181_v31 = vrot.slane %v180_v27, 4 }
  0x24   :  { %v237_v42 = vadd.f32 %v236_v39, %v235_v40 }
  0x25   :  { %v182_v35 = vadd.f32 %v181_v31, %v180_v27 }
  0x26   :  { %v238_v45 = vrot.slane %v237_v42, 4 }
  0x27   :  { %v183_v38 = vrot.slane %v182_v35, 2 }
  0x28   :  { %v239_v47 = vadd.f32 %v238_v45, %v237_v42 }
  0x29   :  { %v184_v41 = vadd.f32 %v183_v38, %v182_v35 }
  0x2a   :  { %v240_v49 = vrot.slane %v239_v47, 2 }
  0x2b   :  { %v185_v43 = vrot.slane %v184_v41, 1 }
  0x2c   :  { %v241_v50 = vadd.f32 %v240_v49, %v239_v47 }
  0x2d   :  { %v186_v46 = vadd.f32 %v185_v43, %v184_v41 }
  0x2e   :  { %v242_v51 = vrot.slane %v241_v50, 1 }
  0x2f   :  { %v187_v48 = vadd.f32 %v186_v46, %v148_v44 }
  0x30   :  { %v243_v53 = vadd.f32 %v242_v51, %v241_v50 }
  0x31   :  { %189 = vst.msk [vmem:[%s389_s1] sm:$0x1] %vm14_vm0, %v187_v48 }
  0x32   :  { %v244_v54 = vadd.f32 %v243_v53, %v190_v52 }
  0x34   :  { %245 = vst.msk [vmem:[%s390_s2] sm:$0x1] %vm14_vm0, %v244_v54 }

// kernel: unet_generator_forward.25
= control target key start
LH: loop header
LB: loop body
LE: loop exit
PB: predicated region body
PF: predicated region fallthrough
CT: control target
= control target key end

     0   :  { %s754_s1 = inlined_call_operand.vmem [shape: bf16[128,128], index: 1, kind: input, shape index: {}]   ;;  %s755_s0 = inlined_call_operand.vmem [shape: bf16[128,128], index: 0, kind: input, shape index: {}]   ;;  %s756_s2 = inlined_call_operand.vmem [shape: f32[1,128], index: 2, kind: input, shape index: {}]   ;;  %s757_s3 = inlined_call_operand.vmem [shape: bf16[128,128], index: 3, kind: output, shape index: {}]  }
   0x1   :  { %v627_v0 = vld [vmem:[%s754_s1 + $0x38] sm:$0xff]   ;;  %v628_v1 = vld [vmem:[%s754_s1 + $0x30] sm:$0xff]   ;;  %v629_v2 = vld [vmem:[%s754_s1 + $0x28] sm:$0xff]  }
   0x2   :  { %579 = vmatprep.subr.bf16.mxu0 %v627_v0  ;;  %611 = vmatprep.subr.bf16.mxu1 %v627_v0  ;;  %v630_v3 = vld [vmem:[%s754_s1 + $0x20] sm:$0xff]   ;;  %v631_v14 = vld [vmem:[%s754_s1 + $0x18] sm:$0xff]   ;;  %v632_v19 = vld [vmem:[%s754_s1 + $0x10] sm:$0xff]  }
   0x3   :  { %580 = vmatpush3.bf16.msra.mxu0 %v627_v0  ;;  %619 = vmatpush3.bf16.msra.mxu1 %v627_v0  ;;  %v36_v4 = vld [vmem:[%s755_s0] sm:$0xf]  ;;  %v37_v5 = vld [vmem:[%s755_s0 + $0x4] sm:$0xf]  ;;  %v633_v20 = vld [vmem:[%s754_s1 + $0x8] sm:$0xff]  }
   0x4   :  { %581 = vmatprep.subr.bf16.mxu0 %v628_v1  ;;  %612 = vmatprep.subr.bf16.mxu1 %v628_v1  ;;  %v44_v6 = vld [vmem:[%s755_s0 + $0x20] sm:$0xf]  ;;  %v52_v7 = vmul.bf16 1045249613, %v36_v4  ;;  %v53_v8 = vmul.bf16 1045249613, %v37_v5 }
   0x5   :  { %v45_v9 = vld [vmem:[%s755_s0 + $0x24] sm:$0xf]  ;;  %v60_v10 = vmul.bf16 1045249613, %v44_v6  ;;  %v38_v21 = vld [vmem:[%s755_s0 + $0x8] sm:$0xf] }
   0x6   :  { %v61_v11 = vmul.bf16 1045249613, %v45_v9  ;;  %v68_v12 = vmax.bf16 %v52_v7, %v36_v4  ;;  %v69_v13 = vmax.bf16 %v53_v8, %v37_v5  ;;  %v39_v22 = vld [vmem:[%s755_s0 + $0xc] sm:$0xf]  ;;  %v46_v23 = vld [vmem:[%s755_s0 + $0x28] sm:$0xf] }
   0x7   :  { %582 = vmatpush3.bf16.msra.mxu0 %v628_v1  ;;  %620 = vmatpush3.bf16.msra.mxu1 %v628_v1  ;;  %v76_v15 = vmax.bf16 %v60_v10, %v44_v6  ;;  %v47_v24 = vld [vmem:[%s755_s0 + $0x2c] sm:$0xf]  ;;  %v40_v25 = vld [vmem:[%s755_s0 + $0x10] sm:$0xf]  ;;  %v41_v26 = vld [vmem:[%s755_s0 + $0x14] sm:$0xf] }
   0x8   :  { %583 = vmatprep.subr.bf16.mxu0 %v629_v2  ;;  %613 = vmatprep.subr.bf16.mxu1 %v629_v2  ;;  %v77_v16 = vmax.bf16 %v61_v11, %v45_v9  ;;  %v467_v17 = vcombine.low %v68_v12, %v69_v13  ;;  %v48_v27 = vld [vmem:[%s755_s0 + $0x30] sm:$0xf]  ;;  %v49_v28 = vld [vmem:[%s755_s0 + $0x34] sm:$0xf]  ;;  %v54_v29 = vmul.bf16 1045249613, %v38_v21 }
   0x9   :  { %v55_v30 = vmul.bf16 1045249613, %v39_v22  ;;  %v62_v31 = vmul.bf16 1045249613, %v46_v23  ;;  %v63_v32 = vmul.bf16 1045249613, %v47_v24 }
   0xa   :  { %v471_v18 = vcombine.low %v76_v15, %v77_v16  ;;  %595 = vmatprep.mubr.bf16.mxu0 %v467_v17  ;;  %v56_v33 = vmul.bf16 1045249613, %v40_v25  ;;  %v57_v34 = vmul.bf16 1045249613, %v41_v26  ;;  %v64_v35 = vmul.bf16 1045249613, %v48_v27 }
   0xb   :  { %584 = vmatpush3.bf16.msra.mxu0 %v629_v2  ;;  %621 = vmatpush3.bf16.msra.mxu1 %v629_v2  ;;  %v65_v36 = vmul.bf16 1045249613, %v49_v28  ;;  %v634_v37 = vld [vmem:[%s754_s1] sm:$0xff]   ;;  %v70_v38 = vmax.bf16 %v54_v29, %v38_v21  ;;  %v71_v39 = vmax.bf16 %v55_v30, %v39_v22  ;;  %v78_v40 = vmax.bf16 %v62_v31, %v46_v23  ;;  %v42_v43 = vld [vmem:[%s755_s0 + $0x18] sm:$0xf] }
   0xc   :  { %585 = vmatprep.subr.bf16.mxu0 %v630_v3  ;;  %614 = vmatprep.subr.bf16.mxu1 %v630_v3  ;;  %v79_v41 = vmax.bf16 %v63_v32, %v47_v24  ;;  %v72_v42 = vmax.bf16 %v56_v33, %v40_v25  ;;  %v73_v44 = vmax.bf16 %v57_v34, %v41_v26  ;;  %v43_v47 = vld [vmem:[%s755_s0 + $0x1c] sm:$0xf]  ;;  %v50_v48 = vld [vmem:[%s755_s0 + $0x38] sm:$0xf]  ;;  %v58_v51 = vmul.bf16 1045249613, %v42_v43 }
   0xd   :  { %603 = vmatprep.mubr.bf16.mxu1 %v471_v18  ;;  %v80_v45 = vmax.bf16 %v64_v35, %v48_v27  ;;  %v81_v46 = vmax.bf16 %v65_v36, %v49_v28  ;;  %v51_v49 = vld [vmem:[%s755_s0 + $0x3c] sm:$0xf]  ;;  %v468_v50 = vcombine.low %v70_v38, %v71_v39  ;;  %v59_v53 = vmul.bf16 1045249613, %v43_v47  ;;  %v483_v2 = vld [vmem:[%s756_s2] ss:$0 sm:$0xff] }
   0xe   :  { %v472_v52 = vcombine.low %v78_v40, %v79_v41  ;;  %v66_v54 = vmul.bf16 1045249613, %v50_v48  ;;  %v67_v55 = vmul.bf16 1045249613, %v51_v49  ;;  %v469_v56 = vcombine.low %v72_v42, %v73_v44 }
   0xf   :  { %586 = vmatpush3.bf16.msra.mxu0 %v630_v3  ;;  %622 = vmatpush3.bf16.msra.mxu1 %v630_v3  ;;  %v473_v57 = vcombine.low %v80_v45, %v81_v46  ;;  %v74_v58 = vmax.bf16 %v58_v51, %v42_v43  ;;  %v75_v59 = vmax.bf16 %v59_v53, %v43_v47 }
  0x10   :  { %587 = vmatprep.subr.bf16.mxu0 %v631_v14  ;;  %615 = vmatprep.subr.bf16.mxu1 %v631_v14  ;;  %v82_v60 = vmax.bf16 %v66_v54, %v50_v48  ;;  %v83_v61 = vmax.bf16 %v67_v55, %v51_v49 }
  0x11   :  { %v470_v62 = vcombine.low %v74_v58, %v75_v59 }
  0x12   :  { %v474_v63 = vcombine.low %v82_v60, %v83_v61 }
  0x13   :  { %588 = vmatpush3.bf16.msra.mxu0 %v631_v14  ;;  %623 = vmatpush3.bf16.msra.mxu1 %v631_v14 }
  0x14   :  { %589 = vmatprep.subr.bf16.mxu0 %v632_v19  ;;  %616 = vmatprep.subr.bf16.mxu1 %v632_v19 }
  0x17   :  { %590 = vmatpush3.bf16.msra.mxu0 %v632_v19  ;;  %624 = vmatpush3.bf16.msra.mxu1 %v632_v19 }
  0x18   :  { %591 = vmatprep.subr.bf16.mxu0 %v633_v20  ;;  %617 = vmatprep.subr.bf16.mxu1 %v633_v20 }
  0x1b   :  { %592 = vmatpush3.bf16.msra.mxu0 %v633_v20  ;;  %625 = vmatpush3.bf16.msra.mxu1 %v633_v20 }
  0x1c   :  { %593 = vmatprep.subr.bf16.mxu0 %v634_v37  ;;  %618 = vmatprep.subr.bf16.mxu1 %v634_v37 }
  0x1f   :  { %594 = vmatpush3.bf16.msra.mxu0 %v634_v37  ;;  %626 = vmatpush3.bf16.msra.mxu1 %v634_v37 }
  0x22   :  { %596 = vmatmul.mubr.bf16.vlgmr.msra.gmra.mxu0 %v468_v50  ;;  %604 = vmatmul.mubr.bf16.vlgmr.msra.gmra.mxu1 %v472_v52 }
  0x23   :  { %599 = vmatprep.mubr.bf16.mxu0 %v469_v56  ;;  %607 = vmatprep.mubr.bf16.mxu1 %v473_v57 }
  0x2a   :  { %600 = vmatmul.mubr.bf16.gmra.mxu0 %v470_v62  ;;  %608 = vmatmul.mubr.bf16.gmra.mxu1 %v474_v63 }
  0xe2   :  { %v597_v0 = vpop.f32.mrf.mxu0  ;;  %v605_v1 = vpop.f32.mrf.mxu1 }
  0xe3   :  { %v369_v7 = vadd.f32 %v597_v0, %v483_v2  ;;  %v377_v8 = vadd.f32 %v605_v1, %v483_v2 }
  0xe4   :  { %v246_v3 = vpop.f32.mrf.mxu0  ;;  %v278_v4 = vpop.f32.mrf.mxu1 }
  0xe5   :  { %v367_v11 = vadd.f32 %v483_v2, %v246_v3  ;;  %v375_v12 = vadd.f32 %v483_v2, %v278_v4 }
  0xe6   :  { %v598_v5 = vpop.f32.mrf.mxu0  ;;  %v606_v6 = vpop.f32.mrf.mxu1 }
  0xe7   :  { %v370_v9 = vadd.f32 %v598_v5, %v483_v2  ;;  %v378_v10 = vadd.f32 %v606_v6, %v483_v2 }
  0xe8   :  { %v249_v13 = vpop.f32.mrf.mxu0  ;;  %v281_v14 = vpop.f32.mrf.mxu1 }
  0xe9   :  { %v524_v15 = vpack.c.bf16 %v370_v9, %v369_v7  ;;  %v544_v16 = vpack.c.bf16 %v378_v10, %v377_v8  ;;  %v368_v17 = vadd.f32 %v483_v2, %v249_v13  ;;  %v376_v18 = vadd.f32 %v483_v2, %v281_v14 }
  0xea   :  { %v601_v19 = vpop.f32.mrf.mxu0  ;;  %v609_v20 = vpop.f32.mrf.mxu1 }
  0xeb   :  { %556 = vst [vmem:[%s757_s3 + $0x8] sm:$0xff] %v524_v15   ;;  %560 = vst [vmem:[%s757_s3 + $0x28] sm:$0xff] %v544_v16   ;;  %v519_v21 = vpack.c.bf16 %v368_v17, %v367_v11  ;;  %v539_v22 = vpack.c.bf16 %v376_v18, %v375_v12  ;;  %v373_v27 = vadd.f32 %v601_v19, %v483_v2 }
  0xec   :  { %v262_v23 = vpop.f32.mrf.mxu0  ;;  %v294_v24 = vpop.f32.mrf.mxu1  ;;  %v381_v28 = vadd.f32 %v609_v20, %v483_v2 }
  0xed   :  { %520 = vst [vmem:[%s757_s3] sm:$0xff] %v519_v21   ;;  %559 = vst [vmem:[%s757_s3 + $0x20] sm:$0xff] %v539_v22   ;;  %v371_v31 = vadd.f32 %v483_v2, %v262_v23  ;;  %v379_v32 = vadd.f32 %v483_v2, %v294_v24 }
  0xee   :  { %v602_v25 = vpop.f32.mrf.mxu0  ;;  %v610_v26 = vpop.f32.mrf.mxu1 }
  0xef   :  { %v374_v29 = vadd.f32 %v602_v25, %v483_v2  ;;  %v382_v30 = vadd.f32 %v610_v26, %v483_v2 }
  0xf0   :  { %v265_v33 = vpop.f32.mrf.mxu0  ;;  %v297_v34 = vpop.f32.mrf.mxu1 }
  0xf1   :  { %v534_v35 = vpack.c.bf16 %v374_v29, %v373_v27  ;;  %v554_v36 = vpack.c.bf16 %v382_v30, %v381_v28  ;;  %v372_v37 = vadd.f32 %v483_v2, %v265_v33  ;;  %v380_v38 = vadd.f32 %v483_v2, %v297_v34 }
  0xf3   :  { %558 = vst [vmem:[%s757_s3 + $0x18] sm:$0xff] %v534_v35   ;;  %562 = vst [vmem:[%s757_s3 + $0x38] sm:$0xff] %v554_v36   ;;  %v529_v39 = vpack.c.bf16 %v372_v37, %v371_v31  ;;  %v549_v40 = vpack.c.bf16 %v380_v38, %v379_v32 }
  0xf5   :  { %557 = vst [vmem:[%s757_s3 + $0x10] sm:$0xff] %v529_v39   ;;  %561 = vst [vmem:[%s757_s3 + $0x30] sm:$0xff] %v549_v40  }

// kernel: unet_generator_forward.27
= control target key start
LH: loop header
LB: loop body
LE: loop exit
PB: predicated region body
PF: predicated region fallthrough
CT: control target
= control target key end

     0   :  { %vm156_vm0 = vcmask 125952   ;;  %s400_s0 = inlined_call_operand.vmem [shape: bf16[128,16], index: 0, kind: input, shape index: {}]   ;;  %s401_s1 = inlined_call_operand.vmem [shape: f32[1,16], index: 1, kind: input, shape index: {}]   ;;  %s402_s2 = inlined_call_operand.vmem [shape: f32[1,16], index: 2, kind: input, shape index: {}]   ;;  %s403_s3 = inlined_call_operand.vmem [shape: bf16[128,16], index: 3, kind: output, shape index: {}]  }
   0x1   :  { %v212_v0 = vld [vmem:[%s400_s0] sm:$0xff]   ;;  %v243_v4 = vld [vmem:[%s400_s0 + $0x8] sm:$0xff]   ;;  %v244_v5 = vld [vmem:[%s400_s0 + $0x10] sm:$0xff]  }
   0x2   :  { %v276_v1 = vld [vmem:[%s401_s1] ss:$0 sm:$0xff]  ;;  %v213_v2 = vunpack.c.l.bf16 %v212_v0  ;;  %v214_v3 = vunpack.c.h.bf16 %v212_v0  ;;  %v245_v6 = vld [vmem:[%s400_s0 + $0x18] sm:$0xff]   ;;  %v217_v8 = vunpack.c.l.bf16 %v243_v4  ;;  %v218_v9 = vunpack.c.h.bf16 %v243_v4  ;;  %v247_v33 = vld [vmem:[%s400_s0 + $0x28] sm:$0xff]  }
   0x3   :  { %v290_v7 = vld [vmem:[%s402_s2] ss:$0 sm:$0xff]  ;;  %v221_v10 = vunpack.c.l.bf16 %v244_v5  ;;  %v222_v11 = vunpack.c.h.bf16 %v244_v5  ;;  %v225_v14 = vunpack.c.l.bf16 %v245_v6  ;;  %v226_v15 = vunpack.c.h.bf16 %v245_v6  ;;  %v248_v34 = vld [vmem:[%s400_s0 + $0x30] sm:$0xff]   ;;  %v249_v39 = vld [vmem:[%s400_s0 + $0x38] sm:$0xff]  }
   0x4   :  { %v53_v12 = vmul.f32 %v213_v2, %v276_v1  ;;  %v54_v13 = vmul.f32 %v214_v3, %v276_v1  ;;  %v55_v16 = vmul.f32 %v217_v8, %v276_v1  ;;  %v56_v17 = vmul.f32 %v218_v9, %v276_v1  ;;  %v246_v28 = vld [vmem:[%s400_s0 + $0x20] sm:$0xff]  }
   0x5   :  { %v57_v18 = vmul.f32 %v221_v10, %v276_v1  ;;  %v58_v19 = vmul.f32 %v222_v11, %v276_v1  ;;  %v59_v22 = vmul.f32 %v225_v14, %v276_v1  ;;  %v60_v23 = vmul.f32 %v226_v15, %v276_v1 }
   0x6   :  { %v76_v20 = vadd.f32 %v290_v7, %v53_v12  ;;  %v77_v21 = vadd.f32 %v290_v7, %v54_v13  ;;  %v78_v24 = vadd.f32 %v290_v7, %v55_v16  ;;  %v79_v25 = vadd.f32 %v290_v7, %v56_v17 }
   0x7   :  { %v80_v26 = vadd.f32 %v290_v7, %v57_v18  ;;  %v81_v27 = vadd.f32 %v290_v7, %v58_v19  ;;  %v82_v31 = vadd.f32 %v290_v7, %v59_v22  ;;  %v83_v32 = vadd.f32 %v290_v7, %v60_v23 }
   0x8   :  { %v195_v29 = vpack.c.bf16 %v76_v20, %v76_v20  ;;  %v196_v30 = vpack.c.bf16 %v77_v21, %v77_v21  ;;  %v197_v35 = vpack.c.bf16 %v78_v24, %v78_v24  ;;  %v198_v36 = vpack.c.bf16 %v79_v25, %v79_v25 }
   0x9   :  { %v199_v37 = vpack.c.bf16 %v80_v26, %v80_v26  ;;  %v200_v38 = vpack.c.bf16 %v81_v27, %v81_v27  ;;  %v201_v40 = vpack.c.bf16 %v82_v31, %v82_v31  ;;  %v202_v41 = vpack.c.bf16 %v83_v32, %v83_v32 }
   0xa   :  { %157 = vst.msk [vmem:[%s403_s3] sm:$0xf] %vm156_vm0, %v195_v29  ;;  %158 = vst.msk [vmem:[%s403_s3 + $0x4] sm:$0xf] %vm156_vm0, %v196_v30  ;;  %v229_v42 = vunpack.c.l.bf16 %v246_v28  ;;  %v230_v43 = vunpack.c.h.bf16 %v246_v28  ;;  %v233_v44 = vunpack.c.l.bf16 %v247_v33  ;;  %v234_v45 = vunpack.c.h.bf16 %v247_v33 }
   0xb   :  { %159 = vst.msk [vmem:[%s403_s3 + $0x8] sm:$0xf] %vm156_vm0, %v197_v35  ;;  %160 = vst.msk [vmem:[%s403_s3 + $0xc] sm:$0xf] %vm156_vm0, %v198_v36  ;;  %v237_v46 = vunpack.c.l.bf16 %v248_v34  ;;  %v238_v47 = vunpack.c.h.bf16 %v248_v34  ;;  %v241_v50 = vunpack.c.l.bf16 %v249_v39  ;;  %v242_v51 = vunpack.c.h.bf16 %v249_v39 }
   0xc   :  { %161 = vst.msk [vmem:[%s403_s3 + $0x10] sm:$0xf] %vm156_vm0, %v199_v37  ;;  %162 = vst.msk [vmem:[%s403_s3 + $0x14] sm:$0xf] %vm156_vm0, %v200_v38  ;;  %v61_v48 = vmul.f32 %v229_v42, %v276_v1  ;;  %v62_v49 = vmul.f32 %v230_v43, %v276_v1  ;;  %v63_v52 = vmul.f32 %v233_v44, %v276_v1 }
   0xd   :  { %163 = vst.msk [vmem:[%s403_s3 + $0x18] sm:$0xf] %vm156_vm0, %v201_v40  ;;  %164 = vst.msk [vmem:[%s403_s3 + $0x1c] sm:$0xf] %vm156_vm0, %v202_v41  ;;  %v64_v53 = vmul.f32 %v234_v45, %v276_v1  ;;  %v65_v54 = vmul.f32 %v237_v46, %v276_v1  ;;  %v66_v55 = vmul.f32 %v238_v47, %v276_v1 }
   0xe   :  { %v84_v56 = vadd.f32 %v290_v7, %v61_v48  ;;  %v85_v57 = vadd.f32 %v290_v7, %v62_v49  ;;  %v67_v58 = vmul.f32 %v241_v50, %v276_v1  ;;  %v68_v59 = vmul.f32 %v242_v51, %v276_v1 }
   0xf   :  { %v86_v60 = vadd.f32 %v290_v7, %v63_v52  ;;  %v87_v61 = vadd.f32 %v290_v7, %v64_v53  ;;  %v88_v62 = vadd.f32 %v290_v7, %v65_v54  ;;  %v89_v63 = vadd.f32 %v290_v7, %v66_v55 }
  0x10   :  { %v203_v0 = vpack.c.bf16 %v84_v56, %v84_v56  ;;  %v204_v2 = vpack.c.bf16 %v85_v57, %v85_v57  ;;  %v90_v3 = vadd.f32 %v290_v7, %v67_v58  ;;  %v91_v4 = vadd.f32 %v290_v7, %v68_v59 }
  0x11   :  { %v205_v5 = vpack.c.bf16 %v86_v60, %v86_v60  ;;  %v206_v6 = vpack.c.bf16 %v87_v61, %v87_v61  ;;  %v207_v8 = vpack.c.bf16 %v88_v62, %v88_v62  ;;  %v208_v9 = vpack.c.bf16 %v89_v63, %v89_v63 }
  0x12   :  { %165 = vst.msk [vmem:[%s403_s3 + $0x20] sm:$0xf] %vm156_vm0, %v203_v0  ;;  %166 = vst.msk [vmem:[%s403_s3 + $0x24] sm:$0xf] %vm156_vm0, %v204_v2  ;;  %v209_v1 = vpack.c.bf16 %v90_v3, %v90_v3  ;;  %v210_v10 = vpack.c.bf16 %v91_v4, %v91_v4 }
  0x13   :  { %167 = vst.msk [vmem:[%s403_s3 + $0x28] sm:$0xf] %vm156_vm0, %v205_v5  ;;  %168 = vst.msk [vmem:[%s403_s3 + $0x2c] sm:$0xf] %vm156_vm0, %v206_v6 }
  0x14   :  { %169 = vst.msk [vmem:[%s403_s3 + $0x30] sm:$0xf] %vm156_vm0, %v207_v8  ;;  %170 = vst.msk [vmem:[%s403_s3 + $0x34] sm:$0xf] %vm156_vm0, %v208_v9 }
  0x15   :  { %171 = vst.msk [vmem:[%s403_s3 + $0x38] sm:$0xf] %vm156_vm0, %v209_v1  ;;  %172 = vst.msk [vmem:[%s403_s3 + $0x3c] sm:$0xf] %vm156_vm0, %v210_v10 }

// kernel: unet_generator_forward.29
= control target key start
LH: loop header
LB: loop body
LE: loop exit
PB: predicated region body
PF: predicated region fallthrough
CT: control target
= control target key end

     0   :  { %vm14_vm0 = vcmask 253952   ;;  %v108_v0 = vmov 0.0   ;;  %vm53_vm1 = vcmask 261120   ;;  %s160_s0 = inlined_call_operand.vmem [shape: bf16[32,32], index: 0, kind: input, shape index: {}]   ;;  %s161_s1 = inlined_call_operand.vmem [shape: f32[1,32], index: 1, kind: output, shape index: {0}]   ;;  %s162_s2 = inlined_call_operand.vmem [shape: f32[1,32], index: 2, kind: output, shape index: {1}]  }
   0x1   :  { %15 = vst.msk [vmem:[%s161_s1] sm:$0x1] %vm14_vm0, %v108_v0  ;;  %v99_v1 = vld [vmem:[%s160_s0] sm:$0xff]   ;;  %v106_v2 = vld [vmem:[%s160_s0 + $0x8] sm:$0xff]   ;;  %16 = vst.msk [vmem:[%s162_s2] sm:$0x1] %vm14_vm0, %v108_v0 }
   0x2   :  { %v100_v3 = vunpack.c.l.bf16 %v99_v1  ;;  %v101_v4 = vunpack.c.h.bf16 %v99_v1  ;;  %v104_v5 = vunpack.c.l.bf16 %v106_v2  ;;  %v105_v6 = vunpack.c.h.bf16 %v106_v2 }
   0x4   :  { %v54_v7 = vsel %vm53_vm1, %v100_v3, 0.0  ;;  %v55_v8 = vsel %vm53_vm1, %v101_v4, 0.0  ;;  %v57_v9 = vsel %vm53_vm1, %v104_v5, 0.0  ;;  %v71_v11 = vmul.f32 %v100_v3, %v100_v3 }
   0x5   :  { %v56_v10 = vadd.f32 %v55_v8, %v54_v7  ;;  %v72_v12 = vmul.f32 %v101_v4, %v101_v4  ;;  %v73_v13 = vmul.f32 %v104_v5, %v104_v5  ;;  %v59_v14 = vsel %vm53_vm1, %v105_v6, 0.0 }
   0x6   :  { %v74_v15 = vmul.f32 %v105_v6, %v105_v6  ;;  %v75_v17 = vsel %vm53_vm1, %v71_v11, 0.0 }
   0x7   :  { %v58_v16 = vadd.f32 %v57_v9, %v56_v10  ;;  %v76_v18 = vsel %vm53_vm1, %v72_v12, 0.0  ;;  %v78_v19 = vsel %vm53_vm1, %v73_v13, 0.0 }
   0x8   :  { %v77_v20 = vadd.f32 %v76_v18, %v75_v17  ;;  %v80_v22 = vsel %vm53_vm1, %v74_v15, 0.0  ;;  %v52_v33 = vld [vmem:[%s161_s1] sm:$0x1] }
   0x9   :  { %v60_v21 = vadd.f32 %v59_v14, %v58_v16  ;;  %v70_v38 = vld [vmem:[%s162_s2] sm:$0x1] }
   0xa   :  { %v79_v23 = vadd.f32 %v78_v19, %v77_v20 }
   0xb   :  { %v61_v24 = vrot.slane %v60_v21, 4 }
   0xc   :  { %v81_v25 = vadd.f32 %v80_v22, %v79_v23 }
   0xd   :  { %v62_v26 = vadd.f32 %v61_v24, %v60_v21 }
   0xe   :  { %v82_v27 = vrot.slane %v81_v25, 4 }
   0xf   :  { %v63_v28 = vrot.slane %v62_v26, 2 }
  0x10   :  { %v83_v29 = vadd.f32 %v82_v27, %v81_v25 }
  0x11   :  { %v64_v30 = vadd.f32 %v63_v28, %v62_v26 }
  0x12   :  { %v84_v31 = vrot.slane %v83_v29, 2 }
  0x13   :  { %v65_v32 = vrot.slane %v64_v30, 1 }
  0x14   :  { %v85_v34 = vadd.f32 %v84_v31, %v83_v29 }
  0x15   :  { %v66_v35 = vadd.f32 %v65_v32, %v64_v30 }
  0x16   :  { %v86_v36 = vrot.slane %v85_v34, 1 }
  0x17   :  { %v67_v37 = vadd.f32 %v66_v35, %v52_v33 }
  0x18   :  { %v87_v39 = vadd.f32 %v86_v36, %v85_v34 }
  0x19   :  { %69 = vst.msk [vmem:[%s161_s1] sm:$0x1] %vm14_vm0, %v67_v37 }
  0x1a   :  { %v88_v40 = vadd.f32 %v87_v39, %v70_v38 }
  0x1c   :  { %89 = vst.msk [vmem:[%s162_s2] sm:$0x1] %vm14_vm0, %v88_v40 }

// kernel: unet_generator_forward.30
= control target key start
LH: loop header
LB: loop body
LE: loop exit
PB: predicated region body
PF: predicated region fallthrough
CT: control target
= control target key end

     0   :  { %vm60_vm0 = vcmask 257024   ;;  %s132_s0 = inlined_call_operand.vmem [shape: bf16[32,32], index: 0, kind: input, shape index: {}]   ;;  %s133_s1 = inlined_call_operand.vmem [shape: f32[1,32], index: 1, kind: input, shape index: {}]   ;;  %s134_s2 = inlined_call_operand.vmem [shape: f32[1,32], index: 2, kind: input, shape index: {}]   ;;  %s135_s3 = inlined_call_operand.vmem [shape: bf16[32,32], index: 3, kind: output, shape index: {}]  }
   0x1   :  { %v80_v0 = vld [vmem:[%s132_s0] sm:$0xff]   ;;  %v87_v4 = vld [vmem:[%s132_s0 + $0x8] sm:$0xff]  }
   0x2   :  { %v69_v1 = vld [vmem:[%s133_s1] ss:$0 sm:$0xff]  ;;  %v81_v2 = vunpack.c.l.bf16 %v80_v0  ;;  %v82_v3 = vunpack.c.h.bf16 %v80_v0  ;;  %v85_v6 = vunpack.c.l.bf16 %v87_v4  ;;  %v86_v7 = vunpack.c.h.bf16 %v87_v4 }
   0x3   :  { %v70_v5 = vld [vmem:[%s134_s2] ss:$0 sm:$0xff] }
   0x4   :  { %v29_v8 = vmul.f32 %v81_v2, %v69_v1  ;;  %v30_v9 = vmul.f32 %v82_v3, %v69_v1  ;;  %v31_v10 = vmul.f32 %v85_v6, %v69_v1  ;;  %v32_v11 = vmul.f32 %v86_v7, %v69_v1 }
   0x6   :  { %v40_v12 = vadd.f32 %v70_v5, %v29_v8  ;;  %v41_v13 = vadd.f32 %v70_v5, %v30_v9  ;;  %v42_v14 = vadd.f32 %v70_v5, %v31_v10  ;;  %v43_v15 = vadd.f32 %v70_v5, %v32_v11 }
   0x8   :  { %v75_v16 = vpack.c.bf16 %v40_v12, %v40_v12  ;;  %v76_v17 = vpack.c.bf16 %v41_v13, %v41_v13  ;;  %v77_v18 = vpack.c.bf16 %v42_v14, %v42_v14  ;;  %v78_v19 = vpack.c.bf16 %v43_v15, %v43_v15 }
   0xa   :  { %61 = vst.msk [vmem:[%s135_s3] sm:$0xf] %vm60_vm0, %v75_v16  ;;  %62 = vst.msk [vmem:[%s135_s3 + $0x4] sm:$0xf] %vm60_vm0, %v76_v17 }
   0xb   :  { %63 = vst.msk [vmem:[%s135_s3 + $0x8] sm:$0xf] %vm60_vm0, %v77_v18  ;;  %64 = vst.msk [vmem:[%s135_s3 + $0xc] sm:$0xf] %vm60_vm0, %v78_v19 }

// kernel: unet_generator_forward.28
= control target key start
LH: loop header
LB: loop body
LE: loop exit
PB: predicated region body
PF: predicated region fallthrough
CT: control target
= control target key end

     0   :  { %s476_s1 = inlined_call_operand.vmem [shape: bf16[256,128], index: 1, kind: input, shape index: {}]   ;;  %s477_s0 = inlined_call_operand.vmem [shape: bf16[32,256], index: 0, kind: input, shape index: {}]   ;;  %s478_s2 = inlined_call_operand.vmem [shape: f32[1,128], index: 2, kind: input, shape index: {}]   ;;  %s479_s3 = inlined_call_operand.vmem [shape: bf16[32,128], index: 3, kind: output, shape index: {}]  }
   0x1   :  { %v371_v0 = vld [vmem:[%s476_s1 + $0x78] sm:$0xff]   ;;  %v373_v2 = vld [vmem:[%s476_s1 + $0x70] sm:$0xff]   ;;  %v375_v4 = vld [vmem:[%s476_s1 + $0x68] sm:$0xff]  }
   0x2   :  { %v372_v1 = vld [vmem:[%s476_s1 + $0x38] sm:$0xff]   ;;  %327 = vmatprep.subr.bf16.mxu0 %v371_v0  ;;  %355 = vmatprep.subr.bf16.mxu1 %v371_v0  ;;  %v374_v3 = vld [vmem:[%s476_s1 + $0x30] sm:$0xff]   ;;  %v376_v5 = vld [vmem:[%s476_s1 + $0x28] sm:$0xff]  }
   0x3   :  { %328 = vmatpush3.bf16.msra.mxu0 %v372_v1  ;;  %363 = vmatpush3.bf16.msra.mxu1 %v372_v1  ;;  %v377_v6 = vld [vmem:[%s476_s1 + $0x60] sm:$0xff]   ;;  %v379_v8 = vld [vmem:[%s476_s1 + $0x58] sm:$0xff]   ;;  %v381_v10 = vld [vmem:[%s476_s1 + $0x50] sm:$0xff]  }
   0x4   :  { %329 = vmatprep.subr.bf16.mxu0 %v373_v2  ;;  %356 = vmatprep.subr.bf16.mxu1 %v373_v2  ;;  %v378_v7 = vld [vmem:[%s476_s1 + $0x20] sm:$0xff]   ;;  %v380_v9 = vld [vmem:[%s476_s1 + $0x18] sm:$0xff]   ;;  %v25_v12 = vld [vmem:[%s477_s0 + $0x8] sm:$0xff] }
   0x5   :  { %v24_v11 = vld [vmem:[%s477_s0] sm:$0xff]  ;;  %v26_v13 = vld [vmem:[%s477_s0 + $0x10] sm:$0xff]  ;;  %v29_v15 = vmul.bf16 1045249613, %v25_v12  ;;  %v27_v16 = vld [vmem:[%s477_s0 + $0x18] sm:$0xff] }
   0x6   :  { %v28_v14 = vmul.bf16 1045249613, %v24_v11  ;;  %v30_v17 = vmul.bf16 1045249613, %v26_v13  ;;  %v31_v18 = vmul.bf16 1045249613, %v27_v16 }
   0x7   :  { %330 = vmatpush3.bf16.msra.mxu0 %v374_v3  ;;  %364 = vmatpush3.bf16.msra.mxu1 %v374_v3  ;;  %v382_v19 = vld [vmem:[%s476_s1 + $0x10] sm:$0xff]   ;;  %v33_v21 = vmax.bf16 %v29_v15, %v25_v12  ;;  %v383_v22 = vld [vmem:[%s476_s1 + $0x48] sm:$0xff]   ;;  %v385_v28 = vld [vmem:[%s476_s1 + $0x40] sm:$0xff]  }
   0x8   :  { %331 = vmatprep.subr.bf16.mxu0 %v375_v4  ;;  %357 = vmatprep.subr.bf16.mxu1 %v375_v4  ;;  %v32_v20 = vmax.bf16 %v28_v14, %v24_v11  ;;  %v34_v23 = vmax.bf16 %v30_v17, %v26_v13  ;;  %v35_v24 = vmax.bf16 %v31_v18, %v27_v16  ;;  %v384_v27 = vld [vmem:[%s476_s1 + $0x8] sm:$0xff]   ;;  %v386_v29 = vld [vmem:[%s476_s1] sm:$0xff]  }
   0x9   :  { %v307_v40 = vld [vmem:[%s478_s2] ss:$0 sm:$0xff] }
   0xa   :  { %v288_v25 = vcombine.high %v32_v20, %v33_v21  ;;  %v290_v26 = vcombine.high %v34_v23, %v35_v24  ;;  %v287_v30 = vcombine.low %v32_v20, %v33_v21  ;;  %v289_v31 = vcombine.low %v34_v23, %v35_v24 }
   0xb   :  { %332 = vmatpush3.bf16.msra.mxu0 %v376_v5  ;;  %365 = vmatpush3.bf16.msra.mxu1 %v376_v5 }
   0xc   :  { %333 = vmatprep.subr.bf16.mxu0 %v377_v6  ;;  %358 = vmatprep.subr.bf16.mxu1 %v377_v6 }
   0xd   :  { %220 = vmatprep.mubr.bf16.mxu0 %v288_v25  ;;  %228 = vmatprep.mubr.bf16.mxu1 %v290_v26 }
   0xf   :  { %334 = vmatpush3.bf16.msra.mxu0 %v378_v7  ;;  %366 = vmatpush3.bf16.msra.mxu1 %v378_v7 }
  0x10   :  { %335 = vmatprep.subr.bf16.mxu0 %v379_v8  ;;  %359 = vmatprep.subr.bf16.mxu1 %v379_v8 }
  0x13   :  { %336 = vmatpush3.bf16.msra.mxu0 %v380_v9  ;;  %367 = vmatpush3.bf16.msra.mxu1 %v380_v9 }
  0x14   :  { %337 = vmatprep.subr.bf16.mxu0 %v381_v10  ;;  %360 = vmatprep.subr.bf16.mxu1 %v381_v10 }
  0x17   :  { %338 = vmatpush3.bf16.msra.mxu0 %v382_v19  ;;  %368 = vmatpush3.bf16.msra.mxu1 %v382_v19 }
  0x18   :  { %339 = vmatprep.subr.bf16.mxu0 %v383_v22  ;;  %361 = vmatprep.subr.bf16.mxu1 %v383_v22 }
  0x1b   :  { %340 = vmatpush3.bf16.msra.mxu0 %v384_v27  ;;  %369 = vmatpush3.bf16.msra.mxu1 %v384_v27 }
  0x1c   :  { %341 = vmatprep.subr.bf16.mxu0 %v385_v28  ;;  %362 = vmatprep.subr.bf16.mxu1 %v385_v28 }
  0x1f   :  { %342 = vmatpush3.bf16.msra.mxu0 %v386_v29  ;;  %370 = vmatpush3.bf16.msra.mxu1 %v386_v29 }
  0x22   :  { %221 = vmatmul.mubr.bf16.vlgmr.msra.gmra.mxu0 %v287_v30  ;;  %229 = vmatmul.mubr.bf16.vlgmr.msra.gmra.mxu1 %v289_v31 }
  0xe2   :  { %v343_v32 = vpop.f32.mrf.mxu0  ;;  %v349_v33 = vpop.f32.mrf.mxu1 }
  0xe4   :  { %v344_v34 = vpop.f32.mrf.mxu0  ;;  %v350_v35 = vpop.f32.mrf.mxu1 }
  0xe5   :  { %v345_v38 = vadd.f32 %v344_v34, %v343_v32  ;;  %v351_v39 = vadd.f32 %v350_v35, %v349_v33 }
  0xe6   :  { %v346_v36 = vpop.f32.mrf.mxu0  ;;  %v352_v37 = vpop.f32.mrf.mxu1 }
  0xe7   :  { %v259_v45 = vadd.f32 %v345_v38, %v307_v40  ;;  %v261_v46 = vadd.f32 %v351_v39, %v307_v40 }
  0xe8   :  { %v347_v41 = vpop.f32.mrf.mxu0  ;;  %v353_v42 = vpop.f32.mrf.mxu1 }
  0xe9   :  { %v348_v43 = vadd.f32 %v347_v41, %v346_v36  ;;  %v354_v44 = vadd.f32 %v353_v42, %v352_v37 }
  0xeb   :  { %v260_v47 = vadd.f32 %v348_v43, %v307_v40  ;;  %v262_v48 = vadd.f32 %v354_v44, %v307_v40 }
  0xed   :  { %v319_v49 = vpack.c.bf16 %v260_v47, %v259_v45  ;;  %v324_v50 = vpack.c.bf16 %v262_v48, %v261_v46 }
  0xef   :  { %320 = vst [vmem:[%s479_s3] sm:$0xff] %v319_v49   ;;  %326 = vst [vmem:[%s479_s3 + $0x8] sm:$0xff] %v324_v50  }

// kernel: unet_generator_forward.33
= control target key start
LH: loop header
LB: loop body
LE: loop exit
PB: predicated region body
PF: predicated region fallthrough
CT: control target
= control target key end

     0   :  { %vm33_vm0 = vcmask 519168   ;;  %s73_s0 = inlined_call_operand.vmem [shape: bf16[8,64], index: 0, kind: input, shape index: {}]   ;;  %s74_s1 = inlined_call_operand.vmem [shape: f32[1,64], index: 1, kind: input, shape index: {}]   ;;  %s75_s2 = inlined_call_operand.vmem [shape: f32[1,64], index: 2, kind: input, shape index: {}]   ;;  %s76_s3 = inlined_call_operand.vmem [shape: bf16[8,64], index: 3, kind: output, shape index: {}]  }
   0x1   :  { %v14_v0 = vld [vmem:[%s73_s0] sm:$0xf] }
   0x2   :  { %v39_v1 = vld [vmem:[%s74_s1] ss:$0 sm:$0xff]  ;;  %v15_v2 = vunpack.c.l.bf16 %v14_v0 }
   0x3   :  { %v40_v3 = vld [vmem:[%s75_s2] ss:$0 sm:$0xff] }
   0x4   :  { %v23_v4 = vmul.f32 %v39_v1, %v15_v2 }
   0x6   :  { %v31_v5 = vadd.f32 %v40_v3, %v23_v4 }
   0x8   :  { %v32_v6 = vpack.c.bf16 %v31_v5, %v31_v5 }
   0xa   :  { %34 = vst.msk [vmem:[%s76_s3] sm:$0xf] %vm33_vm0, %v32_v6 }

// kernel: unet_generator_forward.32
= control target key start
LH: loop header
LB: loop body
LE: loop exit
PB: predicated region body
PF: predicated region fallthrough
CT: control target
= control target key end

     0   :  { %vm14_vm0 = vcmask 516096   ;;  %v60_v0 = vmov 0.0   ;;  %vm29_vm1 = vcmask 523264   ;;  %s101_s0 = inlined_call_operand.vmem [shape: bf16[8,64], index: 0, kind: input, shape index: {}]   ;;  %s102_s1 = inlined_call_operand.vmem [shape: f32[1,64], index: 1, kind: output, shape index: {0}]   ;;  %s103_s2 = inlined_call_operand.vmem [shape: f32[1,64], index: 2, kind: output, shape index: {1}]  }
   0x1   :  { %15 = vst.msk [vmem:[%s102_s1] sm:$0x1] %vm14_vm0, %v60_v0  ;;  %v17_v1 = vld [vmem:[%s101_s0] sm:$0xf]  ;;  %16 = vst.msk [vmem:[%s103_s2] sm:$0x1] %vm14_vm0, %v60_v0 }
   0x2   :  { %v18_v2 = vunpack.c.l.bf16 %v17_v1 }
   0x4   :  { %v30_v3 = vsel %vm29_vm1, %v18_v2, 0.0  ;;  %v41_v4 = vmul.f32 %v18_v2, %v18_v2 }
   0x5   :  { %v31_v5 = vrot.slane %v30_v3, 4 }
   0x6   :  { %v42_v6 = vsel %vm29_vm1, %v41_v4, 0.0 }
   0x7   :  { %v32_v7 = vadd.f32 %v31_v5, %v30_v3  ;;  %v43_v8 = vrot.slane %v42_v6, 4 }
   0x8   :  { %v28_v15 = vld [vmem:[%s102_s1] sm:$0x1] }
   0x9   :  { %v33_v9 = vrot.slane %v32_v7, 2  ;;  %v44_v10 = vadd.f32 %v43_v8, %v42_v6  ;;  %v40_v18 = vld [vmem:[%s103_s2] sm:$0x1] }
   0xb   :  { %v34_v11 = vadd.f32 %v33_v9, %v32_v7  ;;  %v45_v12 = vrot.slane %v44_v10, 2 }
   0xd   :  { %v35_v13 = vrot.slane %v34_v11, 1  ;;  %v46_v14 = vadd.f32 %v45_v12, %v44_v10 }
   0xf   :  { %v36_v16 = vadd.f32 %v35_v13, %v34_v11  ;;  %v47_v17 = vrot.slane %v46_v14, 1 }
  0x11   :  { %v37_v19 = vadd.f32 %v36_v16, %v28_v15  ;;  %v48_v20 = vadd.f32 %v47_v17, %v46_v14 }
  0x13   :  { %39 = vst.msk [vmem:[%s102_s1] sm:$0x1] %vm14_vm0, %v37_v19  ;;  %v49_v21 = vadd.f32 %v48_v20, %v40_v18 }
  0x15   :  { %50 = vst.msk [vmem:[%s103_s2] sm:$0x1] %vm14_vm0, %v49_v21 }

// kernel: unet_generator_forward.31
= control target key start
LH: loop header
LB: loop body
LE: loop exit
PB: predicated region body
PF: predicated region fallthrough
CT: control target
= control target key end

     0   :  { %s639_s1 = inlined_call_operand.vmem [shape: bf16[512,128], index: 1, kind: input, shape index: {}]   ;;  %s640_s0 = inlined_call_operand.vmem [shape: bf16[8,512], index: 0, kind: input, shape index: {}]   ;;  %s641_s2 = inlined_call_operand.vmem [shape: f32[1,128], index: 2, kind: input, shape index: {}]   ;;  %s642_s3 = inlined_call_operand.vmem [shape: bf16[8,128], index: 3, kind: output, shape index: {}]  }
   0x1   :  { %v479_v0 = vld [vmem:[%s639_s1 + $0x78] sm:$0xff]   ;;  %v483_v4 = vld [vmem:[%s639_s1 + $0x70] sm:$0xff]   ;;  %v487_v8 = vld [vmem:[%s639_s1 + $0x68] sm:$0xff]  }
   0x2   :  { %v480_v1 = vld [vmem:[%s639_s1 + $0xf8] sm:$0xff]   ;;  %435 = vmatprep.subr.bf16.mxu0 %v479_v0  ;;  %v484_v5 = vld [vmem:[%s639_s1 + $0xf0] sm:$0xff]   ;;  %v488_v9 = vld [vmem:[%s639_s1 + $0xe8] sm:$0xff]  }
   0x3   :  { %v481_v2 = vld [vmem:[%s639_s1 + $0x38] sm:$0xff]   ;;  %457 = vmatprep.subr.bf16.mxu1 %v480_v1  ;;  %v485_v6 = vld [vmem:[%s639_s1 + $0x30] sm:$0xff]   ;;  %v489_v10 = vld [vmem:[%s639_s1 + $0x28] sm:$0xff]  }
   0x4   :  { %v482_v3 = vld [vmem:[%s639_s1 + $0xb8] sm:$0xff]   ;;  %436 = vmatpush3.bf16.msra.mxu0 %v481_v2  ;;  %v486_v7 = vld [vmem:[%s639_s1 + $0xb0] sm:$0xff]   ;;  %v490_v11 = vld [vmem:[%s639_s1 + $0xa8] sm:$0xff]  }
   0x5   :  { %458 = vmatpush3.bf16.msra.mxu1 %v482_v3  ;;  %437 = vmatprep.subr.bf16.mxu0 %v483_v4  ;;  %v491_v12 = vld [vmem:[%s639_s1 + $0x60] sm:$0xff]   ;;  %v495_v16 = vld [vmem:[%s639_s1 + $0x58] sm:$0xff]   ;;  %v499_v20 = vld [vmem:[%s639_s1 + $0x50] sm:$0xff]  }
   0x6   :  { %459 = vmatprep.subr.bf16.mxu1 %v484_v5  ;;  %v492_v13 = vld [vmem:[%s639_s1 + $0xe0] sm:$0xff]   ;;  %v496_v17 = vld [vmem:[%s639_s1 + $0xd8] sm:$0xff]   ;;  %v500_v21 = vld [vmem:[%s639_s1 + $0xd0] sm:$0xff]  }
   0x7   :  { %v493_v14 = vld [vmem:[%s639_s1 + $0x20] sm:$0xff]   ;;  %v497_v18 = vld [vmem:[%s639_s1 + $0x18] sm:$0xff]   ;;  %v501_v22 = vld [vmem:[%s639_s1 + $0x10] sm:$0xff]  }
   0x8   :  { %438 = vmatpush3.bf16.msra.mxu0 %v485_v6  ;;  %v494_v15 = vld [vmem:[%s639_s1 + $0xa0] sm:$0xff]   ;;  %v498_v19 = vld [vmem:[%s639_s1 + $0x98] sm:$0xff]   ;;  %v502_v23 = vld [vmem:[%s639_s1 + $0x90] sm:$0xff]  }
   0x9   :  { %460 = vmatpush3.bf16.msra.mxu1 %v486_v7  ;;  %439 = vmatprep.subr.bf16.mxu0 %v487_v8  ;;  %v503_v24 = vld [vmem:[%s639_s1 + $0x48] sm:$0xff]   ;;  %v507_v28 = vld [vmem:[%s639_s1 + $0x40] sm:$0xff]  }
   0xa   :  { %461 = vmatprep.subr.bf16.mxu1 %v488_v9  ;;  %v504_v25 = vld [vmem:[%s639_s1 + $0xc8] sm:$0xff]   ;;  %v508_v29 = vld [vmem:[%s639_s1 + $0xc0] sm:$0xff]  }
   0xb   :  { %v505_v26 = vld [vmem:[%s639_s1 + $0x8] sm:$0xff]   ;;  %v509_v30 = vld [vmem:[%s639_s1] sm:$0xff]  }
   0xc   :  { %440 = vmatpush3.bf16.msra.mxu0 %v489_v10  ;;  %v506_v27 = vld [vmem:[%s639_s1 + $0x88] sm:$0xff]   ;;  %v510_v31 = vld [vmem:[%s639_s1 + $0x80] sm:$0xff]  }
   0xd   :  { %462 = vmatpush3.bf16.msra.mxu1 %v490_v11  ;;  %441 = vmatprep.subr.bf16.mxu0 %v491_v12  ;;  %v21_v32 = vld [vmem:[%s640_s0] sm:$0xff]  ;;  %v22_v33 = vld [vmem:[%s640_s0 + $0x8] sm:$0xff] }
   0xe   :  { %463 = vmatprep.subr.bf16.mxu1 %v492_v13  ;;  %v23_v34 = vmul.bf16 1045249613, %v21_v32  ;;  %v24_v35 = vmul.bf16 1045249613, %v22_v33  ;;  %v434_v48 = vld [vmem:[%s641_s2] ss:$0 sm:$0xff] }
  0x10   :  { %442 = vmatpush3.bf16.msra.mxu0 %v493_v14  ;;  %v25_v36 = vmax.bf16 %v23_v34, %v21_v32  ;;  %v26_v37 = vmax.bf16 %v24_v35, %v22_v33 }
  0x11   :  { %464 = vmatpush3.bf16.msra.mxu1 %v494_v15  ;;  %443 = vmatprep.subr.bf16.mxu0 %v495_v16 }
  0x12   :  { %465 = vmatprep.subr.bf16.mxu1 %v496_v17  ;;  %v399_v38 = vcombine.high %v25_v36, %v25_v36  ;;  %v401_v39 = vcombine.high %v26_v37, %v26_v37  ;;  %v398_v40 = vcombine.low %v25_v36, %v25_v36  ;;  %v400_v41 = vcombine.low %v26_v37, %v26_v37 }
  0x14   :  { %444 = vmatpush3.bf16.msra.mxu0 %v497_v18  ;;  %330 = vmatprep.mubr.bf16.mxu0 %v399_v38 }
  0x15   :  { %466 = vmatpush3.bf16.msra.mxu1 %v498_v19  ;;  %445 = vmatprep.subr.bf16.mxu0 %v499_v20 }
  0x16   :  { %467 = vmatprep.subr.bf16.mxu1 %v500_v21  ;;  %370 = vmatprep.mubr.bf16.mxu1 %v401_v39 }
  0x18   :  { %446 = vmatpush3.bf16.msra.mxu0 %v501_v22 }
  0x19   :  { %468 = vmatpush3.bf16.msra.mxu1 %v502_v23  ;;  %447 = vmatprep.subr.bf16.mxu0 %v503_v24 }
  0x1a   :  { %469 = vmatprep.subr.bf16.mxu1 %v504_v25 }
  0x1c   :  { %448 = vmatpush3.bf16.msra.mxu0 %v505_v26 }
  0x1d   :  { %470 = vmatpush3.bf16.msra.mxu1 %v506_v27  ;;  %449 = vmatprep.subr.bf16.mxu0 %v507_v28 }
  0x1e   :  { %471 = vmatprep.subr.bf16.mxu1 %v508_v29 }
  0x20   :  { %450 = vmatpush3.bf16.msra.mxu0 %v509_v30 }
  0x21   :  { %472 = vmatpush3.bf16.msra.mxu1 %v510_v31 }
  0x23   :  { %331 = vmatmul.mubr.bf16.vlgmr.msra.gmra.mxu0 %v398_v40 }
  0x24   :  { %371 = vmatmul.mubr.bf16.vlgmr.msra.gmra.mxu1 %v400_v41 }
  0xe3   :  { %v451_v42 = vpop.f32.mrf.mxu0 }
  0xe4   :  { %v473_v43 = vpop.f32.mrf.mxu1 }
  0xe5   :  { %v452_v44 = vpop.f32.mrf.mxu0 }
  0xe6   :  { %v474_v45 = vpop.f32.mrf.mxu1  ;;  %v453_v46 = vadd.f32 %v452_v44, %v451_v42 }
  0xe7   :  { %v475_v47 = vadd.f32 %v474_v45, %v473_v43  ;;  %v454_v49 = vpop.f32.mrf.mxu0 }
  0xe8   :  { %v476_v50 = vpop.f32.mrf.mxu1 }
  0xe9   :  { %v373_v51 = vadd.f32 %v475_v47, %v453_v46  ;;  %v455_v52 = vpop.f32.mrf.mxu0 }
  0xea   :  { %v477_v53 = vpop.f32.mrf.mxu1 }
  0xeb   :  { %v391_v54 = vadd.f32 %v434_v48, %v373_v51 }
  0xed   :  { %v392_v55 = vpack.c.bf16 %v391_v54, %v391_v54 }
  0xef   :  { %393 = vst [vmem:[%s642_s3] sm:$0xf] %v392_v55 }

// kernel: squeeze.8
= control target key start
LH: loop header
LB: loop body
LE: loop exit
PB: predicated region body
PF: predicated region fallthrough
CT: control target
= control target key end

     0   :  { %vm8_vm0 = vcmask 523264   ;;  %s42_s0 = inlined_call_operand.vmem [shape: f32[256], index: 0, kind: input, shape index: {}]   ;;  %s43_s1 = inlined_call_operand.vmem [shape: f32[4,64], index: 1, kind: output, shape index: {}]  }
   0x1   :  { %v5_v0 = vld [vmem:[%s42_s0] sm:$0x3]  ;;  %s25_s0 = smov 64  }
   0x2   :  { %6 = vst [vmem:[#allocation1] sm:$0x3] %v5_v0 }
   0x9   :  { %v10_v1 = vld [vmem:[#allocation1] sm:$0x3]  }
   0xa   :  { %v7_v2 = vld [vmem:[#allocation1] sm:$0x3]   ;;  %11 = vrot.lane.b32.xlu0 %v10_v1, %s25_s0 }
   0xb   :  { %9 = vst.msk [vmem:[#allocation0] ss:$2 sm:$0x3] %vm8_vm0, %v7_v2  }
  0x7c   :  { %v12_v3 = vpop.permute.xlu0 %11  }
  0x7d   :  { %15 = vst.msk [vmem:[#allocation0 + $0x1] ss:$2 sm:$0x3] %vm8_vm0, %v12_v3  }
  0x84   :  { %v20_v4 = vld [vmem:[#allocation0] sm:$0xf] }
  0x85   :  { %23 = vst [vmem:[%s43_s1] sm:$0xf] %v20_v4 }

// kernel: tile.47
= control target key start
LH: loop header
LB: loop body
LE: loop exit
PB: predicated region body
PF: predicated region fallthrough
CT: control target
= control target key end

     0   :  { %s22_s0 = inlined_call_operand.vmem [shape: f32[64], index: 0, kind: input, shape index: {}]   ;;  %s23_s1 = inlined_call_operand.vmem [shape: f32[4,64], index: 1, kind: output, shape index: {}]  }
   0x1   :  { %v4_v0 = vld [vmem:[%s22_s0] ss:$0 sm:$0xff] }
   0x2   :  { %5 = vst [vmem:[%s23_s1] sm:$0xf] %v4_v0 }

// kernel: unet_generator_forward.36
= control target key start
LH: loop header
LB: loop body
LE: loop exit
PB: predicated region body
PF: predicated region fallthrough
CT: control target
= control target key end

     0   :  { %v14_v0 = vlaneseq  ;;  %v115_v6 = vmov 0.0   ;;  %v116_v13 = vmov 1966171168   ;;  %s165_s0 = inlined_call_operand.vmem [shape: bf16[8,256], index: 0, kind: input, shape index: {}]   ;;  %s166_s1 = inlined_call_operand.vmem [shape: f32[1,256], index: 1, kind: output, shape index: {0}]   ;;  %s167_s2 = inlined_call_operand.vmem [shape: f32[1,256], index: 2, kind: output, shape index: {1}]  }
   0x1   :  { %v20_v1 = vld [vmem:[%s165_s0] sm:$0xff]  ;;  %v50_v14 = vunpack.c.l.s4 %v116_v13 }
   0x2   :  { %vm135_vm0 = vcmp.lt.s32.totalorder %v14_v0, 256  ;;  %v21_v3 = vunpack.c.l.bf16 %v20_v1  ;;  %v22_v4 = vunpack.c.h.bf16 %v20_v1  ;;  %v25_v5 = vshrl.u32 %v14_v0, 7 }
   0x3   :  { %18 = vst.msk [vmem:[%s166_s1] sm:$0x3] %vm135_vm0, %v115_v6  ;;  %19 = vst.msk [vmem:[%s167_s2] sm:$0x3] %vm135_vm0, %v115_v6  ;;  %v51_v23 = vunpack.c.0.s8 %v50_v14 }
   0x4   :  { %vm28_vm1 = vcmp.lt.s32.totalorder %v25_v5, 2 }
   0x5   :  { %v31_v7 = vsel %vm28_vm1, %v21_v3, 0.0  ;;  %v32_v8 = vsel %vm28_vm1, %v22_v4, 0.0  ;;  %v54_v32 = vsub.s32 %v51_v23, %v25_v5 }
   0x6   :  { %v34_v9 = vrot.slane %v31_v7, 4  ;;  %v40_v10 = vrot.slane %v32_v8, 4  ;;  %v71_v11 = vmul.f32 %v31_v7, %v31_v7  ;;  %v72_v12 = vmul.f32 %v32_v8, %v32_v8 }
   0x8   :  { %v35_v15 = vadd.f32 %v34_v9, %v31_v7  ;;  %v41_v16 = vadd.f32 %v40_v10, %v32_v8  ;;  %v73_v17 = vrot.slane %v71_v11, 4  ;;  %v79_v18 = vrot.slane %v72_v12, 4 }
   0xa   :  { %v36_v19 = vrot.slane %v35_v15, 2  ;;  %v42_v20 = vrot.slane %v41_v16, 2  ;;  %v74_v21 = vadd.f32 %v73_v17, %v71_v11  ;;  %v80_v22 = vadd.f32 %v79_v18, %v72_v12  ;;  %v33_v42 = vld [vmem:[%s166_s1] sm:$0x3] }
   0xb   :  { %v70_v45 = vld [vmem:[%s167_s2] sm:$0x3] }
   0xc   :  { %v37_v24 = vadd.f32 %v36_v19, %v35_v15  ;;  %v43_v25 = vadd.f32 %v42_v20, %v41_v16  ;;  %v75_v26 = vrot.slane %v74_v21, 2  ;;  %v81_v27 = vrot.slane %v80_v22, 2 }
   0xe   :  { %v38_v28 = vrot.slane %v37_v24, 1  ;;  %v44_v29 = vrot.slane %v43_v25, 1  ;;  %v76_v30 = vadd.f32 %v75_v26, %v74_v21  ;;  %v82_v31 = vadd.f32 %v81_v27, %v80_v22 }
  0x10   :  { %v39_v33 = vadd.f32 %v38_v28, %v37_v24  ;;  %v45_v34 = vadd.f32 %v44_v29, %v43_v25  ;;  %v77_v35 = vrot.slane %v76_v30, 1  ;;  %v83_v36 = vrot.slane %v82_v31, 1 }
  0x12   :  { %v48_v37 = vcombine.low %v39_v33, %v45_v34  ;;  %v78_v38 = vadd.f32 %v77_v35, %v76_v30  ;;  %v84_v39 = vadd.f32 %v83_v36, %v82_v31 }
  0x14   :  { %v55_v40 = vrot.slane %v48_v37, %v54_v32  ;;  %v87_v41 = vcombine.low %v78_v38, %v84_v39 }
  0x16   :  { %v62_v43 = vrot.slane %v55_v40, %v54_v32  ;;  %v94_v44 = vrot.slane %v87_v41, %v54_v32 }
  0x18   :  { %v64_v46 = vadd.f32 %v62_v43, %v33_v42  ;;  %v101_v47 = vrot.slane %v94_v44, %v54_v32 }
  0x1a   :  { %69 = vst.msk [vmem:[%s166_s1] sm:$0x3] %vm135_vm0, %v64_v46  ;;  %v103_v48 = vadd.f32 %v101_v47, %v70_v45 }
  0x1c   :  { %104 = vst.msk [vmem:[%s167_s2] sm:$0x3] %vm135_vm0, %v103_v48 }

// kernel: unet_generator_forward.35
= control target key start
LH: loop header
LB: loop body
LE: loop exit
PB: predicated region body
PF: predicated region fallthrough
CT: control target
= control target key end

     0   :  { %v894_v48 = vmov 0   ;;  %s1174_s1 = inlined_call_operand.vmem [shape: bf16[640,256], index: 1, kind: input, shape index: {}]   ;;  %s1175_s0 = inlined_call_operand.vmem [shape: bf16[8,640], index: 0, kind: input, shape index: {}]   ;;  %s1176_s2 = inlined_call_operand.vmem [shape: f32[1,256], index: 2, kind: input, shape index: {}]   ;;  %s1177_s3 = inlined_call_operand.vmem [shape: bf16[8,256], index: 3, kind: output, shape index: {}]  }
   0x1   :  { %v774_v0 = vld [vmem:[%s1174_s1 + $0x74] ss:$8 sps:$4 sm:$0xff]   ;;  %v778_v2 = vld [vmem:[%s1174_s1 + $0x70] ss:$8 sps:$4 sm:$0xff]   ;;  %v780_v4 = vld [vmem:[%s1174_s1 + $0x64] ss:$8 sps:$4 sm:$0xff]  }
   0x2   :  { %v776_v1 = vld [vmem:[%s1174_s1 + $0x174] ss:$8 sps:$4 sm:$0xff]   ;;  %527 = vmatprep.subr.bf16.mxu0 %v774_v0  ;;  %v779_v3 = vld [vmem:[%s1174_s1 + $0x170] ss:$8 sps:$4 sm:$0xff]   ;;  %v782_v5 = vld [vmem:[%s1174_s1 + $0x164] ss:$8 sps:$4 sm:$0xff]  }
   0x3   :  { %568 = vmatprep.subr.bf16.mxu1 %v776_v1  ;;  %528 = vmatpush1.bf16.msra.mxu0 %v778_v2  ;;  %v784_v6 = vld [vmem:[%s1174_s1 + $0x60] ss:$8 sps:$4 sm:$0xff]   ;;  %v786_v8 = vld [vmem:[%s1174_s1 + $0x54] ss:$8 sps:$4 sm:$0xff]   ;;  %v790_v10 = vld [vmem:[%s1174_s1 + $0x50] ss:$8 sps:$4 sm:$0xff]  }
   0x4   :  { %569 = vmatpush1.bf16.msra.mxu1 %v779_v3  ;;  %529 = vmatprep.subr.bf16.mxu0 %v780_v4  ;;  %v785_v7 = vld [vmem:[%s1174_s1 + $0x160] ss:$8 sps:$4 sm:$0xff]   ;;  %v788_v9 = vld [vmem:[%s1174_s1 + $0x154] ss:$8 sps:$4 sm:$0xff]   ;;  %v791_v11 = vld [vmem:[%s1174_s1 + $0x150] ss:$8 sps:$4 sm:$0xff]  }
   0x5   :  { %570 = vmatprep.subr.bf16.mxu1 %v782_v5  ;;  %v792_v12 = vld [vmem:[%s1174_s1 + $0x44] ss:$8 sps:$4 sm:$0xff]   ;;  %v796_v14 = vld [vmem:[%s1174_s1 + $0x40] ss:$8 sps:$4 sm:$0xff]   ;;  %v798_v16 = vld [vmem:[%s1174_s1 + $0x34] ss:$8 sps:$4 sm:$0xff]  }
   0x6   :  { %v794_v13 = vld [vmem:[%s1174_s1 + $0x144] ss:$8 sps:$4 sm:$0xff]   ;;  %v797_v15 = vld [vmem:[%s1174_s1 + $0x140] ss:$8 sps:$4 sm:$0xff]   ;;  %v800_v17 = vld [vmem:[%s1174_s1 + $0x134] ss:$8 sps:$4 sm:$0xff]  }
   0x7   :  { %530 = vmatpush1.bf16.msra.mxu0 %v784_v6  ;;  %v802_v18 = vld [vmem:[%s1174_s1 + $0x30] ss:$8 sps:$4 sm:$0xff]   ;;  %v804_v20 = vld [vmem:[%s1174_s1 + $0x24] ss:$8 sps:$4 sm:$0xff]   ;;  %v808_v22 = vld [vmem:[%s1174_s1 + $0x20] ss:$8 sps:$4 sm:$0xff]  }
   0x8   :  { %571 = vmatpush1.bf16.msra.mxu1 %v785_v7  ;;  %531 = vmatprep.subr.bf16.mxu0 %v786_v8  ;;  %v803_v19 = vld [vmem:[%s1174_s1 + $0x130] ss:$8 sps:$4 sm:$0xff]   ;;  %v806_v21 = vld [vmem:[%s1174_s1 + $0x124] ss:$8 sps:$4 sm:$0xff]   ;;  %v809_v23 = vld [vmem:[%s1174_s1 + $0x120] ss:$8 sps:$4 sm:$0xff]  }
   0x9   :  { %572 = vmatprep.subr.bf16.mxu1 %v788_v9  ;;  %v810_v24 = vld [vmem:[%s1174_s1 + $0x14] ss:$8 sps:$4 sm:$0xff]   ;;  %v814_v26 = vld [vmem:[%s1174_s1 + $0x10] ss:$8 sps:$4 sm:$0xff]   ;;  %v816_v28 = vld [vmem:[%s1174_s1 + $0x4] ss:$8 sps:$4 sm:$0xff]  }
   0xa   :  { %v812_v25 = vld [vmem:[%s1174_s1 + $0x114] ss:$8 sps:$4 sm:$0xff]   ;;  %v815_v27 = vld [vmem:[%s1174_s1 + $0x110] ss:$8 sps:$4 sm:$0xff]   ;;  %v818_v29 = vld [vmem:[%s1174_s1 + $0x104] ss:$8 sps:$4 sm:$0xff]  }
   0xb   :  { %532 = vmatpush1.bf16.msra.mxu0 %v790_v10  ;;  %v820_v30 = vld [vmem:[%s1174_s1] ss:$8 sps:$4 sm:$0xff]   ;;  %v822_v32 = vld [vmem:[%s1174_s1 + $0xf4] ss:$8 sps:$4 sm:$0xff]   ;;  %v826_v34 = vld [vmem:[%s1174_s1 + $0xf0] ss:$8 sps:$4 sm:$0xff]  }
   0xc   :  { %573 = vmatpush1.bf16.msra.mxu1 %v791_v11  ;;  %533 = vmatprep.subr.bf16.mxu0 %v792_v12  ;;  %v821_v31 = vld [vmem:[%s1174_s1 + $0x100] ss:$8 sps:$4 sm:$0xff]   ;;  %v824_v33 = vld [vmem:[%s1174_s1 + $0x1f4] ss:$8 sps:$4 sm:$0xff]   ;;  %v827_v35 = vld [vmem:[%s1174_s1 + $0x1f0] ss:$8 sps:$4 sm:$0xff]  }
   0xd   :  { %574 = vmatprep.subr.bf16.mxu1 %v794_v13  ;;  %v828_v36 = vld [vmem:[%s1174_s1 + $0xe4] ss:$8 sps:$4 sm:$0xff]   ;;  %v832_v38 = vld [vmem:[%s1174_s1 + $0xe0] ss:$8 sps:$4 sm:$0xff]   ;;  %v834_v40 = vld [vmem:[%s1174_s1 + $0xd4] ss:$8 sps:$4 sm:$0xff]  }
   0xe   :  { %v830_v37 = vld [vmem:[%s1174_s1 + $0x1e4] ss:$8 sps:$4 sm:$0xff]   ;;  %v833_v39 = vld [vmem:[%s1174_s1 + $0x1e0] ss:$8 sps:$4 sm:$0xff]   ;;  %v836_v41 = vld [vmem:[%s1174_s1 + $0x1d4] ss:$8 sps:$4 sm:$0xff]  }
   0xf   :  { %534 = vmatpush1.bf16.msra.mxu0 %v796_v14  ;;  %v838_v42 = vld [vmem:[%s1174_s1 + $0xd0] ss:$8 sps:$4 sm:$0xff]   ;;  %v840_v44 = vld [vmem:[%s1174_s1 + $0xc4] ss:$8 sps:$4 sm:$0xff]   ;;  %v844_v47 = vld [vmem:[%s1174_s1 + $0xc0] ss:$8 sps:$4 sm:$0xff]  }
  0x10   :  { %575 = vmatpush1.bf16.msra.mxu1 %v797_v15  ;;  %535 = vmatprep.subr.bf16.mxu0 %v798_v16  ;;  %v839_v43 = vld [vmem:[%s1174_s1 + $0x1d0] ss:$8 sps:$4 sm:$0xff]   ;;  %v842_v45 = vld [vmem:[%s1174_s1 + $0x1c4] ss:$8 sps:$4 sm:$0xff]   ;;  %v845_v51 = vld [vmem:[%s1174_s1 + $0x1c0] ss:$8 sps:$4 sm:$0xff]  }
  0x11   :  { %576 = vmatprep.subr.bf16.mxu1 %v800_v17  ;;  %v21_v46 = vld [vmem:[%s1175_s0] sm:$0xff]  ;;  %v22_v50 = vld [vmem:[%s1175_s0 + $0x8] sm:$0xff]  ;;  %v846_v52 = vld [vmem:[%s1174_s1 + $0xb4] ss:$8 sps:$4 sm:$0xff]  }
  0x12   :  { %v24_v49 = vmax.bf16 %v894_v48, %v21_v46  ;;  %v25_v53 = vmax.bf16 %v894_v48, %v22_v50  ;;  %v848_v54 = vld [vmem:[%s1174_s1 + $0x1b4] ss:$8 sps:$4 sm:$0xff]   ;;  %v850_v57 = vld [vmem:[%s1174_s1 + $0xb0] ss:$8 sps:$4 sm:$0xff]   ;;  %v852_v59 = vld [vmem:[%s1174_s1 + $0xa4] ss:$8 sps:$4 sm:$0xff]  }
  0x13   :  { %536 = vmatpush1.bf16.msra.mxu0 %v802_v18  ;;  %v851_v58 = vld [vmem:[%s1174_s1 + $0x1b0] ss:$8 sps:$4 sm:$0xff]   ;;  %v854_v60 = vld [vmem:[%s1174_s1 + $0x1a4] ss:$8 sps:$4 sm:$0xff]   ;;  %v856_v61 = vld [vmem:[%s1174_s1 + $0xa0] ss:$8 sps:$4 sm:$0xff]  }
  0x14   :  { %577 = vmatpush1.bf16.msra.mxu1 %v803_v19  ;;  %537 = vmatprep.subr.bf16.mxu0 %v804_v20  ;;  %v687_v55 = vcombine.high %v24_v49, %v24_v49  ;;  %v689_v56 = vcombine.high %v25_v53, %v25_v53  ;;  %v857_v62 = vld [vmem:[%s1174_s1 + $0x1a0] ss:$8 sps:$4 sm:$0xff]   ;;  %v858_v63 = vld [vmem:[%s1174_s1 + $0x94] ss:$8 sps:$4 sm:$0xff]   ;;  %v862_v1 = vld [vmem:[%s1174_s1 + $0x90] ss:$8 sps:$4 sm:$0xff]   ;;  %v686_v8 = vcombine.low %v24_v49, %v24_v49 }
  0x15   :  { %578 = vmatprep.subr.bf16.mxu1 %v806_v21  ;;  %v860_v0 = vld [vmem:[%s1174_s1 + $0x194] ss:$8 sps:$4 sm:$0xff]   ;;  %v863_v2 = vld [vmem:[%s1174_s1 + $0x190] ss:$8 sps:$4 sm:$0xff]   ;;  %v864_v3 = vld [vmem:[%s1174_s1 + $0x84] ss:$8 sps:$4 sm:$0xff]   ;;  %v688_v9 = vcombine.low %v25_v53, %v25_v53 }
  0x16   :  { %559 = vmatprep.mubr.bf16.mxu0 %v687_v55  ;;  %600 = vmatprep.mubr.bf16.mxu1 %v689_v56  ;;  %v866_v4 = vld [vmem:[%s1174_s1 + $0x184] ss:$8 sps:$4 sm:$0xff]   ;;  %v868_v5 = vld [vmem:[%s1174_s1 + $0x80] ss:$8 sps:$4 sm:$0xff]   ;;  %v872_v7 = vld [vmem:[%s1174_s1 + $0x274] ss:$8 sps:$4 sm:$0xff]  }
  0x17   :  { %538 = vmatpush1.bf16.msra.mxu0 %v808_v22  ;;  %v869_v6 = vld [vmem:[%s1174_s1 + $0x180] ss:$8 sps:$4 sm:$0xff]   ;;  %v870_v10 = vld [vmem:[%s1174_s1 + $0x270] ss:$8 sps:$4 sm:$0xff]   ;;  %v875_v11 = vld [vmem:[%s1174_s1 + $0x264] ss:$8 sps:$4 sm:$0xff]  }
  0x18   :  { %579 = vmatpush1.bf16.msra.mxu1 %v809_v23  ;;  %539 = vmatprep.subr.bf16.mxu0 %v810_v24  ;;  %v873_v12 = vld [vmem:[%s1174_s1 + $0x260] ss:$8 sps:$4 sm:$0xff]   ;;  %v878_v13 = vld [vmem:[%s1174_s1 + $0x254] ss:$8 sps:$4 sm:$0xff]   ;;  %v876_v14 = vld [vmem:[%s1174_s1 + $0x250] ss:$8 sps:$4 sm:$0xff]  }
  0x19   :  { %580 = vmatprep.subr.bf16.mxu1 %v812_v25  ;;  %v881_v15 = vld [vmem:[%s1174_s1 + $0x244] ss:$8 sps:$4 sm:$0xff]   ;;  %v879_v16 = vld [vmem:[%s1174_s1 + $0x240] ss:$8 sps:$4 sm:$0xff]   ;;  %v884_v17 = vld [vmem:[%s1174_s1 + $0x234] ss:$8 sps:$4 sm:$0xff]  }
  0x1a   :  { %v882_v18 = vld [vmem:[%s1174_s1 + $0x230] ss:$8 sps:$4 sm:$0xff]   ;;  %v887_v19 = vld [vmem:[%s1174_s1 + $0x224] ss:$8 sps:$4 sm:$0xff]   ;;  %v885_v20 = vld [vmem:[%s1174_s1 + $0x220] ss:$8 sps:$4 sm:$0xff]  }
  0x1b   :  { %540 = vmatpush1.bf16.msra.mxu0 %v814_v26  ;;  %v890_v21 = vld [vmem:[%s1174_s1 + $0x214] ss:$8 sps:$4 sm:$0xff]   ;;  %v23_v22 = vld [vmem:[%s1175_s0 + $0x10] sm:$0xf]  ;;  %v893_v24 = vld [vmem:[%s1174_s1 + $0x204] ss:$8 sps:$4 sm:$0xff]  }
  0x1c   :  { %581 = vmatpush1.bf16.msra.mxu1 %v815_v27  ;;  %541 = vmatprep.subr.bf16.mxu0 %v816_v28  ;;  %v888_v23 = vld [vmem:[%s1174_s1 + $0x210] ss:$8 sps:$4 sm:$0xff]   ;;  %v26_v25 = vmax.bf16 %v894_v48, %v23_v22  ;;  %v891_v26 = vld [vmem:[%s1174_s1 + $0x200] ss:$8 sps:$4 sm:$0xff]  }
  0x1d   :  { %582 = vmatprep.subr.bf16.mxu1 %v818_v29 }
  0x1e   :  { %v690_v27 = vcombine.low %v26_v25, %v26_v25 }
  0x1f   :  { %542 = vmatpush1.bf16.msra.mxu0 %v820_v30 }
  0x20   :  { %583 = vmatpush1.bf16.msra.mxu1 %v821_v31  ;;  %543 = vmatprep.subr.bf16.mxu0 %v822_v32 }
  0x21   :  { %584 = vmatprep.subr.bf16.mxu1 %v824_v33 }
  0x23   :  { %544 = vmatpush2.bf16.msra.mxu0 %v826_v34 }
  0x24   :  { %585 = vmatpush2.bf16.msra.mxu1 %v827_v35  ;;  %545 = vmatprep.subr.bf16.mxu0 %v828_v36  ;;  %v661_v36 = vlaneseq }
  0x25   :  { %586 = vmatprep.subr.bf16.mxu1 %v830_v37 }
  0x26   :  { %v662_v37 = vshrl.u32 %v661_v36, 7 }
  0x27   :  { %546 = vmatpush2.bf16.msra.mxu0 %v832_v38 }
  0x28   :  { %587 = vmatpush2.bf16.msra.mxu1 %v833_v39  ;;  %547 = vmatprep.subr.bf16.mxu0 %v834_v40  ;;  %v663_v38 = vsub.s32 0, %v662_v37  ;;  %v667_v39 = vsub.s32 1, %v662_v37  ;;  %v659_v40 = vld [vmem:[%s1176_s2] sm:$0x3] }
  0x29   :  { %588 = vmatprep.subr.bf16.mxu1 %v836_v41 }
  0x2a   :  { %v668_v46 = vrot.slane %v659_v40, %v667_v39 }
  0x2b   :  { %548 = vmatpush2.bf16.msra.mxu0 %v838_v42 }
  0x2c   :  { %589 = vmatpush2.bf16.msra.mxu1 %v839_v43  ;;  %549 = vmatprep.subr.bf16.mxu0 %v840_v44 }
  0x2d   :  { %590 = vmatprep.subr.bf16.mxu1 %v842_v45  ;;  %v664_v45 = vrot.slane %v659_v40, %v663_v38 }
  0x2f   :  { %550 = vmatpush2.bf16.msra.mxu0 %v844_v47 }
  0x30   :  { %591 = vmatpush2.bf16.msra.mxu1 %v845_v51  ;;  %551 = vmatprep.subr.bf16.mxu0 %v846_v52 }
  0x31   :  { %592 = vmatprep.subr.bf16.mxu1 %v848_v54 }
  0x33   :  { %552 = vmatpush2.bf16.msra.mxu0 %v850_v57 }
  0x34   :  { %593 = vmatpush2.bf16.msra.mxu1 %v851_v58  ;;  %553 = vmatprep.subr.bf16.mxu0 %v852_v59 }
  0x35   :  { %594 = vmatprep.subr.bf16.mxu1 %v854_v60 }
  0x37   :  { %554 = vmatpush2.bf16.msra.mxu0 %v856_v61 }
  0x38   :  { %595 = vmatpush2.bf16.msra.mxu1 %v857_v62  ;;  %555 = vmatprep.subr.bf16.mxu0 %v858_v63 }
  0x39   :  { %596 = vmatprep.subr.bf16.mxu1 %v860_v0 }
  0x3b   :  { %556 = vmatpush2.bf16.msra.mxu0 %v862_v1 }
  0x3c   :  { %597 = vmatpush2.bf16.msra.mxu1 %v863_v2  ;;  %557 = vmatprep.subr.bf16.mxu0 %v864_v3 }
  0x3d   :  { %598 = vmatprep.subr.bf16.mxu1 %v866_v4 }
  0x3f   :  { %558 = vmatpush2.bf16.msra.mxu0 %v868_v5 }
  0x40   :  { %599 = vmatpush2.bf16.msra.mxu1 %v869_v6  ;;  %609 = vmatprep.subr.bf16.mxu0 %v872_v7 }
  0x42   :  { %560 = vmatmul.mubr.bf16.vlgmr.msra.gmra.mxu0 %v686_v8 }
  0x43   :  { %601 = vmatmul.mubr.bf16.vlgmr.msra.gmra.mxu1 %v688_v9  ;;  %610 = vmatpush1.bf16.msra.mxu0 %v870_v10 }
  0x44   :  { %641 = vmatprep.mubr.bf16.mxu0 %v894_v48  ;;  %611 = vmatprep.subr.bf16.mxu0 %v875_v11 }
  0x47   :  { %612 = vmatpush1.bf16.msra.mxu0 %v873_v12 }
  0x48   :  { %613 = vmatprep.subr.bf16.mxu0 %v878_v13 }
  0x4b   :  { %614 = vmatpush1.bf16.msra.mxu0 %v876_v14 }
  0x4c   :  { %615 = vmatprep.subr.bf16.mxu0 %v881_v15 }
  0x4f   :  { %616 = vmatpush1.bf16.msra.mxu0 %v879_v16 }
  0x50   :  { %617 = vmatprep.subr.bf16.mxu0 %v884_v17 }
  0x53   :  { %618 = vmatpush1.bf16.msra.mxu0 %v882_v18 }
  0x54   :  { %619 = vmatprep.subr.bf16.mxu0 %v887_v19 }
  0x57   :  { %620 = vmatpush1.bf16.msra.mxu0 %v885_v20 }
  0x58   :  { %621 = vmatprep.subr.bf16.mxu0 %v890_v21 }
  0x5b   :  { %622 = vmatpush1.bf16.msra.mxu0 %v888_v23 }
  0x5c   :  { %623 = vmatprep.subr.bf16.mxu0 %v893_v24 }
  0x5f   :  { %624 = vmatpush1.bf16.msra.mxu0 %v891_v26 }
  0x62   :  { %642 = vmatmul.mubr.bf16.vlgmr.msra.gmra.mxu0 %v690_v27 }
 0x102   :  { %v561_v28 = vpop.f32.mrf.mxu0 }
 0x103   :  { %v602_v29 = vpop.f32.mrf.mxu1 }
 0x104   :  { %v563_v30 = vpop.f32.mrf.mxu0  ;;  %v603_v41 = vadd.f32 %v602_v29, %v561_v28 }
 0x105   :  { %v604_v31 = vpop.f32.mrf.mxu1 }
 0x106   :  { %v565_v32 = vpop.f32.mrf.mxu0  ;;  %v605_v43 = vadd.f32 %v604_v31, %v563_v30 }
 0x107   :  { %v606_v33 = vpop.f32.mrf.mxu1 }
 0x108   :  { %v566_v34 = vpop.f32.mrf.mxu0 }
 0x109   :  { %v607_v35 = vpop.f32.mrf.mxu1 }
 0x122   :  { %v643_v42 = vpop.f32.mrf.mxu0 }
 0x123   :  { %v644_v44 = vadd.f32 %v643_v42, %v603_v41 }
 0x124   :  { %v645_v47 = vpop.f32.mrf.mxu0 }
 0x125   :  { %v646_v48 = vadd.f32 %v645_v47, %v605_v43  ;;  %v671_v50 = vadd.f32 %v664_v45, %v644_v44 }
 0x126   :  { %v647_v49 = vpop.f32.mrf.mxu0 }
 0x127   :  { %v672_v51 = vadd.f32 %v668_v46, %v646_v48 }
 0x128   :  { %v648_v52 = vpop.f32.mrf.mxu0 }
 0x129   :  { %v772_v53 = vpack.c.bf16 %v672_v51, %v671_v50 }
 0x12b   :  { %681 = vst [vmem:[%s1177_s3] sm:$0xff] %v772_v53 }

// kernel: unet_generator_forward.34
= control target key start
LH: loop header
LB: loop body
LE: loop exit
PB: predicated region body
PF: predicated region fallthrough
CT: control target
= control target key end

     0   :  { %s1209_s1 = inlined_call_operand.vmem [shape: bf16[1024,128], index: 1, kind: input, shape index: {}]   ;;  %s1210_s0 = inlined_call_operand.vmem [shape: bf16[8,1024], index: 0, kind: input, shape index: {}]   ;;  %s1211_s2 = inlined_call_operand.vmem [shape: f32[1,128], index: 2, kind: input, shape index: {}]   ;;  %s1212_s3 = inlined_call_operand.vmem [shape: bf16[8,128], index: 3, kind: output, shape index: {}]  }
   0x1   :  { %v915_v0 = vld [vmem:[%s1209_s1 + $0x78] sm:$0xff]   ;;  %v919_v4 = vld [vmem:[%s1209_s1 + $0x70] sm:$0xff]   ;;  %v923_v8 = vld [vmem:[%s1209_s1 + $0x68] sm:$0xff]  }
   0x2   :  { %v916_v1 = vld [vmem:[%s1209_s1 + $0xf8] sm:$0xff]   ;;  %827 = vmatprep.subr.bf16.mxu0 %v915_v0  ;;  %v920_v5 = vld [vmem:[%s1209_s1 + $0xf0] sm:$0xff]   ;;  %v924_v9 = vld [vmem:[%s1209_s1 + $0xe8] sm:$0xff]  }
   0x3   :  { %v917_v2 = vld [vmem:[%s1209_s1 + $0x38] sm:$0xff]   ;;  %849 = vmatprep.subr.bf16.mxu1 %v916_v1  ;;  %v921_v6 = vld [vmem:[%s1209_s1 + $0x30] sm:$0xff]   ;;  %v925_v10 = vld [vmem:[%s1209_s1 + $0x28] sm:$0xff]  }
   0x4   :  { %v918_v3 = vld [vmem:[%s1209_s1 + $0xb8] sm:$0xff]   ;;  %828 = vmatpush3.bf16.msra.mxu0 %v917_v2  ;;  %v922_v7 = vld [vmem:[%s1209_s1 + $0xb0] sm:$0xff]   ;;  %v926_v11 = vld [vmem:[%s1209_s1 + $0xa8] sm:$0xff]  }
   0x5   :  { %850 = vmatpush3.bf16.msra.mxu1 %v918_v3  ;;  %829 = vmatprep.subr.bf16.mxu0 %v919_v4  ;;  %v927_v12 = vld [vmem:[%s1209_s1 + $0x60] sm:$0xff]   ;;  %v931_v16 = vld [vmem:[%s1209_s1 + $0x58] sm:$0xff]   ;;  %v935_v20 = vld [vmem:[%s1209_s1 + $0x50] sm:$0xff]  }
   0x6   :  { %851 = vmatprep.subr.bf16.mxu1 %v920_v5  ;;  %v928_v13 = vld [vmem:[%s1209_s1 + $0xe0] sm:$0xff]   ;;  %v932_v17 = vld [vmem:[%s1209_s1 + $0xd8] sm:$0xff]   ;;  %v936_v21 = vld [vmem:[%s1209_s1 + $0xd0] sm:$0xff]  }
   0x7   :  { %v929_v14 = vld [vmem:[%s1209_s1 + $0x20] sm:$0xff]   ;;  %v933_v18 = vld [vmem:[%s1209_s1 + $0x18] sm:$0xff]   ;;  %v937_v22 = vld [vmem:[%s1209_s1 + $0x10] sm:$0xff]  }
   0x8   :  { %830 = vmatpush3.bf16.msra.mxu0 %v921_v6  ;;  %v930_v15 = vld [vmem:[%s1209_s1 + $0xa0] sm:$0xff]   ;;  %v934_v19 = vld [vmem:[%s1209_s1 + $0x98] sm:$0xff]   ;;  %v938_v23 = vld [vmem:[%s1209_s1 + $0x90] sm:$0xff]  }
   0x9   :  { %852 = vmatpush3.bf16.msra.mxu1 %v922_v7  ;;  %831 = vmatprep.subr.bf16.mxu0 %v923_v8  ;;  %v939_v24 = vld [vmem:[%s1209_s1 + $0x48] sm:$0xff]   ;;  %v943_v28 = vld [vmem:[%s1209_s1 + $0x40] sm:$0xff]   ;;  %v947_v36 = vld [vmem:[%s1209_s1 + $0x178] sm:$0xff]  }
   0xa   :  { %853 = vmatprep.subr.bf16.mxu1 %v924_v9  ;;  %v940_v25 = vld [vmem:[%s1209_s1 + $0xc8] sm:$0xff]   ;;  %v944_v29 = vld [vmem:[%s1209_s1 + $0xc0] sm:$0xff]   ;;  %v948_v39 = vld [vmem:[%s1209_s1 + $0x1f8] sm:$0xff]  }
   0xb   :  { %v941_v26 = vld [vmem:[%s1209_s1 + $0x8] sm:$0xff]   ;;  %v945_v30 = vld [vmem:[%s1209_s1] sm:$0xff]   ;;  %v949_v40 = vld [vmem:[%s1209_s1 + $0x138] sm:$0xff]  }
   0xc   :  { %832 = vmatpush3.bf16.msra.mxu0 %v925_v10  ;;  %v942_v27 = vld [vmem:[%s1209_s1 + $0x88] sm:$0xff]   ;;  %v946_v31 = vld [vmem:[%s1209_s1 + $0x80] sm:$0xff]   ;;  %v950_v45 = vld [vmem:[%s1209_s1 + $0x1b8] sm:$0xff]  }
   0xd   :  { %854 = vmatpush3.bf16.msra.mxu1 %v926_v11  ;;  %833 = vmatprep.subr.bf16.mxu0 %v927_v12  ;;  %v21_v32 = vld [vmem:[%s1210_s0] sm:$0xff]  ;;  %v22_v33 = vld [vmem:[%s1210_s0 + $0x8] sm:$0xff]  ;;  %v951_v46 = vld [vmem:[%s1209_s1 + $0x170] sm:$0xff]  }
   0xe   :  { %855 = vmatprep.subr.bf16.mxu1 %v928_v13  ;;  %v25_v34 = vmul.bf16 1045249613, %v21_v32  ;;  %v26_v35 = vmul.bf16 1045249613, %v22_v33  ;;  %v952_v47 = vld [vmem:[%s1209_s1 + $0x1f0] sm:$0xff]   ;;  %v955_v50 = vld [vmem:[%s1209_s1 + $0x168] sm:$0xff]  }
   0xf   :  { %v953_v48 = vld [vmem:[%s1209_s1 + $0x130] sm:$0xff]   ;;  %v956_v51 = vld [vmem:[%s1209_s1 + $0x1e8] sm:$0xff]   ;;  %v959_v54 = vld [vmem:[%s1209_s1 + $0x160] sm:$0xff]  }
  0x10   :  { %834 = vmatpush3.bf16.msra.mxu0 %v929_v14  ;;  %v29_v37 = vmax.bf16 %v25_v34, %v21_v32  ;;  %v30_v38 = vmax.bf16 %v26_v35, %v22_v33  ;;  %v954_v49 = vld [vmem:[%s1209_s1 + $0x1b0] sm:$0xff]   ;;  %v957_v52 = vld [vmem:[%s1209_s1 + $0x128] sm:$0xff]   ;;  %v960_v55 = vld [vmem:[%s1209_s1 + $0x1e0] sm:$0xff]  }
  0x11   :  { %856 = vmatpush3.bf16.msra.mxu1 %v930_v15  ;;  %835 = vmatprep.subr.bf16.mxu0 %v931_v16  ;;  %v958_v53 = vld [vmem:[%s1209_s1 + $0x1a8] sm:$0xff]   ;;  %v961_v56 = vld [vmem:[%s1209_s1 + $0x120] sm:$0xff]   ;;  %v963_v58 = vld [vmem:[%s1209_s1 + $0x158] sm:$0xff]  }
  0x12   :  { %857 = vmatprep.subr.bf16.mxu1 %v932_v17  ;;  %v755_v41 = vcombine.high %v29_v37, %v29_v37  ;;  %v757_v42 = vcombine.high %v30_v38, %v30_v38  ;;  %v754_v43 = vcombine.low %v29_v37, %v29_v37  ;;  %v756_v44 = vcombine.low %v30_v38, %v30_v38  ;;  %v962_v57 = vld [vmem:[%s1209_s1 + $0x1a0] sm:$0xff]   ;;  %v964_v59 = vld [vmem:[%s1209_s1 + $0x1d8] sm:$0xff]   ;;  %v967_v62 = vld [vmem:[%s1209_s1 + $0x150] sm:$0xff]  }
  0x13   :  { %v965_v60 = vld [vmem:[%s1209_s1 + $0x118] sm:$0xff]   ;;  %v968_v63 = vld [vmem:[%s1209_s1 + $0x1d0] sm:$0xff]   ;;  %v971_v2 = vld [vmem:[%s1209_s1 + $0x148] sm:$0xff]  }
  0x14   :  { %836 = vmatpush3.bf16.msra.mxu0 %v933_v18  ;;  %606 = vmatprep.mubr.bf16.mxu0 %v755_v41  ;;  %v966_v61 = vld [vmem:[%s1209_s1 + $0x198] sm:$0xff]   ;;  %v969_v0 = vld [vmem:[%s1209_s1 + $0x110] sm:$0xff]   ;;  %v972_v3 = vld [vmem:[%s1209_s1 + $0x1c8] sm:$0xff]  }
  0x15   :  { %858 = vmatpush3.bf16.msra.mxu1 %v934_v19  ;;  %837 = vmatprep.subr.bf16.mxu0 %v935_v20  ;;  %v970_v1 = vld [vmem:[%s1209_s1 + $0x190] sm:$0xff]   ;;  %v973_v4 = vld [vmem:[%s1209_s1 + $0x108] sm:$0xff]   ;;  %v975_v6 = vld [vmem:[%s1209_s1 + $0x140] sm:$0xff]  }
  0x16   :  { %859 = vmatprep.subr.bf16.mxu1 %v936_v21  ;;  %646 = vmatprep.mubr.bf16.mxu1 %v757_v42  ;;  %v974_v5 = vld [vmem:[%s1209_s1 + $0x188] sm:$0xff]   ;;  %v976_v7 = vld [vmem:[%s1209_s1 + $0x1c0] sm:$0xff]   ;;  %v23_v10 = vld [vmem:[%s1210_s0 + $0x10] sm:$0xff] }
  0x17   :  { %v977_v8 = vld [vmem:[%s1209_s1 + $0x100] sm:$0xff]   ;;  %v24_v11 = vld [vmem:[%s1210_s0 + $0x18] sm:$0xff]  ;;  %v27_v12 = vmul.bf16 1045249613, %v23_v10 }
  0x18   :  { %838 = vmatpush3.bf16.msra.mxu0 %v937_v22  ;;  %v978_v9 = vld [vmem:[%s1209_s1 + $0x180] sm:$0xff]   ;;  %v28_v13 = vmul.bf16 1045249613, %v24_v11 }
  0x19   :  { %860 = vmatpush3.bf16.msra.mxu1 %v938_v23  ;;  %839 = vmatprep.subr.bf16.mxu0 %v939_v24  ;;  %v31_v14 = vmax.bf16 %v27_v12, %v23_v10 }
  0x1a   :  { %861 = vmatprep.subr.bf16.mxu1 %v940_v25  ;;  %v32_v15 = vmax.bf16 %v28_v13, %v24_v11 }
  0x1b   :  { %v759_v16 = vcombine.high %v31_v14, %v31_v14  ;;  %v758_v18 = vcombine.low %v31_v14, %v31_v14 }
  0x1c   :  { %840 = vmatpush3.bf16.msra.mxu0 %v941_v26  ;;  %v761_v17 = vcombine.high %v32_v15, %v32_v15  ;;  %v760_v19 = vcombine.low %v32_v15, %v32_v15 }
  0x1d   :  { %862 = vmatpush3.bf16.msra.mxu1 %v942_v27  ;;  %841 = vmatprep.subr.bf16.mxu0 %v943_v28 }
  0x1e   :  { %863 = vmatprep.subr.bf16.mxu1 %v944_v29 }
  0x20   :  { %842 = vmatpush3.bf16.msra.mxu0 %v945_v30 }
  0x21   :  { %864 = vmatpush3.bf16.msra.mxu1 %v946_v31  ;;  %871 = vmatprep.subr.bf16.mxu0 %v947_v36 }
  0x22   :  { %893 = vmatprep.subr.bf16.mxu1 %v948_v39 }
  0x23   :  { %607 = vmatmul.mubr.bf16.vlgmr.msra.gmra.mxu0 %v754_v43 }
  0x24   :  { %647 = vmatmul.mubr.bf16.vlgmr.msra.gmra.mxu1 %v756_v44  ;;  %872 = vmatpush3.bf16.msra.mxu0 %v949_v40  ;;  %v826_v40 = vld [vmem:[%s1211_s2] ss:$0 sm:$0xff] }
  0x25   :  { %894 = vmatpush3.bf16.msra.mxu1 %v950_v45  ;;  %873 = vmatprep.subr.bf16.mxu0 %v951_v46 }
  0x26   :  { %895 = vmatprep.subr.bf16.mxu1 %v952_v47  ;;  %686 = vmatprep.mubr.bf16.mxu0 %v759_v16 }
  0x27   :  { %726 = vmatprep.mubr.bf16.mxu1 %v761_v17 }
  0x28   :  { %874 = vmatpush3.bf16.msra.mxu0 %v953_v48 }
  0x29   :  { %896 = vmatpush3.bf16.msra.mxu1 %v954_v49  ;;  %875 = vmatprep.subr.bf16.mxu0 %v955_v50 }
  0x2a   :  { %897 = vmatprep.subr.bf16.mxu1 %v956_v51 }
  0x2c   :  { %876 = vmatpush3.bf16.msra.mxu0 %v957_v52 }
  0x2d   :  { %898 = vmatpush3.bf16.msra.mxu1 %v958_v53  ;;  %877 = vmatprep.subr.bf16.mxu0 %v959_v54 }
  0x2e   :  { %899 = vmatprep.subr.bf16.mxu1 %v960_v55 }
  0x30   :  { %878 = vmatpush3.bf16.msra.mxu0 %v961_v56 }
  0x31   :  { %900 = vmatpush3.bf16.msra.mxu1 %v962_v57  ;;  %879 = vmatprep.subr.bf16.mxu0 %v963_v58 }
  0x32   :  { %901 = vmatprep.subr.bf16.mxu1 %v964_v59 }
  0x34   :  { %880 = vmatpush3.bf16.msra.mxu0 %v965_v60 }
  0x35   :  { %902 = vmatpush3.bf16.msra.mxu1 %v966_v61  ;;  %881 = vmatprep.subr.bf16.mxu0 %v967_v62 }
  0x36   :  { %903 = vmatprep.subr.bf16.mxu1 %v968_v63 }
  0x38   :  { %882 = vmatpush3.bf16.msra.mxu0 %v969_v0 }
  0x39   :  { %904 = vmatpush3.bf16.msra.mxu1 %v970_v1  ;;  %883 = vmatprep.subr.bf16.mxu0 %v971_v2 }
  0x3a   :  { %905 = vmatprep.subr.bf16.mxu1 %v972_v3 }
  0x3c   :  { %884 = vmatpush3.bf16.msra.mxu0 %v973_v4 }
  0x3d   :  { %906 = vmatpush3.bf16.msra.mxu1 %v974_v5  ;;  %885 = vmatprep.subr.bf16.mxu0 %v975_v6 }
  0x3e   :  { %907 = vmatprep.subr.bf16.mxu1 %v976_v7 }
  0x40   :  { %886 = vmatpush3.bf16.msra.mxu0 %v977_v8 }
  0x41   :  { %908 = vmatpush3.bf16.msra.mxu1 %v978_v9 }
  0x43   :  { %687 = vmatmul.mubr.bf16.vlgmr.msra.gmra.mxu0 %v758_v18 }
  0x44   :  { %727 = vmatmul.mubr.bf16.vlgmr.msra.gmra.mxu1 %v760_v19 }
  0xe3   :  { %v843_v20 = vpop.f32.mrf.mxu0 }
  0xe4   :  { %v865_v21 = vpop.f32.mrf.mxu1 }
  0xe5   :  { %v844_v22 = vpop.f32.mrf.mxu0 }
  0xe6   :  { %v866_v23 = vpop.f32.mrf.mxu1  ;;  %v845_v28 = vadd.f32 %v844_v22, %v843_v20 }
  0xe7   :  { %v846_v24 = vpop.f32.mrf.mxu0  ;;  %v867_v29 = vadd.f32 %v866_v23, %v865_v21 }
  0xe8   :  { %v868_v25 = vpop.f32.mrf.mxu1 }
  0xe9   :  { %v847_v26 = vpop.f32.mrf.mxu0  ;;  %v649_v34 = vadd.f32 %v867_v29, %v845_v28 }
  0xea   :  { %v869_v27 = vpop.f32.mrf.mxu1 }
 0x103   :  { %v887_v30 = vpop.f32.mrf.mxu0 }
 0x104   :  { %v909_v31 = vpop.f32.mrf.mxu1 }
 0x105   :  { %v888_v32 = vpop.f32.mrf.mxu0 }
 0x106   :  { %v910_v33 = vpop.f32.mrf.mxu1  ;;  %v889_v35 = vadd.f32 %v888_v32, %v887_v30 }
 0x107   :  { %v890_v36 = vpop.f32.mrf.mxu0  ;;  %v911_v39 = vadd.f32 %v910_v33, %v909_v31 }
 0x108   :  { %v912_v37 = vpop.f32.mrf.mxu1  ;;  %v689_v38 = vadd.f32 %v889_v35, %v649_v34 }
 0x109   :  { %v891_v41 = vpop.f32.mrf.mxu0 }
 0x10a   :  { %v913_v42 = vpop.f32.mrf.mxu1  ;;  %v729_v43 = vadd.f32 %v911_v39, %v689_v38 }
 0x10c   :  { %v747_v44 = vadd.f32 %v826_v40, %v729_v43 }
 0x10e   :  { %v748_v45 = vpack.c.bf16 %v747_v44, %v747_v44 }
 0x110   :  { %749 = vst [vmem:[%s1212_s3] sm:$0xf] %v748_v45 }

// kernel: unet_generator_forward.37
= control target key start
LH: loop header
LB: loop body
LE: loop exit
PB: predicated region body
PF: predicated region fallthrough
CT: control target
= control target key end

     0   :  { %s577_s15 = smov 0   ;;  %s579_s16 = smov 0   ;;  %s651_s0 = inlined_call_operand.vmem [shape: bf16[2,2,1,128], index: 0, kind: input, shape index: {}]   ;;  %s652_s1 = inlined_call_operand.vmem [shape: bf16[2,1,1,256], index: 1, kind: input, shape index: {}]   ;;  %s653_s2 = inlined_call_operand.vmem [shape: f32[1,256], index: 2, kind: input, shape index: {}]   ;;  %s654_s3 = inlined_call_operand.vmem [shape: f32[1,256], index: 3, kind: input, shape index: {}]   ;;  %s655_s4 = inlined_call_operand.vmem [shape: bf16[2,2,1,256], index: 4, kind: output, shape index: {}]  }
   0x1   :  { %s581_s17 = smov 0  }
   0x2 LB: > { %s26_s18 = sadd.s32 1, %s543_s16  ;;  %p484_p0 = scmp.ge.s32.totalorder %s547_s17, 1  ;;  %s547_s17 = sphi %s581_s17, %s14_s17   ;;  %s543_s16 = sphi %s579_s16, %s659_s16   ;;  %s539_s15 = sphi %s577_s15, %s658_s15  }
   0x3   : > { %p28_p1 = scmp.ge.s32.totalorder %s26_s18, 2  ;;  %p197_p2 = scmp.lt.s32.totalorder %s547_s17, 3 }
   0x5   : > { %s661_s18 = smov (%p28_p1, %s26_s18), 0  ;;  %p198_p3 = pnand %p484_p0, %p197_p2 }
   0x6   : > { %p239_p4 = scmp.lt.s32.totalorder (!%p198_p3), %s539_s15, 1  ;;  %s551_s8 = smov (!%p198_p3), 64  }
   0x7   : > { %201 = sbr.rel (%p198_p3) target bundleno = 154 (0x9a), region = 36 }
   0xc   : > { %v274_v0 = vlaneseq  ;;  %v549_v1 = vmov 857870592   ;;  %vm304_vm0 = vcmask 516096   ;;  %s663_s15 = smov (!%p239_p4, %s539_s15), 1  ;;  %vm305_vm1 = vsmask.f32 256 }
   0xd   : > { %v272_v2 = vunpack.c.l.s4 %v549_v1  ;;  %s485_s19 = sshll.u32 %s663_s15, 1  ;;  %s487_s20 = sshll.u32 %s663_s15, 2  ;;  %v269_v5 = vld [vmem:[%s653_s2] sm:$0x3]  ;;  %vm608_vm2 = vmand %vm304_vm0, %vm305_vm1  ;;  %v550_v9 = vmov 1966171168  }
   0xe   : > { %v275_v3 = vshrl.u32 %v274_v0, 7  ;;  %v280_v6 = vld [vmem:[%s654_s3] sm:$0x3]  ;;  %s245_s27 = scalar_lea.vmem %s651_s0, %s485_s19  ;;  %s254_s30 = scalar_lea.vmem %s652_s1, %s485_s19  ;;  %v312_v10 = vunpack.c.l.s4 %v550_v9  ;;  %vm328_vm3 = vcmask 1040896  }
   0xf   : > { %v273_v4 = vunpack.c.0.s8 %v272_v2  ;;  %s615_s7 = scalar_lea.vmem %s655_s4, %s487_s20  ;;  %v265_v11 = vld [vmem:[%s245_s27] sm:$0x1]  ;;  %v266_v16 = vld [vmem:[%s245_s27 + $0x1] sm:$0x1]  ;;  %vm329_vm4 = vmand %vm328_vm3, %vm305_vm1 }
  0x10   : > { %v267_v12 = vld [vmem:[%s254_s30] sm:$0x3]  ;;  %334 = vrot.lane.b32.xlu0 %v265_v11, %s551_s8  ;;  %v488_v17 = vld [vmem:[%s615_s7 + $0x2] sm:$0x1]  ;;  %v294_v22 = vsub.s32 0, %v275_v3  ;;  %v313_v23 = vunpack.c.0.s8 %v312_v10  ;;  %v298_v24 = vsub.s32 2, %v275_v3 }
  0x11   : > { %v276_v7 = vsub.s32 %v273_v4, %v275_v3  ;;  %v268_v13 = vunpack.c.l.bf16 %v267_v12  ;;  %v307_v15 = vld [vmem:[%s615_s7] sm:$0x1]  ;;  %v345_v20 = vsel %vm608_vm2, %v266_v16, %v488_v17  ;;  %v337_v35 = vld [vmem:[%s615_s7 + $0x1] sm:$0x1]  ;;  %v492_v38 = vld [vmem:[%s615_s7 + $0x3] sm:$0x1] }
  0x12   : > { %v308_v19 = vsel %vm608_vm2, %v265_v11, %v307_v15  ;;  %489 = vst [vmem:[%s615_s7 + $0x2] sm:$0x1] %v345_v20  ;;  %v316_v27 = vsub.s32 %v313_v23, %v275_v3 }
  0x13   : > { %v277_v14 = vrot.slane %v269_v5, %v276_v7  ;;  %v288_v18 = vrot.slane %v280_v6, %v276_v7  ;;  %309 = vst [vmem:[%s615_s7] sm:$0x1] %v308_v19 }
  0x14   : > { %369 = vrot.lane.b32.xlu0 %v266_v16, %s551_s8 }
  0x15   : > { %v279_v21 = vmul.f32 %v277_v14, %v268_v13 }
  0x17   : > { %v290_v25 = vadd.f32 %v288_v18, %v279_v21 }
  0x19   : > { %v295_v26 = vrot.slane %v290_v25, %v294_v22  ;;  %v299_v28 = vrot.slane %v290_v25, %v298_v24  ;;  %v490_v48 = vld [vmem:[%s615_s7 + $0x2] sm:$0x1] }
  0x1a   : > { %v330_v43 = vld [vmem:[%s615_s7] sm:$0x1] }
  0x1b   : > { %v302_v29 = vpack.c.bf16 %v295_v26, %v295_v26  ;;  %v303_v30 = vpack.c.bf16 %v299_v28, %v299_v28 }
  0x1d   : > { %v317_v31 = vrot.slane %v302_v29, %v316_v27  ;;  %v354_v32 = vrot.slane %v303_v30, %v316_v27 }
  0x1f   : > { %v324_v33 = vrot.slane %v317_v31, %v316_v27  ;;  %v361_v34 = vrot.slane %v354_v32, %v316_v27 }
  0x21   : > { %325 = vrot.lane.b32.xlu1 %v324_v33, %s551_s8 }
  0x25   : > { %362 = vrot.lane.b32.xlu1 %v361_v34, %s551_s8 }
  0x82   : > { %v335_v36 = vpop.permute.xlu0 %334 }
  0x83   : > { %v338_v37 = vsel %vm608_vm2, %v335_v36, %v337_v35 }
  0x84   : > { %339 = vst [vmem:[%s615_s7 + $0x1] sm:$0x1] %v338_v37 }
  0x86   : > { %v370_v39 = vpop.permute.xlu0 %369 }
  0x87   : > { %v373_v40 = vsel %vm608_vm2, %v370_v39, %v492_v38 }
  0x88   : > { %493 = vst [vmem:[%s615_s7 + $0x3] sm:$0x1] %v373_v40 }
  0x8b   : > { %v340_v41 = vld [vmem:[%s615_s7 + $0x1] sm:$0x1] }
  0x8c   : > { %v341_v42 = vsel %vm329_vm4, %v302_v29, %v340_v41 }
  0x8d   : > { %342 = vst [vmem:[%s615_s7 + $0x1] sm:$0x1] %v341_v42 }
  0x8f   : > { %v494_v44 = vld [vmem:[%s615_s7 + $0x3] sm:$0x1] }
  0x90   : > { %v376_v46 = vsel %vm329_vm4, %v303_v30, %v494_v44 }
  0x91   : > { %495 = vst [vmem:[%s615_s7 + $0x3] sm:$0x1] %v376_v46 }
  0x93   : > { %v326_v45 = vpop.permute.xlu1 %325 }
  0x94   : > { %v331_v47 = vsel %vm329_vm4, %v326_v45, %v330_v43 }
  0x95   : > { %332 = vst [vmem:[%s615_s7] sm:$0x1] %v331_v47 }
  0x97   : > { %v363_v49 = vpop.permute.xlu1 %362 }
  0x98   : > { %v366_v50 = vsel %vm329_vm4, %v363_v49, %v490_v48 }
  0x99   : > { %491 = vst [vmem:[%s615_s7 + $0x2] sm:$0x1] %v366_v50 }
  0x9a PF: > { %s14_s17 = sadd.s32 1, %s547_s17   ;;  %s658_s15 = smov %s543_s16 }
  0x9b   : > { %p11_p5 = scmp.ge.s32.totalorder %s14_s17, 4   ;;  %s659_s16 = smov %s661_s18 }
  0x9d   :  { %13 = sbr.rel (!%p11_p5) target bundleno = 2 (0x2), region = 70 }

// kernel: squeeze.11
= control target key start
LH: loop header
LB: loop body
LE: loop exit
PB: predicated region body
PF: predicated region fallthrough
CT: control target
= control target key end

     0   :  { %s40_s8 = smov 32   ;;  %vm8_vm0 = vcmask 261120   ;;  %s41_s9 = smov 64   ;;  %s58_s0 = inlined_call_operand.vmem [shape: f32[128], index: 0, kind: input, shape index: {}]   ;;  %s59_s1 = inlined_call_operand.vmem [shape: f32[4,32], index: 1, kind: output, shape index: {}]  }
   0x1   :  { %v5_v0 = vld [vmem:[%s58_s0] sm:$0x1]  ;;  %s39_s0 = smov 96  }
   0x2   :  { %6 = vst [vmem:[#allocation1] sm:$0x1] %v5_v0 }
   0x9   :  { %v10_v1 = vld [vmem:[#allocation1] sm:$0x1]  }
   0xa   :  { %v22_v2 = vld [vmem:[#allocation1] sm:$0x1]   ;;  %11 = vrot.lane.b32.xlu0 %v10_v1, %s39_s0 }
   0xb   :  { %23 = vrot.lane.b32.xlu1 %v22_v2, %s40_s8  ;;  %v7_v3 = vld [vmem:[#allocation1] sm:$0x1]  }
   0xc   :  { %v16_v4 = vld [vmem:[#allocation1] sm:$0x1]   ;;  %9 = vst.msk [vmem:[#allocation0] sm:$0x1] %vm8_vm0, %v7_v3  }
   0xe   :  { %17 = vrot.lane.b32.xlu0 %v16_v4, %s41_s9 }
  0x7c   :  { %v12_v5 = vpop.permute.xlu0 %11  }
  0x7d   :  { %v24_v6 = vpop.permute.xlu1 %23   ;;  %15 = vst.msk [vmem:[#allocation0 + $0x1] sm:$0x1] %vm8_vm0, %v12_v5  }
  0x7e   :  { %27 = vst.msk [vmem:[#allocation0 + $0x3] sm:$0x1] %vm8_vm0, %v24_v6  }
  0x80   :  { %v18_v7 = vpop.permute.xlu0 %17  }
  0x81   :  { %21 = vst.msk [vmem:[#allocation0 + $0x2] sm:$0x1] %vm8_vm0, %v18_v7  }
  0x88   :  { %v32_v8 = vld [vmem:[#allocation0] sm:$0xf] }
  0x89   :  { %35 = vst [vmem:[%s59_s1] sm:$0xf] %v32_v8 }

// kernel: tile.57
= control target key start
LH: loop header
LB: loop body
LE: loop exit
PB: predicated region body
PF: predicated region fallthrough
CT: control target
= control target key end

     0   :  { %s22_s0 = inlined_call_operand.vmem [shape: f32[32], index: 0, kind: input, shape index: {}]   ;;  %s23_s1 = inlined_call_operand.vmem [shape: f32[4,32], index: 1, kind: output, shape index: {}]  }
   0x1   :  { %v4_v0 = vld [vmem:[%s22_s0] ss:$0 sm:$0xff] }
   0x2   :  { %5 = vst [vmem:[%s23_s1] sm:$0xf] %v4_v0 }

// kernel: unet_generator_forward.39
= control target key start
LH: loop header
LB: loop body
LE: loop exit
PB: predicated region body
PF: predicated region fallthrough
CT: control target
= control target key end

     0   :  { %v55_v0 = vmov 0.0   ;;  %s92_s1 = inlined_call_operand.vmem [shape: f32[1,128], index: 1, kind: output, shape index: {0}]   ;;  %s93_s2 = inlined_call_operand.vmem [shape: f32[1,128], index: 2, kind: output, shape index: {1}]   ;;  %s94_s0 = inlined_call_operand.vmem [shape: bf16[8,128], index: 0, kind: input, shape index: {}]  }
   0x1   :  { %14 = vst [vmem:[%s92_s1] sm:$0x1] %v55_v0  ;;  %15 = vst [vmem:[%s93_s2] sm:$0x1] %v55_v0  ;;  %v16_v1 = vld [vmem:[%s94_s0] sm:$0xf] }
   0x2   :  { %v17_v2 = vunpack.c.l.bf16 %v16_v1 }
   0x4   :  { %v28_v3 = vrot.slane %v17_v2, 4  ;;  %v37_v4 = vmul.f32 %v17_v2, %v17_v2 }
   0x6   :  { %v29_v5 = vadd.f32 %v28_v3, %v17_v2  ;;  %v38_v6 = vrot.slane %v37_v4, 4 }
   0x8   :  { %v30_v7 = vrot.slane %v29_v5, 2  ;;  %v39_v8 = vadd.f32 %v38_v6, %v37_v4  ;;  %v27_v13 = vld [vmem:[%s92_s1] sm:$0x1] }
   0x9   :  { %v36_v16 = vld [vmem:[%s93_s2] sm:$0x1] }
   0xa   :  { %v31_v9 = vadd.f32 %v30_v7, %v29_v5  ;;  %v40_v10 = vrot.slane %v39_v8, 2 }
   0xc   :  { %v32_v11 = vrot.slane %v31_v9, 1  ;;  %v41_v12 = vadd.f32 %v40_v10, %v39_v8 }
   0xe   :  { %v33_v14 = vadd.f32 %v32_v11, %v31_v9  ;;  %v42_v15 = vrot.slane %v41_v12, 1 }
  0x10   :  { %v34_v17 = vadd.f32 %v33_v14, %v27_v13  ;;  %v43_v18 = vadd.f32 %v42_v15, %v41_v12 }
  0x12   :  { %35 = vst [vmem:[%s92_s1] sm:$0x1] %v34_v17  ;;  %v44_v19 = vadd.f32 %v43_v18, %v36_v16 }
  0x14   :  { %45 = vst [vmem:[%s93_s2] sm:$0x1] %v44_v19 }

// kernel: unet_generator_forward.40
= control target key start
LH: loop header
LB: loop body
LE: loop exit
PB: predicated region body
PF: predicated region fallthrough
CT: control target
= control target key end

     0   :  { %s553_s15 = smov 0   ;;  %s555_s16 = smov 0   ;;  %s628_s0 = inlined_call_operand.vmem [shape: bf16[2,4,2,64], index: 0, kind: input, shape index: {}]   ;;  %s629_s1 = inlined_call_operand.vmem [shape: bf16[2,2,2,128], index: 1, kind: input, shape index: {}]   ;;  %s630_s2 = inlined_call_operand.vmem [shape: f32[1,128], index: 2, kind: input, shape index: {}]   ;;  %s631_s3 = inlined_call_operand.vmem [shape: f32[1,128], index: 3, kind: input, shape index: {}]   ;;  %s632_s4 = inlined_call_operand.vmem [shape: bf16[2,4,2,128], index: 4, kind: output, shape index: {}]  }
   0x1   :  { %s557_s17 = smov 0   ;;  %s559_s18 = smov 0  }
   0x2   :  { %s561_s19 = smov 0  }
   0x3 LB: > { %s23_s20 = sadd.s32 1, %s514_s17  ;;  %s26_s21 = sadd.s32 1, %s518_s18  ;;  %s522_s19 = sphi %s561_s19, %s14_s19   ;;  %s518_s18 = sphi %s559_s18, %s636_s18   ;;  %s514_s17 = sphi %s557_s17, %s635_s17   ;;  %s510_s16 = sphi %s555_s16, %s634_s16   ;;  %s506_s15 = sphi %s553_s15, %s633_s15  }
   0x4   : > { %p24_p0 = scmp.ge.s32.totalorder %s23_s20, 2  ;;  %p426_p1 = scmp.ge.s32.totalorder %s522_s19, 1 }
   0x5   : > { %p196_p2 = scmp.lt.s32.totalorder %s522_s19, 5 }
   0x6   : > { %s638_s20 = smov (%p24_p0, %s23_s20), 0  ;;  %s640_s21 = smov (!%p24_p0, %s26_s21), %s518_s18 }
   0x7   : > { %p197_p3 = pnand %p426_p1, %p196_p2  ;;  %p28_p4 = scmp.ge.s32.totalorder %s640_s21, 2 }
   0x8   : > { %p236_p5 = scmp.lt.s32.totalorder (!%p197_p3), %s510_s16, 1  ;;  %p246_p6 = scmp.lt.s32.totalorder (!%p197_p3), %s506_s15, 1 }
   0x9   : > { %s642_s21 = smov (%p28_p4, %s640_s21), 0  ;;  %200 = sbr.rel (%p197_p3) target bundleno = 155 (0x9b), region = 36 }
   0xa   : > { %s427_s22 = sshll.u32 (!%p197_p3), %s506_s15, 1  ;;  %s525_s14 = smov (!%p197_p3), 32  }
   0xb   : > { %p238_p7 = scmp.lt.s32.totalorder (!%p197_p3), %s427_s22, 3 }
   0xe   : > { %s644_s16 = smov (!%p236_p5, %s510_s16), 1  ;;  %s646_s15 = smov (!%p246_p6, %s506_s15), 1  ;;  %v524_v0 = vmov 1966171168   ;;  %v287_v2 = vlaneseq  ;;  %v432_v4 = vld [vmem:[%s630_s2] ss:$0 sm:$0xff] }
   0xf   : > { %s429_s23 = sshll.u32 %s644_s16, 1  ;;  %v285_v1 = vunpack.c.l.s4 %v524_v0  ;;  %s428_s28 = sshll.u32 %s644_s16, 2  ;;  %v433_v8 = vld [vmem:[%s631_s3] ss:$0 sm:$0xff]  ;;  %vm281_vm0 = vcmask 253952   ;;  %vm301_vm1 = vcmask 516352  }
  0x10   : > { %s249_s24 = sadd.s32 %s429_s23, %s646_s15  ;;  %s648_s22 = smov (!%p238_p7, %s427_s22), 3  ;;  %v288_v7 = vshrl.u32 %v287_v2, 7  ;;  %vm307_vm2 = vcmask 778752   ;;  %vm312_vm3 = vcmask 1041152  }
  0x11   : > { %s250_s27 = scalar_lea.vmem %s629_s1, %s249_s24  ;;  %v286_v6 = vunpack.c.0.s8 %v285_v1  ;;  %s241_s7 = sadd.s32 %s428_s28, %s648_s22 }
  0x12   : > { %v262_v3 = vld [vmem:[%s250_s27] sm:$0x1]  ;;  %s242_s10 = scalar_lea.vmem %s628_s0, %s241_s7  ;;  %s603_s13 = scalar_lea.vmem %s632_s4, %s241_s7 }
  0x13   : > { %v263_v5 = vunpack.c.l.bf16 %v262_v3  ;;  %v260_v10 = vld [vmem:[%s242_s10] sm:$0x1]  ;;  %v261_v11 = vld [vmem:[%s242_s10 + $0x1] sm:$0x1]  ;;  %v289_v13 = vsub.s32 %v286_v6, %v288_v7  ;;  %s526_s15 = smov 96   ;;  %s527_s16 = smov 64  }
  0x14   : > { %304 = vrot.lane.b32.xlu1 %v260_v10, %s525_s14  ;;  %282 = vst.msk [vmem:[%s603_s13] sm:$0x1] %vm281_vm0, %v260_v10  ;;  %434 = vst.msk [vmem:[%s603_s13 + $0x1] sm:$0x1] %vm281_vm0, %v261_v11 }
  0x15   : > { %v271_v9 = vmul.f32 %v432_v4, %v263_v5 }
  0x17   : > { %v279_v12 = vadd.f32 %v433_v8, %v271_v9 }
  0x18   : > { %321 = vrot.lane.b32.xlu1 %v261_v11, %s525_s14 }
  0x19   : > { %v280_v14 = vpack.c.bf16 %v279_v12, %v279_v12 }
  0x1b   : > { %v290_v15 = vrot.slane %v280_v14, %v289_v13 }
  0x1d   : > { %v297_v16 = vrot.slane %v290_v15, %v289_v13 }
  0x1f   : > { %298 = vrot.lane.b32.xlu0 %v297_v16, %s525_s14 }
  0x23   : > { %316 = vrot.lane.b32.xlu0 %v297_v16, %s526_s15 }
  0x27   : > { %309 = vrot.lane.b32.xlu0 %v297_v16, %s527_s16 }
  0x86   : > { %v305_v17 = vpop.permute.xlu1 %304 }
  0x8a   : > { %v322_v19 = vpop.permute.xlu1 %321 }
  0x91   : > { %v299_v18 = vpop.permute.xlu0 %298 }
  0x92   : > { %302 = vst.msk [vmem:[%s603_s13] sm:$0x1] %vm301_vm1, %v299_v18 }
  0x93   : > { %308 = vst.msk [vmem:[%s603_s13] sm:$0x1] %vm307_vm2, %v305_v17 }
  0x95   : > { %v317_v20 = vpop.permute.xlu0 %316 }
  0x96   : > { %435 = vst.msk [vmem:[%s603_s13 + $0x1] sm:$0x1] %vm301_vm1, %v317_v20 }
  0x97   : > { %436 = vst.msk [vmem:[%s603_s13 + $0x1] sm:$0x1] %vm307_vm2, %v322_v19 }
  0x98   : > { %437 = vst.msk [vmem:[%s603_s13 + $0x1] sm:$0x1] %vm312_vm3, %v280_v14 }
  0x99   : > { %v310_v21 = vpop.permute.xlu0 %309 }
  0x9a   : > { %313 = vst.msk [vmem:[%s603_s13] sm:$0x1] %vm312_vm3, %v310_v21 }
  0x9b PF: > { %s14_s19 = sadd.s32 1, %s522_s19   ;;  %s633_s15 = smov %s514_s17 }
  0x9c   : > { %p11_p8 = scmp.ge.s32.totalorder %s14_s19, 6   ;;  %s634_s16 = smov %s518_s18 }
  0x9d   : > { %s635_s17 = smov %s638_s20  ;;  %s636_s18 = smov %s642_s21 }
  0x9e   :  { %13 = sbr.rel (!%p11_p8) target bundleno = 3 (0x3), region = 70 }

// kernel: unet_generator_forward.38
= control target key start
LH: loop header
LB: loop body
LE: loop exit
PB: predicated region body
PF: predicated region fallthrough
CT: control target
= control target key end

     0   :  { %v1133_v34 = vmov 0   ;;  %vm1135_vm0 = vmmov 0   ;;  %s1398_s1 = inlined_call_operand.vmem [shape: bf16[1152,128], index: 1, kind: input, shape index: {}]   ;;  %s1399_s0 = inlined_call_operand.vmem [shape: bf16[8,1152], index: 0, kind: input, shape index: {}]   ;;  %s1400_s2 = inlined_call_operand.vmem [shape: f32[1,128], index: 2, kind: input, shape index: {}]   ;;  %s1401_s3 = inlined_call_operand.vmem [shape: bf16[8,128], index: 3, kind: output, shape index: {}]  }
   0x1   :  { %v1061_v0 = vld [vmem:[%s1398_s1 + $0x78] sm:$0xff]   ;;  %v1065_v4 = vld [vmem:[%s1398_s1 + $0x70] sm:$0xff]   ;;  %v1069_v8 = vld [vmem:[%s1398_s1 + $0x68] sm:$0xff]  }
   0x2   :  { %v1062_v1 = vld [vmem:[%s1398_s1 + $0xf8] sm:$0xff]   ;;  %941 = vmatprep.subr.bf16.mxu0 %v1061_v0  ;;  %v1066_v5 = vld [vmem:[%s1398_s1 + $0xf0] sm:$0xff]   ;;  %v1070_v9 = vld [vmem:[%s1398_s1 + $0xe8] sm:$0xff]  }
   0x3   :  { %v1063_v2 = vld [vmem:[%s1398_s1 + $0x38] sm:$0xff]   ;;  %963 = vmatprep.subr.bf16.mxu1 %v1062_v1  ;;  %v1067_v6 = vld [vmem:[%s1398_s1 + $0x30] sm:$0xff]   ;;  %v1071_v10 = vld [vmem:[%s1398_s1 + $0x28] sm:$0xff]  }
   0x4   :  { %v1064_v3 = vld [vmem:[%s1398_s1 + $0xb8] sm:$0xff]   ;;  %942 = vmatpush3.bf16.msra.mxu0 %v1063_v2  ;;  %v1068_v7 = vld [vmem:[%s1398_s1 + $0xb0] sm:$0xff]   ;;  %v1072_v11 = vld [vmem:[%s1398_s1 + $0xa8] sm:$0xff]  }
   0x5   :  { %964 = vmatpush3.bf16.msra.mxu1 %v1064_v3  ;;  %943 = vmatprep.subr.bf16.mxu0 %v1065_v4  ;;  %v1073_v12 = vld [vmem:[%s1398_s1 + $0x60] sm:$0xff]   ;;  %v1077_v16 = vld [vmem:[%s1398_s1 + $0x58] sm:$0xff]   ;;  %v1081_v20 = vld [vmem:[%s1398_s1 + $0x50] sm:$0xff]  }
   0x6   :  { %965 = vmatprep.subr.bf16.mxu1 %v1066_v5  ;;  %v1074_v13 = vld [vmem:[%s1398_s1 + $0xe0] sm:$0xff]   ;;  %v1078_v17 = vld [vmem:[%s1398_s1 + $0xd8] sm:$0xff]   ;;  %v1082_v21 = vld [vmem:[%s1398_s1 + $0xd0] sm:$0xff]  }
   0x7   :  { %v1075_v14 = vld [vmem:[%s1398_s1 + $0x20] sm:$0xff]   ;;  %v1079_v18 = vld [vmem:[%s1398_s1 + $0x18] sm:$0xff]   ;;  %v1083_v22 = vld [vmem:[%s1398_s1 + $0x10] sm:$0xff]  }
   0x8   :  { %944 = vmatpush3.bf16.msra.mxu0 %v1067_v6  ;;  %v1076_v15 = vld [vmem:[%s1398_s1 + $0xa0] sm:$0xff]   ;;  %v1080_v19 = vld [vmem:[%s1398_s1 + $0x98] sm:$0xff]   ;;  %v1084_v23 = vld [vmem:[%s1398_s1 + $0x90] sm:$0xff]  }
   0x9   :  { %966 = vmatpush3.bf16.msra.mxu1 %v1068_v7  ;;  %945 = vmatprep.subr.bf16.mxu0 %v1069_v8  ;;  %v1085_v24 = vld [vmem:[%s1398_s1 + $0x48] sm:$0xff]   ;;  %v1089_v28 = vld [vmem:[%s1398_s1 + $0x40] sm:$0xff]   ;;  %v1093_v37 = vld [vmem:[%s1398_s1 + $0x178] sm:$0xff]  }
   0xa   :  { %967 = vmatprep.subr.bf16.mxu1 %v1070_v9  ;;  %v1086_v25 = vld [vmem:[%s1398_s1 + $0xc8] sm:$0xff]   ;;  %v1090_v29 = vld [vmem:[%s1398_s1 + $0xc0] sm:$0xff]   ;;  %v1094_v38 = vld [vmem:[%s1398_s1 + $0x138] sm:$0xff]  }
   0xb   :  { %v1087_v26 = vld [vmem:[%s1398_s1 + $0x8] sm:$0xff]   ;;  %v1091_v30 = vld [vmem:[%s1398_s1] sm:$0xff]   ;;  %v1095_v43 = vld [vmem:[%s1398_s1 + $0x1f8] sm:$0xff]  }
   0xc   :  { %946 = vmatpush3.bf16.msra.mxu0 %v1071_v10  ;;  %v1088_v27 = vld [vmem:[%s1398_s1 + $0x88] sm:$0xff]   ;;  %v1092_v31 = vld [vmem:[%s1398_s1 + $0x80] sm:$0xff]   ;;  %v1096_v44 = vld [vmem:[%s1398_s1 + $0x1b8] sm:$0xff]  }
   0xd   :  { %968 = vmatpush3.bf16.msra.mxu1 %v1072_v11  ;;  %947 = vmatprep.subr.bf16.mxu0 %v1073_v12  ;;  %v20_v32 = vld [vmem:[%s1399_s0] sm:$0xff]  ;;  %v21_v33 = vld [vmem:[%s1399_s0 + $0x8] sm:$0xff]  ;;  %v1097_v45 = vld [vmem:[%s1398_s1 + $0x170] sm:$0xff]  }
   0xe   :  { %969 = vmatprep.subr.bf16.mxu1 %v1074_v13  ;;  %v25_v35 = vmax.bf16 %v1133_v34, %v20_v32  ;;  %v26_v36 = vmax.bf16 %v1133_v34, %v21_v33  ;;  %v1098_v46 = vld [vmem:[%s1398_s1 + $0x130] sm:$0xff]   ;;  %v1101_v49 = vld [vmem:[%s1398_s1 + $0x168] sm:$0xff]   ;;  %v1105_v53 = vld [vmem:[%s1398_s1 + $0x160] sm:$0xff]  }
   0xf   :  { %v1099_v47 = vld [vmem:[%s1398_s1 + $0x1f0] sm:$0xff]   ;;  %v1102_v50 = vld [vmem:[%s1398_s1 + $0x128] sm:$0xff]   ;;  %v1106_v54 = vld [vmem:[%s1398_s1 + $0x120] sm:$0xff]  }
  0x10   :  { %948 = vmatpush3.bf16.msra.mxu0 %v1075_v14  ;;  %v860_v39 = vcombine.high %v25_v35, %v25_v35  ;;  %v862_v40 = vcombine.high %v26_v36, %v26_v36  ;;  %v859_v41 = vcombine.low %v25_v35, %v25_v35  ;;  %v861_v42 = vcombine.low %v26_v36, %v26_v36  ;;  %v1100_v48 = vld [vmem:[%s1398_s1 + $0x1b0] sm:$0xff]   ;;  %v1103_v51 = vld [vmem:[%s1398_s1 + $0x1e8] sm:$0xff]   ;;  %v1107_v55 = vld [vmem:[%s1398_s1 + $0x1e0] sm:$0xff]  }
  0x11   :  { %970 = vmatpush3.bf16.msra.mxu1 %v1076_v15  ;;  %949 = vmatprep.subr.bf16.mxu0 %v1077_v16  ;;  %v1104_v52 = vld [vmem:[%s1398_s1 + $0x1a8] sm:$0xff]   ;;  %v1108_v56 = vld [vmem:[%s1398_s1 + $0x1a0] sm:$0xff]   ;;  %v1109_v57 = vld [vmem:[%s1398_s1 + $0x158] sm:$0xff]  }
  0x12   :  { %971 = vmatprep.subr.bf16.mxu1 %v1078_v17  ;;  %671 = vmatprep.mubr.bf16.mxu0 %v860_v39  ;;  %v1110_v58 = vld [vmem:[%s1398_s1 + $0x118] sm:$0xff]   ;;  %v1113_v61 = vld [vmem:[%s1398_s1 + $0x150] sm:$0xff]   ;;  %v1117_v1 = vld [vmem:[%s1398_s1 + $0x148] sm:$0xff]  }
  0x13   :  { %711 = vmatprep.mubr.bf16.mxu1 %v862_v40  ;;  %v1111_v59 = vld [vmem:[%s1398_s1 + $0x1d8] sm:$0xff]   ;;  %v1114_v62 = vld [vmem:[%s1398_s1 + $0x110] sm:$0xff]   ;;  %v1118_v2 = vld [vmem:[%s1398_s1 + $0x108] sm:$0xff]  }
  0x14   :  { %950 = vmatpush3.bf16.msra.mxu0 %v1079_v18  ;;  %v1112_v60 = vld [vmem:[%s1398_s1 + $0x198] sm:$0xff]   ;;  %v1115_v63 = vld [vmem:[%s1398_s1 + $0x1d0] sm:$0xff]   ;;  %v1119_v3 = vld [vmem:[%s1398_s1 + $0x1c8] sm:$0xff]   ;;  %v1134_v18 = vmov 0.0  }
  0x15   :  { %972 = vmatpush3.bf16.msra.mxu1 %v1080_v19  ;;  %951 = vmatprep.subr.bf16.mxu0 %v1081_v20  ;;  %v1116_v0 = vld [vmem:[%s1398_s1 + $0x190] sm:$0xff]   ;;  %v1120_v4 = vld [vmem:[%s1398_s1 + $0x188] sm:$0xff]   ;;  %v1121_v5 = vld [vmem:[%s1398_s1 + $0x140] sm:$0xff]  }
  0x16   :  { %973 = vmatprep.subr.bf16.mxu1 %v1082_v21  ;;  %v1122_v6 = vld [vmem:[%s1398_s1 + $0x100] sm:$0xff]   ;;  %v22_v8 = vld [vmem:[%s1399_s0 + $0x10] sm:$0xff]  ;;  %v23_v11 = vld [vmem:[%s1399_s0 + $0x18] sm:$0xff] }
  0x17   :  { %v1123_v7 = vld [vmem:[%s1398_s1 + $0x1c0] sm:$0xff]   ;;  %v27_v9 = vmax.bf16 %v1133_v34, %v22_v8  ;;  %v28_v14 = vmax.bf16 %v1133_v34, %v23_v11  ;;  %v1125_v15 = vld [vmem:[%s1398_s1 + $0x238] sm:$0xff]   ;;  %v1126_v19 = vld [vmem:[%s1398_s1 + $0x230] sm:$0xff]  }
  0x18   :  { %952 = vmatpush3.bf16.msra.mxu0 %v1083_v22  ;;  %v1124_v10 = vld [vmem:[%s1398_s1 + $0x180] sm:$0xff]   ;;  %v1127_v22 = vld [vmem:[%s1398_s1 + $0x228] sm:$0xff]  }
  0x19   :  { %974 = vmatpush3.bf16.msra.mxu1 %v1084_v23  ;;  %953 = vmatprep.subr.bf16.mxu0 %v1085_v24  ;;  %v864_v12 = vcombine.high %v27_v9, %v27_v9  ;;  %v863_v13 = vcombine.low %v27_v9, %v27_v9  ;;  %v866_v16 = vcombine.high %v28_v14, %v28_v14  ;;  %v24_v20 = vld [vmem:[%s1399_s0 + $0x20] sm:$0xf]  ;;  %v1129_v24 = vld [vmem:[%s1398_s1 + $0x218] sm:$0xff]  }
  0x1a   :  { %975 = vmatprep.subr.bf16.mxu1 %v1086_v25  ;;  %v865_v17 = vcombine.low %v28_v14, %v28_v14  ;;  %v29_v21 = vmax.bf16 %v1133_v34, %v24_v20  ;;  %v1128_v23 = vld [vmem:[%s1398_s1 + $0x220] sm:$0xff]   ;;  %v1130_v25 = vld [vmem:[%s1398_s1 + $0x210] sm:$0xff]  }
  0x1c   :  { %954 = vmatpush3.bf16.msra.mxu0 %v1087_v26  ;;  %v1131_v26 = vld [vmem:[%s1398_s1 + $0x208] sm:$0xff]  }
  0x1d   :  { %976 = vmatpush3.bf16.msra.mxu1 %v1088_v27  ;;  %955 = vmatprep.subr.bf16.mxu0 %v1089_v28  ;;  %v1132_v27 = vld [vmem:[%s1398_s1 + $0x200] sm:$0xff]   ;;  %v867_v28 = vcombine.low %v29_v21, %v29_v21 }
  0x1e   :  { %977 = vmatprep.subr.bf16.mxu1 %v1090_v29 }
  0x20   :  { %956 = vmatpush3.bf16.msra.mxu0 %v1091_v30 }
  0x21   :  { %978 = vmatpush3.bf16.msra.mxu1 %v1092_v31  ;;  %985 = vmatprep.subr.bf16.mxu0 %v1093_v37 }
  0x22   :  { %1007 = vmatprep.subr.bf16.mxu1 %v1095_v43 }
  0x23   :  { %672 = vmatmul.mubr.bf16.vlgmr.msra.gmra.mxu0 %v859_v41 }
  0x24   :  { %712 = vmatmul.mubr.bf16.vlgmr.msra.gmra.mxu1 %v861_v42  ;;  %986 = vmatpush3.bf16.msra.mxu0 %v1094_v38 }
  0x25   :  { %1008 = vmatpush3.bf16.msra.mxu1 %v1096_v44  ;;  %987 = vmatprep.subr.bf16.mxu0 %v1097_v45 }
  0x26   :  { %1009 = vmatprep.subr.bf16.mxu1 %v1099_v47  ;;  %751 = vmatprep.mubr.bf16.mxu0 %v864_v12 }
  0x27   :  { %791 = vmatprep.mubr.bf16.mxu1 %v866_v16 }
  0x28   :  { %988 = vmatpush3.bf16.msra.mxu0 %v1098_v46 }
  0x29   :  { %1010 = vmatpush3.bf16.msra.mxu1 %v1100_v48  ;;  %989 = vmatprep.subr.bf16.mxu0 %v1101_v49 }
  0x2a   :  { %1011 = vmatprep.subr.bf16.mxu1 %v1103_v51 }
  0x2c   :  { %990 = vmatpush3.bf16.msra.mxu0 %v1102_v50 }
  0x2d   :  { %1012 = vmatpush3.bf16.msra.mxu1 %v1104_v52  ;;  %991 = vmatprep.subr.bf16.mxu0 %v1105_v53  ;;  %v940_v53 = vld [vmem:[%s1400_s2] ss:$0 sm:$0xff] }
  0x2e   :  { %1013 = vmatprep.subr.bf16.mxu1 %v1107_v55 }
  0x30   :  { %992 = vmatpush3.bf16.msra.mxu0 %v1106_v54 }
  0x31   :  { %1014 = vmatpush3.bf16.msra.mxu1 %v1108_v56  ;;  %993 = vmatprep.subr.bf16.mxu0 %v1109_v57 }
  0x32   :  { %1015 = vmatprep.subr.bf16.mxu1 %v1111_v59 }
  0x34   :  { %994 = vmatpush3.bf16.msra.mxu0 %v1110_v58 }
  0x35   :  { %1016 = vmatpush3.bf16.msra.mxu1 %v1112_v60  ;;  %995 = vmatprep.subr.bf16.mxu0 %v1113_v61 }
  0x36   :  { %1017 = vmatprep.subr.bf16.mxu1 %v1115_v63 }
  0x38   :  { %996 = vmatpush3.bf16.msra.mxu0 %v1114_v62 }
  0x39   :  { %1018 = vmatpush3.bf16.msra.mxu1 %v1116_v0  ;;  %997 = vmatprep.subr.bf16.mxu0 %v1117_v1 }
  0x3a   :  { %1019 = vmatprep.subr.bf16.mxu1 %v1119_v3 }
  0x3c   :  { %998 = vmatpush3.bf16.msra.mxu0 %v1118_v2 }
  0x3d   :  { %1020 = vmatpush3.bf16.msra.mxu1 %v1120_v4  ;;  %999 = vmatprep.subr.bf16.mxu0 %v1121_v5 }
  0x3e   :  { %1021 = vmatprep.subr.bf16.mxu1 %v1123_v7 }
  0x40   :  { %1000 = vmatpush3.bf16.msra.mxu0 %v1122_v6 }
  0x41   :  { %1022 = vmatpush3.bf16.msra.mxu1 %v1124_v10  ;;  %1038 = vmatprep.subr.bf16.mxu0 %v1134_v18 }
  0x43   :  { %752 = vmatmul.mubr.bf16.vlgmr.msra.gmra.mxu0 %v863_v13 }
  0x44   :  { %1039 = vmatpush3.bf16.msra.mxu0 %v1125_v15  ;;  %792 = vmatmul.mubr.bf16.vlgmr.msra.gmra.mxu1 %v865_v17 }
  0x45   :  { %1040 = vmatprep.subr.bf16.mxu0 %v1134_v18  ;;  %1054 = vmatprep.mubr.msk.bf16.mxu0 %vm1135_vm0, %v1134_v18 }
  0x48   :  { %1041 = vmatpush3.bf16.msra.mxu0 %v1126_v19 }
  0x49   :  { %1042 = vmatprep.subr.bf16.mxu0 %v1134_v18 }
  0x4c   :  { %1043 = vmatpush3.bf16.msra.mxu0 %v1127_v22 }
  0x4d   :  { %1044 = vmatprep.subr.bf16.mxu0 %v1134_v18 }
  0x50   :  { %1045 = vmatpush3.bf16.msra.mxu0 %v1128_v23 }
  0x51   :  { %1046 = vmatprep.subr.bf16.mxu0 %v1134_v18 }
  0x54   :  { %1047 = vmatpush3.bf16.msra.mxu0 %v1129_v24 }
  0x55   :  { %1048 = vmatprep.subr.bf16.mxu0 %v1134_v18 }
  0x58   :  { %1049 = vmatpush3.bf16.msra.mxu0 %v1130_v25 }
  0x59   :  { %1050 = vmatprep.subr.bf16.mxu0 %v1134_v18 }
  0x5c   :  { %1051 = vmatpush3.bf16.msra.mxu0 %v1131_v26 }
  0x5d   :  { %1052 = vmatprep.subr.bf16.mxu0 %v1134_v18 }
  0x60   :  { %1053 = vmatpush3.bf16.msra.mxu0 %v1132_v27 }
  0x63   :  { %1055 = vmatmul.mubr.bf16.vlgmr.msra.gmra.mxu0 %v867_v28 }
  0xe3   :  { %v957_v29 = vpop.f32.mrf.mxu0 }
  0xe4   :  { %v979_v30 = vpop.f32.mrf.mxu1 }
  0xe5   :  { %v958_v31 = vpop.f32.mrf.mxu0 }
  0xe6   :  { %v980_v32 = vpop.f32.mrf.mxu1  ;;  %v959_v45 = vadd.f32 %v958_v31, %v957_v29 }
  0xe7   :  { %v960_v33 = vpop.f32.mrf.mxu0  ;;  %v981_v46 = vadd.f32 %v980_v32, %v979_v30 }
  0xe8   :  { %v982_v34 = vpop.f32.mrf.mxu1 }
  0xe9   :  { %v961_v35 = vpop.f32.mrf.mxu0  ;;  %v714_v48 = vadd.f32 %v981_v46, %v959_v45 }
  0xea   :  { %v983_v36 = vpop.f32.mrf.mxu1 }
 0x103   :  { %v1001_v37 = vpop.f32.mrf.mxu0 }
 0x104   :  { %v1023_v38 = vpop.f32.mrf.mxu1 }
 0x105   :  { %v1002_v39 = vpop.f32.mrf.mxu0 }
 0x106   :  { %v1024_v40 = vpop.f32.mrf.mxu1  ;;  %v1003_v47 = vadd.f32 %v1002_v39, %v1001_v37 }
 0x107   :  { %v1004_v41 = vpop.f32.mrf.mxu0  ;;  %v1025_v50 = vadd.f32 %v1024_v40, %v1023_v38 }
 0x108   :  { %v1026_v42 = vpop.f32.mrf.mxu1  ;;  %v754_v49 = vadd.f32 %v1003_v47, %v714_v48 }
 0x109   :  { %v1005_v43 = vpop.f32.mrf.mxu0 }
 0x10a   :  { %v1027_v44 = vpop.f32.mrf.mxu1  ;;  %v794_v51 = vadd.f32 %v1025_v50, %v754_v49 }
 0x123   :  { %v833_v52 = vpop.f32.mrf.mxu0 }
 0x124   :  { %v834_v54 = vadd.f32 %v833_v52, %v794_v51 }
 0x125   :  { %v1056_v55 = vpop.f32.mrf.mxu0 }
 0x126   :  { %v852_v56 = vadd.f32 %v940_v53, %v834_v54 }
 0x127   :  { %v836_v57 = vpop.f32.mrf.mxu0 }
 0x128   :  { %v853_v58 = vpack.c.bf16 %v852_v56, %v852_v56 }
 0x129   :  { %v1057_v59 = vpop.f32.mrf.mxu0 }
 0x12a   :  { %854 = vst [vmem:[%s1401_s3] sm:$0xf] %v853_v58 }

// kernel: squeeze.12
= control target key start
LH: loop header
LB: loop body
LE: loop exit
PB: predicated region body
PF: predicated region fallthrough
CT: control target
= control target key end

     0   :  { %s40_s8 = smov 80   ;;  %vm8_vm0 = vcmask 130048   ;;  %s41_s9 = smov 96   ;;  %s58_s0 = inlined_call_operand.vmem [shape: f32[64], index: 0, kind: input, shape index: {}]   ;;  %s59_s1 = inlined_call_operand.vmem [shape: f32[4,16], index: 1, kind: output, shape index: {}]  }
   0x1   :  { %v5_v0 = vld [vmem:[%s58_s0] sm:$0x1]  ;;  %s39_s0 = smov 112  }
   0x2   :  { %6 = vst [vmem:[#allocation1] sm:$0x1] %v5_v0 }
   0x9   :  { %v10_v1 = vld [vmem:[#allocation1] sm:$0x1]  }
   0xa   :  { %v22_v2 = vld [vmem:[#allocation1] sm:$0x1]   ;;  %11 = vrot.lane.b32.xlu0 %v10_v1, %s39_s0 }
   0xb   :  { %23 = vrot.lane.b32.xlu1 %v22_v2, %s40_s8  ;;  %v7_v3 = vld [vmem:[#allocation1] sm:$0x1]  }
   0xc   :  { %v16_v4 = vld [vmem:[#allocation1] sm:$0x1]   ;;  %9 = vst.msk [vmem:[#allocation0] sm:$0x1] %vm8_vm0, %v7_v3  }
   0xe   :  { %17 = vrot.lane.b32.xlu0 %v16_v4, %s41_s9 }
  0x7c   :  { %v12_v5 = vpop.permute.xlu0 %11  }
  0x7d   :  { %v24_v6 = vpop.permute.xlu1 %23   ;;  %15 = vst.msk [vmem:[#allocation0 + $0x1] sm:$0x1] %vm8_vm0, %v12_v5  }
  0x7e   :  { %27 = vst.msk [vmem:[#allocation0 + $0x3] sm:$0x1] %vm8_vm0, %v24_v6  }
  0x80   :  { %v18_v7 = vpop.permute.xlu0 %17  }
  0x81   :  { %21 = vst.msk [vmem:[#allocation0 + $0x2] sm:$0x1] %vm8_vm0, %v18_v7  }
  0x88   :  { %v32_v8 = vld [vmem:[#allocation0] sm:$0xf] }
  0x89   :  { %35 = vst [vmem:[%s59_s1] sm:$0xf] %v32_v8 }

// kernel: unet_generator_forward.42
= control target key start
LH: loop header
LB: loop body
LE: loop exit
PB: predicated region body
PF: predicated region fallthrough
CT: control target
= control target key end

     0   :  { %v97_v0 = vmov 0.0   ;;  %s137_s1 = inlined_call_operand.vmem [shape: f32[1,128], index: 1, kind: output, shape index: {0}]   ;;  %s138_s2 = inlined_call_operand.vmem [shape: f32[1,128], index: 2, kind: output, shape index: {1}]   ;;  %s139_s0 = inlined_call_operand.vmem [shape: bf16[32,128], index: 0, kind: input, shape index: {}]  }
   0x1   :  { %14 = vst [vmem:[%s137_s1] sm:$0x1] %v97_v0  ;;  %15 = vst [vmem:[%s138_s2] sm:$0x1] %v97_v0  ;;  %v88_v1 = vld [vmem:[%s139_s0] sm:$0xff]   ;;  %v95_v2 = vld [vmem:[%s139_s0 + $0x8] sm:$0xff]  }
   0x2   :  { %v89_v3 = vunpack.c.l.bf16 %v88_v1  ;;  %v90_v4 = vunpack.c.h.bf16 %v88_v1  ;;  %v93_v5 = vunpack.c.l.bf16 %v95_v2  ;;  %v94_v6 = vunpack.c.h.bf16 %v95_v2 }
   0x4   :  { %v52_v7 = vadd.f32 %v90_v4, %v89_v3  ;;  %v64_v8 = vmul.f32 %v89_v3, %v89_v3  ;;  %v65_v9 = vmul.f32 %v90_v4, %v90_v4  ;;  %v66_v10 = vmul.f32 %v93_v5, %v93_v5 }
   0x5   :  { %v67_v12 = vmul.f32 %v94_v6, %v94_v6 }
   0x6   :  { %v53_v11 = vadd.f32 %v93_v5, %v52_v7  ;;  %v68_v13 = vadd.f32 %v65_v9, %v64_v8 }
   0x8   :  { %v54_v14 = vadd.f32 %v94_v6, %v53_v11  ;;  %v69_v15 = vadd.f32 %v68_v13, %v66_v10  ;;  %v51_v26 = vld [vmem:[%s137_s1] sm:$0x1] }
   0x9   :  { %v63_v29 = vld [vmem:[%s138_s2] sm:$0x1] }
   0xa   :  { %v55_v16 = vrot.slane %v54_v14, 4  ;;  %v70_v17 = vadd.f32 %v69_v15, %v67_v12 }
   0xc   :  { %v56_v18 = vadd.f32 %v55_v16, %v54_v14  ;;  %v71_v19 = vrot.slane %v70_v17, 4 }
   0xe   :  { %v57_v20 = vrot.slane %v56_v18, 2  ;;  %v72_v21 = vadd.f32 %v71_v19, %v70_v17 }
  0x10   :  { %v58_v22 = vadd.f32 %v57_v20, %v56_v18  ;;  %v73_v23 = vrot.slane %v72_v21, 2 }
  0x12   :  { %v59_v24 = vrot.slane %v58_v22, 1  ;;  %v74_v25 = vadd.f32 %v73_v23, %v72_v21 }
  0x14   :  { %v60_v27 = vadd.f32 %v59_v24, %v58_v22  ;;  %v75_v28 = vrot.slane %v74_v25, 1 }
  0x16   :  { %v61_v30 = vadd.f32 %v60_v27, %v51_v26  ;;  %v76_v31 = vadd.f32 %v75_v28, %v74_v25 }
  0x18   :  { %62 = vst [vmem:[%s137_s1] sm:$0x1] %v61_v30  ;;  %v77_v32 = vadd.f32 %v76_v31, %v63_v29 }
  0x1a   :  { %78 = vst [vmem:[%s138_s2] sm:$0x1] %v77_v32 }

// kernel: unet_generator_forward.41
= control target key start
LH: loop header
LB: loop body
LE: loop exit
PB: predicated region body
PF: predicated region fallthrough
CT: control target
= control target key end

     0   :  { %v817_v35 = vmov 0   ;;  %s1003_s1 = inlined_call_operand.vmem [shape: bf16[640,128], index: 1, kind: input, shape index: {}]   ;;  %s1004_s0 = inlined_call_operand.vmem [shape: bf16[32,640], index: 0, kind: input, shape index: {}]   ;;  %s1005_s2 = inlined_call_operand.vmem [shape: f32[1,128], index: 2, kind: input, shape index: {}]   ;;  %s1006_s3 = inlined_call_operand.vmem [shape: bf16[32,128], index: 3, kind: output, shape index: {}]  }
   0x1   :  { %v777_v0 = vld [vmem:[%s1003_s1 + $0x78] sm:$0xff]   ;;  %v781_v4 = vld [vmem:[%s1003_s1 + $0x70] sm:$0xff]   ;;  %v785_v8 = vld [vmem:[%s1003_s1 + $0x68] sm:$0xff]  }
   0x2   :  { %v778_v1 = vld [vmem:[%s1003_s1 + $0xf8] sm:$0xff]   ;;  %690 = vmatprep.subr.bf16.mxu0 %v777_v0  ;;  %v782_v5 = vld [vmem:[%s1003_s1 + $0xf0] sm:$0xff]   ;;  %v786_v9 = vld [vmem:[%s1003_s1 + $0xe8] sm:$0xff]  }
   0x3   :  { %v779_v2 = vld [vmem:[%s1003_s1 + $0x38] sm:$0xff]   ;;  %718 = vmatprep.subr.bf16.mxu1 %v778_v1  ;;  %v783_v6 = vld [vmem:[%s1003_s1 + $0x30] sm:$0xff]   ;;  %v787_v10 = vld [vmem:[%s1003_s1 + $0x28] sm:$0xff]  }
   0x4   :  { %v780_v3 = vld [vmem:[%s1003_s1 + $0xb8] sm:$0xff]   ;;  %691 = vmatpush3.bf16.msra.mxu0 %v779_v2  ;;  %v784_v7 = vld [vmem:[%s1003_s1 + $0xb0] sm:$0xff]   ;;  %v788_v11 = vld [vmem:[%s1003_s1 + $0xa8] sm:$0xff]  }
   0x5   :  { %719 = vmatpush3.bf16.msra.mxu1 %v780_v3  ;;  %692 = vmatprep.subr.bf16.mxu0 %v781_v4  ;;  %v789_v12 = vld [vmem:[%s1003_s1 + $0x60] sm:$0xff]   ;;  %v793_v16 = vld [vmem:[%s1003_s1 + $0x58] sm:$0xff]   ;;  %v797_v20 = vld [vmem:[%s1003_s1 + $0x50] sm:$0xff]  }
   0x6   :  { %720 = vmatprep.subr.bf16.mxu1 %v782_v5  ;;  %v790_v13 = vld [vmem:[%s1003_s1 + $0xe0] sm:$0xff]   ;;  %v794_v17 = vld [vmem:[%s1003_s1 + $0xd8] sm:$0xff]   ;;  %v798_v21 = vld [vmem:[%s1003_s1 + $0xd0] sm:$0xff]  }
   0x7   :  { %v791_v14 = vld [vmem:[%s1003_s1 + $0x20] sm:$0xff]   ;;  %v795_v18 = vld [vmem:[%s1003_s1 + $0x18] sm:$0xff]   ;;  %v799_v22 = vld [vmem:[%s1003_s1 + $0x10] sm:$0xff]  }
   0x8   :  { %693 = vmatpush3.bf16.msra.mxu0 %v783_v6  ;;  %v792_v15 = vld [vmem:[%s1003_s1 + $0xa0] sm:$0xff]   ;;  %v796_v19 = vld [vmem:[%s1003_s1 + $0x98] sm:$0xff]   ;;  %v800_v23 = vld [vmem:[%s1003_s1 + $0x90] sm:$0xff]  }
   0x9   :  { %721 = vmatpush3.bf16.msra.mxu1 %v784_v7  ;;  %694 = vmatprep.subr.bf16.mxu0 %v785_v8  ;;  %v801_v24 = vld [vmem:[%s1003_s1 + $0x48] sm:$0xff]   ;;  %v805_v28 = vld [vmem:[%s1003_s1 + $0x40] sm:$0xff]   ;;  %v26_v33 = vld [vmem:[%s1004_s0 + $0x14] sm:$0xff] }
   0xa   :  { %722 = vmatprep.subr.bf16.mxu1 %v786_v9  ;;  %v802_v25 = vld [vmem:[%s1003_s1 + $0xc8] sm:$0xff]   ;;  %v806_v29 = vld [vmem:[%s1003_s1 + $0xc0] sm:$0xff]   ;;  %v38_v37 = vmax.bf16 %v817_v35, %v26_v33  ;;  %v809_v41 = vld [vmem:[%s1003_s1 + $0x138] sm:$0xff]  }
   0xb   :  { %v803_v26 = vld [vmem:[%s1003_s1 + $0x8] sm:$0xff]   ;;  %v807_v30 = vld [vmem:[%s1003_s1] sm:$0xff]   ;;  %v810_v46 = vld [vmem:[%s1003_s1 + $0x130] sm:$0xff]  }
   0xc   :  { %695 = vmatpush3.bf16.msra.mxu0 %v787_v10  ;;  %v804_v27 = vld [vmem:[%s1003_s1 + $0x88] sm:$0xff]   ;;  %v808_v31 = vld [vmem:[%s1003_s1 + $0x80] sm:$0xff]   ;;  %v30_v51 = vld [vmem:[%s1004_s0 + $0x30] sm:$0xff] }
   0xd   :  { %723 = vmatpush3.bf16.msra.mxu1 %v788_v11  ;;  %696 = vmatprep.subr.bf16.mxu0 %v789_v12  ;;  %v23_v32 = vld [vmem:[%s1004_s0] sm:$0xff]  ;;  %v24_v34 = vld [vmem:[%s1004_s0 + $0x8] sm:$0xff]  ;;  %v42_v54 = vmax.bf16 %v817_v35, %v30_v51  ;;  %v25_v59 = vld [vmem:[%s1004_s0 + $0x10] sm:$0xf] }
   0xe   :  { %724 = vmatprep.subr.bf16.mxu1 %v790_v13  ;;  %v35_v36 = vmax.bf16 %v817_v35, %v23_v32  ;;  %v27_v38 = vld [vmem:[%s1004_s0 + $0x1c] sm:$0xff]  ;;  %v36_v39 = vmax.bf16 %v817_v35, %v24_v34  ;;  %v29_v47 = vld [vmem:[%s1004_s0 + $0x28] sm:$0xff]  ;;  %v28_v61 = vld [vmem:[%s1004_s0 + $0x24] sm:$0xf]  ;;  %v37_v62 = vmax.bf16 %v817_v35, %v25_v59 }
   0xf   :  { %v39_v40 = vmax.bf16 %v817_v35, %v27_v38  ;;  %v32_v48 = vld [vmem:[%s1004_s0 + $0x3c] sm:$0xff]  ;;  %v41_v49 = vmax.bf16 %v817_v35, %v29_v47  ;;  %v33_v52 = vld [vmem:[%s1004_s0 + $0x44] sm:$0xff]  ;;  %v40_v0 = vmax.bf16 %v817_v35, %v28_v61  ;;  %v814_v3 = vld [vmem:[%s1003_s1 + $0x110] sm:$0xff]  }
  0x10   :  { %697 = vmatpush3.bf16.msra.mxu0 %v791_v14  ;;  %v621_v42 = vcombine.high %v35_v36, %v38_v37  ;;  %v620_v43 = vcombine.low %v35_v36, %v38_v37  ;;  %v44_v50 = vmax.bf16 %v817_v35, %v32_v48  ;;  %v811_v53 = vld [vmem:[%s1003_s1 + $0x128] sm:$0xff]   ;;  %v45_v55 = vmax.bf16 %v817_v35, %v33_v52  ;;  %v812_v63 = vld [vmem:[%s1003_s1 + $0x120] sm:$0xff]   ;;  %v813_v2 = vld [vmem:[%s1003_s1 + $0x118] sm:$0xff]  }
  0x11   :  { %725 = vmatpush3.bf16.msra.mxu1 %v792_v15  ;;  %698 = vmatprep.subr.bf16.mxu0 %v793_v16  ;;  %v623_v44 = vcombine.high %v36_v39, %v39_v40  ;;  %v622_v45 = vcombine.low %v36_v39, %v39_v40  ;;  %v624_v1 = vcombine.low %v37_v62, %v40_v0  ;;  %v815_v4 = vld [vmem:[%s1003_s1 + $0x108] sm:$0xff]   ;;  %v31_v5 = vld [vmem:[%s1004_s0 + $0x38] sm:$0xf]  ;;  %v816_v7 = vld [vmem:[%s1003_s1 + $0x100] sm:$0xff]  }
  0x12   :  { %726 = vmatprep.subr.bf16.mxu1 %v794_v17  ;;  %455 = vmatprep.mubr.bf16.mxu0 %v621_v42  ;;  %v626_v56 = vcombine.high %v41_v49, %v44_v50  ;;  %v628_v57 = vcombine.high %v42_v54, %v45_v55  ;;  %v625_v58 = vcombine.low %v41_v49, %v44_v50  ;;  %v34_v6 = vld [vmem:[%s1004_s0 + $0x4c] sm:$0xf] }
  0x13   :  { %504 = vmatprep.mubr.bf16.mxu1 %v623_v44  ;;  %v627_v60 = vcombine.low %v42_v54, %v45_v55  ;;  %v43_v8 = vmax.bf16 %v817_v35, %v31_v5  ;;  %v46_v9 = vmax.bf16 %v817_v35, %v34_v6 }
  0x14   :  { %699 = vmatpush3.bf16.msra.mxu0 %v795_v18 }
  0x15   :  { %727 = vmatpush3.bf16.msra.mxu1 %v796_v19  ;;  %700 = vmatprep.subr.bf16.mxu0 %v797_v20  ;;  %v629_v10 = vcombine.low %v43_v8, %v46_v9 }
  0x16   :  { %728 = vmatprep.subr.bf16.mxu1 %v798_v21 }
  0x18   :  { %701 = vmatpush3.bf16.msra.mxu0 %v799_v22 }
  0x19   :  { %729 = vmatpush3.bf16.msra.mxu1 %v800_v23  ;;  %702 = vmatprep.subr.bf16.mxu0 %v801_v24 }
  0x1a   :  { %730 = vmatprep.subr.bf16.mxu1 %v802_v25 }
  0x1c   :  { %703 = vmatpush3.bf16.msra.mxu0 %v803_v26 }
  0x1d   :  { %731 = vmatpush3.bf16.msra.mxu1 %v804_v27  ;;  %704 = vmatprep.subr.bf16.mxu0 %v805_v28 }
  0x1e   :  { %732 = vmatprep.subr.bf16.mxu1 %v806_v29 }
  0x20   :  { %705 = vmatpush3.bf16.msra.mxu0 %v807_v30 }
  0x21   :  { %733 = vmatpush3.bf16.msra.mxu1 %v808_v31  ;;  %756 = vmatprep.subr.bf16.mxu0 %v809_v41 }
  0x23   :  { %456 = vmatmul.mubr.bf16.vlgmr.msra.gmra.mxu0 %v620_v43 }
  0x24   :  { %505 = vmatmul.mubr.bf16.vlgmr.msra.gmra.mxu1 %v622_v45  ;;  %757 = vmatpush3.bf16.msra.mxu0 %v809_v41  ;;  %v670_v41 = vld [vmem:[%s1005_s2] ss:$0 sm:$0xff] }
  0x25   :  { %758 = vmatprep.subr.bf16.mxu0 %v810_v46  ;;  %463 = vmatprep.mubr.bf16.mxu0 %v626_v56 }
  0x26   :  { %512 = vmatprep.mubr.bf16.mxu1 %v628_v57 }
  0x28   :  { %759 = vmatpush3.bf16.msra.mxu0 %v810_v46 }
  0x29   :  { %760 = vmatprep.subr.bf16.mxu0 %v811_v53 }
  0x2b   :  { %464 = vmatmul.mubr.bf16.gmra.mxu0 %v625_v58 }
  0x2c   :  { %761 = vmatpush3.bf16.msra.mxu0 %v811_v53  ;;  %513 = vmatmul.mubr.bf16.gmra.mxu1 %v627_v60 }
  0x2d   :  { %762 = vmatprep.subr.bf16.mxu0 %v812_v63  ;;  %772 = vmatprep.mubr.bf16.mxu0 %v624_v1 }
  0x30   :  { %763 = vmatpush3.bf16.msra.mxu0 %v812_v63 }
  0x31   :  { %764 = vmatprep.subr.bf16.mxu0 %v813_v2 }
  0x34   :  { %765 = vmatpush3.bf16.msra.mxu0 %v813_v2 }
  0x35   :  { %766 = vmatprep.subr.bf16.mxu0 %v814_v3 }
  0x38   :  { %767 = vmatpush3.bf16.msra.mxu0 %v814_v3 }
  0x39   :  { %768 = vmatprep.subr.bf16.mxu0 %v815_v4 }
  0x3c   :  { %769 = vmatpush3.bf16.msra.mxu0 %v815_v4 }
  0x3d   :  { %770 = vmatprep.subr.bf16.mxu0 %v816_v7 }
  0x40   :  { %771 = vmatpush3.bf16.msra.mxu0 %v816_v7 }
  0x43   :  { %773 = vmatmul.mubr.bf16.vlgmr.msra.gmra.mxu0 %v629_v10 }
  0xe3   :  { %v706_v11 = vpop.f32.mrf.mxu0 }
  0xe4   :  { %v734_v12 = vpop.f32.mrf.mxu1 }
  0xe5   :  { %v707_v13 = vpop.f32.mrf.mxu0 }
  0xe6   :  { %v735_v14 = vpop.f32.mrf.mxu1  ;;  %v708_v29 = vadd.f32 %v707_v13, %v706_v11 }
  0xe7   :  { %v709_v15 = vpop.f32.mrf.mxu0  ;;  %v736_v30 = vadd.f32 %v735_v14, %v734_v12 }
  0xe8   :  { %v737_v16 = vpop.f32.mrf.mxu1 }
  0xe9   :  { %v710_v17 = vpop.f32.mrf.mxu0  ;;  %v507_v39 = vadd.f32 %v736_v30, %v708_v29 }
  0xea   :  { %v738_v18 = vpop.f32.mrf.mxu1  ;;  %v711_v34 = vadd.f32 %v710_v17, %v709_v15 }
  0xeb   :  { %v712_v19 = vpop.f32.mrf.mxu0  ;;  %v739_v35 = vadd.f32 %v738_v18, %v737_v16 }
  0xec   :  { %v740_v20 = vpop.f32.mrf.mxu1 }
  0xed   :  { %v713_v21 = vpop.f32.mrf.mxu0  ;;  %v510_v45 = vadd.f32 %v739_v35, %v711_v34 }
  0xee   :  { %v741_v22 = vpop.f32.mrf.mxu1  ;;  %v714_v27 = vadd.f32 %v713_v21, %v712_v19 }
  0xef   :  { %v715_v23 = vpop.f32.mrf.mxu0  ;;  %v742_v28 = vadd.f32 %v741_v22, %v740_v20 }
  0xf0   :  { %v743_v24 = vpop.f32.mrf.mxu1 }
  0xf1   :  { %v716_v25 = vpop.f32.mrf.mxu0  ;;  %v515_v36 = vadd.f32 %v742_v28, %v714_v27 }
  0xf2   :  { %v744_v26 = vpop.f32.mrf.mxu1  ;;  %v717_v31 = vadd.f32 %v716_v25, %v715_v23 }
  0xf3   :  { %v745_v32 = vadd.f32 %v744_v26, %v743_v24 }
  0xf5   :  { %v518_v40 = vadd.f32 %v745_v32, %v717_v31 }
 0x103   :  { %v774_v33 = vpop.f32.mrf.mxu0 }
 0x104   :  { %v564_v38 = vadd.f32 %v774_v33, %v515_v36 }
 0x105   :  { %v555_v37 = vpop.f32.mrf.mxu0 }
 0x106   :  { %v556_v43 = vadd.f32 %v555_v37, %v507_v39  ;;  %v594_v47 = vadd.f32 %v670_v41, %v564_v38 }
 0x107   :  { %v775_v42 = vpop.f32.mrf.mxu0 }
 0x108   :  { %v567_v44 = vadd.f32 %v775_v42, %v518_v40  ;;  %v592_v50 = vadd.f32 %v670_v41, %v556_v43 }
 0x109   :  { %v558_v46 = vpop.f32.mrf.mxu0 }
 0x10a   :  { %v595_v48 = vadd.f32 %v670_v41, %v567_v44  ;;  %v559_v49 = vadd.f32 %v558_v46, %v510_v45 }
 0x10c   :  { %v687_v51 = vpack.c.bf16 %v595_v48, %v594_v47  ;;  %v593_v52 = vadd.f32 %v670_v41, %v559_v49 }
 0x10e   :  { %689 = vst [vmem:[%s1006_s3 + $0x8] sm:$0xff] %v687_v51   ;;  %v682_v53 = vpack.c.bf16 %v593_v52, %v592_v50 }
 0x110   :  { %683 = vst [vmem:[%s1006_s3] sm:$0xff] %v682_v53  }

// kernel: unet_generator_forward.43
= control target key start
LH: loop header
LB: loop body
LE: loop exit
PB: predicated region body
PF: predicated region fallthrough
CT: control target
= control target key end

     0   :  { %s569_s15 = smov 0   ;;  %s571_s16 = smov 0   ;;  %s634_s0 = inlined_call_operand.vmem [shape: bf16[2,8,4,32], index: 0, kind: input, shape index: {}]   ;;  %s635_s1 = inlined_call_operand.vmem [shape: bf16[2,4,4,128], index: 1, kind: input, shape index: {}]   ;;  %s636_s2 = inlined_call_operand.vmem [shape: f32[1,128], index: 2, kind: input, shape index: {}]   ;;  %s637_s3 = inlined_call_operand.vmem [shape: f32[1,128], index: 3, kind: input, shape index: {}]   ;;  %s638_s4 = inlined_call_operand.vmem [shape: bf16[2,8,4,64], index: 4, kind: output, shape index: {}]  }
   0x1   :  { %s573_s17 = smov 0   ;;  %s575_s18 = smov 0  }
   0x2   :  { %s577_s19 = smov 0  }
   0x3 LB: > { %s23_s20 = sadd.s32 1, %s530_s17  ;;  %s26_s21 = sadd.s32 1, %s534_s18  ;;  %s538_s19 = sphi %s577_s19, %s14_s19   ;;  %s534_s18 = sphi %s575_s18, %s642_s18   ;;  %s530_s17 = sphi %s573_s17, %s641_s17   ;;  %s526_s16 = sphi %s571_s16, %s640_s16   ;;  %s522_s15 = sphi %s569_s15, %s639_s15  }
   0x4   : > { %p24_p0 = scmp.ge.s32.totalorder %s23_s20, 4  ;;  %p439_p1 = scmp.ge.s32.totalorder %s538_s19, 1 }
   0x5   : > { %p198_p2 = scmp.lt.s32.totalorder %s538_s19, 9 }
   0x6   : > { %s644_s20 = smov (%p24_p0, %s23_s20), 0  ;;  %s646_s21 = smov (!%p24_p0, %s26_s21), %s534_s18 }
   0x7   : > { %p199_p3 = pnand %p439_p1, %p198_p2  ;;  %p28_p4 = scmp.ge.s32.totalorder %s646_s21, 2 }
   0x8   : > { %p241_p5 = scmp.lt.s32.totalorder (!%p199_p3), %s526_s16, 1  ;;  %p252_p6 = scmp.lt.s32.totalorder (!%p199_p3), %s522_s15, 3 }
   0x9   : > { %s648_s21 = smov (%p28_p4, %s646_s21), 0  ;;  %202 = sbr.rel (%p199_p3) target bundleno = 154 (0x9a), region = 36 }
   0xa   : > { %s440_s22 = sshll.u32 (!%p199_p3), %s522_s15, 1 }
   0xb   : > { %p243_p7 = scmp.lt.s32.totalorder (!%p199_p3), %s440_s22, 7 }
   0xe   : > { %s650_s16 = smov (!%p241_p5, %s526_s16), 1  ;;  %s652_s15 = smov (!%p252_p6, %s522_s15), 3  ;;  %v540_v0 = vmov 1983009808   ;;  %v295_v2 = vlaneseq  ;;  %v448_v4 = vld [vmem:[%s636_s2] ss:$0 sm:$0xff] }
   0xf   : > { %s443_s23 = sshll.u32 %s650_s16, 2  ;;  %v293_v1 = vunpack.c.l.s4 %v540_v0  ;;  %s441_s29 = sshll.u32 %s650_s16, 3  ;;  %v449_v8 = vld [vmem:[%s637_s3] ss:$0 sm:$0xff]  ;;  %vm289_vm0 = vcmask 123904   ;;  %vm302_vm1 = vcmask 255104  }
  0x10   : > { %s255_s24 = sadd.s32 %s443_s23, %s652_s15  ;;  %s654_s22 = smov (!%p243_p7, %s440_s22), 7  ;;  %v296_v7 = vshrl.u32 %v295_v2, 7  ;;  %vm308_vm2 = vcmask 386304   ;;  %vm313_vm3 = vcmask 517504  }
  0x11   : > { %s444_s25 = sshll.u32 %s255_s24, 1  ;;  %v294_v6 = vunpack.c.0.s8 %v293_v1  ;;  %s246_s8 = sadd.s32 %s441_s29, %s654_s22 }
  0x12   : > { %s257_s28 = scalar_lea.vmem %s635_s1, %s444_s25  ;;  %s442_s9 = sshll.u32 %s246_s8, 1 }
  0x13   : > { %v270_v3 = vld [vmem:[%s257_s28] sm:$0x3]  ;;  %s248_s12 = scalar_lea.vmem %s634_s0, %s442_s9  ;;  %s266_s15 = scalar_lea.vmem %s638_s4, %s442_s9  ;;  %v297_v11 = vsub.s32 %v294_v6, %v296_v7 }
  0x14   : > { %v271_v5 = vunpack.c.l.bf16 %v270_v3  ;;  %v268_v12 = vld [vmem:[%s248_s12] sm:$0x3]  ;;  %v269_v13 = vld [vmem:[%s248_s12 + $0x2] sm:$0x3]  ;;  %s541_s16 = smov 16   ;;  %s542_s22 = smov 112  }
  0x15   : > { %305 = vrot.lane.b32.xlu1 %v268_v12, %s541_s16  ;;  %290 = vst.msk [vmem:[%s266_s15] sm:$0x3] %vm289_vm0, %v268_v12  ;;  %450 = vst.msk [vmem:[%s266_s15 + $0x2] sm:$0x3] %vm289_vm0, %v269_v13  ;;  %s543_s23 = smov 32  }
  0x16   : > { %v279_v9 = vmul.f32 %v448_v4, %v271_v5 }
  0x18   : > { %v287_v10 = vadd.f32 %v449_v8, %v279_v9 }
  0x19   : > { %322 = vrot.lane.b32.xlu1 %v269_v13, %s541_s16 }
  0x1a   : > { %v288_v14 = vpack.c.bf16 %v287_v10, %v287_v10 }
  0x1c   : > { %v298_v15 = vrot.slane %v288_v14, %v297_v11 }
  0x1e   : > { %299 = vrot.lane.b32.xlu0 %v298_v15, %s541_s16 }
  0x22   : > { %317 = vrot.lane.b32.xlu0 %v298_v15, %s542_s22 }
  0x26   : > { %310 = vrot.lane.b32.xlu0 %v298_v15, %s543_s23 }
  0x87   : > { %v306_v16 = vpop.permute.xlu1 %305 }
  0x8b   : > { %v323_v18 = vpop.permute.xlu1 %322 }
  0x90   : > { %v300_v17 = vpop.permute.xlu0 %299 }
  0x91   : > { %303 = vst.msk [vmem:[%s266_s15] sm:$0x3] %vm302_vm1, %v300_v17 }
  0x92   : > { %309 = vst.msk [vmem:[%s266_s15] sm:$0x3] %vm308_vm2, %v306_v16 }
  0x94   : > { %v318_v19 = vpop.permute.xlu0 %317 }
  0x95   : > { %451 = vst.msk [vmem:[%s266_s15 + $0x2] sm:$0x3] %vm302_vm1, %v318_v19 }
  0x96   : > { %452 = vst.msk [vmem:[%s266_s15 + $0x2] sm:$0x3] %vm308_vm2, %v323_v18 }
  0x97   : > { %453 = vst.msk [vmem:[%s266_s15 + $0x2] sm:$0x3] %vm313_vm3, %v288_v14 }
  0x98   : > { %v311_v20 = vpop.permute.xlu0 %310 }
  0x99   : > { %314 = vst.msk [vmem:[%s266_s15] sm:$0x3] %vm313_vm3, %v311_v20 }
  0x9a PF: > { %s14_s19 = sadd.s32 1, %s538_s19   ;;  %s639_s15 = smov %s530_s17 }
  0x9b   : > { %p11_p8 = scmp.ge.s32.totalorder %s14_s19, 10   ;;  %s640_s16 = smov %s534_s18 }
  0x9c   : > { %s641_s17 = smov %s644_s20  ;;  %s642_s18 = smov %s648_s21 }
  0x9d   :  { %13 = sbr.rel (!%p11_p8) target bundleno = 3 (0x3), region = 70 }

// kernel: squeeze.14
= control target key start
LH: loop header
LB: loop body
LE: loop exit
PB: predicated region body
PF: predicated region fallthrough
CT: control target
= control target key end

     0   :  { %s40_s8 = smov 104   ;;  %vm8_vm0 = vcmask 64512   ;;  %s41_s9 = smov 112   ;;  %s58_s0 = inlined_call_operand.vmem [shape: f32[32], index: 0, kind: input, shape index: {}]   ;;  %s59_s1 = inlined_call_operand.vmem [shape: f32[4,8], index: 1, kind: output, shape index: {}]  }
   0x1   :  { %v5_v0 = vld [vmem:[%s58_s0] sm:$0x1]  ;;  %s39_s0 = smov 120  }
   0x2   :  { %6 = vst [vmem:[#allocation1] sm:$0x1] %v5_v0 }
   0x9   :  { %v10_v1 = vld [vmem:[#allocation1] sm:$0x1]  }
   0xa   :  { %v22_v2 = vld [vmem:[#allocation1] sm:$0x1]   ;;  %11 = vrot.lane.b32.xlu0 %v10_v1, %s39_s0 }
   0xb   :  { %23 = vrot.lane.b32.xlu1 %v22_v2, %s40_s8  ;;  %v7_v3 = vld [vmem:[#allocation1] sm:$0x1]  }
   0xc   :  { %v16_v4 = vld [vmem:[#allocation1] sm:$0x1]   ;;  %9 = vst.msk [vmem:[#allocation0] sm:$0x1] %vm8_vm0, %v7_v3  }
   0xe   :  { %17 = vrot.lane.b32.xlu0 %v16_v4, %s41_s9 }
  0x7c   :  { %v12_v5 = vpop.permute.xlu0 %11  }
  0x7d   :  { %v24_v6 = vpop.permute.xlu1 %23   ;;  %15 = vst.msk [vmem:[#allocation0 + $0x1] sm:$0x1] %vm8_vm0, %v12_v5  }
  0x7e   :  { %27 = vst.msk [vmem:[#allocation0 + $0x3] sm:$0x1] %vm8_vm0, %v24_v6  }
  0x80   :  { %v18_v7 = vpop.permute.xlu0 %17  }
  0x81   :  { %21 = vst.msk [vmem:[#allocation0 + $0x2] sm:$0x1] %vm8_vm0, %v18_v7  }
  0x88   :  { %v32_v8 = vld [vmem:[#allocation0] sm:$0xf] }
  0x89   :  { %35 = vst [vmem:[%s59_s1] sm:$0xf] %v32_v8 }

// kernel: unet_generator_forward.45
= control target key start
LH: loop header
LB: loop body
LE: loop exit
PB: predicated region body
PF: predicated region fallthrough
CT: control target
= control target key end

     0   :  { %v259_v0 = vmov 0.0   ;;  %s317_s1 = inlined_call_operand.vmem [shape: f32[1,128], index: 1, kind: output, shape index: {0}]   ;;  %s318_s2 = inlined_call_operand.vmem [shape: f32[1,128], index: 2, kind: output, shape index: {1}]   ;;  %s319_s0 = inlined_call_operand.vmem [shape: bf16[128,128], index: 0, kind: input, shape index: {}]  }
   0x1   :  { %14 = vst [vmem:[%s317_s1] sm:$0x1] %v259_v0  ;;  %15 = vst [vmem:[%s318_s2] sm:$0x1] %v259_v0  ;;  %v220_v1 = vld [vmem:[%s319_s0] sm:$0xff]   ;;  %v251_v2 = vld [vmem:[%s319_s0 + $0x8] sm:$0xff]  }
   0x2   :  { %v221_v3 = vunpack.c.l.bf16 %v220_v1  ;;  %v222_v4 = vunpack.c.h.bf16 %v220_v1  ;;  %v225_v5 = vunpack.c.l.bf16 %v251_v2  ;;  %v252_v6 = vld [vmem:[%s319_s0 + $0x10] sm:$0xff]   ;;  %v226_v7 = vunpack.c.h.bf16 %v251_v2  ;;  %v253_v14 = vld [vmem:[%s319_s0 + $0x18] sm:$0xff]   ;;  %v254_v23 = vld [vmem:[%s319_s0 + $0x20] sm:$0xff]  }
   0x3   :  { %v229_v11 = vunpack.c.l.bf16 %v252_v6  ;;  %v230_v15 = vunpack.c.h.bf16 %v252_v6  ;;  %v233_v19 = vunpack.c.l.bf16 %v253_v14  ;;  %v234_v24 = vunpack.c.h.bf16 %v253_v14  ;;  %v255_v32 = vld [vmem:[%s319_s0 + $0x28] sm:$0xff]   ;;  %v256_v41 = vld [vmem:[%s319_s0 + $0x30] sm:$0xff]   ;;  %v257_v50 = vld [vmem:[%s319_s0 + $0x38] sm:$0xff]  }
   0x4   :  { %v148_v8 = vadd.f32 %v222_v4, %v221_v3  ;;  %v172_v9 = vmul.f32 %v221_v3, %v221_v3  ;;  %v173_v10 = vmul.f32 %v222_v4, %v222_v4  ;;  %v174_v13 = vmul.f32 %v225_v5, %v225_v5 }
   0x5   :  { %v175_v17 = vmul.f32 %v226_v7, %v226_v7  ;;  %v176_v21 = vmul.f32 %v229_v11, %v229_v11  ;;  %v177_v26 = vmul.f32 %v230_v15, %v230_v15  ;;  %v237_v28 = vunpack.c.l.bf16 %v254_v23 }
   0x6   :  { %v149_v12 = vadd.f32 %v225_v5, %v148_v8  ;;  %v188_v18 = vadd.f32 %v173_v10, %v172_v9  ;;  %v178_v30 = vmul.f32 %v233_v19, %v233_v19  ;;  %v238_v33 = vunpack.c.h.bf16 %v254_v23 }
   0x7   :  { %v179_v35 = vmul.f32 %v234_v24, %v234_v24  ;;  %v241_v37 = vunpack.c.l.bf16 %v255_v32  ;;  %v180_v39 = vmul.f32 %v237_v28, %v237_v28  ;;  %v242_v42 = vunpack.c.h.bf16 %v255_v32 }
   0x8   :  { %v150_v16 = vadd.f32 %v226_v7, %v149_v12  ;;  %v189_v22 = vadd.f32 %v188_v18, %v174_v13  ;;  %v181_v44 = vmul.f32 %v238_v33, %v238_v33  ;;  %v245_v46 = vunpack.c.l.bf16 %v256_v41 }
   0x9   :  { %v182_v48 = vmul.f32 %v241_v37, %v241_v37  ;;  %v246_v51 = vunpack.c.h.bf16 %v256_v41  ;;  %v183_v53 = vmul.f32 %v242_v42, %v242_v42  ;;  %v249_v55 = vunpack.c.l.bf16 %v257_v50 }
   0xa   :  { %v151_v20 = vadd.f32 %v229_v11, %v150_v16  ;;  %v190_v27 = vadd.f32 %v189_v22, %v175_v17  ;;  %v184_v57 = vmul.f32 %v245_v46, %v245_v46  ;;  %v250_v59 = vunpack.c.h.bf16 %v257_v50 }
   0xb   :  { %v185_v61 = vmul.f32 %v246_v51, %v246_v51  ;;  %v186_v0 = vmul.f32 %v249_v55, %v249_v55 }
   0xc   :  { %v152_v25 = vadd.f32 %v230_v15, %v151_v20  ;;  %v191_v31 = vadd.f32 %v190_v27, %v176_v21  ;;  %v187_v3 = vmul.f32 %v250_v59, %v250_v59  ;;  %v147_v15 = vld [vmem:[%s317_s1] sm:$0x1] }
   0xd   :  { %v171_v20 = vld [vmem:[%s318_s2] sm:$0x1] }
   0xe   :  { %v153_v29 = vadd.f32 %v233_v19, %v152_v25  ;;  %v192_v36 = vadd.f32 %v191_v31, %v177_v26 }
  0x10   :  { %v154_v34 = vadd.f32 %v234_v24, %v153_v29  ;;  %v193_v40 = vadd.f32 %v192_v36, %v178_v30 }
  0x12   :  { %v155_v38 = vadd.f32 %v237_v28, %v154_v34  ;;  %v194_v45 = vadd.f32 %v193_v40, %v179_v35 }
  0x14   :  { %v156_v43 = vadd.f32 %v238_v33, %v155_v38  ;;  %v195_v49 = vadd.f32 %v194_v45, %v180_v39 }
  0x16   :  { %v157_v47 = vadd.f32 %v241_v37, %v156_v43  ;;  %v196_v54 = vadd.f32 %v195_v49, %v181_v44 }
  0x18   :  { %v158_v52 = vadd.f32 %v242_v42, %v157_v47  ;;  %v197_v58 = vadd.f32 %v196_v54, %v182_v48 }
  0x1a   :  { %v159_v56 = vadd.f32 %v245_v46, %v158_v52  ;;  %v198_v62 = vadd.f32 %v197_v58, %v183_v53 }
  0x1c   :  { %v160_v60 = vadd.f32 %v246_v51, %v159_v56  ;;  %v199_v1 = vadd.f32 %v198_v62, %v184_v57 }
  0x1e   :  { %v161_v63 = vadd.f32 %v249_v55, %v160_v60  ;;  %v200_v4 = vadd.f32 %v199_v1, %v185_v61 }
  0x20   :  { %v162_v2 = vadd.f32 %v250_v59, %v161_v63  ;;  %v201_v6 = vadd.f32 %v200_v4, %v186_v0 }
  0x22   :  { %v163_v5 = vrot.slane %v162_v2, 4  ;;  %v202_v8 = vadd.f32 %v201_v6, %v187_v3 }
  0x24   :  { %v164_v7 = vadd.f32 %v163_v5, %v162_v2  ;;  %v203_v10 = vrot.slane %v202_v8, 4 }
  0x26   :  { %v165_v9 = vrot.slane %v164_v7, 2  ;;  %v204_v12 = vadd.f32 %v203_v10, %v202_v8 }
  0x28   :  { %v166_v11 = vadd.f32 %v165_v9, %v164_v7  ;;  %v205_v14 = vrot.slane %v204_v12, 2 }
  0x2a   :  { %v167_v13 = vrot.slane %v166_v11, 1  ;;  %v206_v17 = vadd.f32 %v205_v14, %v204_v12 }
  0x2c   :  { %v168_v16 = vadd.f32 %v167_v13, %v166_v11  ;;  %v207_v19 = vrot.slane %v206_v17, 1 }
  0x2e   :  { %v169_v18 = vadd.f32 %v168_v16, %v147_v15  ;;  %v208_v21 = vadd.f32 %v207_v19, %v206_v17 }
  0x30   :  { %170 = vst [vmem:[%s317_s1] sm:$0x1] %v169_v18  ;;  %v209_v22 = vadd.f32 %v208_v21, %v171_v20 }
  0x32   :  { %210 = vst [vmem:[%s318_s2] sm:$0x1] %v209_v22 }

// kernel: unet_generator_forward.44
= control target key start
LH: loop header
LB: loop body
LE: loop exit
PB: predicated region body
PF: predicated region fallthrough
CT: control target
= control target key end

     0   :  { %v1052_v25 = vmov 0   ;;  %s1318_s1 = inlined_call_operand.vmem [shape: bf16[384,128], index: 1, kind: input, shape index: {}]   ;;  %s1319_s0 = inlined_call_operand.vmem [shape: bf16[128,384], index: 0, kind: input, shape index: {}]   ;;  %s1320_s2 = inlined_call_operand.vmem [shape: f32[1,128], index: 2, kind: input, shape index: {}]   ;;  %s1321_s3 = inlined_call_operand.vmem [shape: bf16[128,128], index: 3, kind: output, shape index: {}]  }
   0x1   :  { %v1028_v0 = vld [vmem:[%s1318_s1 + $0x78] sm:$0xff]   ;;  %v1031_v3 = vld [vmem:[%s1318_s1 + $0x70] sm:$0xff]   ;;  %v1034_v6 = vld [vmem:[%s1318_s1 + $0x68] sm:$0xff]  }
   0x2   :  { %v1029_v1 = vld [vmem:[%s1318_s1 + $0x38] sm:$0xff]   ;;  %915 = vmatprep.subr.bf16.mxu0 %v1028_v0  ;;  %v1032_v4 = vld [vmem:[%s1318_s1 + $0x30] sm:$0xff]   ;;  %v1035_v7 = vld [vmem:[%s1318_s1 + $0x28] sm:$0xff]  }
   0x3   :  { %v1030_v2 = vld [vmem:[%s1318_s1 + $0xb8] sm:$0xff]   ;;  %916 = vmatpush3.bf16.msra.mxu0 %v1029_v1  ;;  %v1033_v5 = vld [vmem:[%s1318_s1 + $0xb0] sm:$0xff]   ;;  %v1036_v8 = vld [vmem:[%s1318_s1 + $0xa8] sm:$0xff]  }
   0x4   :  { %995 = vmatprep.subr.bf16.mxu1 %v1030_v2  ;;  %917 = vmatprep.subr.bf16.mxu0 %v1031_v3  ;;  %v1037_v9 = vld [vmem:[%s1318_s1 + $0x60] sm:$0xff]   ;;  %v1040_v12 = vld [vmem:[%s1318_s1 + $0x58] sm:$0xff]   ;;  %v1043_v15 = vld [vmem:[%s1318_s1 + $0x50] sm:$0xff]  }
   0x5   :  { %996 = vmatpush3.bf16.msra.mxu1 %v1030_v2  ;;  %v1038_v10 = vld [vmem:[%s1318_s1 + $0x20] sm:$0xff]   ;;  %v1042_v13 = vld [vmem:[%s1318_s1 + $0x98] sm:$0xff]   ;;  %v1045_v16 = vld [vmem:[%s1318_s1 + $0x90] sm:$0xff]  }
   0x6   :  { %997 = vmatprep.subr.bf16.mxu1 %v1033_v5  ;;  %v1039_v11 = vld [vmem:[%s1318_s1 + $0xa0] sm:$0xff]   ;;  %v1041_v14 = vld [vmem:[%s1318_s1 + $0x18] sm:$0xff]   ;;  %v1044_v17 = vld [vmem:[%s1318_s1 + $0x10] sm:$0xff]  }
   0x7   :  { %918 = vmatpush3.bf16.msra.mxu0 %v1032_v4  ;;  %v1046_v18 = vld [vmem:[%s1318_s1 + $0x48] sm:$0xff]   ;;  %v1049_v21 = vld [vmem:[%s1318_s1 + $0x40] sm:$0xff]   ;;  %v38_v28 = vld [vmem:[%s1319_s0 + $0x14] sm:$0xf] }
   0x8   :  { %919 = vmatprep.subr.bf16.mxu0 %v1034_v6  ;;  %v1047_v19 = vld [vmem:[%s1318_s1 + $0x8] sm:$0xff]   ;;  %v35_v22 = vld [vmem:[%s1319_s0] sm:$0xff]  ;;  %v70_v33 = vmax.bf16 %v1052_v25, %v38_v28  ;;  %v39_v34 = vld [vmem:[%s1319_s0 + $0x18] sm:$0xff] }
   0x9   :  { %998 = vmatpush3.bf16.msra.mxu1 %v1033_v5  ;;  %v1048_v20 = vld [vmem:[%s1318_s1 + $0x88] sm:$0xff]   ;;  %v67_v26 = vmax.bf16 %v1052_v25, %v35_v22  ;;  %v40_v30 = vld [vmem:[%s1319_s0 + $0x20] sm:$0xf]  ;;  %v71_v38 = vmax.bf16 %v1052_v25, %v39_v34  ;;  %v44_v40 = vld [vmem:[%s1319_s0 + $0x38] sm:$0xf] }
   0xa   :  { %999 = vmatprep.subr.bf16.mxu1 %v1036_v8  ;;  %v37_v23 = vld [vmem:[%s1319_s0 + $0xc] sm:$0xff]  ;;  %v36_v24 = vld [vmem:[%s1319_s0 + $0x8] sm:$0xf]  ;;  %v1051_v32 = vld [vmem:[%s1318_s1 + $0x80] sm:$0xff]   ;;  %v72_v43 = vmax.bf16 %v1052_v25, %v40_v30  ;;  %v76_v45 = vmax.bf16 %v1052_v25, %v44_v40 }
   0xb   :  { %920 = vmatpush3.bf16.msra.mxu0 %v1035_v7  ;;  %v69_v27 = vmax.bf16 %v1052_v25, %v37_v23  ;;  %v68_v29 = vmax.bf16 %v1052_v25, %v36_v24  ;;  %v42_v31 = vld [vmem:[%s1319_s0 + $0x2c] sm:$0xf]  ;;  %v41_v35 = vld [vmem:[%s1319_s0 + $0x24] sm:$0xff]  ;;  %v43_v50 = vld [vmem:[%s1319_s0 + $0x30] sm:$0xff] }
   0xc   :  { %921 = vmatprep.subr.bf16.mxu0 %v1037_v9  ;;  %v1050_v36 = vld [vmem:[%s1318_s1] sm:$0xff]   ;;  %v73_v39 = vmax.bf16 %v1052_v25, %v41_v35  ;;  %v74_v44 = vmax.bf16 %v1052_v25, %v42_v31  ;;  %v48_v53 = vld [vmem:[%s1319_s0 + $0x50] sm:$0xf]  ;;  %v50_v54 = vld [vmem:[%s1319_s0 + $0x5c] sm:$0xf]  ;;  %v75_v57 = vmax.bf16 %v1052_v25, %v43_v50 }
   0xd   :  { %1000 = vmatpush3.bf16.msra.mxu1 %v1036_v8  ;;  %v788_v37 = vcombine.high %v67_v26, %v69_v27  ;;  %v46_v41 = vld [vmem:[%s1319_s0 + $0x44] sm:$0xf]  ;;  %v789_v42 = vcombine.low %v68_v29, %v70_v33  ;;  %v787_v46 = vcombine.low %v67_v26, %v69_v27  ;;  %v45_v51 = vld [vmem:[%s1319_s0 + $0x3c] sm:$0xff]  ;;  %v52_v55 = vld [vmem:[%s1319_s0 + $0x68] sm:$0xf]  ;;  %v80_v59 = vmax.bf16 %v1052_v25, %v48_v53 }
   0xe   :  { %1001 = vmatprep.subr.bf16.mxu1 %v1039_v11  ;;  %v78_v47 = vmax.bf16 %v1052_v25, %v46_v41  ;;  %v791_v48 = vcombine.high %v71_v38, %v73_v39  ;;  %v792_v49 = vcombine.low %v72_v43, %v74_v44  ;;  %v54_v56 = vld [vmem:[%s1319_s0 + $0x74] sm:$0xf]  ;;  %v77_v58 = vmax.bf16 %v1052_v25, %v45_v51  ;;  %v47_v2 = vld [vmem:[%s1319_s0 + $0x48] sm:$0xff]  ;;  %v56_v5 = vld [vmem:[%s1319_s0 + $0x80] sm:$0xf] }
   0xf   :  { %922 = vmatpush3.bf16.msra.mxu0 %v1038_v10  ;;  %467 = vmatprep.mubr.bf16.mxu0 %v788_v37  ;;  %v82_v60 = vmax.bf16 %v1052_v25, %v50_v54  ;;  %v84_v61 = vmax.bf16 %v1052_v25, %v52_v55  ;;  %v86_v62 = vmax.bf16 %v1052_v25, %v54_v56  ;;  %v49_v3 = vld [vmem:[%s1319_s0 + $0x54] sm:$0xff]  ;;  %v58_v6 = vld [vmem:[%s1319_s0 + $0x8c] sm:$0xf]  ;;  %v62_v8 = vld [vmem:[%s1319_s0 + $0xa4] sm:$0xf] }
  0x10   :  { %923 = vmatprep.subr.bf16.mxu0 %v1040_v12  ;;  %1011 = vmatprep.mubr.bf16.mxu1 %v789_v42  ;;  %v795_v52 = vcombine.low %v76_v45, %v78_v47  ;;  %v790_v63 = vcombine.low %v71_v38, %v73_v39  ;;  %v794_v0 = vcombine.high %v75_v57, %v77_v58  ;;  %v60_v7 = vld [vmem:[%s1319_s0 + $0x98] sm:$0xf]  ;;  %v66_v22 = vld [vmem:[%s1319_s0 + $0xbc] sm:$0xf]  ;;  %v57_v31 = vld [vmem:[%s1319_s0 + $0x84] sm:$0xff] }
  0x11   :  { %1002 = vmatpush3.bf16.msra.mxu1 %v1039_v11  ;;  %v798_v1 = vcombine.low %v80_v59, %v82_v60  ;;  %v801_v4 = vcombine.low %v84_v61, %v86_v62  ;;  %v79_v9 = vmax.bf16 %v1052_v25, %v47_v2  ;;  %v81_v10 = vmax.bf16 %v1052_v25, %v49_v3  ;;  %v55_v30 = vld [vmem:[%s1319_s0 + $0x78] sm:$0xff]  ;;  %v59_v37 = vld [vmem:[%s1319_s0 + $0x90] sm:$0xff]  ;;  %v63_v43 = vld [vmem:[%s1319_s0 + $0xa8] sm:$0xff] }
  0x12   :  { %1003 = vmatprep.subr.bf16.mxu1 %v1042_v13  ;;  %v88_v11 = vmax.bf16 %v1052_v25, %v56_v5  ;;  %v90_v12 = vmax.bf16 %v1052_v25, %v58_v6  ;;  %v98_v27 = vmax.bf16 %v1052_v25, %v66_v22  ;;  %v87_v33 = vmax.bf16 %v1052_v25, %v55_v30  ;;  %v61_v38 = vld [vmem:[%s1319_s0 + $0x9c] sm:$0xff]  ;;  %v65_v44 = vld [vmem:[%s1319_s0 + $0xb4] sm:$0xff] }
  0x13   :  { %924 = vmatpush3.bf16.msra.mxu0 %v1041_v14  ;;  %v94_v14 = vmax.bf16 %v1052_v25, %v62_v8  ;;  %v796_v28 = vcombine.low %v79_v9, %v81_v10  ;;  %v89_v34 = vmax.bf16 %v1052_v25, %v57_v31  ;;  %v91_v39 = vmax.bf16 %v1052_v25, %v59_v37 }
  0x14   :  { %925 = vmatprep.subr.bf16.mxu0 %v1043_v15  ;;  %v793_v15 = vcombine.low %v75_v57, %v77_v58  ;;  %v93_v40 = vmax.bf16 %v1052_v25, %v61_v38  ;;  %v95_v45 = vmax.bf16 %v1052_v25, %v63_v43 }
  0x15   :  { %1004 = vmatpush3.bf16.msra.mxu1 %v1042_v13  ;;  %v92_v13 = vmax.bf16 %v1052_v25, %v60_v7  ;;  %v802_v41 = vcombine.low %v87_v33, %v89_v34 }
  0x16   :  { %1005 = vmatprep.subr.bf16.mxu1 %v1045_v16  ;;  %v806_v42 = vcombine.high %v91_v39, %v93_v40  ;;  %v805_v47 = vcombine.low %v91_v39, %v93_v40 }
  0x17   :  { %926 = vmatpush3.bf16.msra.mxu0 %v1044_v17  ;;  %v51_v17 = vld [vmem:[%s1319_s0 + $0x60] sm:$0xff] }
  0x18   :  { %927 = vmatprep.subr.bf16.mxu0 %v1046_v18  ;;  %v53_v18 = vld [vmem:[%s1319_s0 + $0x6c] sm:$0xff]  ;;  %v83_v23 = vmax.bf16 %v1052_v25, %v51_v17 }
  0x19   :  { %1006 = vmatpush3.bf16.msra.mxu1 %v1045_v16  ;;  %v797_v16 = vcombine.high %v79_v9, %v81_v10  ;;  %v85_v24 = vmax.bf16 %v1052_v25, %v53_v18 }
  0x1a   :  { %1007 = vmatprep.subr.bf16.mxu1 %v1048_v20 }
  0x1b   :  { %928 = vmatpush3.bf16.msra.mxu0 %v1047_v19  ;;  %v804_v19 = vcombine.low %v88_v11, %v90_v12  ;;  %v800_v29 = vcombine.high %v83_v23, %v85_v24  ;;  %v799_v35 = vcombine.low %v83_v23, %v85_v24 }
  0x1c   :  { %929 = vmatprep.subr.bf16.mxu0 %v1049_v21  ;;  %v64_v21 = vld [vmem:[%s1319_s0 + $0xb0] sm:$0xf] }
  0x1d   :  { %1008 = vmatpush3.bf16.msra.mxu1 %v1048_v20  ;;  %v807_v20 = vcombine.low %v92_v13, %v94_v14  ;;  %v96_v26 = vmax.bf16 %v1052_v25, %v64_v21 }
  0x1e   :  { %1009 = vmatprep.subr.bf16.mxu1 %v1051_v32 }
  0x1f   :  { %930 = vmatpush3.bf16.msra.mxu0 %v1050_v36  ;;  %v803_v36 = vcombine.high %v87_v33, %v89_v34 }
  0x21   :  { %1010 = vmatpush3.bf16.msra.mxu1 %v1051_v32  ;;  %v810_v32 = vcombine.low %v96_v26, %v98_v27 }
  0x22   :  { %468 = vmatmul.mubr.bf16.vlgmr.msra.gmra.mxu0 %v787_v46  ;;  %v97_v46 = vmax.bf16 %v1052_v25, %v65_v44  ;;  %v1276_v25 = vld [vmem:[%s1320_s2] ss:$0 sm:$0xff] }
  0x23   :  { %475 = vmatprep.mubr.bf16.mxu0 %v791_v48 }
  0x24   :  { %1012 = vmatmul.mubr.bf16.vlgmr.msra.gmra.mxu1 %v792_v49  ;;  %v809_v48 = vcombine.high %v95_v45, %v97_v46  ;;  %v808_v49 = vcombine.low %v95_v45, %v97_v46 }
  0x25   :  { %1015 = vmatprep.mubr.bf16.mxu1 %v795_v52 }
  0x2a   :  { %476 = vmatmul.mubr.bf16.gmra.mxu0 %v790_v63 }
  0x2b   :  { %483 = vmatprep.mubr.bf16.mxu0 %v794_v0 }
  0x2c   :  { %1016 = vmatmul.mubr.bf16.gmra.mxu1 %v798_v1 }
  0x2d   :  { %1019 = vmatprep.mubr.bf16.mxu1 %v801_v4 }
  0x32   :  { %484 = vmatmul.mubr.bf16.gmra.mxu0 %v793_v15 }
  0x33   :  { %491 = vmatprep.mubr.bf16.mxu0 %v797_v16 }
  0x34   :  { %1020 = vmatmul.mubr.bf16.gmra.mxu1 %v804_v19 }
  0x35   :  { %1023 = vmatprep.mubr.bf16.mxu1 %v807_v20 }
  0x3a   :  { %492 = vmatmul.mubr.bf16.gmra.mxu0 %v796_v28 }
  0x3b   :  { %499 = vmatprep.mubr.bf16.mxu0 %v800_v29 }
  0x3c   :  { %1024 = vmatmul.mubr.bf16.gmra.mxu1 %v810_v32 }
  0x42   :  { %500 = vmatmul.mubr.bf16.gmra.mxu0 %v799_v35 }
  0x43   :  { %507 = vmatprep.mubr.bf16.mxu0 %v803_v36 }
  0x4a   :  { %508 = vmatmul.mubr.bf16.gmra.mxu0 %v802_v41 }
  0x4b   :  { %515 = vmatprep.mubr.bf16.mxu0 %v806_v42 }
  0x52   :  { %516 = vmatmul.mubr.bf16.gmra.mxu0 %v805_v47 }
  0x53   :  { %523 = vmatprep.mubr.bf16.mxu0 %v809_v48 }
  0x5a   :  { %524 = vmatmul.mubr.bf16.gmra.mxu0 %v808_v49 }
  0xe2   :  { %v931_v50 = vpop.f32.mrf.mxu0 }
  0xe4   :  { %v932_v51 = vpop.f32.mrf.mxu0  ;;  %v1013_v52 = vpop.f32.mrf.mxu1 }
  0xe5   :  { %v933_v53 = vadd.f32 %v932_v51, %v931_v50 }
  0xe6   :  { %v934_v54 = vpop.f32.mrf.mxu0  ;;  %v566_v55 = vpop.f32.mrf.mxu1 }
  0xe7   :  { %v567_v58 = vadd.f32 %v933_v53, %v566_v55 }
  0xe8   :  { %v935_v56 = vpop.f32.mrf.mxu0  ;;  %v1014_v57 = vpop.f32.mrf.mxu1 }
  0xe9   :  { %v936_v59 = vadd.f32 %v935_v56, %v934_v54  ;;  %v687_v1 = vadd.f32 %v1276_v25, %v567_v58 }
  0xea   :  { %v937_v60 = vpop.f32.mrf.mxu0  ;;  %v569_v61 = vpop.f32.mrf.mxu1 }
  0xeb   :  { %v570_v62 = vadd.f32 %v936_v59, %v569_v61 }
  0xec   :  { %v938_v63 = vpop.f32.mrf.mxu0  ;;  %v1017_v0 = vpop.f32.mrf.mxu1 }
  0xed   :  { %v688_v2 = vadd.f32 %v1276_v25, %v570_v62  ;;  %v939_v3 = vadd.f32 %v938_v63, %v937_v60 }
  0xee   :  { %v940_v4 = vpop.f32.mrf.mxu0  ;;  %v582_v7 = vpop.f32.mrf.mxu1 }
  0xef   :  { %v871_v5 = vpack.c.bf16 %v688_v2, %v687_v1  ;;  %v575_v8 = vadd.f32 %v1013_v52, %v939_v3 }
  0xf0   :  { %v941_v6 = vpop.f32.mrf.mxu0  ;;  %v1018_v13 = vpop.f32.mrf.mxu1 }
  0xf1   :  { %872 = vst [vmem:[%s1321_s3] sm:$0xff] %v871_v5   ;;  %v942_v9 = vadd.f32 %v941_v6, %v940_v4  ;;  %v689_v14 = vadd.f32 %v1276_v25, %v575_v8 }
  0xf2   :  { %v943_v10 = vpop.f32.mrf.mxu0  ;;  %v585_v20 = vpop.f32.mrf.mxu1 }
  0xf3   :  { %v578_v11 = vadd.f32 %v1014_v57, %v942_v9 }
  0xf4   :  { %v944_v12 = vpop.f32.mrf.mxu0  ;;  %v1021_v27 = vpop.f32.mrf.mxu1 }
  0xf5   :  { %v690_v15 = vadd.f32 %v1276_v25, %v578_v11  ;;  %v945_v16 = vadd.f32 %v944_v12, %v943_v10 }
  0xf6   :  { %v946_v17 = vpop.f32.mrf.mxu0  ;;  %v598_v34 = vpop.f32.mrf.mxu1 }
  0xf7   :  { %v876_v18 = vpack.c.bf16 %v690_v15, %v689_v14  ;;  %v583_v21 = vadd.f32 %v945_v16, %v582_v7 }
  0xf8   :  { %v947_v19 = vpop.f32.mrf.mxu0  ;;  %v1022_v40 = vpop.f32.mrf.mxu1 }
  0xf9   :  { %908 = vst [vmem:[%s1321_s3 + $0x8] sm:$0xff] %v876_v18   ;;  %v948_v22 = vadd.f32 %v947_v19, %v946_v17  ;;  %v691_v28 = vadd.f32 %v1276_v25, %v583_v21 }
  0xfa   :  { %v949_v23 = vpop.f32.mrf.mxu0  ;;  %v601_v47 = vpop.f32.mrf.mxu1 }
  0xfb   :  { %v586_v24 = vadd.f32 %v948_v22, %v585_v20 }
  0xfc   :  { %v950_v26 = vpop.f32.mrf.mxu0  ;;  %v1025_v53 = vpop.f32.mrf.mxu1 }
  0xfd   :  { %v692_v29 = vadd.f32 %v1276_v25, %v586_v24  ;;  %v951_v30 = vadd.f32 %v950_v26, %v949_v23 }
  0xfe   :  { %v952_v31 = vpop.f32.mrf.mxu0  ;;  %v614_v60 = vpop.f32.mrf.mxu1 }
  0xff   :  { %v881_v32 = vpack.c.bf16 %v692_v29, %v691_v28  ;;  %v591_v35 = vadd.f32 %v1017_v0, %v951_v30 }
 0x100   :  { %v953_v33 = vpop.f32.mrf.mxu0  ;;  %v1026_v2 = vpop.f32.mrf.mxu1 }
 0x101   :  { %909 = vst [vmem:[%s1321_s3 + $0x10] sm:$0xff] %v881_v32   ;;  %v954_v36 = vadd.f32 %v953_v33, %v952_v31  ;;  %v693_v41 = vadd.f32 %v1276_v25, %v591_v35 }
 0x102   :  { %v955_v37 = vpop.f32.mrf.mxu0  ;;  %v617_v9 = vpop.f32.mrf.mxu1 }
 0x103   :  { %v594_v38 = vadd.f32 %v1018_v13, %v954_v36 }
 0x104   :  { %v956_v39 = vpop.f32.mrf.mxu0 }
 0x105   :  { %v694_v42 = vadd.f32 %v1276_v25, %v594_v38  ;;  %v957_v43 = vadd.f32 %v956_v39, %v955_v37 }
 0x106   :  { %v958_v44 = vpop.f32.mrf.mxu0 }
 0x107   :  { %v886_v45 = vpack.c.bf16 %v694_v42, %v693_v41  ;;  %v599_v48 = vadd.f32 %v957_v43, %v598_v34 }
 0x108   :  { %v959_v46 = vpop.f32.mrf.mxu0 }
 0x109   :  { %910 = vst [vmem:[%s1321_s3 + $0x18] sm:$0xff] %v886_v45   ;;  %v960_v49 = vadd.f32 %v959_v46, %v958_v44  ;;  %v695_v54 = vadd.f32 %v1276_v25, %v599_v48 }
 0x10a   :  { %v961_v50 = vpop.f32.mrf.mxu0 }
 0x10b   :  { %v602_v51 = vadd.f32 %v960_v49, %v601_v47 }
 0x10c   :  { %v962_v52 = vpop.f32.mrf.mxu0 }
 0x10d   :  { %v696_v55 = vadd.f32 %v1276_v25, %v602_v51  ;;  %v963_v56 = vadd.f32 %v962_v52, %v961_v50 }
 0x10e   :  { %v964_v57 = vpop.f32.mrf.mxu0 }
 0x10f   :  { %v891_v58 = vpack.c.bf16 %v696_v55, %v695_v54  ;;  %v607_v61 = vadd.f32 %v1021_v27, %v963_v56 }
 0x110   :  { %v965_v59 = vpop.f32.mrf.mxu0 }
 0x111   :  { %911 = vst [vmem:[%s1321_s3 + $0x20] sm:$0xff] %v891_v58   ;;  %v966_v62 = vadd.f32 %v965_v59, %v964_v57  ;;  %v697_v3 = vadd.f32 %v1276_v25, %v607_v61 }
 0x112   :  { %v967_v63 = vpop.f32.mrf.mxu0 }
 0x113   :  { %v610_v0 = vadd.f32 %v1022_v40, %v966_v62 }
 0x114   :  { %v968_v1 = vpop.f32.mrf.mxu0 }
 0x115   :  { %v698_v4 = vadd.f32 %v1276_v25, %v610_v0  ;;  %v969_v5 = vadd.f32 %v968_v1, %v967_v63 }
 0x116   :  { %v970_v6 = vpop.f32.mrf.mxu0 }
 0x117   :  { %v896_v7 = vpack.c.bf16 %v698_v4, %v697_v3  ;;  %v615_v10 = vadd.f32 %v969_v5, %v614_v60 }
 0x118   :  { %v971_v8 = vpop.f32.mrf.mxu0 }
 0x119   :  { %912 = vst [vmem:[%s1321_s3 + $0x28] sm:$0xff] %v896_v7   ;;  %v972_v11 = vadd.f32 %v971_v8, %v970_v6  ;;  %v699_v15 = vadd.f32 %v1276_v25, %v615_v10 }
 0x11a   :  { %v973_v12 = vpop.f32.mrf.mxu0 }
 0x11b   :  { %v618_v13 = vadd.f32 %v972_v11, %v617_v9 }
 0x11c   :  { %v974_v14 = vpop.f32.mrf.mxu0 }
 0x11d   :  { %v700_v16 = vadd.f32 %v1276_v25, %v618_v13  ;;  %v975_v17 = vadd.f32 %v974_v14, %v973_v12 }
 0x11e   :  { %v976_v18 = vpop.f32.mrf.mxu0 }
 0x11f   :  { %v901_v19 = vpack.c.bf16 %v700_v16, %v699_v15  ;;  %v623_v21 = vadd.f32 %v1025_v53, %v975_v17 }
 0x120   :  { %v977_v20 = vpop.f32.mrf.mxu0 }
 0x121   :  { %913 = vst [vmem:[%s1321_s3 + $0x30] sm:$0xff] %v901_v19   ;;  %v978_v22 = vadd.f32 %v977_v20, %v976_v18  ;;  %v701_v24 = vadd.f32 %v1276_v25, %v623_v21 }
 0x123   :  { %v626_v23 = vadd.f32 %v1026_v2, %v978_v22 }
 0x125   :  { %v702_v26 = vadd.f32 %v1276_v25, %v626_v23 }
 0x127   :  { %v906_v27 = vpack.c.bf16 %v702_v26, %v701_v24 }
 0x129   :  { %914 = vst [vmem:[%s1321_s3 + $0x38] sm:$0xff] %v906_v27  }

// kernel: unet_generator_forward.46
= control target key start
LH: loop header
LB: loop body
LE: loop exit
PB: predicated region body
PF: predicated region fallthrough
CT: control target
= control target key end

     0   :  { %s564_s15 = smov 0   ;;  %s566_s16 = smov 0   ;;  %s629_s0 = inlined_call_operand.vmem [shape: bf16[2,16,8,16], index: 0, kind: input, shape index: {}]   ;;  %s630_s1 = inlined_call_operand.vmem [shape: bf16[2,8,8,128], index: 1, kind: input, shape index: {}]   ;;  %s631_s2 = inlined_call_operand.vmem [shape: f32[1,128], index: 2, kind: input, shape index: {}]   ;;  %s632_s3 = inlined_call_operand.vmem [shape: f32[1,128], index: 3, kind: input, shape index: {}]   ;;  %s633_s4 = inlined_call_operand.vmem [shape: bf16[2,16,8,32], index: 4, kind: output, shape index: {}]  }
   0x1   :  { %s568_s17 = smov 0   ;;  %s570_s18 = smov 0  }
   0x2   :  { %s572_s19 = smov 0  }
   0x3 LB: > { %s23_s20 = sadd.s32 1, %s526_s17  ;;  %s26_s21 = sadd.s32 1, %s530_s18  ;;  %s534_s19 = sphi %s572_s19, %s14_s19   ;;  %s530_s18 = sphi %s570_s18, %s637_s18   ;;  %s526_s17 = sphi %s568_s17, %s636_s17   ;;  %s522_s16 = sphi %s566_s16, %s635_s16   ;;  %s518_s15 = sphi %s564_s15, %s634_s15  }
   0x4   : > { %p24_p0 = scmp.ge.s32.totalorder %s23_s20, 8  ;;  %p434_p1 = scmp.ge.s32.totalorder %s534_s19, 1 }
   0x5   : > { %p198_p2 = scmp.lt.s32.totalorder %s534_s19, 17 }
   0x6   : > { %s639_s20 = smov (%p24_p0, %s23_s20), 0  ;;  %s641_s21 = smov (!%p24_p0, %s26_s21), %s530_s18 }
   0x7   : > { %p199_p3 = pnand %p434_p1, %p198_p2  ;;  %p28_p4 = scmp.ge.s32.totalorder %s641_s21, 2 }
   0x8   : > { %p241_p5 = scmp.lt.s32.totalorder (!%p199_p3), %s522_s16, 1  ;;  %p252_p6 = scmp.lt.s32.totalorder (!%p199_p3), %s518_s15, 7 }
   0x9   : > { %s643_s21 = smov (%p28_p4, %s641_s21), 0  ;;  %202 = sbr.rel (%p199_p3) target bundleno = 152 (0x98), region = 36 }
   0xa   : > { %s435_s22 = sshll.u32 (!%p199_p3), %s518_s15, 1 }
   0xb   : > { %p243_p7 = scmp.lt.s32.totalorder (!%p199_p3), %s435_s22, 15 }
   0xe   : > { %s645_s16 = smov (!%p241_p5, %s522_s16), 1  ;;  %s647_s15 = smov (!%p252_p6, %s518_s15), 7  ;;  %v443_v1 = vld [vmem:[%s631_s2] ss:$0 sm:$0xff]  ;;  %vm289_vm0 = vcmask 60416   ;;  %vm297_vm1 = vcmask 126016  }
   0xf   : > { %s438_s23 = sshll.u32 %s645_s16, 3  ;;  %s436_s29 = sshll.u32 %s645_s16, 4  ;;  %v444_v3 = vld [vmem:[%s632_s3] ss:$0 sm:$0xff]  ;;  %vm303_vm2 = vcmask 191616   ;;  %vm308_vm3 = vcmask 257216  }
  0x10   : > { %s255_s24 = sadd.s32 %s438_s23, %s647_s15  ;;  %s649_s22 = smov (!%p243_p7, %s435_s22), 15 }
  0x11   : > { %s439_s25 = sshll.u32 %s255_s24, 2  ;;  %s246_s8 = sadd.s32 %s436_s29, %s649_s22 }
  0x12   : > { %s257_s28 = scalar_lea.vmem %s630_s1, %s439_s25  ;;  %s437_s9 = sshll.u32 %s246_s8, 2 }
  0x13   : > { %v270_v0 = vld [vmem:[%s257_s28] sm:$0xf]  ;;  %s248_s12 = scalar_lea.vmem %s629_s0, %s437_s9  ;;  %s266_s15 = scalar_lea.vmem %s633_s4, %s437_s9 }
  0x14   : > { %v271_v2 = vunpack.c.l.bf16 %v270_v0  ;;  %v268_v6 = vld [vmem:[%s248_s12] sm:$0xf]  ;;  %v269_v7 = vld [vmem:[%s248_s12 + $0x4] sm:$0xf]  ;;  %s536_s16 = smov 8   ;;  %s537_s22 = smov 120  }
  0x15   : > { %300 = vrot.lane.b32.xlu1 %v268_v6, %s536_s16  ;;  %290 = vst.msk [vmem:[%s266_s15] sm:$0xf] %vm289_vm0, %v268_v6  ;;  %446 = vst.msk [vmem:[%s266_s15 + $0x4] sm:$0xf] %vm289_vm0, %v269_v7  ;;  %s538_s23 = smov 16  }
  0x16   : > { %v279_v4 = vmul.f32 %v443_v1, %v271_v2 }
  0x18   : > { %v287_v5 = vadd.f32 %v444_v3, %v279_v4 }
  0x19   : > { %317 = vrot.lane.b32.xlu1 %v269_v7, %s536_s16 }
  0x1a   : > { %v288_v8 = vpack.c.bf16 %v287_v5, %v287_v5 }
  0x1c   : > { %294 = vrot.lane.b32.xlu0 %v288_v8, %s536_s16 }
  0x20   : > { %312 = vrot.lane.b32.xlu0 %v288_v8, %s537_s22 }
  0x24   : > { %305 = vrot.lane.b32.xlu0 %v288_v8, %s538_s23 }
  0x87   : > { %v301_v9 = vpop.permute.xlu1 %300 }
  0x8b   : > { %v318_v11 = vpop.permute.xlu1 %317 }
  0x8e   : > { %v295_v10 = vpop.permute.xlu0 %294 }
  0x8f   : > { %298 = vst.msk [vmem:[%s266_s15] sm:$0xf] %vm297_vm1, %v295_v10 }
  0x90   : > { %304 = vst.msk [vmem:[%s266_s15] sm:$0xf] %vm303_vm2, %v301_v9 }
  0x92   : > { %v313_v12 = vpop.permute.xlu0 %312 }
  0x93   : > { %447 = vst.msk [vmem:[%s266_s15 + $0x4] sm:$0xf] %vm297_vm1, %v313_v12 }
  0x94   : > { %448 = vst.msk [vmem:[%s266_s15 + $0x4] sm:$0xf] %vm303_vm2, %v318_v11 }
  0x95   : > { %449 = vst.msk [vmem:[%s266_s15 + $0x4] sm:$0xf] %vm308_vm3, %v288_v8 }
  0x96   : > { %v306_v13 = vpop.permute.xlu0 %305 }
  0x97   : > { %309 = vst.msk [vmem:[%s266_s15] sm:$0xf] %vm308_vm3, %v306_v13 }
  0x98 PF: > { %s14_s19 = sadd.s32 1, %s534_s19   ;;  %s634_s15 = smov %s526_s17 }
  0x99   : > { %p11_p8 = scmp.ge.s32.totalorder %s14_s19, 18   ;;  %s635_s16 = smov %s530_s18 }
  0x9a   : > { %s636_s17 = smov %s639_s20  ;;  %s637_s18 = smov %s643_s21 }
  0x9b   :  { %13 = sbr.rel (!%p11_p8) target bundleno = 3 (0x3), region = 70 }

// kernel: tile.86
= control target key start
LH: loop header
LB: loop body
LE: loop exit
PB: predicated region body
PF: predicated region fallthrough
CT: control target
= control target key end

     0   :  { %s22_s0 = inlined_call_operand.vmem [shape: f32[3], index: 0, kind: input, shape index: {}]   ;;  %s23_s1 = inlined_call_operand.vmem [shape: f32[4,3], index: 1, kind: output, shape index: {}]  }
   0x1   :  { %v4_v0 = vld [vmem:[%s22_s0] ss:$0 sm:$0xff] }
   0x2   :  { %5 = vst [vmem:[%s23_s1] sm:$0xf] %v4_v0 }

// kernel: tile.87
= control target key start
LH: loop header
LB: loop body
LE: loop exit
PB: predicated region body
PF: predicated region fallthrough
CT: control target
= control target key end

     0   :  { %vm8_vm0 = vcmask 23552   ;;  %s40_s8 = smov 3   ;;  %s41_s9 = smov 6   ;;  %vm14_vm1 = vcmask 97352   ;;  %vm20_vm2 = vcmask 72752   ;;  %vm26_vm3 = vcmask 48152   ;;  %s58_s0 = inlined_call_operand.vmem [shape: f32[4,3], index: 0, kind: input, shape index: {}]   ;;  %s59_s1 = inlined_call_operand.vmem [shape: f32[1,12], index: 1, kind: output, shape index: {}]  }
   0x1   :  { %v5_v0 = vld [vmem:[%s58_s0] sm:$0xf]  ;;  %s39_s0 = smov 9  }
   0x2   :  { %6 = vst [vmem:[#allocation1] sm:$0xf] %v5_v0 }
   0x9   :  { %v11_v1 = vld [vmem:[#allocation1 + $0x3] sm:$0x1]   ;;  %v23_v2 = vld [vmem:[#allocation1 + $0x1] sm:$0x1]   ;;  %v7_v3 = vld [vmem:[#allocation1] sm:$0x1]  }
   0xa   :  { %12 = vrot.lane.b32.xlu0 %v11_v1, %s39_s0  ;;  %24 = vrot.lane.b32.xlu1 %v23_v2, %s40_s8  ;;  %v17_v4 = vld [vmem:[#allocation1 + $0x2] sm:$0x1]   ;;  %9 = vst.msk [vmem:[#allocation0] sm:$0x1] %vm8_vm0, %v7_v3  }
   0xe   :  { %18 = vrot.lane.b32.xlu0 %v17_v4, %s41_s9 }
  0x7c   :  { %v13_v5 = vpop.permute.xlu0 %12   ;;  %v25_v6 = vpop.permute.xlu1 %24  }
  0x7d   :  { %15 = vst.msk [vmem:[#allocation0] sm:$0x1] %vm14_vm1, %v13_v5  }
  0x80   :  { %v19_v7 = vpop.permute.xlu0 %18  }
  0x81   :  { %21 = vst.msk [vmem:[#allocation0] sm:$0x1] %vm20_vm2, %v19_v7  }
  0x82   :  { %27 = vst.msk [vmem:[#allocation0] sm:$0x1] %vm26_vm3, %v25_v6  }
  0x89   :  { %v32_v8 = vld [vmem:[#allocation0] sm:$0x1] }
  0x8a   :  { %35 = vst [vmem:[%s59_s1] sm:$0x1] %v32_v8 }

// kernel: unet_generator_forward.47
= control target key start
LH: loop header
LB: loop body
LE: loop exit
PB: predicated region body
PF: predicated region fallthrough
CT: control target
= control target key end

     0   :  { %s1438_s12 = smov 0   ;;  %s1440_s13 = smov 0   ;;  %s1663_s0 = inlined_call_operand.vmem [shape: bf16[512,256], index: 0, kind: input, shape index: {}]   ;;  %s1664_s1 = inlined_call_operand.vmem [shape: bf16[256,128], index: 1, kind: input, shape index: {}]   ;;  %s1665_s2 = inlined_call_operand.vmem [shape: f32[1,128], index: 2, kind: input, shape index: {}]   ;;  %s1666_s3 = inlined_call_operand.vmem [shape: f32[512,128], index: 3, kind: output, shape index: {}]  }
   0x1   :  { %s1442_s14 = smov 0  }
   0x2 LB: > { %s25_s15 = sadd.s32 1, %s1411_s13  ;;  %p1102_p0 = scmp.ge.s32.totalorder %s1415_s14, 1  ;;  %s1415_s14 = sphi %s1442_s14, %s13_s14   ;;  %s1411_s13 = sphi %s1440_s13, %s1668_s13   ;;  %s1407_s12 = sphi %s1438_s12, %s1667_s12  }
   0x3   : > { %p27_p1 = scmp.ge.s32.totalorder %s25_s15, 2  ;;  %p169_p2 = scmp.lt.s32.totalorder %s1415_s14, 3 }
   0x5   : > { %s1670_s15 = smov (%p27_p1, %s25_s15), 0  ;;  %p170_p3 = pnand %p1102_p0, %p169_p2 }
   0x6   : > { %s1103_s18 = sshll.u32 (!%p170_p3), %s1407_s12, 5 }
   0x7   : > { %173 = sbr.rel (%p170_p3) target bundleno = 320 (0x140), region = 32  ;;  %p205_p4 = scmp.lt.s32.totalorder (!%p170_p3), %s1103_s18, 63 }
   0xc   : > { %v1313_v0 = vld [vmem:[%s1664_s1 + $0x78] sm:$0xff]   ;;  %v1315_v2 = vld [vmem:[%s1664_s1 + $0x70] sm:$0xff]   ;;  %v1317_v4 = vld [vmem:[%s1664_s1 + $0x68] sm:$0xff]   ;;  %s1672_s18 = smov (!%p205_p4, %s1103_s18), 63  ;;  %v1417_v14 = vmov 0  }
   0xd   : > { %v1314_v1 = vld [vmem:[%s1664_s1 + $0x38] sm:$0xff]   ;;  %1160 = vmatprep.subr.bf16.mxu0 %v1313_v0  ;;  %1272 = vmatprep.subr.bf16.mxu1 %v1313_v0  ;;  %v1316_v3 = vld [vmem:[%s1664_s1 + $0x30] sm:$0xff]   ;;  %v1318_v5 = vld [vmem:[%s1664_s1 + $0x28] sm:$0xff]   ;;  %s1159_s4 = sshll.u32 %s1672_s18, 3 }
   0xe   : > { %1161 = vmatpush3.bf16.msra.mxu0 %v1314_v1  ;;  %1280 = vmatpush3.bf16.msra.mxu1 %v1314_v1  ;;  %v1319_v6 = vld [vmem:[%s1664_s1 + $0x60] sm:$0xff]   ;;  %v1321_v8 = vld [vmem:[%s1664_s1 + $0x58] sm:$0xff]   ;;  %s1491_s11 = scalar_lea.vmem %s1663_s0, %s1159_s4  ;;  %v1323_v10 = vld [vmem:[%s1664_s1 + $0x50] sm:$0xff]   ;;  %s1596_s8 = scalar_lea.vmem %s1666_s3, %s1159_s4 }
   0xf   : > { %1162 = vmatprep.subr.bf16.mxu0 %v1315_v2  ;;  %1273 = vmatprep.subr.bf16.mxu1 %v1315_v2  ;;  %v1320_v7 = vld [vmem:[%s1664_s1 + $0x20] sm:$0xff]   ;;  %v1322_v9 = vld [vmem:[%s1664_s1 + $0x18] sm:$0xff]   ;;  %v265_v12 = vld [vmem:[%s1491_s11 + $0x8] sm:$0xff] }
  0x10   : > { %v264_v11 = vld [vmem:[%s1491_s11] sm:$0xff]  ;;  %v297_v16 = vmax.bf16 %v1417_v14, %v265_v12  ;;  %v281_v17 = vld [vmem:[%s1491_s11 + $0x88] sm:$0xff]  ;;  %v1324_v20 = vld [vmem:[%s1664_s1 + $0x10] sm:$0xff]  }
  0x11   : > { %v280_v13 = vld [vmem:[%s1491_s11 + $0x80] sm:$0xff]  ;;  %v296_v15 = vmax.bf16 %v1417_v14, %v264_v11  ;;  %v313_v19 = vmax.bf16 %v1417_v14, %v281_v17  ;;  %v1325_v22 = vld [vmem:[%s1664_s1 + $0x48] sm:$0xff]   ;;  %v266_v26 = vld [vmem:[%s1491_s11 + $0x10] sm:$0xff] }
  0x12   : > { %1163 = vmatpush3.bf16.msra.mxu0 %v1316_v3  ;;  %1281 = vmatpush3.bf16.msra.mxu1 %v1316_v3  ;;  %v312_v18 = vmax.bf16 %v1417_v14, %v280_v13  ;;  %v1326_v24 = vld [vmem:[%s1664_s1 + $0x8] sm:$0xff]   ;;  %v1327_v25 = vld [vmem:[%s1664_s1 + $0x40] sm:$0xff]   ;;  %v267_v27 = vld [vmem:[%s1491_s11 + $0x18] sm:$0xff]  ;;  %v298_v30 = vmax.bf16 %v1417_v14, %v266_v26 }
  0x13   : > { %1164 = vmatprep.subr.bf16.mxu0 %v1317_v4  ;;  %1274 = vmatprep.subr.bf16.mxu1 %v1317_v4  ;;  %v1109_v21 = vcombine.high %v296_v15, %v297_v16  ;;  %v282_v28 = vld [vmem:[%s1491_s11 + $0x90] sm:$0xff]  ;;  %v283_v29 = vld [vmem:[%s1491_s11 + $0x98] sm:$0xff]  ;;  %v1328_v31 = vld [vmem:[%s1664_s1] sm:$0xff]   ;;  %v299_v32 = vmax.bf16 %v1417_v14, %v267_v27  ;;  %v1108_v35 = vcombine.low %v296_v15, %v297_v16 }
  0x14   : > { %v1125_v23 = vcombine.high %v312_v18, %v313_v19  ;;  %v314_v33 = vmax.bf16 %v1417_v14, %v282_v28  ;;  %v315_v34 = vmax.bf16 %v1417_v14, %v283_v29  ;;  %v1124_v36 = vcombine.low %v312_v18, %v313_v19  ;;  %v268_v39 = vld [vmem:[%s1491_s11 + $0x20] sm:$0xff]  ;;  %v269_v40 = vld [vmem:[%s1491_s11 + $0x28] sm:$0xff]  ;;  %v270_v51 = vld [vmem:[%s1491_s11 + $0x30] sm:$0xff] }
  0x15   : > { %680 = vmatprep.mubr.bf16.mxu0 %v1109_v21  ;;  %v1111_v37 = vcombine.high %v298_v30, %v299_v32  ;;  %v284_v41 = vld [vmem:[%s1491_s11 + $0xa0] sm:$0xff]  ;;  %v285_v42 = vld [vmem:[%s1491_s11 + $0xa8] sm:$0xff]  ;;  %v300_v43 = vmax.bf16 %v1417_v14, %v268_v39  ;;  %v301_v44 = vmax.bf16 %v1417_v14, %v269_v40  ;;  %v1110_v47 = vcombine.low %v298_v30, %v299_v32  ;;  %v271_v52 = vld [vmem:[%s1491_s11 + $0x38] sm:$0xff] }
  0x16   : > { %1165 = vmatpush3.bf16.msra.mxu0 %v1318_v5  ;;  %1282 = vmatpush3.bf16.msra.mxu1 %v1318_v5  ;;  %v1127_v38 = vcombine.high %v314_v33, %v315_v34  ;;  %v316_v45 = vmax.bf16 %v1417_v14, %v284_v41  ;;  %v317_v46 = vmax.bf16 %v1417_v14, %v285_v42  ;;  %v286_v53 = vld [vmem:[%s1491_s11 + $0xb0] sm:$0xff]  ;;  %v287_v54 = vld [vmem:[%s1491_s11 + $0xb8] sm:$0xff]  ;;  %v272_v63 = vld [vmem:[%s1491_s11 + $0x40] sm:$0xff] }
  0x17   : > { %1166 = vmatprep.subr.bf16.mxu0 %v1319_v6  ;;  %1275 = vmatprep.subr.bf16.mxu1 %v1319_v6  ;;  %v1126_v48 = vcombine.low %v314_v33, %v315_v34  ;;  %v1113_v49 = vcombine.high %v300_v43, %v301_v44  ;;  %v302_v55 = vmax.bf16 %v1417_v14, %v270_v51  ;;  %v273_v0 = vld [vmem:[%s1491_s11 + $0x48] sm:$0xff]  ;;  %v288_v1 = vld [vmem:[%s1491_s11 + $0xc0] sm:$0xff]  ;;  %v274_v11 = vld [vmem:[%s1491_s11 + $0x50] sm:$0xff] }
  0x18   : > { %744 = vmatprep.mubr.bf16.mxu1 %v1125_v23  ;;  %v1129_v50 = vcombine.high %v316_v45, %v317_v46  ;;  %v303_v56 = vmax.bf16 %v1417_v14, %v271_v52  ;;  %v318_v57 = vmax.bf16 %v1417_v14, %v286_v53  ;;  %v319_v58 = vmax.bf16 %v1417_v14, %v287_v54  ;;  %v289_v2 = vld [vmem:[%s1491_s11 + $0xc8] sm:$0xff]  ;;  %v275_v12 = vld [vmem:[%s1491_s11 + $0x58] sm:$0xff]  ;;  %v290_v13 = vld [vmem:[%s1491_s11 + $0xd0] sm:$0xff] }
  0x19   : > { %v1112_v59 = vcombine.low %v300_v43, %v301_v44  ;;  %v1128_v60 = vcombine.low %v316_v45, %v317_v46  ;;  %v304_v3 = vmax.bf16 %v1417_v14, %v272_v63  ;;  %v305_v4 = vmax.bf16 %v1417_v14, %v273_v0  ;;  %v291_v15 = vld [vmem:[%s1491_s11 + $0xd8] sm:$0xff]  ;;  %v292_v26 = vld [vmem:[%s1491_s11 + $0xe0] sm:$0xff]  ;;  %v293_v27 = vld [vmem:[%s1491_s11 + $0xe8] sm:$0xff] }
  0x1a   : > { %1167 = vmatpush3.bf16.msra.mxu0 %v1320_v7  ;;  %1283 = vmatpush3.bf16.msra.mxu1 %v1320_v7  ;;  %v1115_v61 = vcombine.high %v302_v55, %v303_v56  ;;  %v1131_v62 = vcombine.high %v318_v57, %v319_v58  ;;  %v320_v5 = vmax.bf16 %v1417_v14, %v288_v1  ;;  %v295_v39 = vld [vmem:[%s1491_s11 + $0xf8] sm:$0xff]  ;;  %v1581_v53 = vld [vmem:[%s1665_s2] ss:$0 sm:$0xff] }
  0x1b   : > { %1168 = vmatprep.subr.bf16.mxu0 %v1321_v8  ;;  %1276 = vmatprep.subr.bf16.mxu1 %v1321_v8  ;;  %v321_v6 = vmax.bf16 %v1417_v14, %v289_v2  ;;  %v1114_v7 = vcombine.low %v302_v55, %v303_v56  ;;  %v1130_v8 = vcombine.low %v318_v57, %v319_v58 }
  0x1c   : > { %v306_v16 = vmax.bf16 %v1417_v14, %v274_v11  ;;  %v307_v17 = vmax.bf16 %v1417_v14, %v275_v12  ;;  %v322_v18 = vmax.bf16 %v1417_v14, %v290_v13  ;;  %v323_v19 = vmax.bf16 %v1417_v14, %v291_v15 }
  0x1d   : > { %v1132_v21 = vcombine.low %v320_v5, %v321_v6  ;;  %v324_v30 = vmax.bf16 %v1417_v14, %v292_v26  ;;  %v327_v43 = vmax.bf16 %v1417_v14, %v295_v39 }
  0x1e   : > { %1169 = vmatpush3.bf16.msra.mxu0 %v1322_v9  ;;  %1284 = vmatpush3.bf16.msra.mxu1 %v1322_v9  ;;  %v1117_v9 = vcombine.high %v304_v3, %v305_v4  ;;  %v1135_v23 = vcombine.high %v322_v18, %v323_v19  ;;  %v1118_v32 = vcombine.low %v306_v16, %v307_v17 }
  0x1f   : > { %1170 = vmatprep.subr.bf16.mxu0 %v1323_v10  ;;  %1277 = vmatprep.subr.bf16.mxu1 %v1323_v10  ;;  %v1133_v10 = vcombine.high %v320_v5, %v321_v6  ;;  %v1134_v33 = vcombine.low %v322_v18, %v323_v19 }
  0x22   : > { %1171 = vmatpush3.bf16.msra.mxu0 %v1324_v20  ;;  %1285 = vmatpush3.bf16.msra.mxu1 %v1324_v20  ;;  %v1116_v20 = vcombine.low %v304_v3, %v305_v4 }
  0x23   : > { %1172 = vmatprep.subr.bf16.mxu0 %v1325_v22  ;;  %1278 = vmatprep.subr.bf16.mxu1 %v1325_v22  ;;  %v1119_v22 = vcombine.high %v306_v16, %v307_v17 }
  0x26   : > { %1173 = vmatpush3.bf16.msra.mxu0 %v1326_v24  ;;  %1286 = vmatpush3.bf16.msra.mxu1 %v1326_v24  ;;  %v276_v24 = vld [vmem:[%s1491_s11 + $0x60] sm:$0xff] }
  0x27   : > { %1174 = vmatprep.subr.bf16.mxu0 %v1327_v25  ;;  %1279 = vmatprep.subr.bf16.mxu1 %v1327_v25  ;;  %v277_v25 = vld [vmem:[%s1491_s11 + $0x68] sm:$0xff]  ;;  %v308_v28 = vmax.bf16 %v1417_v14, %v276_v24 }
  0x28   : > { %v309_v29 = vmax.bf16 %v1417_v14, %v277_v25 }
  0x2a   : > { %1175 = vmatpush3.bf16.msra.mxu0 %v1328_v31  ;;  %1287 = vmatpush3.bf16.msra.mxu1 %v1328_v31  ;;  %v325_v31 = vmax.bf16 %v1417_v14, %v293_v27  ;;  %v1121_v34 = vcombine.high %v308_v28, %v309_v29  ;;  %v1120_v44 = vcombine.low %v308_v28, %v309_v29 }
  0x2c   : > { %v1136_v45 = vcombine.low %v324_v30, %v325_v31 }
  0x2d   : > { %681 = vmatmul.mubr.bf16.vlgmr.msra.gmra.mxu0 %v1108_v35  ;;  %745 = vmatmul.mubr.bf16.vlgmr.msra.gmra.mxu1 %v1124_v36  ;;  %v1137_v35 = vcombine.high %v324_v30, %v325_v31  ;;  %v278_v36 = vld [vmem:[%s1491_s11 + $0x70] sm:$0xff] }
  0x2e   : > { %688 = vmatprep.mubr.bf16.mxu0 %v1111_v37  ;;  %752 = vmatprep.mubr.bf16.mxu1 %v1127_v38  ;;  %v279_v37 = vld [vmem:[%s1491_s11 + $0x78] sm:$0xff]  ;;  %v294_v38 = vld [vmem:[%s1491_s11 + $0xf0] sm:$0xff]  ;;  %v310_v40 = vmax.bf16 %v1417_v14, %v278_v36 }
  0x2f   : > { %v311_v41 = vmax.bf16 %v1417_v14, %v279_v37  ;;  %v326_v42 = vmax.bf16 %v1417_v14, %v294_v38 }
  0x31   : > { %v1123_v46 = vcombine.high %v310_v40, %v311_v41 }
  0x35   : > { %689 = vmatmul.mubr.bf16.gmra.mxu0 %v1110_v47  ;;  %753 = vmatmul.mubr.bf16.gmra.mxu1 %v1126_v48  ;;  %v1139_v47 = vcombine.high %v326_v42, %v327_v43  ;;  %v1122_v48 = vcombine.low %v310_v40, %v311_v41 }
  0x36   : > { %696 = vmatprep.mubr.bf16.mxu0 %v1113_v49  ;;  %760 = vmatprep.mubr.bf16.mxu1 %v1129_v50  ;;  %v1138_v49 = vcombine.low %v326_v42, %v327_v43 }
  0x3d   : > { %697 = vmatmul.mubr.bf16.gmra.mxu0 %v1112_v59  ;;  %761 = vmatmul.mubr.bf16.gmra.mxu1 %v1128_v60 }
  0x3e   : > { %704 = vmatprep.mubr.bf16.mxu0 %v1115_v61  ;;  %768 = vmatprep.mubr.bf16.mxu1 %v1131_v62 }
  0x45   : > { %705 = vmatmul.mubr.bf16.gmra.mxu0 %v1114_v7  ;;  %769 = vmatmul.mubr.bf16.gmra.mxu1 %v1130_v8 }
  0x46   : > { %712 = vmatprep.mubr.bf16.mxu0 %v1117_v9  ;;  %776 = vmatprep.mubr.bf16.mxu1 %v1133_v10 }
  0x4d   : > { %713 = vmatmul.mubr.bf16.gmra.mxu0 %v1116_v20  ;;  %777 = vmatmul.mubr.bf16.gmra.mxu1 %v1132_v21 }
  0x4e   : > { %720 = vmatprep.mubr.bf16.mxu0 %v1119_v22  ;;  %784 = vmatprep.mubr.bf16.mxu1 %v1135_v23 }
  0x55   : > { %721 = vmatmul.mubr.bf16.gmra.mxu0 %v1118_v32  ;;  %785 = vmatmul.mubr.bf16.gmra.mxu1 %v1134_v33 }
  0x56   : > { %728 = vmatprep.mubr.bf16.mxu0 %v1121_v34  ;;  %792 = vmatprep.mubr.bf16.mxu1 %v1137_v35 }
  0x5d   : > { %729 = vmatmul.mubr.bf16.gmra.mxu0 %v1120_v44  ;;  %793 = vmatmul.mubr.bf16.gmra.mxu1 %v1136_v45 }
  0x5e   : > { %736 = vmatprep.mubr.bf16.mxu0 %v1123_v46  ;;  %800 = vmatprep.mubr.bf16.mxu1 %v1139_v47 }
  0x65   : > { %737 = vmatmul.mubr.bf16.gmra.mxu0 %v1122_v48  ;;  %801 = vmatmul.mubr.bf16.gmra.mxu1 %v1138_v49 }
  0xed   : > { %v1176_v50 = vpop.f32.mrf.mxu0  ;;  %v1224_v51 = vpop.f32.mrf.mxu1 }
  0xef   : > { %v1177_v52 = vpop.f32.mrf.mxu0  ;;  %v1225_v14 = vpop.f32.mrf.mxu1 }
  0xf0   : > { %v1178_v54 = vadd.f32 %v1177_v52, %v1176_v50  ;;  %v1226_v55 = vadd.f32 %v1225_v14, %v1224_v51 }
  0xf1   : > { %v1179_v56 = vpop.f32.mrf.mxu0  ;;  %v1227_v57 = vpop.f32.mrf.mxu1 }
  0xf2   : > { %v915_v58 = vadd.f32 %v1178_v54, %v1581_v53  ;;  %v931_v59 = vadd.f32 %v1226_v55, %v1581_v53 }
  0xf3   : > { %v1180_v60 = vpop.f32.mrf.mxu0  ;;  %v1228_v61 = vpop.f32.mrf.mxu1 }
  0xf4   : > { %1329 = vtanh.f32 %v915_v58  ;;  %v1181_v62 = vadd.f32 %v1180_v60, %v1179_v56  ;;  %v1229_v63 = vadd.f32 %v1228_v61, %v1227_v57 }
  0xf5   : > { %1331 = vtanh.f32 %v931_v59  ;;  %v1182_v0 = vpop.f32.mrf.mxu0  ;;  %v1230_v1 = vpop.f32.mrf.mxu1 }
  0xf6   : > { %v916_v2 = vadd.f32 %v1181_v62, %v1581_v53  ;;  %v932_v3 = vadd.f32 %v1229_v63, %v1581_v53 }
  0xf7   : > { %v1183_v4 = vpop.f32.mrf.mxu0  ;;  %v1231_v5 = vpop.f32.mrf.mxu1 }
  0xf8   : > { %1333 = vtanh.f32 %v916_v2  ;;  %v1184_v6 = vadd.f32 %v1183_v4, %v1182_v0  ;;  %v1232_v7 = vadd.f32 %v1231_v5, %v1230_v1 }
  0xf9   : > { %1335 = vtanh.f32 %v932_v3  ;;  %v1185_v8 = vpop.f32.mrf.mxu0  ;;  %v1233_v9 = vpop.f32.mrf.mxu1 }
  0xfa   : > { %v917_v10 = vadd.f32 %v1184_v6, %v1581_v53  ;;  %v933_v11 = vadd.f32 %v1232_v7, %v1581_v53 }
  0xfb   : > { %v1186_v12 = vpop.f32.mrf.mxu0  ;;  %v1234_v13 = vpop.f32.mrf.mxu1 }
  0xfc   : > { %1337 = vtanh.f32 %v917_v10  ;;  %v1187_v15 = vadd.f32 %v1186_v12, %v1185_v8  ;;  %v1235_v16 = vadd.f32 %v1234_v13, %v1233_v9 }
  0xfd   : > { %1339 = vtanh.f32 %v933_v11  ;;  %v1188_v17 = vpop.f32.mrf.mxu0  ;;  %v1236_v18 = vpop.f32.mrf.mxu1 }
  0xfe   : > { %v918_v19 = vadd.f32 %v1187_v15, %v1581_v53  ;;  %v934_v20 = vadd.f32 %v1235_v16, %v1581_v53 }
  0xff   : > { %v1189_v21 = vpop.f32.mrf.mxu0  ;;  %v1237_v22 = vpop.f32.mrf.mxu1 }
 0x100   : > { %1341 = vtanh.f32 %v918_v19  ;;  %v1190_v23 = vadd.f32 %v1189_v21, %v1188_v17  ;;  %v1238_v24 = vadd.f32 %v1237_v22, %v1236_v18 }
 0x101   : > { %v1330_v25 = vpop.eup %1329  ;;  %1343 = vtanh.f32 %v934_v20  ;;  %v1191_v26 = vpop.f32.mrf.mxu0 }
 0x102   : > { %v1239_v27 = vpop.f32.mrf.mxu1  ;;  %v1332_v28 = vpop.eup %1331  ;;  %979 = vst [vmem:[%s1596_s8] sm:$0xff] %v1330_v25  ;;  %v919_v29 = vadd.f32 %v1190_v23, %v1581_v53  ;;  %v935_v30 = vadd.f32 %v1238_v24, %v1581_v53 }
 0x103   : > { %995 = vst [vmem:[%s1596_s8 + $0x80] sm:$0xff] %v1332_v28  ;;  %v1192_v31 = vpop.f32.mrf.mxu0 }
 0x104   : > { %v1240_v32 = vpop.f32.mrf.mxu1  ;;  %1345 = vtanh.f32 %v919_v29  ;;  %v1193_v33 = vadd.f32 %v1192_v31, %v1191_v26 }
 0x105   : > { %v1241_v34 = vadd.f32 %v1240_v32, %v1239_v27  ;;  %v1334_v35 = vpop.eup %1333  ;;  %1347 = vtanh.f32 %v935_v30  ;;  %v1194_v36 = vpop.f32.mrf.mxu0 }
 0x106   : > { %v1242_v37 = vpop.f32.mrf.mxu1  ;;  %v1336_v38 = vpop.eup %1335  ;;  %980 = vst [vmem:[%s1596_s8 + $0x8] sm:$0xff] %v1334_v35  ;;  %v920_v39 = vadd.f32 %v1193_v33, %v1581_v53 }
 0x107   : > { %v936_v40 = vadd.f32 %v1241_v34, %v1581_v53  ;;  %996 = vst [vmem:[%s1596_s8 + $0x88] sm:$0xff] %v1336_v38  ;;  %v1195_v41 = vpop.f32.mrf.mxu0 }
 0x108   : > { %v1243_v42 = vpop.f32.mrf.mxu1  ;;  %1349 = vtanh.f32 %v920_v39  ;;  %v1196_v43 = vadd.f32 %v1195_v41, %v1194_v36 }
 0x109   : > { %v1244_v44 = vadd.f32 %v1243_v42, %v1242_v37  ;;  %v1338_v45 = vpop.eup %1337  ;;  %1351 = vtanh.f32 %v936_v40  ;;  %v1197_v46 = vpop.f32.mrf.mxu0 }
 0x10a   : > { %v1245_v47 = vpop.f32.mrf.mxu1  ;;  %v1340_v48 = vpop.eup %1339  ;;  %981 = vst [vmem:[%s1596_s8 + $0x10] sm:$0xff] %v1338_v45  ;;  %v921_v49 = vadd.f32 %v1196_v43, %v1581_v53 }
 0x10b   : > { %v937_v50 = vadd.f32 %v1244_v44, %v1581_v53  ;;  %997 = vst [vmem:[%s1596_s8 + $0x90] sm:$0xff] %v1340_v48  ;;  %v1198_v51 = vpop.f32.mrf.mxu0 }
 0x10c   : > { %v1246_v52 = vpop.f32.mrf.mxu1  ;;  %1353 = vtanh.f32 %v921_v49  ;;  %v1199_v14 = vadd.f32 %v1198_v51, %v1197_v46 }
 0x10d   : > { %v1247_v54 = vadd.f32 %v1246_v52, %v1245_v47  ;;  %v1342_v55 = vpop.eup %1341  ;;  %1355 = vtanh.f32 %v937_v50  ;;  %v1200_v56 = vpop.f32.mrf.mxu0 }
 0x10e   : > { %v1248_v57 = vpop.f32.mrf.mxu1  ;;  %v1344_v58 = vpop.eup %1343  ;;  %982 = vst [vmem:[%s1596_s8 + $0x18] sm:$0xff] %v1342_v55  ;;  %v922_v59 = vadd.f32 %v1199_v14, %v1581_v53 }
 0x10f   : > { %v938_v60 = vadd.f32 %v1247_v54, %v1581_v53  ;;  %998 = vst [vmem:[%s1596_s8 + $0x98] sm:$0xff] %v1344_v58  ;;  %v1201_v61 = vpop.f32.mrf.mxu0 }
 0x110   : > { %v1249_v62 = vpop.f32.mrf.mxu1  ;;  %1357 = vtanh.f32 %v922_v59  ;;  %v1202_v63 = vadd.f32 %v1201_v61, %v1200_v56 }
 0x111   : > { %v1250_v0 = vadd.f32 %v1249_v62, %v1248_v57  ;;  %v1346_v1 = vpop.eup %1345  ;;  %1359 = vtanh.f32 %v938_v60  ;;  %v1203_v2 = vpop.f32.mrf.mxu0 }
 0x112   : > { %v1251_v3 = vpop.f32.mrf.mxu1  ;;  %v1348_v4 = vpop.eup %1347  ;;  %983 = vst [vmem:[%s1596_s8 + $0x20] sm:$0xff] %v1346_v1  ;;  %v923_v5 = vadd.f32 %v1202_v63, %v1581_v53 }
 0x113   : > { %v939_v6 = vadd.f32 %v1250_v0, %v1581_v53  ;;  %999 = vst [vmem:[%s1596_s8 + $0xa0] sm:$0xff] %v1348_v4  ;;  %v1204_v7 = vpop.f32.mrf.mxu0 }
 0x114   : > { %v1252_v8 = vpop.f32.mrf.mxu1  ;;  %1361 = vtanh.f32 %v923_v5  ;;  %v1205_v9 = vadd.f32 %v1204_v7, %v1203_v2 }
 0x115   : > { %v1253_v10 = vadd.f32 %v1252_v8, %v1251_v3  ;;  %v1350_v11 = vpop.eup %1349  ;;  %1363 = vtanh.f32 %v939_v6  ;;  %v1206_v12 = vpop.f32.mrf.mxu0 }
 0x116   : > { %v1254_v13 = vpop.f32.mrf.mxu1  ;;  %v1352_v15 = vpop.eup %1351  ;;  %984 = vst [vmem:[%s1596_s8 + $0x28] sm:$0xff] %v1350_v11  ;;  %v924_v16 = vadd.f32 %v1205_v9, %v1581_v53 }
 0x117   : > { %v940_v17 = vadd.f32 %v1253_v10, %v1581_v53  ;;  %1000 = vst [vmem:[%s1596_s8 + $0xa8] sm:$0xff] %v1352_v15  ;;  %v1207_v18 = vpop.f32.mrf.mxu0 }
 0x118   : > { %v1255_v19 = vpop.f32.mrf.mxu1  ;;  %1365 = vtanh.f32 %v924_v16  ;;  %v1208_v20 = vadd.f32 %v1207_v18, %v1206_v12 }
 0x119   : > { %v1256_v21 = vadd.f32 %v1255_v19, %v1254_v13  ;;  %v1354_v22 = vpop.eup %1353  ;;  %1367 = vtanh.f32 %v940_v17  ;;  %v1209_v23 = vpop.f32.mrf.mxu0 }
 0x11a   : > { %v1257_v24 = vpop.f32.mrf.mxu1  ;;  %v1356_v25 = vpop.eup %1355  ;;  %985 = vst [vmem:[%s1596_s8 + $0x30] sm:$0xff] %v1354_v22  ;;  %v925_v26 = vadd.f32 %v1208_v20, %v1581_v53 }
 0x11b   : > { %v941_v27 = vadd.f32 %v1256_v21, %v1581_v53  ;;  %1001 = vst [vmem:[%s1596_s8 + $0xb0] sm:$0xff] %v1356_v25  ;;  %v1210_v28 = vpop.f32.mrf.mxu0 }
 0x11c   : > { %v1258_v29 = vpop.f32.mrf.mxu1  ;;  %1369 = vtanh.f32 %v925_v26  ;;  %v1211_v30 = vadd.f32 %v1210_v28, %v1209_v23 }
 0x11d   : > { %v1259_v31 = vadd.f32 %v1258_v29, %v1257_v24  ;;  %v1358_v32 = vpop.eup %1357  ;;  %1371 = vtanh.f32 %v941_v27  ;;  %v1212_v33 = vpop.f32.mrf.mxu0 }
 0x11e   : > { %v1260_v34 = vpop.f32.mrf.mxu1  ;;  %v1360_v35 = vpop.eup %1359  ;;  %986 = vst [vmem:[%s1596_s8 + $0x38] sm:$0xff] %v1358_v32  ;;  %v926_v36 = vadd.f32 %v1211_v30, %v1581_v53 }
 0x11f   : > { %v942_v37 = vadd.f32 %v1259_v31, %v1581_v53  ;;  %1002 = vst [vmem:[%s1596_s8 + $0xb8] sm:$0xff] %v1360_v35  ;;  %v1213_v38 = vpop.f32.mrf.mxu0 }
 0x120   : > { %v1261_v39 = vpop.f32.mrf.mxu1  ;;  %1373 = vtanh.f32 %v926_v36  ;;  %v1214_v40 = vadd.f32 %v1213_v38, %v1212_v33 }
 0x121   : > { %v1262_v41 = vadd.f32 %v1261_v39, %v1260_v34  ;;  %v1362_v42 = vpop.eup %1361  ;;  %1375 = vtanh.f32 %v942_v37  ;;  %v1215_v43 = vpop.f32.mrf.mxu0 }
 0x122   : > { %v1263_v44 = vpop.f32.mrf.mxu1  ;;  %v1364_v45 = vpop.eup %1363  ;;  %987 = vst [vmem:[%s1596_s8 + $0x40] sm:$0xff] %v1362_v42  ;;  %v927_v46 = vadd.f32 %v1214_v40, %v1581_v53 }
 0x123   : > { %v943_v47 = vadd.f32 %v1262_v41, %v1581_v53  ;;  %1003 = vst [vmem:[%s1596_s8 + $0xc0] sm:$0xff] %v1364_v45  ;;  %v1216_v48 = vpop.f32.mrf.mxu0 }
 0x124   : > { %v1264_v49 = vpop.f32.mrf.mxu1  ;;  %1377 = vtanh.f32 %v927_v46  ;;  %v1217_v50 = vadd.f32 %v1216_v48, %v1215_v43 }
 0x125   : > { %v1265_v51 = vadd.f32 %v1264_v49, %v1263_v44  ;;  %v1366_v52 = vpop.eup %1365  ;;  %1379 = vtanh.f32 %v943_v47  ;;  %v1218_v14 = vpop.f32.mrf.mxu0 }
 0x126   : > { %v1266_v54 = vpop.f32.mrf.mxu1  ;;  %v1368_v55 = vpop.eup %1367  ;;  %988 = vst [vmem:[%s1596_s8 + $0x48] sm:$0xff] %v1366_v52  ;;  %v928_v56 = vadd.f32 %v1217_v50, %v1581_v53 }
 0x127   : > { %v944_v57 = vadd.f32 %v1265_v51, %v1581_v53  ;;  %1004 = vst [vmem:[%s1596_s8 + $0xc8] sm:$0xff] %v1368_v55  ;;  %v1219_v58 = vpop.f32.mrf.mxu0 }
 0x128   : > { %v1267_v59 = vpop.f32.mrf.mxu1  ;;  %1381 = vtanh.f32 %v928_v56  ;;  %v1220_v60 = vadd.f32 %v1219_v58, %v1218_v14 }
 0x129   : > { %v1268_v61 = vadd.f32 %v1267_v59, %v1266_v54  ;;  %v1370_v62 = vpop.eup %1369  ;;  %1383 = vtanh.f32 %v944_v57  ;;  %v1221_v63 = vpop.f32.mrf.mxu0 }
 0x12a   : > { %v1269_v0 = vpop.f32.mrf.mxu1  ;;  %v1372_v1 = vpop.eup %1371  ;;  %989 = vst [vmem:[%s1596_s8 + $0x50] sm:$0xff] %v1370_v62  ;;  %v929_v2 = vadd.f32 %v1220_v60, %v1581_v53 }
 0x12b   : > { %v945_v3 = vadd.f32 %v1268_v61, %v1581_v53  ;;  %1005 = vst [vmem:[%s1596_s8 + $0xd0] sm:$0xff] %v1372_v1  ;;  %v1222_v4 = vpop.f32.mrf.mxu0 }
 0x12c   : > { %v1270_v5 = vpop.f32.mrf.mxu1  ;;  %1385 = vtanh.f32 %v929_v2  ;;  %v1223_v6 = vadd.f32 %v1222_v4, %v1221_v63 }
 0x12d   : > { %v1271_v7 = vadd.f32 %v1270_v5, %v1269_v0  ;;  %v1374_v8 = vpop.eup %1373  ;;  %1387 = vtanh.f32 %v945_v3 }
 0x12e   : > { %v1376_v9 = vpop.eup %1375  ;;  %990 = vst [vmem:[%s1596_s8 + $0x58] sm:$0xff] %v1374_v8  ;;  %v930_v10 = vadd.f32 %v1223_v6, %v1581_v53 }
 0x12f   : > { %v946_v11 = vadd.f32 %v1271_v7, %v1581_v53  ;;  %1006 = vst [vmem:[%s1596_s8 + $0xd8] sm:$0xff] %v1376_v9 }
 0x130   : > { %1389 = vtanh.f32 %v930_v10 }
 0x131   : > { %v1378_v12 = vpop.eup %1377  ;;  %1391 = vtanh.f32 %v946_v11 }
 0x132   : > { %v1380_v13 = vpop.eup %1379  ;;  %991 = vst [vmem:[%s1596_s8 + $0x60] sm:$0xff] %v1378_v12 }
 0x133   : > { %1007 = vst [vmem:[%s1596_s8 + $0xe0] sm:$0xff] %v1380_v13 }
 0x135   : > { %v1382_v15 = vpop.eup %1381 }
 0x136   : > { %v1384_v16 = vpop.eup %1383  ;;  %992 = vst [vmem:[%s1596_s8 + $0x68] sm:$0xff] %v1382_v15 }
 0x137   : > { %1008 = vst [vmem:[%s1596_s8 + $0xe8] sm:$0xff] %v1384_v16 }
 0x139   : > { %v1386_v17 = vpop.eup %1385 }
 0x13a   : > { %v1388_v18 = vpop.eup %1387  ;;  %993 = vst [vmem:[%s1596_s8 + $0x70] sm:$0xff] %v1386_v17 }
 0x13b   : > { %1009 = vst [vmem:[%s1596_s8 + $0xf0] sm:$0xff] %v1388_v18 }
 0x13d   : > { %v1390_v19 = vpop.eup %1389 }
 0x13e   : > { %v1392_v20 = vpop.eup %1391  ;;  %994 = vst [vmem:[%s1596_s8 + $0x78] sm:$0xff] %v1390_v19 }
 0x13f   : > { %1010 = vst [vmem:[%s1596_s8 + $0xf8] sm:$0xff] %v1392_v20 }
 0x140 PF: > { %s13_s14 = sadd.s32 1, %s1415_s14   ;;  %s1667_s12 = smov %s1411_s13 }
 0x141   : > { %p10_p5 = scmp.ge.s32.totalorder %s13_s14, 4   ;;  %s1668_s13 = smov %s1670_s15 }
 0x143   :  { %12 = sbr.rel (!%p10_p5) target bundleno = 2 (0x2), region = 73 }

</bundles_post_ra>
